<compile_context>
chip_gen: v5e
topology: v5e:2x2
jax: 0.10.0
libtpu: 0.0.40
codegen_flags: <defaults>
</compile_context>

<pallas_src>
import jax
import jax.numpy as jnp
from jax import lax
from jax.experimental import pallas as pl
from jax.experimental.pallas import tpu as pltpu


# --------------------------------------------------------------------------- #
# helpers traced inside the kernel (lower to Mosaic ops on VMEM values)        #
# --------------------------------------------------------------------------- #

def _shift2d(x, dh, dw):
    """out[n, i, j, c] = x[n, i+dh, j+dw, c], zeros outside bounds (NHWC)."""
    N, H, W, C = x.shape
    if dh > 0:
        x = jnp.concatenate([x[:, dh:, :, :], jnp.zeros((N, dh, W, C), x.dtype)], axis=1)
    elif dh < 0:
        x = jnp.concatenate([jnp.zeros((N, -dh, W, C), x.dtype), x[:, :H + dh, :, :]], axis=1)
    if dw > 0:
        x = jnp.concatenate([x[:, :, dw:, :], jnp.zeros((N, H, dw, C), x.dtype)], axis=2)
    elif dw < 0:
        x = jnp.concatenate([jnp.zeros((N, H, -dw, C), x.dtype), x[:, :, :W + dw, :]], axis=2)
    return x


def _interleave_w(a, b):
    """a, b: (N,H,W,C) -> (N,H,2W,C); `a` lands on even W positions."""
    N, H, W, C = a.shape
    t = jnp.concatenate([a.reshape(N * H * W, 1, C),
                         b.reshape(N * H * W, 1, C)], axis=1)          # (NHW, 2, C)
    return t.reshape(N, H, 2 * W, C)                                   # lane dim kept


def _interleave_h(a, b):
    """a, b: (N,H,W,C) -> (N,2H,W,C); `a` lands on even H positions."""
    N, H, W, C = a.shape
    t = jnp.concatenate([a.reshape(N * H, 1, W, C),
                         b.reshape(N * H, 1, W, C)], axis=1)           # (NH, 2, W, C)
    return t.reshape(N, 2 * H, W, C)


def _dot(a, w):
    return jnp.dot(a, w, preferred_element_type=jnp.float32)


def _leaky_relu(x):
    return jnp.where(x >= 0.0, x, 0.01 * x)        # PyTorch default slope 0.01


# --------------------------------------------------------------------------- #
# fused decoder kernel                                                         #
# --------------------------------------------------------------------------- #

def _build_decoder_kernel(B, chans):
    """chans = reversed hidden_dims, e.g. [512, 64].

    ConvT channel pairs: chans[0]->chans[1]->...->chans[-1]  plus the
    final_layer ConvT chans[-1]->chans[-1].  Final Conv2d: chans[-1] -> 3.
    """
    C0 = chans[0]
    convt_pairs = [(chans[i], chans[i + 1]) for i in range(len(chans) - 1)]
    convt_pairs.append((chans[-1], chans[-1]))
    n_convt = len(convt_pairs)
    Cf = chans[-1]
    Hf = 2 * (2 ** n_convt)          # spatial size after all ConvT layers

    def kernel(*refs):
        # ref layout: z, lin_w, lin_b, [w,b,gamma,beta]*n_convt, fc_w, fc_b, out
        z_ref, lw_ref, lb_ref = refs[0], refs[1], refs[2]
        convt_refs = refs[3:3 + 4 * n_convt]
        fcw_ref = refs[3 + 4 * n_convt]
        fcb_ref = refs[4 + 4 * n_convt]
        out_ref = refs[-1]

        # ---- decoder_input: Linear(latent -> C0*4) -------------------------
        # lin_w is pre-permuted so lw_ref[s] is the (L, C0) matrix for NHWC
        # spatial position s = h*2 + w of the 2x2 grid -> no reshape/transpose
        # of the activation is needed afterwards.
        zb = z_ref[...].astype(jnp.bfloat16)
        pos = [_dot(zb, lw_ref[s]) + lb_ref[s] for s in range(4)]       # (B, C0) f32
        top = jnp.concatenate([pos[0].reshape(B, 1, 1, C0),
                               pos[1].reshape(B, 1, 1, C0)], axis=2)
        bot = jnp.concatenate([pos[2].reshape(B, 1, 1, C0),
                               pos[3].reshape(B, 1, 1, C0)], axis=2)
        x = jnp.concatenate([top, bot], axis=1)                         # (B,2,2,C0)

        # ---- [ConvTranspose2d(k3,s2,p1,op1) -> BN(batch stats) -> LeakyReLU]
        for li, (Cin, Cout) in enumerate(convt_pairs):
            w_ref, b_ref, g_ref, bt_ref = convt_refs[4 * li:4 * li + 4]
            N, H, W, _ = x.shape
            M = N * H * W
            xb = x.astype(jnp.bfloat16)
            # dense shifted patches, materialized once and reused by all taps
            p00 = xb.reshape(M, Cin)
            p01 = _shift2d(xb, 0, 1).reshape(M, Cin)
            p10 = _shift2d(xb, 1, 0).reshape(M, Cin)
            p11 = _shift2d(xb, 1, 1).reshape(M, Cin)
            wk = lambda kh, kw: w_ref[kh, kw]                           # (Cin,Cout) bf16

            # sub-pixel decomposition: out[2i+ph, 2j+pw] = y[ph][pw][i, j]
            y00 = _dot(p00, wk(1, 1))
            y01 = _dot(p00, wk(1, 2)) + _dot(p01, wk(1, 0))
            y10 = _dot(p00, wk(2, 1)) + _dot(p10, wk(0, 1))
            y11 = (_dot(p00, wk(2, 2)) + _dot(p01, wk(2, 0))
                   + _dot(p10, wk(0, 2)) + _dot(p11, wk(0, 0)))
            bias = b_ref[...]                                           # (1, Cout)
            ph = [y00 + bias, y01 + bias, y10 + bias, y11 + bias]

            # BatchNorm2d, training mode: batch stats over all N*H_out*W_out
            # positions (= the 4 phases together), biased variance, eps=1e-5.
            cnt = 4.0 * M
            mean = sum(jnp.sum(t, axis=0, keepdims=True) for t in ph) / cnt
            var = sum(jnp.sum(jnp.square(t - mean), axis=0, keepdims=True)
                      for t in ph) / cnt
            scale = g_ref[...] * lax.rsqrt(var + 1e-5)
            off = bt_ref[...] - mean * scale
            ph = [_leaky_relu(t * scale + off) for t in ph]

            # interleave the 4 phases back into (N, 2H, 2W, Cout)
            ph = [t.reshape(N, H, W, Cout) for t in ph]
            even_rows = _interleave_w(ph[0], ph[1])
            odd_rows = _interleave_w(ph[2], ph[3])
            x = _interleave_h(even_rows, odd_rows)

        # ---- final Conv2d(Cf -> 3, k3, pad=1) + Sigmoid ---------------------
        N, H, W, _ = x.shape
        M = N * H * W
        xb = x.astype(jnp.bfloat16)
        acc = jnp.zeros((M, 3), jnp.float32)
        for dh in (-1, 0, 1):
            for dw in (-1, 0, 1):
                acc = acc + _dot(_shift2d(xb, dh, dw).reshape(M, Cf),
                                 fcw_ref[dh + 1, dw + 1])
        acc = acc + fcb_ref[...]
        # exact sigmoid (exp is on the EUP; keeps the output provably in [0,1])
        out_ref[...] = 1.0 / (1.0 + jnp.exp(-acc))

    return kernel, convt_pairs, Hf


def _full_spec(shape):
    nd = len(shape)
    return pl.BlockSpec(shape, lambda i, _n=nd: (0,) * _n)


def decoder_forward(kparams, z):
    """Fused forward pass.  kparams from prepare_kernel_params()."""
    B, L = z.shape
    chans = kparams["chans"]
    kernel, convt_pairs, Hf = _build_decoder_kernel(B, chans)

    args = [z, kparams["lin_w"], kparams["lin_b"]]
    for blk in kparams["convt"]:
        args += [blk["w"], blk["b"], blk["gamma"], blk["beta"]]
    args += [kparams["fc_w"], kparams["fc_b"]]

    M_out = B * Hf * Hf

    # rough cost hint for the XLA scheduler
    flops = 2 * B * L * chans[0] * 4
    h = 2
    for (cin, cout) in convt_pairs:
        flops += 2 * 9 * (B * h * h) * cin * cout
        h *= 2
    flops += 2 * 9 * (B * h * h) * chans[-1] * 3
    trans = M_out * 3 + 4 * sum(c for _, c in convt_pairs)
    bytes_acc = int(sum(a.size * a.dtype.itemsize for a in args) + M_out * 3 * 4)

    out2d = pl.pallas_call(
        kernel,
        out_shape=jax.ShapeDtypeStruct((M_out, 3), jnp.float32),
        grid=(1,),
        in_specs=[_full_spec(a.shape) for a in args],
        out_specs=_full_spec((M_out, 3)),
        compiler_params=pltpu.CompilerParams(
            dimension_semantics=("arbitrary",),
            vmem_limit_bytes=32 * 1024 * 1024,
        ),
        cost_estimate=pl.CostEstimate(
            flops=int(flops), transcendentals=int(trans), bytes_accessed=bytes_acc),
    )(*args)

    # only layout plumbing left outside the kernel: NHWC -> PyTorch NCHW
    return out2d.reshape(B, Hf, Hf, 3).transpose(0, 3, 1, 2)


# --------------------------------------------------------------------------- #
# parameters: PyTorch-layout init + one-time conversion to kernel layout       #
# --------------------------------------------------------------------------- #

def init_torch_layout_params(hidden_dims, latent_dim, key):
    """Random parameters stored in the same layouts PyTorch uses."""
    hd_last = hidden_dims[-1]                       # accessed BEFORE reverse()
    chans = list(hidden_dims)[::-1]                 # mirrors hidden_dims.reverse()
    keys = iter(jax.random.split(key, 64))
    p = {
        "chans": chans,
        "lin_w": 0.05 * jax.random.normal(next(keys), (hd_last * 4, latent_dim), jnp.float32),
        "lin_b": 0.05 * jax.random.normal(next(keys), (hd_last * 4,), jnp.float32),
        "convt": [],
    }
    pairs = [(chans[i], chans[i + 1]) for i in range(len(chans) - 1)]
    pairs.append((chans[-1], chans[-1]))            # final_layer's ConvTranspose
    for (cin, cout) in pairs:
        p["convt"].append(dict(
            w=0.05 * jax.random.normal(next(keys), (cin, cout, 3, 3), jnp.float32),
            b=0.05 * jax.random.normal(next(keys), (cout,), jnp.float32),
            gamma=jnp.ones((cout,), jnp.float32),
            beta=jnp.zeros((cout,), jnp.float32),
        ))
    p["fc_w"] = 0.05 * jax.random.normal(next(keys), (3, chans[-1], 3, 3), jnp.float32)
    p["fc_b"] = 0.05 * jax.random.normal(next(keys), (3,), jnp.float32)
    return p


def prepare_kernel_params(p):
    """One-time conversion of PyTorch-layout params to kernel layout (bf16 mats)."""
    chans = p["chans"]
    assert chans[0] == 512, "forward() hard-codes result.view(-1, 512, 2, 2)"
    C0 = chans[0]
    L = p["lin_w"].shape[1]
    # Linear: y = z @ W.T + b; output feature f maps to (c, h, w) with
    # f = c*4 + h*2 + w (the view(-1,512,2,2)).  Pre-permute so slice s = h*2+w
    # is the (L, C0) matrix producing NHWC spatial position s directly.
    lw = p["lin_w"].reshape(C0, 4, L).transpose(1, 2, 0)       # (4, L, C0)
    lb = p["lin_b"].reshape(C0, 4).T                           # (4, C0)
    kp = {
        "chans": chans,
        "lin_w": lw.astype(jnp.bfloat16),
        "lin_b": lb.astype(jnp.float32),
        "convt": [],
    }
    for blk in p["convt"]:
        kp["convt"].append(dict(
            # ConvT weight (Cin, Cout, kh, kw) -> (kh, kw, Cin, Cout); the
            # sub-pixel decomposition uses the direct (un-flipped) taps.
            w=jnp.transpose(blk["w"], (2, 3, 0, 1)).astype(jnp.bfloat16),
            b=blk["b"].reshape(1, -1).astype(jnp.float32),
            gamma=blk["gamma"].reshape(1, -1).astype(jnp.float32),
            beta=blk["beta"].reshape(1, -1).astype(jnp.float32),
        ))
    # Conv2d weight (Cout, Cin, kh, kw) -> (kh, kw, Cin, Cout)
    kp["fc_w"] = jnp.transpose(p["fc_w"], (2, 3, 1, 0)).astype(jnp.bfloat16)
    kp["fc_b"] = p["fc_b"].reshape(1, -1).astype(jnp.float32)
    return kp


# --------------------------------------------------------------------------- #

if __name__ == "__main__":
    # forward() hard-codes view(-1, 512, 2, 2) => hidden_dims[-1] must be 512.
    hidden_dims = [64, 512]
    latent_dim = 16
    batch = 2

    key = jax.random.PRNGKey(0)
    pkey, zkey = jax.random.split(key)
    torch_params = init_torch_layout_params(hidden_dims, latent_dim, pkey)
    kparams = prepare_kernel_params(torch_params)
    z = jax.random.normal(zkey, (batch, latent_dim), jnp.float32)

    fwd = jax.jit(lambda zz: decoder_forward(kparams, zz))
    out = jax.block_until_ready(fwd(z))

    assert out.shape == (batch, 3, 8, 8), out.shape
    assert bool(jnp.all(jnp.isfinite(out)))
    assert bool(jnp.all((out >= 0.0) & (out <= 1.0)))   # sigmoid output
    print("KERNEL_OK")
</pallas_src>

<mosaic_0001>
module attributes {stable_mosaic.version = 11 : i64} {
  func.func @kernel(%arg0: i32, %arg1: memref<2x16xf32, #tpu.memory_space<vmem>>, %arg2: memref<4x16x512xbf16, #tpu.memory_space<vmem>>, %arg3: memref<4x512xf32, #tpu.memory_space<vmem>>, %arg4: memref<3x3x512x64xbf16, #tpu.memory_space<vmem>>, %arg5: memref<1x64xf32, #tpu.memory_space<vmem>>, %arg6: memref<1x64xf32, #tpu.memory_space<vmem>>, %arg7: memref<1x64xf32, #tpu.memory_space<vmem>>, %arg8: memref<3x3x64x64xbf16, #tpu.memory_space<vmem>>, %arg9: memref<1x64xf32, #tpu.memory_space<vmem>>, %arg10: memref<1x64xf32, #tpu.memory_space<vmem>>, %arg11: memref<1x64xf32, #tpu.memory_space<vmem>>, %arg12: memref<3x3x64x3xbf16, #tpu.memory_space<vmem>>, %arg13: memref<1x3xf32, #tpu.memory_space<vmem>>, %arg14: memref<128x3xf32, #tpu.memory_space<vmem>>) attributes {dimension_semantics = [#tpu.dimension_semantics<arbitrary>], iteration_bounds = array<i64: 1>, scalar_prefetch = 0 : i64, scratch_operands = 0 : i64, tpu.core_type = #tpu.core_type<tc>, window_params = [{pipeline_mode = #tpu.pipeline_mode<synchronous>, transform_indices = @transform_0, window_bounds = array<i64: 2, 16>}, {pipeline_mode = #tpu.pipeline_mode<synchronous>, transform_indices = @transform_1, window_bounds = array<i64: 4, 16, 512>}, {pipeline_mode = #tpu.pipeline_mode<synchronous>, transform_indices = @transform_2, window_bounds = array<i64: 4, 512>}, {pipeline_mode = #tpu.pipeline_mode<synchronous>, transform_indices = @transform_3, window_bounds = array<i64: 3, 3, 512, 64>}, {pipeline_mode = #tpu.pipeline_mode<synchronous>, transform_indices = @transform_4, window_bounds = array<i64: 1, 64>}, {pipeline_mode = #tpu.pipeline_mode<synchronous>, transform_indices = @transform_5, window_bounds = array<i64: 1, 64>}, {pipeline_mode = #tpu.pipeline_mode<synchronous>, transform_indices = @transform_6, window_bounds = array<i64: 1, 64>}, {pipeline_mode = #tpu.pipeline_mode<synchronous>, transform_indices = @transform_7, window_bounds = array<i64: 3, 3, 64, 64>}, {pipeline_mode = #tpu.pipeline_mode<synchronous>, transform_indices = @transform_8, window_bounds = array<i64: 1, 64>}, {pipeline_mode = #tpu.pipeline_mode<synchronous>, transform_indices = @transform_9, window_bounds = array<i64: 1, 64>}, {pipeline_mode = #tpu.pipeline_mode<synchronous>, transform_indices = @transform_10, window_bounds = array<i64: 1, 64>}, {pipeline_mode = #tpu.pipeline_mode<synchronous>, transform_indices = @transform_11, window_bounds = array<i64: 3, 3, 64, 3>}, {pipeline_mode = #tpu.pipeline_mode<synchronous>, transform_indices = @transform_12, window_bounds = array<i64: 1, 3>}, {pipeline_mode = #tpu.pipeline_mode<synchronous>, transform_indices = @transform_13, window_bounds = array<i64: 128, 3>}]} {
    %c0 = arith.constant 0 : index
    %c0_0 = arith.constant 0 : index
    %0 = vector.load %arg1[%c0, %c0_0] : memref<2x16xf32, #tpu.memory_space<vmem>>, vector<2x16xf32>
    %1 = arith.truncf %0 : vector<2x16xf32> to vector<2x16xbf16>
    %c0_1 = arith.constant 0 : index
    %c0_2 = arith.constant 0 : index
    %c0_3 = arith.constant 0 : index
    %2 = vector.load %arg2[%c0_1, %c0_2, %c0_3] : memref<4x16x512xbf16, #tpu.memory_space<vmem>>, vector<1x16x512xbf16>
    %3 = vector.shape_cast %2 : vector<1x16x512xbf16> to vector<16x512xbf16>
    %cst = arith.constant dense<0.000000e+00> : vector<2x512xf32>
    %4 = tpu.matmul %1, %3, %cst {dimension_numbers = #tpu.dot_dimension_numbers<[1], [0], [0], [1], [0, 0, 1, 1], [], []>} : vector<2x16xbf16>, vector<16x512xbf16>, vector<2x512xf32> -> vector<2x512xf32>
    %c0_4 = arith.constant 0 : index
    %c0_5 = arith.constant 0 : index
    %5 = vector.load %arg3[%c0_4, %c0_5] : memref<4x512xf32, #tpu.memory_space<vmem>>, vector<1x512xf32>
    %6 = vector.shape_cast %5 : vector<1x512xf32> to vector<512xf32>
    %7 = vector.shape_cast %6 : vector<512xf32> to vector<1x512xf32>
    %8 = vector.broadcast %7 : vector<1x512xf32> to vector<2x512xf32>
    %9 = arith.addf %4, %8 : vector<2x512xf32>
    %c1 = arith.constant 1 : index
    %c0_6 = arith.constant 0 : index
    %c0_7 = arith.constant 0 : index
    %10 = vector.load %arg2[%c1, %c0_6, %c0_7] : memref<4x16x512xbf16, #tpu.memory_space<vmem>>, vector<1x16x512xbf16>
    %11 = vector.shape_cast %10 : vector<1x16x512xbf16> to vector<16x512xbf16>
    %cst_8 = arith.constant dense<0.000000e+00> : vector<2x512xf32>
    %12 = tpu.matmul %1, %11, %cst_8 {dimension_numbers = #tpu.dot_dimension_numbers<[1], [0], [0], [1], [0, 0, 1, 1], [], []>} : vector<2x16xbf16>, vector<16x512xbf16>, vector<2x512xf32> -> vector<2x512xf32>
    %c1_9 = arith.constant 1 : index
    %c0_10 = arith.constant 0 : index
    %13 = vector.load %arg3[%c1_9, %c0_10] : memref<4x512xf32, #tpu.memory_space<vmem>>, vector<1x512xf32>
    %14 = vector.shape_cast %13 : vector<1x512xf32> to vector<512xf32>
    %15 = vector.shape_cast %14 : vector<512xf32> to vector<1x512xf32>
    %16 = vector.broadcast %15 : vector<1x512xf32> to vector<2x512xf32>
    %17 = arith.addf %12, %16 : vector<2x512xf32>
    %c2 = arith.constant 2 : index
    %c0_11 = arith.constant 0 : index
    %c0_12 = arith.constant 0 : index
    %18 = vector.load %arg2[%c2, %c0_11, %c0_12] : memref<4x16x512xbf16, #tpu.memory_space<vmem>>, vector<1x16x512xbf16>
    %19 = vector.shape_cast %18 : vector<1x16x512xbf16> to vector<16x512xbf16>
    %cst_13 = arith.constant dense<0.000000e+00> : vector<2x512xf32>
    %20 = tpu.matmul %1, %19, %cst_13 {dimension_numbers = #tpu.dot_dimension_numbers<[1], [0], [0], [1], [0, 0, 1, 1], [], []>} : vector<2x16xbf16>, vector<16x512xbf16>, vector<2x512xf32> -> vector<2x512xf32>
    %c2_14 = arith.constant 2 : index
    %c0_15 = arith.constant 0 : index
    %21 = vector.load %arg3[%c2_14, %c0_15] : memref<4x512xf32, #tpu.memory_space<vmem>>, vector<1x512xf32>
    %22 = vector.shape_cast %21 : vector<1x512xf32> to vector<512xf32>
    %23 = vector.shape_cast %22 : vector<512xf32> to vector<1x512xf32>
    %24 = vector.broadcast %23 : vector<1x512xf32> to vector<2x512xf32>
    %25 = arith.addf %20, %24 : vector<2x512xf32>
    %c3 = arith.constant 3 : index
    %c0_16 = arith.constant 0 : index
    %c0_17 = arith.constant 0 : index
    %26 = vector.load %arg2[%c3, %c0_16, %c0_17] : memref<4x16x512xbf16, #tpu.memory_space<vmem>>, vector<1x16x512xbf16>
    %27 = vector.shape_cast %26 : vector<1x16x512xbf16> to vector<16x512xbf16>
    %cst_18 = arith.constant dense<0.000000e+00> : vector<2x512xf32>
    %28 = tpu.matmul %1, %27, %cst_18 {dimension_numbers = #tpu.dot_dimension_numbers<[1], [0], [0], [1], [0, 0, 1, 1], [], []>} : vector<2x16xbf16>, vector<16x512xbf16>, vector<2x512xf32> -> vector<2x512xf32>
    %c3_19 = arith.constant 3 : index
    %c0_20 = arith.constant 0 : index
    %29 = vector.load %arg3[%c3_19, %c0_20] : memref<4x512xf32, #tpu.memory_space<vmem>>, vector<1x512xf32>
    %30 = vector.shape_cast %29 : vector<1x512xf32> to vector<512xf32>
    %31 = vector.shape_cast %30 : vector<512xf32> to vector<1x512xf32>
    %32 = vector.broadcast %31 : vector<1x512xf32> to vector<2x512xf32>
    %33 = arith.addf %28, %32 : vector<2x512xf32>
    %34 = vector.shape_cast %9 : vector<2x512xf32> to vector<2x1x1x512xf32>
    %35 = vector.shape_cast %17 : vector<2x512xf32> to vector<2x1x1x512xf32>
    %36 = tpu.concatenate %34, %35 in 2 : vector<2x1x1x512xf32>, vector<2x1x1x512xf32> -> vector<2x1x2x512xf32>
    %37 = vector.shape_cast %25 : vector<2x512xf32> to vector<2x1x1x512xf32>
    %38 = vector.shape_cast %33 : vector<2x512xf32> to vector<2x1x1x512xf32>
    %39 = tpu.concatenate %37, %38 in 2 : vector<2x1x1x512xf32>, vector<2x1x1x512xf32> -> vector<2x1x2x512xf32>
    %40 = tpu.concatenate %36, %39 in 1 : vector<2x1x2x512xf32>, vector<2x1x2x512xf32> -> vector<2x2x2x512xf32>
    %41 = arith.truncf %40 : vector<2x2x2x512xf32> to vector<2x2x2x512xbf16>
    %42 = vector.shape_cast %41 : vector<2x2x2x512xbf16> to vector<8x512xbf16>
    %43 = vector.extract_strided_slice %41 {offsets = [0, 0, 1, 0], sizes = [2, 2, 1, 512], strides = [1, 1, 1, 1]} : vector<2x2x2x512xbf16> to vector<2x2x1x512xbf16>
    %cst_21 = arith.constant 0.000000e+00 : bf16
    %44 = vector.broadcast %cst_21 : bf16 to vector<2x2x1x512xbf16>
    %45 = tpu.concatenate %43, %44 in 2 : vector<2x2x1x512xbf16>, vector<2x2x1x512xbf16> -> vector<2x2x2x512xbf16>
    %46 = vector.shape_cast %45 : vector<2x2x2x512xbf16> to vector<8x512xbf16>
    %47 = vector.extract_strided_slice %41 {offsets = [0, 1, 0, 0], sizes = [2, 1, 2, 512], strides = [1, 1, 1, 1]} : vector<2x2x2x512xbf16> to vector<2x1x2x512xbf16>
    %cst_22 = arith.constant 0.000000e+00 : bf16
    %48 = vector.broadcast %cst_22 : bf16 to vector<2x1x2x512xbf16>
    %49 = tpu.concatenate %47, %48 in 1 : vector<2x1x2x512xbf16>, vector<2x1x2x512xbf16> -> vector<2x2x2x512xbf16>
    %50 = vector.shape_cast %49 : vector<2x2x2x512xbf16> to vector<8x512xbf16>
    %51 = vector.extract_strided_slice %41 {offsets = [0, 1, 0, 0], sizes = [2, 1, 2, 512], strides = [1, 1, 1, 1]} : vector<2x2x2x512xbf16> to vector<2x1x2x512xbf16>
    %cst_23 = arith.constant 0.000000e+00 : bf16
    %52 = vector.broadcast %cst_23 : bf16 to vector<2x1x2x512xbf16>
    %53 = tpu.concatenate %51, %52 in 1 : vector<2x1x2x512xbf16>, vector<2x1x2x512xbf16> -> vector<2x2x2x512xbf16>
    %54 = vector.extract_strided_slice %53 {offsets = [0, 0, 1, 0], sizes = [2, 2, 1, 512], strides = [1, 1, 1, 1]} : vector<2x2x2x512xbf16> to vector<2x2x1x512xbf16>
    %cst_24 = arith.constant 0.000000e+00 : bf16
    %55 = vector.broadcast %cst_24 : bf16 to vector<2x2x1x512xbf16>
    %56 = tpu.concatenate %54, %55 in 2 : vector<2x2x1x512xbf16>, vector<2x2x1x512xbf16> -> vector<2x2x2x512xbf16>
    %57 = vector.shape_cast %56 : vector<2x2x2x512xbf16> to vector<8x512xbf16>
    %c1_25 = arith.constant 1 : index
    %c1_26 = arith.constant 1 : index
    %c0_27 = arith.constant 0 : index
    %c0_28 = arith.constant 0 : index
    %58 = vector.load %arg4[%c1_25, %c1_26, %c0_27, %c0_28] : memref<3x3x512x64xbf16, #tpu.memory_space<vmem>>, vector<1x1x512x64xbf16>
    %59 = vector.shape_cast %58 : vector<1x1x512x64xbf16> to vector<512x64xbf16>
    %cst_29 = arith.constant dense<0.000000e+00> : vector<8x64xf32>
    %60 = tpu.matmul %42, %59, %cst_29 {dimension_numbers = #tpu.dot_dimension_numbers<[1], [0], [0], [1], [0, 0, 1, 1], [], []>} : vector<8x512xbf16>, vector<512x64xbf16>, vector<8x64xf32> -> vector<8x64xf32>
    %c1_30 = arith.constant 1 : index
    %c2_31 = arith.constant 2 : index
    %c0_32 = arith.constant 0 : index
    %c0_33 = arith.constant 0 : index
    %61 = vector.load %arg4[%c1_30, %c2_31, %c0_32, %c0_33] : memref<3x3x512x64xbf16, #tpu.memory_space<vmem>>, vector<1x1x512x64xbf16>
    %62 = vector.shape_cast %61 : vector<1x1x512x64xbf16> to vector<512x64xbf16>
    %cst_34 = arith.constant dense<0.000000e+00> : vector<8x64xf32>
    %63 = tpu.matmul %42, %62, %cst_34 {dimension_numbers = #tpu.dot_dimension_numbers<[1], [0], [0], [1], [0, 0, 1, 1], [], []>} : vector<8x512xbf16>, vector<512x64xbf16>, vector<8x64xf32> -> vector<8x64xf32>
    %c1_35 = arith.constant 1 : index
    %c0_36 = arith.constant 0 : index
    %c0_37 = arith.constant 0 : index
    %c0_38 = arith.constant 0 : index
    %64 = vector.load %arg4[%c1_35, %c0_36, %c0_37, %c0_38] : memref<3x3x512x64xbf16, #tpu.memory_space<vmem>>, vector<1x1x512x64xbf16>
    %65 = vector.shape_cast %64 : vector<1x1x512x64xbf16> to vector<512x64xbf16>
    %cst_39 = arith.constant dense<0.000000e+00> : vector<8x64xf32>
    %66 = tpu.matmul %46, %65, %cst_39 {dimension_numbers = #tpu.dot_dimension_numbers<[1], [0], [0], [1], [0, 0, 1, 1], [], []>} : vector<8x512xbf16>, vector<512x64xbf16>, vector<8x64xf32> -> vector<8x64xf32>
    %67 = arith.addf %63, %66 : vector<8x64xf32>
    %c2_40 = arith.constant 2 : index
    %c1_41 = arith.constant 1 : index
    %c0_42 = arith.constant 0 : index
    %c0_43 = arith.constant 0 : index
    %68 = vector.load %arg4[%c2_40, %c1_41, %c0_42, %c0_43] : memref<3x3x512x64xbf16, #tpu.memory_space<vmem>>, vector<1x1x512x64xbf16>
    %69 = vector.shape_cast %68 : vector<1x1x512x64xbf16> to vector<512x64xbf16>
    %cst_44 = arith.constant dense<0.000000e+00> : vector<8x64xf32>
    %70 = tpu.matmul %42, %69, %cst_44 {dimension_numbers = #tpu.dot_dimension_numbers<[1], [0], [0], [1], [0, 0, 1, 1], [], []>} : vector<8x512xbf16>, vector<512x64xbf16>, vector<8x64xf32> -> vector<8x64xf32>
    %c0_45 = arith.constant 0 : index
    %c1_46 = arith.constant 1 : index
    %c0_47 = arith.constant 0 : index
    %c0_48 = arith.constant 0 : index
    %71 = vector.load %arg4[%c0_45, %c1_46, %c0_47, %c0_48] : memref<3x3x512x64xbf16, #tpu.memory_space<vmem>>, vector<1x1x512x64xbf16>
    %72 = vector.shape_cast %71 : vector<1x1x512x64xbf16> to vector<512x64xbf16>
    %cst_49 = arith.constant dense<0.000000e+00> : vector<8x64xf32>
    %73 = tpu.matmul %50, %72, %cst_49 {dimension_numbers = #tpu.dot_dimension_numbers<[1], [0], [0], [1], [0, 0, 1, 1], [], []>} : vector<8x512xbf16>, vector<512x64xbf16>, vector<8x64xf32> -> vector<8x64xf32>
    %74 = arith.addf %70, %73 : vector<8x64xf32>
    %c2_50 = arith.constant 2 : index
    %c2_51 = arith.constant 2 : index
    %c0_52 = arith.constant 0 : index
    %c0_53 = arith.constant 0 : index
    %75 = vector.load %arg4[%c2_50, %c2_51, %c0_52, %c0_53] : memref<3x3x512x64xbf16, #tpu.memory_space<vmem>>, vector<1x1x512x64xbf16>
    %76 = vector.shape_cast %75 : vector<1x1x512x64xbf16> to vector<512x64xbf16>
    %cst_54 = arith.constant dense<0.000000e+00> : vector<8x64xf32>
    %77 = tpu.matmul %42, %76, %cst_54 {dimension_numbers = #tpu.dot_dimension_numbers<[1], [0], [0], [1], [0, 0, 1, 1], [], []>} : vector<8x512xbf16>, vector<512x64xbf16>, vector<8x64xf32> -> vector<8x64xf32>
    %c2_55 = arith.constant 2 : index
    %c0_56 = arith.constant 0 : index
    %c0_57 = arith.constant 0 : index
    %c0_58 = arith.constant 0 : index
    %78 = vector.load %arg4[%c2_55, %c0_56, %c0_57, %c0_58] : memref<3x3x512x64xbf16, #tpu.memory_space<vmem>>, vector<1x1x512x64xbf16>
    %79 = vector.shape_cast %78 : vector<1x1x512x64xbf16> to vector<512x64xbf16>
    %cst_59 = arith.constant dense<0.000000e+00> : vector<8x64xf32>
    %80 = tpu.matmul %46, %79, %cst_59 {dimension_numbers = #tpu.dot_dimension_numbers<[1], [0], [0], [1], [0, 0, 1, 1], [], []>} : vector<8x512xbf16>, vector<512x64xbf16>, vector<8x64xf32> -> vector<8x64xf32>
    %81 = arith.addf %77, %80 : vector<8x64xf32>
    %c0_60 = arith.constant 0 : index
    %c2_61 = arith.constant 2 : index
    %c0_62 = arith.constant 0 : index
    %c0_63 = arith.constant 0 : index
    %82 = vector.load %arg4[%c0_60, %c2_61, %c0_62, %c0_63] : memref<3x3x512x64xbf16, #tpu.memory_space<vmem>>, vector<1x1x512x64xbf16>
    %83 = vector.shape_cast %82 : vector<1x1x512x64xbf16> to vector<512x64xbf16>
    %cst_64 = arith.constant dense<0.000000e+00> : vector<8x64xf32>
    %84 = tpu.matmul %50, %83, %cst_64 {dimension_numbers = #tpu.dot_dimension_numbers<[1], [0], [0], [1], [0, 0, 1, 1], [], []>} : vector<8x512xbf16>, vector<512x64xbf16>, vector<8x64xf32> -> vector<8x64xf32>
    %85 = arith.addf %81, %84 : vector<8x64xf32>
    %c0_65 = arith.constant 0 : index
    %c0_66 = arith.constant 0 : index
    %c0_67 = arith.constant 0 : index
    %c0_68 = arith.constant 0 : index
    %86 = vector.load %arg4[%c0_65, %c0_66, %c0_67, %c0_68] : memref<3x3x512x64xbf16, #tpu.memory_space<vmem>>, vector<1x1x512x64xbf16>
    %87 = vector.shape_cast %86 : vector<1x1x512x64xbf16> to vector<512x64xbf16>
    %cst_69 = arith.constant dense<0.000000e+00> : vector<8x64xf32>
    %88 = tpu.matmul %57, %87, %cst_69 {dimension_numbers = #tpu.dot_dimension_numbers<[1], [0], [0], [1], [0, 0, 1, 1], [], []>} : vector<8x512xbf16>, vector<512x64xbf16>, vector<8x64xf32> -> vector<8x64xf32>
    %89 = arith.addf %85, %88 : vector<8x64xf32>
    %c0_70 = arith.constant 0 : index
    %c0_71 = arith.constant 0 : index
    %90 = vector.load %arg5[%c0_70, %c0_71] : memref<1x64xf32, #tpu.memory_space<vmem>>, vector<1x64xf32>
    %91 = vector.broadcast %90 : vector<1x64xf32> to vector<8x64xf32>
    %92 = arith.addf %60, %91 : vector<8x64xf32>
    %93 = vector.broadcast %90 : vector<1x64xf32> to vector<8x64xf32>
    %94 = arith.addf %67, %93 : vector<8x64xf32>
    %95 = vector.broadcast %90 : vector<1x64xf32> to vector<8x64xf32>
    %96 = arith.addf %74, %95 : vector<8x64xf32>
    %97 = vector.broadcast %90 : vector<1x64xf32> to vector<8x64xf32>
    %98 = arith.addf %89, %97 : vector<8x64xf32>
    %cst_72 = arith.constant dense<0.000000e+00> : vector<64xf32>
    %99 = vector.multi_reduction <add>, %92, %cst_72 [0] : vector<8x64xf32> to vector<64xf32>
    %100 = vector.shape_cast %99 : vector<64xf32> to vector<1x64xf32>
    %cst_73 = arith.constant 0.000000e+00 : f32
    %101 = vector.broadcast %cst_73 : f32 to vector<1x64xf32>
    %102 = arith.addf %101, %100 : vector<1x64xf32>
    %cst_74 = arith.constant dense<0.000000e+00> : vector<64xf32>
    %103 = vector.multi_reduction <add>, %94, %cst_74 [0] : vector<8x64xf32> to vector<64xf32>
    %104 = vector.shape_cast %103 : vector<64xf32> to vector<1x64xf32>
    %105 = arith.addf %102, %104 : vector<1x64xf32>
    %cst_75 = arith.constant dense<0.000000e+00> : vector<64xf32>
    %106 = vector.multi_reduction <add>, %96, %cst_75 [0] : vector<8x64xf32> to vector<64xf32>
    %107 = vector.shape_cast %106 : vector<64xf32> to vector<1x64xf32>
    %108 = arith.addf %105, %107 : vector<1x64xf32>
    %cst_76 = arith.constant dense<0.000000e+00> : vector<64xf32>
    %109 = vector.multi_reduction <add>, %98, %cst_76 [0] : vector<8x64xf32> to vector<64xf32>
    %110 = vector.shape_cast %109 : vector<64xf32> to vector<1x64xf32>
    %111 = arith.addf %108, %110 : vector<1x64xf32>
    %cst_77 = arith.constant 3.200000e+01 : f32
    %112 = vector.broadcast %cst_77 : f32 to vector<1x64xf32>
    %113 = arith.divf %111, %112 : vector<1x64xf32>
    %114 = vector.broadcast %113 : vector<1x64xf32> to vector<8x64xf32>
    %115 = arith.subf %92, %114 : vector<8x64xf32>
    %116 = arith.mulf %115, %115 : vector<8x64xf32>
    %cst_78 = arith.constant dense<0.000000e+00> : vector<64xf32>
    %117 = vector.multi_reduction <add>, %116, %cst_78 [0] : vector<8x64xf32> to vector<64xf32>
    %118 = vector.shape_cast %117 : vector<64xf32> to vector<1x64xf32>
    %cst_79 = arith.constant 0.000000e+00 : f32
    %119 = vector.broadcast %cst_79 : f32 to vector<1x64xf32>
    %120 = arith.addf %119, %118 : vector<1x64xf32>
    %121 = vector.broadcast %113 : vector<1x64xf32> to vector<8x64xf32>
    %122 = arith.subf %94, %121 : vector<8x64xf32>
    %123 = arith.mulf %122, %122 : vector<8x64xf32>
    %cst_80 = arith.constant dense<0.000000e+00> : vector<64xf32>
    %124 = vector.multi_reduction <add>, %123, %cst_80 [0] : vector<8x64xf32> to vector<64xf32>
    %125 = vector.shape_cast %124 : vector<64xf32> to vector<1x64xf32>
    %126 = arith.addf %120, %125 : vector<1x64xf32>
    %127 = vector.broadcast %113 : vector<1x64xf32> to vector<8x64xf32>
    %128 = arith.subf %96, %127 : vector<8x64xf32>
    %129 = arith.mulf %128, %128 : vector<8x64xf32>
    %cst_81 = arith.constant dense<0.000000e+00> : vector<64xf32>
    %130 = vector.multi_reduction <add>, %129, %cst_81 [0] : vector<8x64xf32> to vector<64xf32>
    %131 = vector.shape_cast %130 : vector<64xf32> to vector<1x64xf32>
    %132 = arith.addf %126, %131 : vector<1x64xf32>
    %133 = vector.broadcast %113 : vector<1x64xf32> to vector<8x64xf32>
    %134 = arith.subf %98, %133 : vector<8x64xf32>
    %135 = arith.mulf %134, %134 : vector<8x64xf32>
    %cst_82 = arith.constant dense<0.000000e+00> : vector<64xf32>
    %136 = vector.multi_reduction <add>, %135, %cst_82 [0] : vector<8x64xf32> to vector<64xf32>
    %137 = vector.shape_cast %136 : vector<64xf32> to vector<1x64xf32>
    %138 = arith.addf %132, %137 : vector<1x64xf32>
    %cst_83 = arith.constant 3.200000e+01 : f32
    %139 = vector.broadcast %cst_83 : f32 to vector<1x64xf32>
    %140 = arith.divf %138, %139 : vector<1x64xf32>
    %c0_84 = arith.constant 0 : index
    %c0_85 = arith.constant 0 : index
    %141 = vector.load %arg6[%c0_84, %c0_85] : memref<1x64xf32, #tpu.memory_space<vmem>>, vector<1x64xf32>
    %cst_86 = arith.constant 9.99999974E-6 : f32
    %142 = vector.broadcast %cst_86 : f32 to vector<1x64xf32>
    %143 = arith.addf %140, %142 : vector<1x64xf32>
    %144 = math.rsqrt %143 : vector<1x64xf32>
    %145 = arith.mulf %141, %144 : vector<1x64xf32>
    %c0_87 = arith.constant 0 : index
    %c0_88 = arith.constant 0 : index
    %146 = vector.load %arg7[%c0_87, %c0_88] : memref<1x64xf32, #tpu.memory_space<vmem>>, vector<1x64xf32>
    %147 = arith.mulf %113, %145 : vector<1x64xf32>
    %148 = arith.subf %146, %147 : vector<1x64xf32>
    %149 = vector.broadcast %145 : vector<1x64xf32> to vector<8x64xf32>
    %150 = arith.mulf %92, %149 : vector<8x64xf32>
    %151 = vector.broadcast %148 : vector<1x64xf32> to vector<8x64xf32>
    %152 = arith.addf %150, %151 : vector<8x64xf32>
    %cst_89 = arith.constant 0.000000e+00 : f32
    %153 = vector.broadcast %cst_89 : f32 to vector<8x64xf32>
    %154 = arith.cmpf oge, %152, %153 : vector<8x64xf32>
    %cst_90 = arith.constant 0.00999999977 : f32
    %155 = vector.broadcast %cst_90 : f32 to vector<8x64xf32>
    %156 = arith.mulf %155, %152 : vector<8x64xf32>
    %157 = arith.select %154, %152, %156 : vector<8x64xi1>, vector<8x64xf32>
    %158 = vector.broadcast %145 : vector<1x64xf32> to vector<8x64xf32>
    %159 = arith.mulf %94, %158 : vector<8x64xf32>
    %160 = vector.broadcast %148 : vector<1x64xf32> to vector<8x64xf32>
    %161 = arith.addf %159, %160 : vector<8x64xf32>
    %cst_91 = arith.constant 0.000000e+00 : f32
    %162 = vector.broadcast %cst_91 : f32 to vector<8x64xf32>
    %163 = arith.cmpf oge, %161, %162 : vector<8x64xf32>
    %cst_92 = arith.constant 0.00999999977 : f32
    %164 = vector.broadcast %cst_92 : f32 to vector<8x64xf32>
    %165 = arith.mulf %164, %161 : vector<8x64xf32>
    %166 = arith.select %163, %161, %165 : vector<8x64xi1>, vector<8x64xf32>
    %167 = vector.broadcast %145 : vector<1x64xf32> to vector<8x64xf32>
    %168 = arith.mulf %96, %167 : vector<8x64xf32>
    %169 = vector.broadcast %148 : vector<1x64xf32> to vector<8x64xf32>
    %170 = arith.addf %168, %169 : vector<8x64xf32>
    %cst_93 = arith.constant 0.000000e+00 : f32
    %171 = vector.broadcast %cst_93 : f32 to vector<8x64xf32>
    %172 = arith.cmpf oge, %170, %171 : vector<8x64xf32>
    %cst_94 = arith.constant 0.00999999977 : f32
    %173 = vector.broadcast %cst_94 : f32 to vector<8x64xf32>
    %174 = arith.mulf %173, %170 : vector<8x64xf32>
    %175 = arith.select %172, %170, %174 : vector<8x64xi1>, vector<8x64xf32>
    %176 = vector.broadcast %145 : vector<1x64xf32> to vector<8x64xf32>
    %177 = arith.mulf %98, %176 : vector<8x64xf32>
    %178 = vector.broadcast %148 : vector<1x64xf32> to vector<8x64xf32>
    %179 = arith.addf %177, %178 : vector<8x64xf32>
    %cst_95 = arith.constant 0.000000e+00 : f32
    %180 = vector.broadcast %cst_95 : f32 to vector<8x64xf32>
    %181 = arith.cmpf oge, %179, %180 : vector<8x64xf32>
    %cst_96 = arith.constant 0.00999999977 : f32
    %182 = vector.broadcast %cst_96 : f32 to vector<8x64xf32>
    %183 = arith.mulf %182, %179 : vector<8x64xf32>
    %184 = arith.select %181, %179, %183 : vector<8x64xi1>, vector<8x64xf32>
    %185 = vector.shape_cast %157 : vector<8x64xf32> to vector<2x2x2x64xf32>
    %186 = vector.shape_cast %166 : vector<8x64xf32> to vector<2x2x2x64xf32>
    %187 = vector.shape_cast %175 : vector<8x64xf32> to vector<2x2x2x64xf32>
    %188 = vector.shape_cast %184 : vector<8x64xf32> to vector<2x2x2x64xf32>
    %189 = vector.shape_cast %185 : vector<2x2x2x64xf32> to vector<8x1x64xf32>
    %190 = vector.shape_cast %186 : vector<2x2x2x64xf32> to vector<8x1x64xf32>
    %191 = tpu.concatenate %189, %190 in 1 : vector<8x1x64xf32>, vector<8x1x64xf32> -> vector<8x2x64xf32>
    %192 = vector.shape_cast %191 : vector<8x2x64xf32> to vector<2x2x4x64xf32>
    %193 = vector.shape_cast %187 : vector<2x2x2x64xf32> to vector<8x1x64xf32>
    %194 = vector.shape_cast %188 : vector<2x2x2x64xf32> to vector<8x1x64xf32>
    %195 = tpu.concatenate %193, %194 in 1 : vector<8x1x64xf32>, vector<8x1x64xf32> -> vector<8x2x64xf32>
    %196 = vector.shape_cast %195 : vector<8x2x64xf32> to vector<2x2x4x64xf32>
    %197 = vector.shape_cast %192 : vector<2x2x4x64xf32> to vector<4x1x4x64xf32>
    %198 = vector.shape_cast %196 : vector<2x2x4x64xf32> to vector<4x1x4x64xf32>
    %199 = tpu.concatenate %197, %198 in 1 : vector<4x1x4x64xf32>, vector<4x1x4x64xf32> -> vector<4x2x4x64xf32>
    %200 = vector.shape_cast %199 : vector<4x2x4x64xf32> to vector<2x4x4x64xf32>
    %201 = arith.truncf %200 : vector<2x4x4x64xf32> to vector<2x4x4x64xbf16>
    %202 = vector.shape_cast %201 : vector<2x4x4x64xbf16> to vector<32x64xbf16>
    %203 = vector.extract_strided_slice %201 {offsets = [0, 0, 1, 0], sizes = [2, 4, 3, 64], strides = [1, 1, 1, 1]} : vector<2x4x4x64xbf16> to vector<2x4x3x64xbf16>
    %cst_97 = arith.constant 0.000000e+00 : bf16
    %204 = vector.broadcast %cst_97 : bf16 to vector<2x4x1x64xbf16>
    %205 = tpu.concatenate %203, %204 in 2 : vector<2x4x3x64xbf16>, vector<2x4x1x64xbf16> -> vector<2x4x4x64xbf16>
    %206 = vector.shape_cast %205 : vector<2x4x4x64xbf16> to vector<32x64xbf16>
    %207 = vector.extract_strided_slice %201 {offsets = [0, 1, 0, 0], sizes = [2, 3, 4, 64], strides = [1, 1, 1, 1]} : vector<2x4x4x64xbf16> to vector<2x3x4x64xbf16>
    %cst_98 = arith.constant 0.000000e+00 : bf16
    %208 = vector.broadcast %cst_98 : bf16 to vector<2x1x4x64xbf16>
    %209 = tpu.concatenate %207, %208 in 1 : vector<2x3x4x64xbf16>, vector<2x1x4x64xbf16> -> vector<2x4x4x64xbf16>
    %210 = vector.shape_cast %209 : vector<2x4x4x64xbf16> to vector<32x64xbf16>
    %211 = vector.extract_strided_slice %201 {offsets = [0, 1, 0, 0], sizes = [2, 3, 4, 64], strides = [1, 1, 1, 1]} : vector<2x4x4x64xbf16> to vector<2x3x4x64xbf16>
    %cst_99 = arith.constant 0.000000e+00 : bf16
    %212 = vector.broadcast %cst_99 : bf16 to vector<2x1x4x64xbf16>
    %213 = tpu.concatenate %211, %212 in 1 : vector<2x3x4x64xbf16>, vector<2x1x4x64xbf16> -> vector<2x4x4x64xbf16>
    %214 = vector.extract_strided_slice %213 {offsets = [0, 0, 1, 0], sizes = [2, 4, 3, 64], strides = [1, 1, 1, 1]} : vector<2x4x4x64xbf16> to vector<2x4x3x64xbf16>
    %cst_100 = arith.constant 0.000000e+00 : bf16
    %215 = vector.broadcast %cst_100 : bf16 to vector<2x4x1x64xbf16>
    %216 = tpu.concatenate %214, %215 in 2 : vector<2x4x3x64xbf16>, vector<2x4x1x64xbf16> -> vector<2x4x4x64xbf16>
    %217 = vector.shape_cast %216 : vector<2x4x4x64xbf16> to vector<32x64xbf16>
    %c1_101 = arith.constant 1 : index
    %c1_102 = arith.constant 1 : index
    %c0_103 = arith.constant 0 : index
    %c0_104 = arith.constant 0 : index
    %218 = vector.load %arg8[%c1_101, %c1_102, %c0_103, %c0_104] : memref<3x3x64x64xbf16, #tpu.memory_space<vmem>>, vector<1x1x64x64xbf16>
    %219 = vector.shape_cast %218 : vector<1x1x64x64xbf16> to vector<64x64xbf16>
    %cst_105 = arith.constant dense<0.000000e+00> : vector<32x64xf32>
    %220 = tpu.matmul %202, %219, %cst_105 {dimension_numbers = #tpu.dot_dimension_numbers<[1], [0], [0], [1], [0, 0, 1, 1], [], []>} : vector<32x64xbf16>, vector<64x64xbf16>, vector<32x64xf32> -> vector<32x64xf32>
    %c1_106 = arith.constant 1 : index
    %c2_107 = arith.constant 2 : index
    %c0_108 = arith.constant 0 : index
    %c0_109 = arith.constant 0 : index
    %221 = vector.load %arg8[%c1_106, %c2_107, %c0_108, %c0_109] : memref<3x3x64x64xbf16, #tpu.memory_space<vmem>>, vector<1x1x64x64xbf16>
    %222 = vector.shape_cast %221 : vector<1x1x64x64xbf16> to vector<64x64xbf16>
    %cst_110 = arith.constant dense<0.000000e+00> : vector<32x64xf32>
    %223 = tpu.matmul %202, %222, %cst_110 {dimension_numbers = #tpu.dot_dimension_numbers<[1], [0], [0], [1], [0, 0, 1, 1], [], []>} : vector<32x64xbf16>, vector<64x64xbf16>, vector<32x64xf32> -> vector<32x64xf32>
    %c1_111 = arith.constant 1 : index
    %c0_112 = arith.constant 0 : index
    %c0_113 = arith.constant 0 : index
    %c0_114 = arith.constant 0 : index
    %224 = vector.load %arg8[%c1_111, %c0_112, %c0_113, %c0_114] : memref<3x3x64x64xbf16, #tpu.memory_space<vmem>>, vector<1x1x64x64xbf16>
    %225 = vector.shape_cast %224 : vector<1x1x64x64xbf16> to vector<64x64xbf16>
    %cst_115 = arith.constant dense<0.000000e+00> : vector<32x64xf32>
    %226 = tpu.matmul %206, %225, %cst_115 {dimension_numbers = #tpu.dot_dimension_numbers<[1], [0], [0], [1], [0, 0, 1, 1], [], []>} : vector<32x64xbf16>, vector<64x64xbf16>, vector<32x64xf32> -> vector<32x64xf32>
    %227 = arith.addf %223, %226 : vector<32x64xf32>
    %c2_116 = arith.constant 2 : index
    %c1_117 = arith.constant 1 : index
    %c0_118 = arith.constant 0 : index
    %c0_119 = arith.constant 0 : index
    %228 = vector.load %arg8[%c2_116, %c1_117, %c0_118, %c0_119] : memref<3x3x64x64xbf16, #tpu.memory_space<vmem>>, vector<1x1x64x64xbf16>
    %229 = vector.shape_cast %228 : vector<1x1x64x64xbf16> to vector<64x64xbf16>
    %cst_120 = arith.constant dense<0.000000e+00> : vector<32x64xf32>
    %230 = tpu.matmul %202, %229, %cst_120 {dimension_numbers = #tpu.dot_dimension_numbers<[1], [0], [0], [1], [0, 0, 1, 1], [], []>} : vector<32x64xbf16>, vector<64x64xbf16>, vector<32x64xf32> -> vector<32x64xf32>
    %c0_121 = arith.constant 0 : index
    %c1_122 = arith.constant 1 : index
    %c0_123 = arith.constant 0 : index
    %c0_124 = arith.constant 0 : index
    %231 = vector.load %arg8[%c0_121, %c1_122, %c0_123, %c0_124] : memref<3x3x64x64xbf16, #tpu.memory_space<vmem>>, vector<1x1x64x64xbf16>
    %232 = vector.shape_cast %231 : vector<1x1x64x64xbf16> to vector<64x64xbf16>
    %cst_125 = arith.constant dense<0.000000e+00> : vector<32x64xf32>
    %233 = tpu.matmul %210, %232, %cst_125 {dimension_numbers = #tpu.dot_dimension_numbers<[1], [0], [0], [1], [0, 0, 1, 1], [], []>} : vector<32x64xbf16>, vector<64x64xbf16>, vector<32x64xf32> -> vector<32x64xf32>
    %234 = arith.addf %230, %233 : vector<32x64xf32>
    %c2_126 = arith.constant 2 : index
    %c2_127 = arith.constant 2 : index
    %c0_128 = arith.constant 0 : index
    %c0_129 = arith.constant 0 : index
    %235 = vector.load %arg8[%c2_126, %c2_127, %c0_128, %c0_129] : memref<3x3x64x64xbf16, #tpu.memory_space<vmem>>, vector<1x1x64x64xbf16>
    %236 = vector.shape_cast %235 : vector<1x1x64x64xbf16> to vector<64x64xbf16>
    %cst_130 = arith.constant dense<0.000000e+00> : vector<32x64xf32>
    %237 = tpu.matmul %202, %236, %cst_130 {dimension_numbers = #tpu.dot_dimension_numbers<[1], [0], [0], [1], [0, 0, 1, 1], [], []>} : vector<32x64xbf16>, vector<64x64xbf16>, vector<32x64xf32> -> vector<32x64xf32>
    %c2_131 = arith.constant 2 : index
    %c0_132 = arith.constant 0 : index
    %c0_133 = arith.constant 0 : index
    %c0_134 = arith.constant 0 : index
    %238 = vector.load %arg8[%c2_131, %c0_132, %c0_133, %c0_134] : memref<3x3x64x64xbf16, #tpu.memory_space<vmem>>, vector<1x1x64x64xbf16>
    %239 = vector.shape_cast %238 : vector<1x1x64x64xbf16> to vector<64x64xbf16>
    %cst_135 = arith.constant dense<0.000000e+00> : vector<32x64xf32>
    %240 = tpu.matmul %206, %239, %cst_135 {dimension_numbers = #tpu.dot_dimension_numbers<[1], [0], [0], [1], [0, 0, 1, 1], [], []>} : vector<32x64xbf16>, vector<64x64xbf16>, vector<32x64xf32> -> vector<32x64xf32>
    %241 = arith.addf %237, %240 : vector<32x64xf32>
    %c0_136 = arith.constant 0 : index
    %c2_137 = arith.constant 2 : index
    %c0_138 = arith.constant 0 : index
    %c0_139 = arith.constant 0 : index
    %242 = vector.load %arg8[%c0_136, %c2_137, %c0_138, %c0_139] : memref<3x3x64x64xbf16, #tpu.memory_space<vmem>>, vector<1x1x64x64xbf16>
    %243 = vector.shape_cast %242 : vector<1x1x64x64xbf16> to vector<64x64xbf16>
    %cst_140 = arith.constant dense<0.000000e+00> : vector<32x64xf32>
    %244 = tpu.matmul %210, %243, %cst_140 {dimension_numbers = #tpu.dot_dimension_numbers<[1], [0], [0], [1], [0, 0, 1, 1], [], []>} : vector<32x64xbf16>, vector<64x64xbf16>, vector<32x64xf32> -> vector<32x64xf32>
    %245 = arith.addf %241, %244 : vector<32x64xf32>
    %c0_141 = arith.constant 0 : index
    %c0_142 = arith.constant 0 : index
    %c0_143 = arith.constant 0 : index
    %c0_144 = arith.constant 0 : index
    %246 = vector.load %arg8[%c0_141, %c0_142, %c0_143, %c0_144] : memref<3x3x64x64xbf16, #tpu.memory_space<vmem>>, vector<1x1x64x64xbf16>
    %247 = vector.shape_cast %246 : vector<1x1x64x64xbf16> to vector<64x64xbf16>
    %cst_145 = arith.constant dense<0.000000e+00> : vector<32x64xf32>
    %248 = tpu.matmul %217, %247, %cst_145 {dimension_numbers = #tpu.dot_dimension_numbers<[1], [0], [0], [1], [0, 0, 1, 1], [], []>} : vector<32x64xbf16>, vector<64x64xbf16>, vector<32x64xf32> -> vector<32x64xf32>
    %249 = arith.addf %245, %248 : vector<32x64xf32>
    %c0_146 = arith.constant 0 : index
    %c0_147 = arith.constant 0 : index
    %250 = vector.load %arg9[%c0_146, %c0_147] : memref<1x64xf32, #tpu.memory_space<vmem>>, vector<1x64xf32>
    %251 = vector.broadcast %250 : vector<1x64xf32> to vector<32x64xf32>
    %252 = arith.addf %220, %251 : vector<32x64xf32>
    %253 = vector.broadcast %250 : vector<1x64xf32> to vector<32x64xf32>
    %254 = arith.addf %227, %253 : vector<32x64xf32>
    %255 = vector.broadcast %250 : vector<1x64xf32> to vector<32x64xf32>
    %256 = arith.addf %234, %255 : vector<32x64xf32>
    %257 = vector.broadcast %250 : vector<1x64xf32> to vector<32x64xf32>
    %258 = arith.addf %249, %257 : vector<32x64xf32>
    %cst_148 = arith.constant dense<0.000000e+00> : vector<64xf32>
    %259 = vector.multi_reduction <add>, %252, %cst_148 [0] : vector<32x64xf32> to vector<64xf32>
    %260 = vector.shape_cast %259 : vector<64xf32> to vector<1x64xf32>
    %cst_149 = arith.constant 0.000000e+00 : f32
    %261 = vector.broadcast %cst_149 : f32 to vector<1x64xf32>
    %262 = arith.addf %261, %260 : vector<1x64xf32>
    %cst_150 = arith.constant dense<0.000000e+00> : vector<64xf32>
    %263 = vector.multi_reduction <add>, %254, %cst_150 [0] : vector<32x64xf32> to vector<64xf32>
    %264 = vector.shape_cast %263 : vector<64xf32> to vector<1x64xf32>
    %265 = arith.addf %262, %264 : vector<1x64xf32>
    %cst_151 = arith.constant dense<0.000000e+00> : vector<64xf32>
    %266 = vector.multi_reduction <add>, %256, %cst_151 [0] : vector<32x64xf32> to vector<64xf32>
    %267 = vector.shape_cast %266 : vector<64xf32> to vector<1x64xf32>
    %268 = arith.addf %265, %267 : vector<1x64xf32>
    %cst_152 = arith.constant dense<0.000000e+00> : vector<64xf32>
    %269 = vector.multi_reduction <add>, %258, %cst_152 [0] : vector<32x64xf32> to vector<64xf32>
    %270 = vector.shape_cast %269 : vector<64xf32> to vector<1x64xf32>
    %271 = arith.addf %268, %270 : vector<1x64xf32>
    %cst_153 = arith.constant 1.280000e+02 : f32
    %272 = vector.broadcast %cst_153 : f32 to vector<1x64xf32>
    %273 = arith.divf %271, %272 : vector<1x64xf32>
    %274 = vector.broadcast %273 : vector<1x64xf32> to vector<32x64xf32>
    %275 = arith.subf %252, %274 : vector<32x64xf32>
    %276 = arith.mulf %275, %275 : vector<32x64xf32>
    %cst_154 = arith.constant dense<0.000000e+00> : vector<64xf32>
    %277 = vector.multi_reduction <add>, %276, %cst_154 [0] : vector<32x64xf32> to vector<64xf32>
    %278 = vector.shape_cast %277 : vector<64xf32> to vector<1x64xf32>
    %cst_155 = arith.constant 0.000000e+00 : f32
    %279 = vector.broadcast %cst_155 : f32 to vector<1x64xf32>
    %280 = arith.addf %279, %278 : vector<1x64xf32>
    %281 = vector.broadcast %273 : vector<1x64xf32> to vector<32x64xf32>
    %282 = arith.subf %254, %281 : vector<32x64xf32>
    %283 = arith.mulf %282, %282 : vector<32x64xf32>
    %cst_156 = arith.constant dense<0.000000e+00> : vector<64xf32>
    %284 = vector.multi_reduction <add>, %283, %cst_156 [0] : vector<32x64xf32> to vector<64xf32>
    %285 = vector.shape_cast %284 : vector<64xf32> to vector<1x64xf32>
    %286 = arith.addf %280, %285 : vector<1x64xf32>
    %287 = vector.broadcast %273 : vector<1x64xf32> to vector<32x64xf32>
    %288 = arith.subf %256, %287 : vector<32x64xf32>
    %289 = arith.mulf %288, %288 : vector<32x64xf32>
    %cst_157 = arith.constant dense<0.000000e+00> : vector<64xf32>
    %290 = vector.multi_reduction <add>, %289, %cst_157 [0] : vector<32x64xf32> to vector<64xf32>
    %291 = vector.shape_cast %290 : vector<64xf32> to vector<1x64xf32>
    %292 = arith.addf %286, %291 : vector<1x64xf32>
    %293 = vector.broadcast %273 : vector<1x64xf32> to vector<32x64xf32>
    %294 = arith.subf %258, %293 : vector<32x64xf32>
    %295 = arith.mulf %294, %294 : vector<32x64xf32>
    %cst_158 = arith.constant dense<0.000000e+00> : vector<64xf32>
    %296 = vector.multi_reduction <add>, %295, %cst_158 [0] : vector<32x64xf32> to vector<64xf32>
    %297 = vector.shape_cast %296 : vector<64xf32> to vector<1x64xf32>
    %298 = arith.addf %292, %297 : vector<1x64xf32>
    %cst_159 = arith.constant 1.280000e+02 : f32
    %299 = vector.broadcast %cst_159 : f32 to vector<1x64xf32>
    %300 = arith.divf %298, %299 : vector<1x64xf32>
    %c0_160 = arith.constant 0 : index
    %c0_161 = arith.constant 0 : index
    %301 = vector.load %arg10[%c0_160, %c0_161] : memref<1x64xf32, #tpu.memory_space<vmem>>, vector<1x64xf32>
    %cst_162 = arith.constant 9.99999974E-6 : f32
    %302 = vector.broadcast %cst_162 : f32 to vector<1x64xf32>
    %303 = arith.addf %300, %302 : vector<1x64xf32>
    %304 = math.rsqrt %303 : vector<1x64xf32>
    %305 = arith.mulf %301, %304 : vector<1x64xf32>
    %c0_163 = arith.constant 0 : index
    %c0_164 = arith.constant 0 : index
    %306 = vector.load %arg11[%c0_163, %c0_164] : memref<1x64xf32, #tpu.memory_space<vmem>>, vector<1x64xf32>
    %307 = arith.mulf %273, %305 : vector<1x64xf32>
    %308 = arith.subf %306, %307 : vector<1x64xf32>
    %309 = vector.broadcast %305 : vector<1x64xf32> to vector<32x64xf32>
    %310 = arith.mulf %252, %309 : vector<32x64xf32>
    %311 = vector.broadcast %308 : vector<1x64xf32> to vector<32x64xf32>
    %312 = arith.addf %310, %311 : vector<32x64xf32>
    %cst_165 = arith.constant 0.000000e+00 : f32
    %313 = vector.broadcast %cst_165 : f32 to vector<32x64xf32>
    %314 = arith.cmpf oge, %312, %313 : vector<32x64xf32>
    %cst_166 = arith.constant 0.00999999977 : f32
    %315 = vector.broadcast %cst_166 : f32 to vector<32x64xf32>
    %316 = arith.mulf %315, %312 : vector<32x64xf32>
    %317 = arith.select %314, %312, %316 : vector<32x64xi1>, vector<32x64xf32>
    %318 = vector.broadcast %305 : vector<1x64xf32> to vector<32x64xf32>
    %319 = arith.mulf %254, %318 : vector<32x64xf32>
    %320 = vector.broadcast %308 : vector<1x64xf32> to vector<32x64xf32>
    %321 = arith.addf %319, %320 : vector<32x64xf32>
    %cst_167 = arith.constant 0.000000e+00 : f32
    %322 = vector.broadcast %cst_167 : f32 to vector<32x64xf32>
    %323 = arith.cmpf oge, %321, %322 : vector<32x64xf32>
    %cst_168 = arith.constant 0.00999999977 : f32
    %324 = vector.broadcast %cst_168 : f32 to vector<32x64xf32>
    %325 = arith.mulf %324, %321 : vector<32x64xf32>
    %326 = arith.select %323, %321, %325 : vector<32x64xi1>, vector<32x64xf32>
    %327 = vector.broadcast %305 : vector<1x64xf32> to vector<32x64xf32>
    %328 = arith.mulf %256, %327 : vector<32x64xf32>
    %329 = vector.broadcast %308 : vector<1x64xf32> to vector<32x64xf32>
    %330 = arith.addf %328, %329 : vector<32x64xf32>
    %cst_169 = arith.constant 0.000000e+00 : f32
    %331 = vector.broadcast %cst_169 : f32 to vector<32x64xf32>
    %332 = arith.cmpf oge, %330, %331 : vector<32x64xf32>
    %cst_170 = arith.constant 0.00999999977 : f32
    %333 = vector.broadcast %cst_170 : f32 to vector<32x64xf32>
    %334 = arith.mulf %333, %330 : vector<32x64xf32>
    %335 = arith.select %332, %330, %334 : vector<32x64xi1>, vector<32x64xf32>
    %336 = vector.broadcast %305 : vector<1x64xf32> to vector<32x64xf32>
    %337 = arith.mulf %258, %336 : vector<32x64xf32>
    %338 = vector.broadcast %308 : vector<1x64xf32> to vector<32x64xf32>
    %339 = arith.addf %337, %338 : vector<32x64xf32>
    %cst_171 = arith.constant 0.000000e+00 : f32
    %340 = vector.broadcast %cst_171 : f32 to vector<32x64xf32>
    %341 = arith.cmpf oge, %339, %340 : vector<32x64xf32>
    %cst_172 = arith.constant 0.00999999977 : f32
    %342 = vector.broadcast %cst_172 : f32 to vector<32x64xf32>
    %343 = arith.mulf %342, %339 : vector<32x64xf32>
    %344 = arith.select %341, %339, %343 : vector<32x64xi1>, vector<32x64xf32>
    %345 = vector.shape_cast %317 : vector<32x64xf32> to vector<2x4x4x64xf32>
    %346 = vector.shape_cast %326 : vector<32x64xf32> to vector<2x4x4x64xf32>
    %347 = vector.shape_cast %335 : vector<32x64xf32> to vector<2x4x4x64xf32>
    %348 = vector.shape_cast %344 : vector<32x64xf32> to vector<2x4x4x64xf32>
    %349 = vector.shape_cast %345 : vector<2x4x4x64xf32> to vector<32x1x64xf32>
    %350 = vector.shape_cast %346 : vector<2x4x4x64xf32> to vector<32x1x64xf32>
    %351 = tpu.concatenate %349, %350 in 1 : vector<32x1x64xf32>, vector<32x1x64xf32> -> vector<32x2x64xf32>
    %352 = vector.shape_cast %351 : vector<32x2x64xf32> to vector<2x4x8x64xf32>
    %353 = vector.shape_cast %347 : vector<2x4x4x64xf32> to vector<32x1x64xf32>
    %354 = vector.shape_cast %348 : vector<2x4x4x64xf32> to vector<32x1x64xf32>
    %355 = tpu.concatenate %353, %354 in 1 : vector<32x1x64xf32>, vector<32x1x64xf32> -> vector<32x2x64xf32>
    %356 = vector.shape_cast %355 : vector<32x2x64xf32> to vector<2x4x8x64xf32>
    %357 = vector.shape_cast %352 : vector<2x4x8x64xf32> to vector<8x1x8x64xf32>
    %358 = vector.shape_cast %356 : vector<2x4x8x64xf32> to vector<8x1x8x64xf32>
    %359 = tpu.concatenate %357, %358 in 1 : vector<8x1x8x64xf32>, vector<8x1x8x64xf32> -> vector<8x2x8x64xf32>
    %360 = vector.shape_cast %359 : vector<8x2x8x64xf32> to vector<2x8x8x64xf32>
    %361 = arith.truncf %360 : vector<2x8x8x64xf32> to vector<2x8x8x64xbf16>
    %cst_173 = arith.constant 0.000000e+00 : f32
    %362 = vector.broadcast %cst_173 : f32 to vector<128x3xf32>
    %cst_174 = arith.constant 0.000000e+00 : bf16
    %363 = vector.broadcast %cst_174 : bf16 to vector<2x1x8x64xbf16>
    %364 = vector.extract_strided_slice %361 {offsets = [0, 0, 0, 0], sizes = [2, 7, 8, 64], strides = [1, 1, 1, 1]} : vector<2x8x8x64xbf16> to vector<2x7x8x64xbf16>
    %365 = tpu.concatenate %363, %364 in 1 : vector<2x1x8x64xbf16>, vector<2x7x8x64xbf16> -> vector<2x8x8x64xbf16>
    %cst_175 = arith.constant 0.000000e+00 : bf16
    %366 = vector.broadcast %cst_175 : bf16 to vector<2x8x1x64xbf16>
    %367 = vector.extract_strided_slice %365 {offsets = [0, 0, 0, 0], sizes = [2, 8, 7, 64], strides = [1, 1, 1, 1]} : vector<2x8x8x64xbf16> to vector<2x8x7x64xbf16>
    %368 = tpu.concatenate %366, %367 in 2 : vector<2x8x1x64xbf16>, vector<2x8x7x64xbf16> -> vector<2x8x8x64xbf16>
    %369 = vector.shape_cast %368 : vector<2x8x8x64xbf16> to vector<128x64xbf16>
    %c0_176 = arith.constant 0 : index
    %c0_177 = arith.constant 0 : index
    %c0_178 = arith.constant 0 : index
    %c0_179 = arith.constant 0 : index
    %370 = vector.load %arg12[%c0_176, %c0_177, %c0_178, %c0_179] : memref<3x3x64x3xbf16, #tpu.memory_space<vmem>>, vector<1x1x64x3xbf16>
    %371 = vector.shape_cast %370 : vector<1x1x64x3xbf16> to vector<64x3xbf16>
    %cst_180 = arith.constant dense<0.000000e+00> : vector<128x3xf32>
    %372 = tpu.matmul %369, %371, %cst_180 {dimension_numbers = #tpu.dot_dimension_numbers<[1], [0], [0], [1], [0, 0, 1, 1], [], []>} : vector<128x64xbf16>, vector<64x3xbf16>, vector<128x3xf32> -> vector<128x3xf32>
    %373 = arith.addf %362, %372 : vector<128x3xf32>
    %cst_181 = arith.constant 0.000000e+00 : bf16
    %374 = vector.broadcast %cst_181 : bf16 to vector<2x1x8x64xbf16>
    %375 = vector.extract_strided_slice %361 {offsets = [0, 0, 0, 0], sizes = [2, 7, 8, 64], strides = [1, 1, 1, 1]} : vector<2x8x8x64xbf16> to vector<2x7x8x64xbf16>
    %376 = tpu.concatenate %374, %375 in 1 : vector<2x1x8x64xbf16>, vector<2x7x8x64xbf16> -> vector<2x8x8x64xbf16>
    %377 = vector.shape_cast %376 : vector<2x8x8x64xbf16> to vector<128x64xbf16>
    %c0_182 = arith.constant 0 : index
    %c1_183 = arith.constant 1 : index
    %c0_184 = arith.constant 0 : index
    %c0_185 = arith.constant 0 : index
    %378 = vector.load %arg12[%c0_182, %c1_183, %c0_184, %c0_185] : memref<3x3x64x3xbf16, #tpu.memory_space<vmem>>, vector<1x1x64x3xbf16>
    %379 = vector.shape_cast %378 : vector<1x1x64x3xbf16> to vector<64x3xbf16>
    %cst_186 = arith.constant dense<0.000000e+00> : vector<128x3xf32>
    %380 = tpu.matmul %377, %379, %cst_186 {dimension_numbers = #tpu.dot_dimension_numbers<[1], [0], [0], [1], [0, 0, 1, 1], [], []>} : vector<128x64xbf16>, vector<64x3xbf16>, vector<128x3xf32> -> vector<128x3xf32>
    %381 = arith.addf %373, %380 : vector<128x3xf32>
    %cst_187 = arith.constant 0.000000e+00 : bf16
    %382 = vector.broadcast %cst_187 : bf16 to vector<2x1x8x64xbf16>
    %383 = vector.extract_strided_slice %361 {offsets = [0, 0, 0, 0], sizes = [2, 7, 8, 64], strides = [1, 1, 1, 1]} : vector<2x8x8x64xbf16> to vector<2x7x8x64xbf16>
    %384 = tpu.concatenate %382, %383 in 1 : vector<2x1x8x64xbf16>, vector<2x7x8x64xbf16> -> vector<2x8x8x64xbf16>
    %385 = vector.extract_strided_slice %384 {offsets = [0, 0, 1, 0], sizes = [2, 8, 7, 64], strides = [1, 1, 1, 1]} : vector<2x8x8x64xbf16> to vector<2x8x7x64xbf16>
    %cst_188 = arith.constant 0.000000e+00 : bf16
    %386 = vector.broadcast %cst_188 : bf16 to vector<2x8x1x64xbf16>
    %387 = tpu.concatenate %385, %386 in 2 : vector<2x8x7x64xbf16>, vector<2x8x1x64xbf16> -> vector<2x8x8x64xbf16>
    %388 = vector.shape_cast %387 : vector<2x8x8x64xbf16> to vector<128x64xbf16>
    %c0_189 = arith.constant 0 : index
    %c2_190 = arith.constant 2 : index
    %c0_191 = arith.constant 0 : index
    %c0_192 = arith.constant 0 : index
    %389 = vector.load %arg12[%c0_189, %c2_190, %c0_191, %c0_192] : memref<3x3x64x3xbf16, #tpu.memory_space<vmem>>, vector<1x1x64x3xbf16>
    %390 = vector.shape_cast %389 : vector<1x1x64x3xbf16> to vector<64x3xbf16>
    %cst_193 = arith.constant dense<0.000000e+00> : vector<128x3xf32>
    %391 = tpu.matmul %388, %390, %cst_193 {dimension_numbers = #tpu.dot_dimension_numbers<[1], [0], [0], [1], [0, 0, 1, 1], [], []>} : vector<128x64xbf16>, vector<64x3xbf16>, vector<128x3xf32> -> vector<128x3xf32>
    %392 = arith.addf %381, %391 : vector<128x3xf32>
    %cst_194 = arith.constant 0.000000e+00 : bf16
    %393 = vector.broadcast %cst_194 : bf16 to vector<2x8x1x64xbf16>
    %394 = vector.extract_strided_slice %361 {offsets = [0, 0, 0, 0], sizes = [2, 8, 7, 64], strides = [1, 1, 1, 1]} : vector<2x8x8x64xbf16> to vector<2x8x7x64xbf16>
    %395 = tpu.concatenate %393, %394 in 2 : vector<2x8x1x64xbf16>, vector<2x8x7x64xbf16> -> vector<2x8x8x64xbf16>
    %396 = vector.shape_cast %395 : vector<2x8x8x64xbf16> to vector<128x64xbf16>
    %c1_195 = arith.constant 1 : index
    %c0_196 = arith.constant 0 : index
    %c0_197 = arith.constant 0 : index
    %c0_198 = arith.constant 0 : index
    %397 = vector.load %arg12[%c1_195, %c0_196, %c0_197, %c0_198] : memref<3x3x64x3xbf16, #tpu.memory_space<vmem>>, vector<1x1x64x3xbf16>
    %398 = vector.shape_cast %397 : vector<1x1x64x3xbf16> to vector<64x3xbf16>
    %cst_199 = arith.constant dense<0.000000e+00> : vector<128x3xf32>
    %399 = tpu.matmul %396, %398, %cst_199 {dimension_numbers = #tpu.dot_dimension_numbers<[1], [0], [0], [1], [0, 0, 1, 1], [], []>} : vector<128x64xbf16>, vector<64x3xbf16>, vector<128x3xf32> -> vector<128x3xf32>
    %400 = arith.addf %392, %399 : vector<128x3xf32>
    %401 = vector.shape_cast %361 : vector<2x8x8x64xbf16> to vector<128x64xbf16>
    %c1_200 = arith.constant 1 : index
    %c1_201 = arith.constant 1 : index
    %c0_202 = arith.constant 0 : index
    %c0_203 = arith.constant 0 : index
    %402 = vector.load %arg12[%c1_200, %c1_201, %c0_202, %c0_203] : memref<3x3x64x3xbf16, #tpu.memory_space<vmem>>, vector<1x1x64x3xbf16>
    %403 = vector.shape_cast %402 : vector<1x1x64x3xbf16> to vector<64x3xbf16>
    %cst_204 = arith.constant dense<0.000000e+00> : vector<128x3xf32>
    %404 = tpu.matmul %401, %403, %cst_204 {dimension_numbers = #tpu.dot_dimension_numbers<[1], [0], [0], [1], [0, 0, 1, 1], [], []>} : vector<128x64xbf16>, vector<64x3xbf16>, vector<128x3xf32> -> vector<128x3xf32>
    %405 = arith.addf %400, %404 : vector<128x3xf32>
    %406 = vector.extract_strided_slice %361 {offsets = [0, 0, 1, 0], sizes = [2, 8, 7, 64], strides = [1, 1, 1, 1]} : vector<2x8x8x64xbf16> to vector<2x8x7x64xbf16>
    %cst_205 = arith.constant 0.000000e+00 : bf16
    %407 = vector.broadcast %cst_205 : bf16 to vector<2x8x1x64xbf16>
    %408 = tpu.concatenate %406, %407 in 2 : vector<2x8x7x64xbf16>, vector<2x8x1x64xbf16> -> vector<2x8x8x64xbf16>
    %409 = vector.shape_cast %408 : vector<2x8x8x64xbf16> to vector<128x64xbf16>
    %c1_206 = arith.constant 1 : index
    %c2_207 = arith.constant 2 : index
    %c0_208 = arith.constant 0 : index
    %c0_209 = arith.constant 0 : index
    %410 = vector.load %arg12[%c1_206, %c2_207, %c0_208, %c0_209] : memref<3x3x64x3xbf16, #tpu.memory_space<vmem>>, vector<1x1x64x3xbf16>
    %411 = vector.shape_cast %410 : vector<1x1x64x3xbf16> to vector<64x3xbf16>
    %cst_210 = arith.constant dense<0.000000e+00> : vector<128x3xf32>
    %412 = tpu.matmul %409, %411, %cst_210 {dimension_numbers = #tpu.dot_dimension_numbers<[1], [0], [0], [1], [0, 0, 1, 1], [], []>} : vector<128x64xbf16>, vector<64x3xbf16>, vector<128x3xf32> -> vector<128x3xf32>
    %413 = arith.addf %405, %412 : vector<128x3xf32>
    %414 = vector.extract_strided_slice %361 {offsets = [0, 1, 0, 0], sizes = [2, 7, 8, 64], strides = [1, 1, 1, 1]} : vector<2x8x8x64xbf16> to vector<2x7x8x64xbf16>
    %cst_211 = arith.constant 0.000000e+00 : bf16
    %415 = vector.broadcast %cst_211 : bf16 to vector<2x1x8x64xbf16>
    %416 = tpu.concatenate %414, %415 in 1 : vector<2x7x8x64xbf16>, vector<2x1x8x64xbf16> -> vector<2x8x8x64xbf16>
    %cst_212 = arith.constant 0.000000e+00 : bf16
    %417 = vector.broadcast %cst_212 : bf16 to vector<2x8x1x64xbf16>
    %418 = vector.extract_strided_slice %416 {offsets = [0, 0, 0, 0], sizes = [2, 8, 7, 64], strides = [1, 1, 1, 1]} : vector<2x8x8x64xbf16> to vector<2x8x7x64xbf16>
    %419 = tpu.concatenate %417, %418 in 2 : vector<2x8x1x64xbf16>, vector<2x8x7x64xbf16> -> vector<2x8x8x64xbf16>
    %420 = vector.shape_cast %419 : vector<2x8x8x64xbf16> to vector<128x64xbf16>
    %c2_213 = arith.constant 2 : index
    %c0_214 = arith.constant 0 : index
    %c0_215 = arith.constant 0 : index
    %c0_216 = arith.constant 0 : index
    %421 = vector.load %arg12[%c2_213, %c0_214, %c0_215, %c0_216] : memref<3x3x64x3xbf16, #tpu.memory_space<vmem>>, vector<1x1x64x3xbf16>
    %422 = vector.shape_cast %421 : vector<1x1x64x3xbf16> to vector<64x3xbf16>
    %cst_217 = arith.constant dense<0.000000e+00> : vector<128x3xf32>
    %423 = tpu.matmul %420, %422, %cst_217 {dimension_numbers = #tpu.dot_dimension_numbers<[1], [0], [0], [1], [0, 0, 1, 1], [], []>} : vector<128x64xbf16>, vector<64x3xbf16>, vector<128x3xf32> -> vector<128x3xf32>
    %424 = arith.addf %413, %423 : vector<128x3xf32>
    %425 = vector.extract_strided_slice %361 {offsets = [0, 1, 0, 0], sizes = [2, 7, 8, 64], strides = [1, 1, 1, 1]} : vector<2x8x8x64xbf16> to vector<2x7x8x64xbf16>
    %cst_218 = arith.constant 0.000000e+00 : bf16
    %426 = vector.broadcast %cst_218 : bf16 to vector<2x1x8x64xbf16>
    %427 = tpu.concatenate %425, %426 in 1 : vector<2x7x8x64xbf16>, vector<2x1x8x64xbf16> -> vector<2x8x8x64xbf16>
    %428 = vector.shape_cast %427 : vector<2x8x8x64xbf16> to vector<128x64xbf16>
    %c2_219 = arith.constant 2 : index
    %c1_220 = arith.constant 1 : index
    %c0_221 = arith.constant 0 : index
    %c0_222 = arith.constant 0 : index
    %429 = vector.load %arg12[%c2_219, %c1_220, %c0_221, %c0_222] : memref<3x3x64x3xbf16, #tpu.memory_space<vmem>>, vector<1x1x64x3xbf16>
    %430 = vector.shape_cast %429 : vector<1x1x64x3xbf16> to vector<64x3xbf16>
    %cst_223 = arith.constant dense<0.000000e+00> : vector<128x3xf32>
    %431 = tpu.matmul %428, %430, %cst_223 {dimension_numbers = #tpu.dot_dimension_numbers<[1], [0], [0], [1], [0, 0, 1, 1], [], []>} : vector<128x64xbf16>, vector<64x3xbf16>, vector<128x3xf32> -> vector<128x3xf32>
    %432 = arith.addf %424, %431 : vector<128x3xf32>
    %433 = vector.extract_strided_slice %361 {offsets = [0, 1, 0, 0], sizes = [2, 7, 8, 64], strides = [1, 1, 1, 1]} : vector<2x8x8x64xbf16> to vector<2x7x8x64xbf16>
    %cst_224 = arith.constant 0.000000e+00 : bf16
    %434 = vector.broadcast %cst_224 : bf16 to vector<2x1x8x64xbf16>
    %435 = tpu.concatenate %433, %434 in 1 : vector<2x7x8x64xbf16>, vector<2x1x8x64xbf16> -> vector<2x8x8x64xbf16>
    %436 = vector.extract_strided_slice %435 {offsets = [0, 0, 1, 0], sizes = [2, 8, 7, 64], strides = [1, 1, 1, 1]} : vector<2x8x8x64xbf16> to vector<2x8x7x64xbf16>
    %cst_225 = arith.constant 0.000000e+00 : bf16
    %437 = vector.broadcast %cst_225 : bf16 to vector<2x8x1x64xbf16>
    %438 = tpu.concatenate %436, %437 in 2 : vector<2x8x7x64xbf16>, vector<2x8x1x64xbf16> -> vector<2x8x8x64xbf16>
    %439 = vector.shape_cast %438 : vector<2x8x8x64xbf16> to vector<128x64xbf16>
    %c2_226 = arith.constant 2 : index
    %c2_227 = arith.constant 2 : index
    %c0_228 = arith.constant 0 : index
    %c0_229 = arith.constant 0 : index
    %440 = vector.load %arg12[%c2_226, %c2_227, %c0_228, %c0_229] : memref<3x3x64x3xbf16, #tpu.memory_space<vmem>>, vector<1x1x64x3xbf16>
    %441 = vector.shape_cast %440 : vector<1x1x64x3xbf16> to vector<64x3xbf16>
    %cst_230 = arith.constant dense<0.000000e+00> : vector<128x3xf32>
    %442 = tpu.matmul %439, %441, %cst_230 {dimension_numbers = #tpu.dot_dimension_numbers<[1], [0], [0], [1], [0, 0, 1, 1], [], []>} : vector<128x64xbf16>, vector<64x3xbf16>, vector<128x3xf32> -> vector<128x3xf32>
    %443 = arith.addf %432, %442 : vector<128x3xf32>
    %c0_231 = arith.constant 0 : index
    %c0_232 = arith.constant 0 : index
    %444 = vector.load %arg13[%c0_231, %c0_232] : memref<1x3xf32, #tpu.memory_space<vmem>>, vector<1x3xf32>
    %445 = vector.broadcast %444 : vector<1x3xf32> to vector<128x3xf32>
    %446 = arith.addf %443, %445 : vector<128x3xf32>
    %cst_233 = arith.constant 0.000000e+00 : f32
    %447 = vector.broadcast %cst_233 : f32 to vector<128x3xf32>
    %448 = arith.subf %447, %446 : vector<128x3xf32>
    %449 = math.exp %448 : vector<128x3xf32>
    %cst_234 = arith.constant 1.000000e+00 : f32
    %450 = vector.broadcast %cst_234 : f32 to vector<128x3xf32>
    %451 = arith.addf %450, %449 : vector<128x3xf32>
    %cst_235 = arith.constant 1.000000e+00 : f32
    %452 = vector.broadcast %cst_235 : f32 to vector<128x3xf32>
    %453 = arith.divf %452, %451 : vector<128x3xf32>
    %c0_236 = arith.constant 0 : index
    %c0_237 = arith.constant 0 : index
    %454 = vector.load %arg14[%c0_236, %c0_237] : memref<128x3xf32, #tpu.memory_space<vmem>>, vector<128x3xf32>
    tpu.vector_store %arg14[%c0_236, %c0_237], %453 {strides = array<i32>} : memref<128x3xf32, #tpu.memory_space<vmem>>, vector<128x3xf32>,
    return
  }
  func.func @transform_0(%arg0: i32) -> (i32, i32) {
    %c0_i32 = arith.constant 0 : i32
    %c0_i32_0 = arith.constant 0 : i32
    %c0_i32_1 = arith.constant 0 : i32
    return %c0_i32, %c0_i32_0 : i32, i32
  }
  func.func @transform_1(%arg0: i32) -> (i32, i32, i32) {
    %c0_i32 = arith.constant 0 : i32
    %c0_i32_0 = arith.constant 0 : i32
    %c0_i32_1 = arith.constant 0 : i32
    %c0_i32_2 = arith.constant 0 : i32
    return %c0_i32, %c0_i32_0, %c0_i32_1 : i32, i32, i32
  }
  func.func @transform_2(%arg0: i32) -> (i32, i32) {
    %c0_i32 = arith.constant 0 : i32
    %c0_i32_0 = arith.constant 0 : i32
    %c0_i32_1 = arith.constant 0 : i32
    return %c0_i32, %c0_i32_0 : i32, i32
  }
  func.func @transform_3(%arg0: i32) -> (i32, i32, i32, i32) {
    %c0_i32 = arith.constant 0 : i32
    %c0_i32_0 = arith.constant 0 : i32
    %c0_i32_1 = arith.constant 0 : i32
    %c0_i32_2 = arith.constant 0 : i32
    %c0_i32_3 = arith.constant 0 : i32
    return %c0_i32, %c0_i32_0, %c0_i32_1, %c0_i32_2 : i32, i32, i32, i32
  }
  func.func @transform_4(%arg0: i32) -> (i32, i32) {
    %c0_i32 = arith.constant 0 : i32
    %c0_i32_0 = arith.constant 0 : i32
    %c0_i32_1 = arith.constant 0 : i32
    return %c0_i32, %c0_i32_0 : i32, i32
  }
  func.func @transform_5(%arg0: i32) -> (i32, i32) {
    %c0_i32 = arith.constant 0 : i32
    %c0_i32_0 = arith.constant 0 : i32
    %c0_i32_1 = arith.constant 0 : i32
    return %c0_i32, %c0_i32_0 : i32, i32
  }
  func.func @transform_6(%arg0: i32) -> (i32, i32) {
    %c0_i32 = arith.constant 0 : i32
    %c0_i32_0 = arith.constant 0 : i32
    %c0_i32_1 = arith.constant 0 : i32
    return %c0_i32, %c0_i32_0 : i32, i32
  }
  func.func @transform_7(%arg0: i32) -> (i32, i32, i32, i32) {
    %c0_i32 = arith.constant 0 : i32
    %c0_i32_0 = arith.constant 0 : i32
    %c0_i32_1 = arith.constant 0 : i32
    %c0_i32_2 = arith.constant 0 : i32
    %c0_i32_3 = arith.constant 0 : i32
    return %c0_i32, %c0_i32_0, %c0_i32_1, %c0_i32_2 : i32, i32, i32, i32
  }
  func.func @transform_8(%arg0: i32) -> (i32, i32) {
    %c0_i32 = arith.constant 0 : i32
    %c0_i32_0 = arith.constant 0 : i32
    %c0_i32_1 = arith.constant 0 : i32
    return %c0_i32, %c0_i32_0 : i32, i32
  }
  func.func @transform_9(%arg0: i32) -> (i32, i32) {
    %c0_i32 = arith.constant 0 : i32
    %c0_i32_0 = arith.constant 0 : i32
    %c0_i32_1 = arith.constant 0 : i32
    return %c0_i32, %c0_i32_0 : i32, i32
  }
  func.func @transform_10(%arg0: i32) -> (i32, i32) {
    %c0_i32 = arith.constant 0 : i32
    %c0_i32_0 = arith.constant 0 : i32
    %c0_i32_1 = arith.constant 0 : i32
    return %c0_i32, %c0_i32_0 : i32, i32
  }
  func.func @transform_11(%arg0: i32) -> (i32, i32, i32, i32) {
    %c0_i32 = arith.constant 0 : i32
    %c0_i32_0 = arith.constant 0 : i32
    %c0_i32_1 = arith.constant 0 : i32
    %c0_i32_2 = arith.constant 0 : i32
    %c0_i32_3 = arith.constant 0 : i32
    return %c0_i32, %c0_i32_0, %c0_i32_1, %c0_i32_2 : i32, i32, i32, i32
  }
  func.func @transform_12(%arg0: i32) -> (i32, i32) {
    %c0_i32 = arith.constant 0 : i32
    %c0_i32_0 = arith.constant 0 : i32
    %c0_i32_1 = arith.constant 0 : i32
    return %c0_i32, %c0_i32_0 : i32, i32
  }
  func.func @transform_13(%arg0: i32) -> (i32, i32) {
    %c0_i32 = arith.constant 0 : i32
    %c0_i32_0 = arith.constant 0 : i32
    %c0_i32_1 = arith.constant 0 : i32
    return %c0_i32, %c0_i32_0 : i32, i32
  }
}

</mosaic_0001>

<bundles_post_ra>
// kernel: _lambda_.1
= control target key start
LH: loop header
LB: loop body
LE: loop exit
PB: predicated region body
PF: predicated region fallthrough
CT: control target
= control target key end

     0   :  { %18 = vsyncpa [#allocation3], 0  ;;  %s12707_s0 = inlined_call_operand.hbm [shape: f32[2,16], index: 0, kind: input, shape index: {}]   ;;  %s12708_s1 = inlined_call_operand.hbm [shape: bf16[4,16,512], index: 1, kind: input, shape index: {}]   ;;  %s12709_s2 = inlined_call_operand.hbm [shape: f32[4,512], index: 2, kind: input, shape index: {}]   ;;  %s12710_s3 = inlined_call_operand.hbm [shape: bf16[3,3,512,64], index: 3, kind: input, shape index: {}]   ;;  %s12711_s4 = inlined_call_operand.hbm [shape: f32[1,64], index: 4, kind: input, shape index: {}]   ;;  %s12712_s5 = inlined_call_operand.vmem [shape: f32[1,64], index: 5, kind: input, shape index: {}, may-alias: {5,9}]   ;;  %s12713_s6 = inlined_call_operand.vmem [shape: f32[1,64], index: 6, kind: input, shape index: {}, may-alias: {6,10}]   ;;  %s12714_s7 = inlined_call_operand.hbm [shape: bf16[3,3,64,64], index: 7, kind: input, shape index: {}]   ;;  %s12715_s8 = inlined_call_operand.hbm [shape: f32[1,64], index: 8, kind: input, shape index: {}]   ;;  %s12716_s9 = inlined_call_operand.vmem [shape: f32[1,64], index: 9, kind: input, shape index: {}, may-alias: {5,9}]   ;;  %s12717_s10 = inlined_call_operand.vmem [shape: f32[1,64], index: 10, kind: input, shape index: {}, may-alias: {6,10}]   ;;  %s12718_s11 = inlined_call_operand.hbm [shape: bf16[3,3,64,3], index: 11, kind: input, shape index: {}]   ;;  %s12719_s12 = inlined_call_operand.hbm [shape: f32[1,3], index: 12, kind: input, shape index: {}]   ;;  %s12720_s13 = inlined_call_operand.vmem [shape: f32[128,3], index: 13, kind: output, shape index: {}]  }
   0x1   :  { %19 = vsyncpa [#allocation5], 0 }
   0x2   :  { %20 = vsyncpa [#allocation8], 0 }
   0x3   :  { %21 = vsyncpa [#allocation11], 0  ;;  %s38_s27 = sshll.u32 %s12708_s1, 4  ;;  %s39_s27 = int_to_ptr.hbm [resolvable:$true] %s38_s27 }
   0x4   :  { %22 = vsyncpa [#allocation14], 0  ;;  %s10106_s28 = smov [#allocation4]   ;;  %s62_s15 = sshll.u32 %s12710_s3, 4  ;;  %s63_s15 = int_to_ptr.hbm [resolvable:$true] %s62_s15 }
   0x5   :  { %s40_s29 = sshll.u32 %s10106_s28, 4  ;;  %s10107_s16 = smov 256   ;;  %s41_s29 = int_to_ptr.vmem [resolvable:$true] %s40_s29 }
   0x6   :  { %s10108_s17 = smov 16   ;;  %s10109_s18 = smov [#allocation7]  }
   0x7   :  { %46 = dma.hbm_to_vmem [thread:$0]  %s39_s27, 2048, %s41_s29, [#allocation5], %s10107_s16, %s10107_s16, %s10108_s17  }
   0x8   :  { %s64_s19 = sshll.u32 %s10109_s18, 4  ;;  %s10110_s20 = smov 64   ;;  %s65_s19 = int_to_ptr.vmem [resolvable:$true] %s64_s19 }
   0x9   :  { %s10111_s21 = smov 4   ;;  %s90_s23 = sshll.u32 %s12714_s7, 4  ;;  %s91_s23 = int_to_ptr.hbm [resolvable:$true] %s90_s23 }
   0xa   :  { %70 = dma.hbm_to_vmem [thread:$0]  %s63_s15, 36864, %s65_s19, [#allocation8], %s10110_s20, %s10110_s20, %s10111_s21  }
   0xb   :  { %s10112_s24 = smov [#allocation10]   ;;  %s118_s28 = sshll.u32 %s12718_s11, 4  ;;  %s119_s28 = int_to_ptr.hbm [resolvable:$true] %s118_s28 }
   0xc   :  { %s92_s25 = sshll.u32 %s10112_s24, 4  ;;  %s10113_s27 = smov [#allocation13]   ;;  %s93_s25 = int_to_ptr.vmem [resolvable:$true] %s92_s25 }
   0xd   :  { %98 = dma.hbm_to_vmem [thread:$0]  %s91_s23, 4608, %s93_s25, [#allocation11], %s10110_s20, %s10110_s20, %s10111_s21  }
   0xe   :  { %s120_s29 = sshll.u32 %s10113_s27, 4  ;;  %s28_s15 = sshll.u32 %s12707_s0, 4  ;;  %s121_s29 = int_to_ptr.vmem [resolvable:$true] %s120_s29  ;;  %s29_s15 = int_to_ptr.hbm [resolvable:$true] %s28_s15 }
   0xf   :  { %126 = dma.hbm_to_vmem [thread:$0]  %s119_s28, 4608, %s121_s29, [#allocation14], %s10110_s20, %s10110_s20, %s10111_s21  }
  0x10   :  { %s52_s17 = sshll.u32 %s12709_s2, 4  ;;  %s10114_s18 = smov [#allocation2]   ;;  %s53_s17 = int_to_ptr.hbm [resolvable:$true] %s52_s17 }
  0x11   :  { %s30_s19 = sshll.u32 %s10114_s18, 4  ;;  %s10115_s11 = smov [#allocation6]   ;;  %s31_s19 = int_to_ptr.vmem [resolvable:$true] %s30_s19 }
  0x12   :  { %33 = dma.hbm_to_vmem [thread:$0]  %s29_s15, 32, %s31_s19, [#allocation3]  }
  0x13   :  { %s54_s1 = sshll.u32 %s10115_s11, 4  ;;  %s76_s24 = sshll.u32 %s12711_s4, 4  ;;  %s55_s1 = int_to_ptr.vmem [resolvable:$true] %s54_s1  ;;  %s77_s24 = int_to_ptr.hbm [resolvable:$true] %s76_s24 }
  0x14   :  { %57 = dma.hbm_to_vmem [thread:$0]  %s53_s17, 256, %s55_s1, [#allocation5]  }
  0x15   :  { %s104_s21 = sshll.u32 %s12715_s8, 4  ;;  %s10116_s25 = smov [#allocation9]   ;;  %s105_s21 = int_to_ptr.hbm [resolvable:$true] %s104_s21 }
  0x16   :  { %s78_s2 = sshll.u32 %s10116_s25, 4  ;;  %s10117_s26 = smov [#allocation12]   ;;  %s79_s2 = int_to_ptr.vmem [resolvable:$true] %s78_s2 }
  0x17   :  { %81 = dma.hbm_to_vmem [thread:$0]  %s77_s24, 16, %s79_s2, [#allocation8]  }
  0x18   :  { %s106_s3 = sshll.u32 %s10117_s26, 4  ;;  %s132_s29 = sshll.u32 %s12719_s12, 4  ;;  %s107_s3 = int_to_ptr.vmem [resolvable:$true] %s106_s3  ;;  %s133_s29 = int_to_ptr.hbm [resolvable:$true] %s132_s29 }
  0x19   :  { %109 = dma.hbm_to_vmem [thread:$0]  %s105_s21, 16, %s107_s3, [#allocation11]  }
  0x1a   :  { %s10118_s4 = smov [#allocation15]  }
  0x1b   :  { %s134_s30 = sshll.u32 %s10118_s4, 4  ;;  %s135_s30 = int_to_ptr.vmem [resolvable:$true] %s134_s30 }
  0x1c   :  { %137 = dma.hbm_to_vmem [thread:$0]  %s133_s29, 16, %s135_s30, [#allocation14]  }
  0x1d   :  { %10096 = dma.done.wait [#allocation3], 32  }
  0x1e   :  { %10097 = vsyncadd [#allocation3], 4294967264 }
  0x1f   :  { %10098 = dma.done.wait [#allocation5], 2304  }
  0x20   :  { %10099 = vsyncadd [#allocation5], 4294964992 }
  0x21   :  { %10100 = dma.done.wait [#allocation8], 36880  }
  0x22   :  { %10101 = vsyncadd [#allocation8], 4294930416 }
  0x23   :  { %10102 = dma.done.wait [#allocation11], 4624  }
  0x24   :  { %10103 = vsyncadd [#allocation11], 4294962672 }
  0x25   :  { %10104 = dma.done.wait [#allocation14], 4624  }
  0x26   :  { %10105 = vsyncadd [#allocation14], 4294962672  ;;  %vm211_vm0 = vcmask 130048   ;;  %v7801_v0 = vld [vmem:[#allocation4] sm:$0xf]  ;;  %v9496_v52 = vld [vmem:[#allocation7 + $0x338] sm:$0xff] }
  0x27   :  { %v9411_v1 = vld [vmem:[#allocation4 + $0xc] sm:$0xf0]  ;;  %v9409_v2 = vld [vmem:[#allocation4 + $0x4] sm:$0xf]  ;;  %v7803_v4 = vld [vmem:[#allocation4 + $0x10] sm:$0xf0] }
  0x28   :  { %v7802_v3 = vor.u32 %v9411_v1, %v7801_v0  ;;  %v7809_v5 = vld [vmem:[#allocation4 + $0x8] sm:$0xf]  ;;  %v9412_v6 = vld [vmem:[#allocation4 + $0x14] sm:$0xf0]  ;;  %v7806_v7 = vor.u32 %v9409_v2, %v7803_v4  ;;  %v9410_v9 = vld [vmem:[#allocation4 + $0xc] sm:$0xf] }
  0x29   :  { %v7810_v8 = vor.u32 %v9412_v6, %v7809_v5  ;;  %v7811_v10 = vld [vmem:[#allocation4 + $0x18] sm:$0xf0]  ;;  %v7821_v14 = vld [vmem:[#allocation4 + $0x20] sm:$0xf]  ;;  %v9415_v15 = vld [vmem:[#allocation4 + $0x2c] sm:$0xf0] }
  0x2a   :  { %v175_v11 = vld [vmem:[#allocation2] sm:$0x3]  ;;  %222 = vmatpush.bf16.msra.mxu0 %v7802_v3  ;;  %v7814_v12 = vor.u32 %v9410_v9, %v7811_v10  ;;  %v9413_v16 = vld [vmem:[#allocation4 + $0x24] sm:$0xf]  ;;  %235 = vmatpush.bf16.msra.mxu1 %v7806_v7  ;;  %v7822_v17 = vor.u32 %v9415_v15, %v7821_v14  ;;  %v7823_v18 = vld [vmem:[#allocation4 + $0x30] sm:$0xf0] }
  0x2b   :  { %v10219_v13 = vpack.c.bf16 %v175_v11, %v175_v11  ;;  %248 = vmatpush.bf16.msra.mxu2 %v7810_v8  ;;  %v7829_v19 = vld [vmem:[#allocation4 + $0x28] sm:$0xf]  ;;  %v9416_v20 = vld [vmem:[#allocation4 + $0x34] sm:$0xf0]  ;;  %v7826_v21 = vor.u32 %v9413_v16, %v7823_v18  ;;  %v9414_v23 = vld [vmem:[#allocation4 + $0x2c] sm:$0xf] }
  0x2c   :  { %261 = vmatpush.bf16.msra.mxu3 %v7814_v12  ;;  %v7830_v22 = vor.u32 %v9416_v20, %v7829_v19  ;;  %v7831_v24 = vld [vmem:[#allocation4 + $0x38] sm:$0xf0]  ;;  %v7841_v25 = vld [vmem:[#allocation4 + $0x40] sm:$0xf]  ;;  %v9419_v27 = vld [vmem:[#allocation4 + $0x4c] sm:$0xf0] }
  0x2d   :  { %7815 = vmatmul.msk.bf16.vlgmr.msra.gmra.mxu0 %vm211_vm0, %v10219_v13  ;;  %v7834_v26 = vor.u32 %v9414_v23, %v7831_v24  ;;  %v9417_v28 = vld [vmem:[#allocation4 + $0x44] sm:$0xf]  ;;  %v7843_v29 = vld [vmem:[#allocation4 + $0x50] sm:$0xf0]  ;;  %7816 = vmatmul.msk.bf16.vlgmr.msra.gmra.mxu1 %vm211_vm0, %v10219_v13  ;;  %v7842_v30 = vor.u32 %v9419_v27, %v7841_v25  ;;  %v7849_v32 = vld [vmem:[#allocation4 + $0x48] sm:$0xf] }
  0x2e   :  { %7817 = vmatmul.msk.bf16.vlgmr.msra.gmra.mxu2 %vm211_vm0, %v10219_v13  ;;  %v7846_v31 = vor.u32 %v9417_v28, %v7843_v29  ;;  %v9420_v33 = vld [vmem:[#allocation4 + $0x54] sm:$0xf0]  ;;  %v9418_v34 = vld [vmem:[#allocation4 + $0x4c] sm:$0xf]  ;;  %310 = vmatpush.bf16.msrb.mxu0 %v7822_v17  ;;  %v7851_v36 = vld [vmem:[#allocation4 + $0x58] sm:$0xf0] }
  0x2f   :  { %7818 = vmatmul.msk.bf16.vlgmr.msra.gmra.mxu3 %vm211_vm0, %v10219_v13  ;;  %v7850_v35 = vor.u32 %v9420_v33, %v7849_v32  ;;  %323 = vmatpush.bf16.msrb.mxu1 %v7826_v21  ;;  %v7854_v37 = vor.u32 %v9418_v34, %v7851_v36  ;;  %v7861_v38 = vld [vmem:[#allocation4 + $0x60] sm:$0xf]  ;;  %v9423_v39 = vld [vmem:[#allocation4 + $0x6c] sm:$0xf0]  ;;  %v9421_v40 = vld [vmem:[#allocation4 + $0x64] sm:$0xf] }
  0x30   :  { %336 = vmatpush.bf16.msrb.mxu2 %v7830_v22  ;;  %349 = vmatpush.bf16.msrb.mxu3 %v7834_v26  ;;  %v7863_v41 = vld [vmem:[#allocation4 + $0x70] sm:$0xf0]  ;;  %v7869_v42 = vld [vmem:[#allocation4 + $0x68] sm:$0xf]  ;;  %v9424_v43 = vld [vmem:[#allocation4 + $0x74] sm:$0xf0]  ;;  %v7862_v46 = vor.u32 %v9423_v39, %v7861_v38 }
  0x31   :  { %v9422_v44 = vld [vmem:[#allocation4 + $0x6c] sm:$0xf]  ;;  %v7871_v45 = vld [vmem:[#allocation4 + $0x78] sm:$0xf0]  ;;  %v7866_v47 = vor.u32 %v9421_v40, %v7863_v41  ;;  %v7870_v48 = vor.u32 %v9424_v43, %v7869_v42  ;;  %v9495_v62 = vld [vmem:[#allocation7 + $0x330] sm:$0xff]  ;;  %vm544_vm1 = vcmask 1041409  }
  0x32   :  { %398 = vmatpush.bf16.msra.mxu0 %v7842_v30  ;;  %v7874_v49 = vor.u32 %v9422_v44, %v7871_v45  ;;  %v9504_v53 = vld [vmem:[#allocation7 + $0x378] sm:$0xff]  ;;  %v9503_v63 = vld [vmem:[#allocation7 + $0x370] sm:$0xff]  ;;  %v9494_v7 = vld [vmem:[#allocation7 + $0x328] sm:$0xff]  ;;  %vm546_vm2 = vcmask 1043459   ;;  %vm538_vm3 = vcmask 1040384   ;;  %vm540_vm4 = vcmask 1042434  }
  0x33   :  { %411 = vmatpush.bf16.msra.mxu1 %v7846_v31  ;;  %v9512_v54 = vld [vmem:[#allocation7 + $0x3b8] sm:$0xff]  ;;  %v9511_v0 = vld [vmem:[#allocation7 + $0x3b0] sm:$0xff]  ;;  %v9502_v8 = vld [vmem:[#allocation7 + $0x368] sm:$0xff]  ;;  %vm548_vm5 = vcmask 1042433   ;;  %vm542_vm6 = vcmask 1041408   ;;  %vm3857_vm9 = vcmask 523264  }
  0x34   :  { %424 = vmatpush.bf16.msra.mxu2 %v7850_v35  ;;  %437 = vmatpush.bf16.msra.mxu3 %v7854_v37  ;;  %v181_v55 = vld [vmem:[#allocation6] ss:$4 sm:$0xf]  ;;  %v273_v6 = vld [vmem:[#allocation6 + $0x1] ss:$4 sm:$0xf] }
  0x35   :  { %v184_v57 = vperm.slane %v181_v55, 1  ;;  %v185_v58 = vperm.slane %v181_v55, 2  ;;  %v186_v59 = vperm.slane %v181_v55, 3  ;;  %v183_v2 = vperm.slane %v181_v55, 0  ;;  %v9510_v9 = vld [vmem:[#allocation7 + $0x3a8] sm:$0xff]  ;;  %v9480_v10 = vld [vmem:[#allocation7 + $0x5b8] sm:$0xff] }
  0x36   :  { %v276_v12 = vperm.slane %v273_v6, 1  ;;  %v275_v20 = vperm.slane %v273_v6, 0  ;;  %v277_v24 = vperm.slane %v273_v6, 2  ;;  %v9493_v25 = vld [vmem:[#allocation7 + $0x320] sm:$0xff]  ;;  %v278_v28 = vperm.slane %v273_v6, 3  ;;  %v9479_v29 = vld [vmem:[#allocation7 + $0x5b0] sm:$0xff] }
  0x37   :  { %v9501_v26 = vld [vmem:[#allocation7 + $0x360] sm:$0xff]  ;;  %v9492_v39 = vld [vmem:[#allocation7 + $0x318] sm:$0xff]  ;;  %v9478_v45 = vld [vmem:[#allocation7 + $0x5a8] sm:$0xff]  ;;  %vm826_vm7 = vsmask.f32 256 }
  0x38   :  { %v9509_v27 = vld [vmem:[#allocation7 + $0x3a0] sm:$0xff]  ;;  %v9500_v40 = vld [vmem:[#allocation7 + $0x358] sm:$0xff]  ;;  %v9498_v6 = vld [vmem:[#allocation7 + $0x348] sm:$0xff] }
  0x39   :  { %v9508_v41 = vld [vmem:[#allocation7 + $0x398] sm:$0xff]  ;;  %v9477_v55 = vld [vmem:[#allocation7 + $0x5a0] sm:$0xff]  ;;  %vm10302_vm8 = vmand %vm538_vm3, %vm826_vm7 }
  0x3d   :  { %7835 = vmatmul.msk.bf16.vlgmr.msrb.gmra.mxu0 %vm211_vm0, %v10219_v13  ;;  %7836 = vmatmul.msk.bf16.vlgmr.msrb.gmra.mxu1 %vm211_vm0, %v10219_v13 }
  0x3e   :  { %7837 = vmatmul.msk.bf16.vlgmr.msrb.gmra.mxu2 %vm211_vm0, %v10219_v13  ;;  %486 = vmatpush.bf16.msrb.mxu0 %v7862_v46 }
  0x3f   :  { %7838 = vmatmul.msk.bf16.vlgmr.msrb.gmra.mxu3 %vm211_vm0, %v10219_v13  ;;  %499 = vmatpush.bf16.msrb.mxu1 %v7866_v47 }
  0x40   :  { %512 = vmatpush.bf16.msrb.mxu2 %v7870_v48  ;;  %525 = vmatpush.bf16.msrb.mxu3 %v7874_v49 }
  0x4d   :  { %7855 = vmatmul.msk.bf16.vlgmr.msra.gmra.mxu0 %vm211_vm0, %v10219_v13  ;;  %7856 = vmatmul.msk.bf16.vlgmr.msra.gmra.mxu1 %vm211_vm0, %v10219_v13 }
  0x4e   :  { %7857 = vmatmul.msk.bf16.vlgmr.msra.gmra.mxu2 %vm211_vm0, %v10219_v13  ;;  %1335 = vmatpush.bf16.msra.mxu0 %v9496_v52  ;;  %v9499_v52 = vld [vmem:[#allocation7 + $0x350] sm:$0xff] }
  0x4f   :  { %7858 = vmatmul.msk.bf16.vlgmr.msra.gmra.mxu3 %vm211_vm0, %v10219_v13  ;;  %1348 = vmatpush.bf16.msra.mxu1 %v9504_v53 }
  0x50   :  { %1361 = vmatpush.bf16.msra.mxu3 %v9512_v54  ;;  %1620 = vmatpush.bf16.msra.mxu2 %v9480_v10  ;;  %v9507_v54 = vld [vmem:[#allocation7 + $0x390] sm:$0xff] }
  0x52   :  { %1336 = vmatpush.bf16.msra.mxu0 %v9495_v62 }
  0x53   :  { %1349 = vmatpush.bf16.msra.mxu1 %v9503_v63 }
  0x54   :  { %1362 = vmatpush.bf16.msra.mxu3 %v9511_v0  ;;  %1621 = vmatpush.bf16.msra.mxu2 %v9479_v29  ;;  %v9490_v0 = vld [vmem:[#allocation7 + $0x308] sm:$0xff] }
  0x56   :  { %1337 = vmatpush.bf16.msra.mxu0 %v9494_v7 }
  0x57   :  { %1350 = vmatpush.bf16.msra.mxu1 %v9502_v8 }
  0x58   :  { %1363 = vmatpush.bf16.msra.mxu3 %v9510_v9  ;;  %1622 = vmatpush.bf16.msra.mxu2 %v9478_v45 }
  0x5a   :  { %1338 = vmatpush.bf16.msra.mxu0 %v9493_v25 }
  0x5b   :  { %1351 = vmatpush.bf16.msra.mxu1 %v9501_v26 }
  0x5c   :  { %1364 = vmatpush.bf16.msra.mxu3 %v9509_v27  ;;  %1623 = vmatpush.bf16.msra.mxu2 %v9477_v55 }
  0x5d   :  { %7875 = vmatmul.msk.bf16.vlgmr.msrb.gmra.mxu0 %vm211_vm0, %v10219_v13  ;;  %7876 = vmatmul.msk.bf16.vlgmr.msrb.gmra.mxu1 %vm211_vm0, %v10219_v13 }
  0x5e   :  { %7877 = vmatmul.msk.bf16.vlgmr.msrb.gmra.mxu2 %vm211_vm0, %v10219_v13  ;;  %1339 = vmatpush.bf16.msra.mxu0 %v9492_v39 }
  0x5f   :  { %7878 = vmatmul.msk.bf16.vlgmr.msrb.gmra.mxu3 %vm211_vm0, %v10219_v13  ;;  %1352 = vmatpush.bf16.msra.mxu1 %v9500_v40 }
  0x60   :  { %1365 = vmatpush.bf16.msra.mxu3 %v9508_v41 }
  0x63   :  { %1353 = vmatpush.bf16.msra.mxu1 %v9499_v52 }
  0x64   :  { %1366 = vmatpush.bf16.msra.mxu3 %v9507_v54 }
  0x67   :  { %1354 = vmatpush.bf16.msra.mxu1 %v9498_v6 }
  0xaa   :  { %v224_v50 = vpop.f32.mrf.mxu0  ;;  %v237_v51 = vpop.f32.mrf.mxu1 }
  0xab   :  { %v238_v3 = vadd.f32 %v237_v51, %v184_v57  ;;  %v225_v13 = vadd.f32 %v224_v50, %v183_v2  ;;  %v9491_v51 = vld [vmem:[#allocation7 + $0x310] sm:$0xff] }
  0xac   :  { %1340 = vmatpush.bf16.msra.mxu0 %v9491_v51 }
  0xad   :  { %v535_v14 = vrot.slane %v238_v3, 7 }
  0xaf   :  { %v545_v22 = vsel %vm544_vm1, %v225_v13, %v535_v14  ;;  %v539_v30 = vsel %vm538_vm3, %v225_v13, %v535_v14  ;;  %v9506_v13 = vld [vmem:[#allocation7 + $0x388] sm:$0xff] }
  0xb0   :  { %1341 = vmatpush.bf16.msra.mxu0 %v9490_v0  ;;  %1367 = vmatpush.bf16.msra.mxu3 %v9506_v13 }
  0xb1   :  { %v250_v56 = vpop.f32.mrf.mxu2 }
  0xb2   :  { %v263_v60 = vpop.f32.mrf.mxu3  ;;  %v226_v61 = vpop.f32.mrf.mxu0  ;;  %v251_v4 = vadd.f32 %v250_v56, %v185_v58 }
  0xb3   :  { %v239_v1 = vpop.f32.mrf.mxu1  ;;  %v264_v5 = vadd.f32 %v263_v60, %v186_v59 }
  0xb4   :  { %v536_v15 = vrot.slane %v251_v4, 6 }
  0xb5   :  { %v537_v16 = vrot.slane %v264_v5, 5 }
  0xb7   :  { %v547_v23 = vsel %vm546_vm2, %v536_v15, %v537_v16  ;;  %v541_v31 = vsel %vm540_vm4, %v536_v15, %v537_v16 }
  0xb8   :  { %v549_v32 = vsel %vm548_vm5, %v545_v22, %v547_v23  ;;  %v543_v42 = vsel %vm542_vm6, %v539_v30, %v541_v31 }
  0xb9   :  { %v252_v11 = vpop.f32.mrf.mxu2  ;;  %v550_v46 = vrot.slane %v549_v32, 1  ;;  %v565_v53 = vperm.slane %v543_v42, 0  ;;  %v566_v56 = vperm.slane %v543_v42, 1  ;;  %v567_v57 = vperm.slane %v543_v42, 2 }
  0xba   :  { %v265_v17 = vpop.f32.mrf.mxu3  ;;  %v312_v18 = vpop.f32.mrf.mxu0  ;;  %v568_v60 = vperm.slane %v543_v42, 3 }
  0xbb   :  { %v325_v19 = vpop.f32.mrf.mxu1  ;;  %v313_v33 = vadd.f32 %v312_v18, %v275_v20  ;;  %v569_v61 = vperm.slane %v550_v46, 0  ;;  %v570_v7 = vperm.slane %v550_v46, 1  ;;  %v571_v8 = vperm.slane %v550_v46, 2 }
  0xbc   :  { %v326_v21 = vadd.f32 %v325_v19, %v276_v12  ;;  %v572_v9 = vperm.slane %v550_v46, 3  ;;  %v9476_v19 = vld [vmem:[#allocation7 + $0x598] sm:$0xff] }
  0xbd   :  { %1624 = vmatpush.bf16.msra.mxu2 %v9476_v19 }
  0xbe   :  { %v555_v34 = vrot.slane %v326_v21, 7 }
  0xc0   :  { %v558_v48 = vsel %vm538_vm3, %v313_v33, %v555_v34  ;;  %v561_v49 = vsel %vm544_vm1, %v313_v33, %v555_v34 }
  0xc1   :  { %v338_v35 = vpop.f32.mrf.mxu2 }
  0xc2   :  { %v339_v36 = vadd.f32 %v338_v35, %v277_v24  ;;  %v351_v37 = vpop.f32.mrf.mxu3  ;;  %v314_v38 = vpop.f32.mrf.mxu0  ;;  %v10285_v35 = vld [vmem:[#allocation6 + $0x3] ss:$4 sm:$0xf] }
  0xc3   :  { %v352_v43 = vadd.f32 %v351_v37, %v278_v28  ;;  %v327_v44 = vpop.f32.mrf.mxu1  ;;  %v10273_v28 = vld [vmem:[#allocation6 + $0x2] ss:$4 sm:$0xf] }
  0xc4   :  { %v556_v47 = vrot.slane %v339_v36, 6  ;;  %v363_v32 = vperm.slane %v10273_v28, 0  ;;  %v364_v34 = vperm.slane %v10273_v28, 1  ;;  %v365_v40 = vperm.slane %v10273_v28, 2 }
  0xc5   :  { %v557_v50 = vrot.slane %v352_v43, 5  ;;  %v366_v41 = vperm.slane %v10273_v28, 3 }
  0xc7   :  { %v559_v58 = vsel %vm540_vm4, %v556_v47, %v557_v50  ;;  %v562_v59 = vsel %vm546_vm2, %v556_v47, %v557_v50 }
  0xc8   :  { %v560_v62 = vsel %vm542_vm6, %v558_v48, %v559_v58  ;;  %v563_v63 = vsel %vm548_vm5, %v561_v49, %v562_v59  ;;  %v452_v48 = vperm.slane %v10285_v35, 1 }
  0xc9   :  { %v564_v1 = vrot.slane %v563_v63, 1  ;;  %v581_v2 = vperm.slane %v560_v62, 0  ;;  %v582_v3 = vperm.slane %v560_v62, 1  ;;  %v583_v4 = vperm.slane %v560_v62, 2  ;;  %v340_v5 = vpop.f32.mrf.mxu2 }
  0xca   :  { %v584_v10 = vperm.slane %v560_v62, 3  ;;  %v353_v11 = vpop.f32.mrf.mxu3  ;;  %v400_v12 = vpop.f32.mrf.mxu0 }
  0xcb   :  { %v585_v14 = vperm.slane %v564_v1, 0  ;;  %v586_v15 = vperm.slane %v564_v1, 1  ;;  %v587_v16 = vperm.slane %v564_v1, 2  ;;  %v588_v17 = vperm.slane %v564_v1, 3  ;;  %v413_v18 = vpop.f32.mrf.mxu1 }
  0xcc   :  { %v597_v20 = vsel %vm538_vm3, %v565_v53, %v581_v2  ;;  %v598_v21 = vsel %vm538_vm3, %v566_v56, %v582_v3  ;;  %v599_v22 = vsel %vm538_vm3, %v567_v57, %v583_v4  ;;  %v600_v23 = vsel %vm538_vm3, %v568_v60, %v584_v10 }
  0xcd   :  { %v601_v24 = vsel %vm538_vm3, %v569_v61, %v585_v14  ;;  %v602_v25 = vsel %vm538_vm3, %v570_v7, %v586_v15  ;;  %v603_v26 = vsel %vm538_vm3, %v571_v8, %v587_v16  ;;  %v604_v27 = vsel %vm538_vm3, %v572_v9, %v588_v17 }
  0xce   :  { %v10275_v29 = vpack.c.bf16 %v598_v21, %v597_v20  ;;  %v10277_v30 = vpack.c.bf16 %v600_v23, %v599_v22  ;;  %v10279_v31 = vpack.c.bf16 %v602_v25, %v601_v24  ;;  %v10282_v33 = vpack.c.bf16 %v604_v27, %v603_v26 }
  0xcf   :  { %v10294_v46 = vadd.f32 %v400_v12, %v363_v32  ;;  %v414_v52 = vadd.f32 %v413_v18, %v364_v34 }
  0xd0   :  { %v729_v36 = vunpack.c.l.b16 %v10275_v29  ;;  %v730_v37 = vunpack.c.h.b16 %v10275_v29  ;;  %v731_v39 = vunpack.c.l.b16 %v10277_v30  ;;  %v732_v44 = vunpack.c.h.b16 %v10277_v30 }
  0xd1   :  { %v426_v38 = vpop.f32.mrf.mxu2  ;;  %v737_v45 = vunpack.c.l.b16 %v10279_v31  ;;  %v738_v49 = vunpack.c.h.b16 %v10279_v31  ;;  %v739_v50 = vunpack.c.l.b16 %v10282_v33  ;;  %v740_v51 = vunpack.c.h.b16 %v10282_v33 }
  0xd2   :  { %v439_v42 = vpop.f32.mrf.mxu3  ;;  %v402_v43 = vpop.f32.mrf.mxu0  ;;  %v745_v53 = vpack.c.b16 %v729_v36, %v729_v36  ;;  %v746_v54 = vpack.c.b16 %v730_v37, %v730_v37  ;;  %v747_v55 = vpack.c.b16 %v731_v39, %v731_v39  ;;  %v748_v56 = vpack.c.b16 %v732_v44, %v732_v44 }
  0xd3   :  { %v415_v47 = vpop.f32.mrf.mxu1  ;;  %v753_v58 = vpack.c.b16 %v737_v45, %v737_v45  ;;  %v754_v59 = vpack.c.b16 %v738_v49, %v738_v49  ;;  %v755_v60 = vpack.c.b16 %v739_v50, %v739_v50  ;;  %v756_v61 = vpack.c.b16 %v740_v51, %v740_v51 }
  0xd4   :  { %v762_v62 = vshrl.u32 %v745_v53, 16  ;;  %v765_v63 = vshrl.u32 %v746_v54, 16  ;;  %v768_v0 = vshrl.u32 %v747_v55, 16  ;;  %v771_v1 = vshrl.u32 %v748_v56, 16 }
  0xd5   :  { %v786_v2 = vshrl.u32 %v753_v58, 16  ;;  %v789_v3 = vshrl.u32 %v754_v59, 16  ;;  %v792_v4 = vshrl.u32 %v755_v60, 16  ;;  %v795_v5 = vshrl.u32 %v756_v61, 16 }
  0xd6   :  { %v828_v6 = vsel %vm10302_vm8, %v762_v62, 0  ;;  %v829_v7 = vsel %vm10302_vm8, %v765_v63, 0  ;;  %v830_v8 = vsel %vm10302_vm8, %v768_v0, 0  ;;  %v831_v9 = vsel %vm10302_vm8, %v771_v1, 0 }
  0xd7   :  { %v836_v11 = vsel %vm10302_vm8, %v786_v2, 0  ;;  %v837_v12 = vsel %vm10302_vm8, %v789_v3, 0  ;;  %v838_v13 = vsel %vm10302_vm8, %v792_v4, 0  ;;  %v839_v14 = vsel %vm10302_vm8, %v795_v5, 0 }
  0xd8   :  { %v856_v17 = vrot.slane %v829_v7, 7  ;;  %v857_v18 = vrot.slane %v830_v8, 6  ;;  %v858_v19 = vrot.slane %v831_v9, 5  ;;  %v862_v20 = vrot.slane %v837_v12, 7 }
  0xd9   :  { %v428_v10 = vpop.f32.mrf.mxu2  ;;  %v863_v22 = vrot.slane %v838_v13, 6  ;;  %v864_v23 = vrot.slane %v839_v14, 5  ;;  %v609_v24 = vrot.slane %v414_v52, 7  ;;  %v427_v25 = vadd.f32 %v426_v38, %v365_v40 }
  0xda   :  { %v441_v15 = vpop.f32.mrf.mxu3  ;;  %v488_v16 = vpop.f32.mrf.mxu0  ;;  %v870_v26 = vsel %vm538_vm3, %v828_v6, %v856_v17  ;;  %v873_v27 = vsel %vm540_vm4, %v857_v18, %v858_v19  ;;  %v884_v28 = vsel %vm538_vm3, %v836_v11, %v862_v20  ;;  %v440_v32 = vadd.f32 %v439_v42, %v366_v41  ;;  %v9505_v20 = vld [vmem:[#allocation7 + $0x380] sm:$0xff] }
  0xdb   :  { %v501_v21 = vpop.f32.mrf.mxu1  ;;  %v10326_v34 = vsel %vm542_vm6, %v870_v26, %v873_v27  ;;  %v887_v36 = vsel %vm540_vm4, %v863_v22, %v864_v23  ;;  %v453_v37 = vperm.slane %v10285_v35, 2  ;;  %v610_v38 = vrot.slane %v427_v25, 6  ;;  %v9489_v15 = vld [vmem:[#allocation7 + $0x300] sm:$0xff]  ;;  %v9520_v22 = vld [vmem:[#allocation7 + $0x3f8] sm:$0xff]  ;;  %1368 = vmatpush.bf16.msra.mxu3 %v9505_v20  ;;  %v9575_v20 = vld [vmem:[#allocation7 + $0x1b0] sm:$0xff] }
  0xdc   :  { %v10331_v39 = vsel %vm542_vm6, %v884_v28, %v887_v36  ;;  %1128 = vst [vmem:[#allocation1] ss:$9 sm:$0xff] %v10326_v34  ;;  %v611_v40 = vrot.slane %v440_v32, 5  ;;  %v451_v43 = vperm.slane %v10285_v35, 0  ;;  %v502_v44 = vadd.f32 %v501_v21, %v452_v48  ;;  %v9475_v21 = vld [vmem:[#allocation7 + $0x590] sm:$0xff]  ;;  %1342 = vmatpush.bf16.msra.mxu0 %v9489_v15  ;;  %v9464_v27 = vld [vmem:[#allocation7 + $0x538] sm:$0xff] }
  0xdd   :  { %1132 = vst [vmem:[#allocation1 + $0x2] ss:$9 sm:$0xff] %v10331_v39  ;;  %v615_v41 = vsel %vm544_vm1, %v10294_v46, %v609_v24  ;;  %v454_v49 = vperm.slane %v10285_v35, 3  ;;  %v612_v52 = vsel %vm538_vm3, %v10294_v46, %v609_v24  ;;  %v9472_v28 = vld [vmem:[#allocation7 + $0x578] sm:$0xff]  ;;  %1625 = vmatpush.bf16.msra.mxu2 %v9475_v21  ;;  %v9469_v15 = vld [vmem:[#allocation7 + $0x560] sm:$0xff] }
  0xde   :  { %v616_v42 = vsel %vm546_vm2, %v610_v38, %v611_v40  ;;  %v613_v53 = vsel %vm540_vm4, %v610_v38, %v611_v40  ;;  %v489_v48 = vadd.f32 %v488_v16, %v451_v43  ;;  %v623_v56 = vrot.slane %v502_v44, 7  ;;  %v9497_v16 = vld [vmem:[#allocation7 + $0x340] sm:$0xff] }
  0xdf   :  { %v617_v55 = vsel %vm548_vm5, %v615_v41, %v616_v42  ;;  %v614_v58 = vsel %vm542_vm6, %v612_v52, %v613_v53  ;;  %1355 = vmatpush.bf16.msra.mxu1 %v9497_v16  ;;  %v9474_v42 = vld [vmem:[#allocation7 + $0x588] sm:$0xff]  ;;  %1374 = vmatpush.bf16.msrb.mxu3 %v9520_v22  ;;  %v9471_v52 = vld [vmem:[#allocation7 + $0x570] sm:$0xff] }
  0xe0   :  { %v618_v61 = vrot.slane %v617_v55, 1  ;;  %v626_v62 = vsel %vm538_vm3, %v489_v48, %v623_v56  ;;  %v629_v35 = vsel %vm544_vm1, %v489_v48, %v623_v56  ;;  %v633_v0 = vperm.slane %v614_v58, 0  ;;  %1594 = vmatpush.bf16.msrb.mxu0 %v9464_v27  ;;  %v9473_v48 = vld [vmem:[#allocation7 + $0x580] sm:$0xff]  ;;  %v9516_v27 = vld [vmem:[#allocation7 + $0x3d8] sm:$0xff] }
  0xe1   :  { %v514_v45 = vpop.f32.mrf.mxu2  ;;  %v634_v1 = vperm.slane %v614_v58, 1  ;;  %v635_v2 = vperm.slane %v614_v58, 2  ;;  %v636_v3 = vperm.slane %v614_v58, 3  ;;  %1626 = vmatpush.bf16.msra.mxu2 %v9474_v42  ;;  %v9518_v58 = vld [vmem:[#allocation7 + $0x3e8] sm:$0xff] }
  0xe2   :  { %v515_v47 = vadd.f32 %v514_v45, %v453_v37  ;;  %v527_v50 = vpop.f32.mrf.mxu3  ;;  %v490_v51 = vpop.f32.mrf.mxu0  ;;  %v637_v7 = vperm.slane %v618_v61, 0  ;;  %v638_v8 = vperm.slane %v618_v61, 1  ;;  %v639_v17 = vperm.slane %v618_v61, 2 }
  0xe3   :  { %v503_v54 = vpop.f32.mrf.mxu1  ;;  %v528_v60 = vadd.f32 %v527_v50, %v454_v49  ;;  %v640_v18 = vperm.slane %v618_v61, 3  ;;  %v9519_v49 = vld [vmem:[#allocation7 + $0x3f0] sm:$0xff]  ;;  %1607 = vmatpush.bf16.msrb.mxu1 %v9472_v28  ;;  %v9462_v61 = vld [vmem:[#allocation7 + $0x528] sm:$0xff] }
  0xe4   :  { %v624_v59 = vrot.slane %v515_v47, 6  ;;  %v9463_v51 = vld [vmem:[#allocation7 + $0x530] sm:$0xff]  ;;  %1375 = vmatpush.bf16.msrb.mxu3 %v9519_v49  ;;  %v9574_v49 = vld [vmem:[#allocation7 + $0x1a8] sm:$0xff] }
  0xe5   :  { %v625_v63 = vrot.slane %v528_v60, 5  ;;  %1595 = vmatpush.bf16.msrb.mxu0 %v9463_v51  ;;  %1627 = vmatpush.bf16.msra.mxu2 %v9473_v48 }
  0xe7   :  { %v627_v4 = vsel %vm540_vm4, %v624_v59, %v625_v63  ;;  %v630_v5 = vsel %vm546_vm2, %v624_v59, %v625_v63  ;;  %1608 = vmatpush.bf16.msrb.mxu1 %v9471_v52  ;;  %vm4223_vm2 = vsmask.f32 1280 }
  0xe8   :  { %v628_v9 = vsel %vm542_vm6, %v626_v62, %v627_v4  ;;  %v631_v10 = vsel %vm548_vm5, %v629_v35, %v630_v5  ;;  %v9470_v62 = vld [vmem:[#allocation7 + $0x568] sm:$0xff]  ;;  %1376 = vmatpush.bf16.msrb.mxu3 %v9518_v58 }
  0xe9   :  { %v516_v46 = vpop.f32.mrf.mxu2  ;;  %v632_v11 = vrot.slane %v631_v10, 1  ;;  %v649_v12 = vperm.slane %v628_v9, 0  ;;  %v650_v13 = vperm.slane %v628_v9, 1  ;;  %v651_v14 = vperm.slane %v628_v9, 2  ;;  %1596 = vmatpush.bf16.msrb.mxu0 %v9462_v61  ;;  %v9573_v61 = vld [vmem:[#allocation7 + $0x1a0] sm:$0xff] }
  0xea   :  { %v529_v6 = vpop.f32.mrf.mxu3  ;;  %v652_v19 = vperm.slane %v628_v9, 3  ;;  %v9517_v9 = vld [vmem:[#allocation7 + $0x3e0] sm:$0xff] }
  0xeb   :  { %v653_v23 = vperm.slane %v632_v11, 0  ;;  %v654_v24 = vperm.slane %v632_v11, 1  ;;  %v655_v25 = vperm.slane %v632_v11, 2  ;;  %v656_v26 = vperm.slane %v632_v11, 3  ;;  %1609 = vmatpush.bf16.msrb.mxu1 %v9470_v62 }
  0xec   :  { %v665_v32 = vsel %vm538_vm3, %v633_v0, %v649_v12  ;;  %v666_v36 = vsel %vm538_vm3, %v634_v1, %v650_v13  ;;  %v667_v37 = vsel %vm538_vm3, %v635_v2, %v651_v14  ;;  %v668_v38 = vsel %vm538_vm3, %v636_v3, %v652_v19  ;;  %v9576_v1 = vld [vmem:[#allocation7 + $0x1b8] sm:$0xff]  ;;  %v9461_v14 = vld [vmem:[#allocation7 + $0x520] sm:$0xff]  ;;  %1377 = vmatpush.bf16.msrb.mxu3 %v9517_v9 }
  0xed   :  { %v669_v40 = vsel %vm538_vm3, %v637_v7, %v653_v23  ;;  %v670_v43 = vsel %vm538_vm3, %v638_v8, %v654_v24  ;;  %v671_v44 = vsel %vm538_vm3, %v639_v17, %v655_v25  ;;  %v672_v41 = vsel %vm538_vm3, %v640_v18, %v656_v26  ;;  %2009 = vmatpush.bf16.msrb.mxu2 %v9576_v1 }
  0xee   :  { %v10359_v45 = vpack.c.bf16 %v666_v36, %v665_v32  ;;  %v10361_v47 = vpack.c.bf16 %v668_v38, %v667_v37  ;;  %v10363_v50 = vpack.c.bf16 %v670_v43, %v669_v40  ;;  %v10365_v53 = vpack.c.bf16 %v672_v41, %v671_v44  ;;  %1597 = vmatpush.bf16.msrb.mxu0 %v9461_v14  ;;  %v9460_v38 = vld [vmem:[#allocation7 + $0x518] sm:$0xff]  ;;  %v9457_v14 = vld [vmem:[#allocation7 + $0x500] sm:$0xff] }
  0xef   :  { %1610 = vmatpush.bf16.msrb.mxu1 %v9469_v15  ;;  %v9468_v40 = vld [vmem:[#allocation7 + $0x558] sm:$0xff]  ;;  %v689_v62 = vrot.slane %v10275_v29, 3  ;;  %v9465_v15 = vld [vmem:[#allocation7 + $0x540] sm:$0xff] }
  0xf0   :  { %v733_v54 = vunpack.c.l.b16 %v10359_v45  ;;  %v734_v55 = vunpack.c.h.b16 %v10359_v45  ;;  %v735_v56 = vunpack.c.l.b16 %v10361_v47  ;;  %v736_v59 = vunpack.c.h.b16 %v10361_v47  ;;  %1378 = vmatpush.bf16.msrb.mxu3 %v9516_v27 }
  0xf1   :  { %v741_v60 = vunpack.c.l.b16 %v10363_v50  ;;  %v742_v35 = vunpack.c.h.b16 %v10363_v50  ;;  %v743_v63 = vunpack.c.l.b16 %v10365_v53  ;;  %v744_v0 = vunpack.c.h.b16 %v10365_v53  ;;  %2010 = vmatpush.bf16.msrb.mxu2 %v9575_v20 }
  0xf2   :  { %v749_v46 = vpack.c.b16 %v733_v54, %v733_v54  ;;  %v750_v2 = vpack.c.b16 %v734_v55, %v734_v55  ;;  %v751_v3 = vpack.c.b16 %v735_v56, %v735_v56  ;;  %v752_v4 = vpack.c.b16 %v736_v59, %v736_v59  ;;  %v9515_v56 = vld [vmem:[#allocation7 + $0x3d0] sm:$0xff]  ;;  %1598 = vmatpush.bf16.msrb.mxu0 %v9460_v38 }
  0xf3   :  { %v757_v5 = vpack.c.b16 %v741_v60, %v741_v60  ;;  %v758_v6 = vpack.c.b16 %v742_v35, %v742_v35  ;;  %v759_v7 = vpack.c.b16 %v743_v63, %v743_v63  ;;  %v760_v8 = vpack.c.b16 %v744_v0, %v744_v0  ;;  %1611 = vmatpush.bf16.msrb.mxu1 %v9468_v40  ;;  %v9459_v59 = vld [vmem:[#allocation7 + $0x510] sm:$0xff] }
  0xf4   :  { %v774_v10 = vshrl.u32 %v749_v46, 16  ;;  %v777_v11 = vshrl.u32 %v750_v2, 16  ;;  %v780_v12 = vshrl.u32 %v751_v3, 16  ;;  %v783_v13 = vshrl.u32 %v752_v4, 16  ;;  %v9467_v60 = vld [vmem:[#allocation7 + $0x550] sm:$0xff]  ;;  %1379 = vmatpush.bf16.msrb.mxu3 %v9515_v56  ;;  %v9514_v2 = vld [vmem:[#allocation7 + $0x3c8] sm:$0xff] }
  0xf5   :  { %v798_v16 = vshrl.u32 %v757_v5, 16  ;;  %v801_v17 = vshrl.u32 %v758_v6, 16  ;;  %v804_v18 = vshrl.u32 %v759_v7, 16  ;;  %v807_v19 = vshrl.u32 %v760_v8, 16  ;;  %2011 = vmatpush.bf16.msrb.mxu2 %v9574_v49  ;;  %v9458_v6 = vld [vmem:[#allocation7 + $0x508] sm:$0xff]  ;;  %v9487_v38 = vld [vmem:[#allocation7 + $0x5f0] sm:$0xff] }
  0xf6   :  { %v833_v21 = vsel %vm10302_vm8, %v777_v11, 0  ;;  %v834_v22 = vsel %vm10302_vm8, %v780_v12, 0  ;;  %v835_v23 = vsel %vm10302_vm8, %v783_v13, 0  ;;  %v832_v43 = vsel %vm10302_vm8, %v774_v10, 0  ;;  %1599 = vmatpush.bf16.msrb.mxu0 %v9459_v59  ;;  %v9466_v7 = vld [vmem:[#allocation7 + $0x548] sm:$0xff]  ;;  %v9513_v13 = vld [vmem:[#allocation7 + $0x3c0] sm:$0xff] }
  0xf7   :  { %v841_v24 = vsel %vm10302_vm8, %v801_v17, 0  ;;  %v842_v25 = vsel %vm10302_vm8, %v804_v18, 0  ;;  %v843_v26 = vsel %vm10302_vm8, %v807_v19, 0  ;;  %v859_v28 = vrot.slane %v833_v21, 7  ;;  %1612 = vmatpush.bf16.msrb.mxu1 %v9467_v60  ;;  %v9559_v40 = vld [vmem:[#allocation7 + $0x130] sm:$0xff]  ;;  %v9486_v49 = vld [vmem:[#allocation7 + $0x5e8] sm:$0xff] }
  0xf8   :  { %v860_v32 = vrot.slane %v834_v22, 6  ;;  %v861_v36 = vrot.slane %v835_v23, 5  ;;  %v865_v37 = vrot.slane %v841_v24, 7  ;;  %v840_v44 = vsel %vm10302_vm8, %v798_v16, 0  ;;  %1380 = vmatpush.bf16.msrb.mxu3 %v9514_v2  ;;  %v9571_v22 = vld [vmem:[#allocation7 + $0x190] sm:$0xff]  ;;  %v9560_v24 = vld [vmem:[#allocation7 + $0x138] sm:$0xff] }
  0xf9   :  { %v866_v41 = vrot.slane %v842_v25, 6  ;;  %v867_v42 = vrot.slane %v843_v26, 5  ;;  %v877_v51 = vsel %vm538_vm3, %v832_v43, %v859_v28  ;;  %v690_v35 = vrot.slane %v10277_v30, 6  ;;  %2012 = vmatpush.bf16.msrb.mxu2 %v9573_v61  ;;  %v9568_v25 = vld [vmem:[#allocation7 + $0x178] sm:$0xff]  ;;  %v9567_v43 = vld [vmem:[#allocation7 + $0x170] sm:$0xff] }
  0xfa   :  { %v880_v52 = vsel %vm540_vm4, %v860_v32, %v861_v36  ;;  %v891_v54 = vsel %vm538_vm3, %v840_v44, %v865_v37  ;;  %v691_v63 = vrot.slane %v10277_v30, 1  ;;  %v692_v0 = vrot.slane %v10359_v45, 3  ;;  %1600 = vmatpush.bf16.msrb.mxu0 %v9458_v6  ;;  %v9570_v37 = vld [vmem:[#allocation7 + $0x188] sm:$0xff]  ;;  %v9564_v2 = vld [vmem:[#allocation7 + $0x158] sm:$0xff]  ;;  %v9563_v6 = vld [vmem:[#allocation7 + $0x150] sm:$0xff] }
  0xfb   :  { %v10395_v55 = vsel %vm542_vm6, %v877_v51, %v880_v52  ;;  %v894_v48 = vsel %vm540_vm4, %v866_v41, %v867_v42  ;;  %v693_v1 = vrot.slane %v10361_v47, 6  ;;  %v694_v46 = vrot.slane %v10361_v47, 1  ;;  %v9572_v47 = vld [vmem:[#allocation7 + $0x198] sm:$0xff]  ;;  %1613 = vmatpush.bf16.msrb.mxu1 %v9466_v7  ;;  %v9569_v42 = vld [vmem:[#allocation7 + $0x180] sm:$0xff]  ;;  %v9558_v51 = vld [vmem:[#allocation7 + $0x128] sm:$0xff] }
  0xfc   :  { %v10399_v58 = vsel %vm542_vm6, %v891_v54, %v894_v48  ;;  %1130 = vst [vmem:[#allocation1 + $0x1] ss:$9 sm:$0xff] %v10395_v55  ;;  %v695_v3 = vrot.slane %v10279_v31, 3  ;;  %v696_v4 = vrot.slane %v10282_v33, 6  ;;  %v697_v5 = vrot.slane %v10282_v33, 1  ;;  %1381 = vmatpush.bf16.msrb.mxu3 %v9513_v13  ;;  %v9566_v52 = vld [vmem:[#allocation7 + $0x168] sm:$0xff] }
  0xfd   :  { %1134 = vst [vmem:[#allocation1 + $0x3] ss:$9 sm:$0xff] %v10399_v58  ;;  %v698_v30 = vrot.slane %v10363_v50, 3  ;;  %v699_v8 = vrot.slane %v10365_v53, 6  ;;  %v700_v9 = vrot.slane %v10365_v53, 1  ;;  %v703_v10 = vsel %vm538_vm3, %v10275_v29, %v689_v62  ;;  %2013 = vmatpush.bf16.msrb.mxu2 %v9572_v47  ;;  %v9544_v54 = vld [vmem:[#allocation7 + $0x7b8] sm:$0xff] }
  0xfe   :  { %v706_v11 = vsel %vm540_vm4, %v690_v35, %v691_v63  ;;  %v710_v33 = vsel %vm538_vm3, %v10359_v45, %v692_v0  ;;  %v713_v12 = vsel %vm540_vm4, %v693_v1, %v694_v46  ;;  %v717_v16 = vsel %vm538_vm3, %v10279_v31, %v695_v3  ;;  %v9488_v31 = vld [vmem:[#allocation7 + $0x5f8] sm:$0xff]  ;;  %1601 = vmatpush.bf16.msrb.mxu0 %v9457_v14  ;;  %v9485_v62 = vld [vmem:[#allocation7 + $0x5e0] sm:$0xff]  ;;  %v9543_v0 = vld [vmem:[#allocation7 + $0x7b0] sm:$0xff] }
  0xff   :  { %v720_v53 = vsel %vm540_vm4, %v696_v4, %v697_v5  ;;  %v10425_v29 = vsel %vm542_vm6, %v703_v10, %v706_v11  ;;  %v724_v45 = vsel %vm538_vm3, %v10363_v50, %v698_v30  ;;  %v727_v20 = vsel %vm540_vm4, %v699_v8, %v700_v9  ;;  %1614 = vmatpush.bf16.msrb.mxu1 %v9465_v15  ;;  %v9557_v35 = vld [vmem:[#allocation7 + $0x120] sm:$0xff]  ;;  %v9484_v1 = vld [vmem:[#allocation7 + $0x5d8] sm:$0xff]  ;;  %v9542_v3 = vld [vmem:[#allocation7 + $0x7a8] sm:$0xff] }
 0x100   :  { %v10433_v23 = vsel %vm542_vm6, %v710_v33, %v713_v12  ;;  %v10437_v26 = vsel %vm542_vm6, %v717_v16, %v720_v53  ;;  %v10441_v50 = vsel %vm542_vm6, %v724_v45, %v727_v20  ;;  %v12722_v27 = vmov 0   ;;  %v9565_v63 = vld [vmem:[#allocation7 + $0x160] sm:$0xff]  ;;  %v9556_v46 = vld [vmem:[#allocation7 + $0x118] sm:$0xff]  ;;  %v9483_v4 = vld [vmem:[#allocation7 + $0x5d0] sm:$0xff] }
 0x101   :  { %v897_v28 = vrot.slane %v12722_v27, 3  ;;  %v898_v32 = vrot.slane %v12722_v27, 6  ;;  %v10447_v36 = vrot.slane %v12722_v27, 1  ;;  %2014 = vmatpush.bf16.msrb.mxu2 %v9571_v22  ;;  %v9555_v5 = vld [vmem:[#allocation7 + $0x110] sm:$0xff]  ;;  %v9541_v7 = vld [vmem:[#allocation7 + $0x7a0] sm:$0xff]  ;;  %v9482_v10 = vld [vmem:[#allocation7 + $0x5c8] sm:$0xff] }
 0x102   :  { %v9554_v11 = vld [vmem:[#allocation7 + $0x108] sm:$0xff]  ;;  %v9540_v12 = vld [vmem:[#allocation7 + $0x798] sm:$0xff]  ;;  %v9481_v13 = vld [vmem:[#allocation7 + $0x5c0] sm:$0xff] }
 0x103   :  { %v902_v44 = vsel %vm538_vm3, 0, %v897_v28  ;;  %v905_v41 = vsel %vm540_vm4, %v898_v32, %v10447_v36  ;;  %v9562_v33 = vld [vmem:[#allocation7 + $0x148] sm:$0xff]  ;;  %v9553_v14 = vld [vmem:[#allocation7 + $0x100] sm:$0xff]  ;;  %v9584_v15 = vld [vmem:[#allocation7 + $0x1f8] sm:$0xff] }
 0x104   :  { %v1135_v17 = vld [vmem:[#allocation1] sm:$0xff]  ;;  %v1136_v18 = vld [vmem:[#allocation1 + $0x9] sm:$0xff]  ;;  %v1137_v19 = vld [vmem:[#allocation1 + $0x12] sm:$0xff]  ;;  %v10454_v48 = vsel %vm542_vm6, %v902_v44, %v905_v41 }
 0x105   :  { %v10430_v21 = vld [vmem:[#allocation1 + $0x1b] sm:$0xff]  ;;  %1343 = vmatmul.bf16.vlgmr.msra.gmra.mxu0 %v1135_v17  ;;  %1356 = vmatmul.bf16.vlgmr.msra.gmra.mxu1 %v1136_v18  ;;  %v9539_v53 = vld [vmem:[#allocation7 + $0x790] sm:$0xff]  ;;  %v9528_v17 = vld [vmem:[#allocation7 + $0x738] sm:$0xff] }
 0x106   :  { %1387 = vst [vmem:[#allocation1] ss:$9 sm:$0xff] %v10425_v29  ;;  %1369 = vmatmul.bf16.vlgmr.msra.gmra.mxu3 %v1137_v19  ;;  %1983 = vmatpush.bf16.msra.mxu0 %v9560_v24  ;;  %v9561_v16 = vld [vmem:[#allocation7 + $0x140] sm:$0xff]  ;;  %v9536_v18 = vld [vmem:[#allocation7 + $0x778] sm:$0xff]  ;;  %v9583_v19 = vld [vmem:[#allocation7 + $0x1f0] sm:$0xff] }
 0x107   :  { %1389 = vst [vmem:[#allocation1 + $0x1] ss:$9 sm:$0xff] %v10433_v23  ;;  %1633 = vmatpush.bf16.msra.mxu3 %v9488_v31  ;;  %1996 = vmatpush.bf16.msra.mxu1 %v9568_v25  ;;  %v9538_v45 = vld [vmem:[#allocation7 + $0x788] sm:$0xff]  ;;  %v9527_v20 = vld [vmem:[#allocation7 + $0x730] sm:$0xff]  ;;  %v9537_v32 = vld [vmem:[#allocation7 + $0x780] sm:$0xff] }
 0x108   :  { %1391 = vst [vmem:[#allocation1 + $0x2] ss:$9 sm:$0xff] %v10437_v26  ;;  %2015 = vmatpush.bf16.msrb.mxu2 %v9570_v37  ;;  %v9582_v28 = vld [vmem:[#allocation7 + $0x1e8] sm:$0xff]  ;;  %v9533_v44 = vld [vmem:[#allocation7 + $0x760] sm:$0xff]  ;;  %v9639_v41 = vld [vmem:[#allocation7 + $0x6b0] sm:$0xff] }
 0x109   :  { %1393 = vst [vmem:[#allocation1 + $0x3] ss:$9 sm:$0xff] %v10441_v50  ;;  %v9526_v37 = vld [vmem:[#allocation7 + $0x728] sm:$0xff] }
 0x10a   :  { %1984 = vmatpush.bf16.msra.mxu0 %v9559_v40  ;;  %v9640_v40 = vld [vmem:[#allocation7 + $0x6b8] sm:$0xff] }
 0x10b   :  { %1634 = vmatpush.bf16.msra.mxu3 %v9487_v38  ;;  %1997 = vmatpush.bf16.msra.mxu1 %v9567_v43  ;;  %v9534_v38 = vld [vmem:[#allocation7 + $0x768] sm:$0xff]  ;;  %v9581_v43 = vld [vmem:[#allocation7 + $0x1e0] sm:$0xff] }
 0x10c   :  { %2016 = vmatpush.bf16.msrb.mxu2 %v9569_v42  ;;  %v9580_v42 = vld [vmem:[#allocation7 + $0x1d8] sm:$0xff] }
 0x10e   :  { %1985 = vmatpush.bf16.msra.mxu0 %v9558_v51 }
 0x10f   :  { %1635 = vmatpush.bf16.msra.mxu3 %v9486_v49  ;;  %1998 = vmatpush.bf16.msra.mxu1 %v9566_v52  ;;  %v9532_v49 = vld [vmem:[#allocation7 + $0x758] sm:$0xff] }
 0x110   :  { %v1394_v56 = vld [vmem:[#allocation1] sm:$0xff]  ;;  %v1395_v59 = vld [vmem:[#allocation1 + $0x9] sm:$0xff]  ;;  %v1396_v60 = vld [vmem:[#allocation1 + $0x12] sm:$0xff] }
 0x111   :  { %v10456_v61 = vld [vmem:[#allocation1 + $0x1b] sm:$0xff]  ;;  %1628 = vmatmul.bf16.vlgmr.msra.gmra.mxu2 %v1396_v60 }
 0x112   :  { %1776 = vst [vmem:[#allocation1] ss:$9 sm:$0xff] %v10433_v23  ;;  %2268 = vmatpush.bf16.msra.mxu2 %v9544_v54  ;;  %1986 = vmatpush.bf16.msra.mxu0 %v9557_v35  ;;  %v9638_v60 = vld [vmem:[#allocation7 + $0x6a8] sm:$0xff]  ;;  %v9523_v35 = vld [vmem:[#allocation7 + $0x710] sm:$0xff] }
 0x113   :  { %1778 = vst [vmem:[#allocation1 + $0x1] ss:$9 sm:$0xff] %v10454_v48  ;;  %1636 = vmatpush.bf16.msra.mxu3 %v9485_v62  ;;  %1999 = vmatpush.bf16.msra.mxu1 %v9565_v63  ;;  %v9579_v62 = vld [vmem:[#allocation7 + $0x1d0] sm:$0xff] }
 0x114   :  { %1780 = vst [vmem:[#allocation1 + $0x2] ss:$9 sm:$0xff] %v10441_v50  ;;  %v9531_v63 = vld [vmem:[#allocation7 + $0x750] sm:$0xff] }
 0x115   :  { %1782 = vst [vmem:[#allocation1 + $0x3] ss:$9 sm:$0xff] %v10454_v48  ;;  %1602 = vmatmul.bf16.vlgmr.msrb.gmra.mxu0 %v1394_v56  ;;  %1615 = vmatmul.bf16.vlgmr.msrb.gmra.mxu1 %v1395_v59  ;;  %v908_v56 = vunpack.c.h.b16 %v12722_v27 }
 0x116   :  { %1382 = vmatmul.bf16.vlgmr.msrb.gmra.mxu3 %v10430_v21  ;;  %2269 = vmatpush.bf16.msra.mxu2 %v9543_v0  ;;  %v9535_v21 = vld [vmem:[#allocation7 + $0x770] sm:$0xff] }
 0x117   :  { %1637 = vmatpush.bf16.msra.mxu3 %v9484_v1  ;;  %1987 = vmatpush.bf16.msra.mxu0 %v9556_v46  ;;  %v910_v0 = vpack.c.b16 %v908_v56, %v908_v56  ;;  %v9637_v1 = vld [vmem:[#allocation7 + $0x6a0] sm:$0xff]  ;;  %v9607_v56 = vld [vmem:[#allocation7 + $0x8b0] sm:$0xff] }
 0x118   :  { %2000 = vmatpush.bf16.msra.mxu1 %v9564_v2  ;;  %v9578_v2 = vld [vmem:[#allocation7 + $0x1c8] sm:$0xff] }
 0x11a   :  { %2270 = vmatpush.bf16.msra.mxu2 %v9542_v3  ;;  %v9522_v3 = vld [vmem:[#allocation7 + $0x708] sm:$0xff] }
 0x11b   :  { %1638 = vmatpush.bf16.msra.mxu3 %v9483_v4  ;;  %1988 = vmatpush.bf16.msra.mxu0 %v9555_v5  ;;  %v9530_v4 = vld [vmem:[#allocation7 + $0x748] sm:$0xff]  ;;  %v915_v5 = vshrl.u32 %v910_v0, 16  ;;  %v9619_v0 = vld [vmem:[#allocation7 + $0x610] sm:$0xff] }
 0x11c   :  { %v1783_v30 = vld [vmem:[#allocation1] sm:$0xff]  ;;  %v1784_v8 = vld [vmem:[#allocation1 + $0x9] sm:$0xff]  ;;  %v1785_v9 = vld [vmem:[#allocation1 + $0x12] sm:$0xff]  ;;  %2001 = vmatpush.bf16.msra.mxu1 %v9563_v6 }
 0x11d   :  { %v10463_v47 = vld [vmem:[#allocation1 + $0x1b] sm:$0xff]  ;;  %v9636_v6 = vld [vmem:[#allocation7 + $0x698] sm:$0xff] }
 0x11e   :  { %2035 = vst [vmem:[#allocation1] ss:$9 sm:$0xff] %v10425_v29  ;;  %2271 = vmatpush.bf16.msra.mxu2 %v9541_v7 }
 0x11f   :  { %2037 = vst [vmem:[#allocation1 + $0x1] ss:$9 sm:$0xff] %v10433_v23  ;;  %1639 = vmatpush.bf16.msra.mxu3 %v9482_v10  ;;  %1989 = vmatpush.bf16.msra.mxu0 %v9554_v11  ;;  %v9552_v10 = vld [vmem:[#allocation7 + $0x7f8] sm:$0xff] }
 0x120   :  { %2039 = vst [vmem:[#allocation1 + $0x2] ss:$9 sm:$0xff] %v10437_v26  ;;  %2002 = vmatpush.bf16.msra.mxu1 %v9562_v33 }
 0x121   :  { %2041 = vst [vmem:[#allocation1 + $0x3] ss:$9 sm:$0xff] %v10441_v50  ;;  %2017 = vmatmul.bf16.vlgmr.msrb.gmra.mxu2 %v1785_v9  ;;  %v9529_v9 = vld [vmem:[#allocation7 + $0x740] sm:$0xff] }
 0x122   :  { %2272 = vmatpush.bf16.msra.mxu2 %v9540_v12 }
 0x123   :  { %1640 = vmatpush.bf16.msra.mxu3 %v9481_v13  ;;  %1990 = vmatpush.bf16.msra.mxu0 %v9553_v14  ;;  %v920_v13 = vsel %vm10302_vm8, %v915_v5, 0 }
 0x124   :  { %2003 = vmatpush.bf16.msra.mxu1 %v9561_v16  ;;  %v9624_v16 = vld [vmem:[#allocation7 + $0x638] sm:$0xff] }
 0x126   :  { %2273 = vmatpush.bf16.msra.mxu2 %v9539_v53  ;;  %1641 = vmatmul.bf16.vlgmr.msra.gmra.mxu3 %v10456_v61  ;;  %v10490_v61 = vunpack.c.l.b16 %v12722_v27 }
 0x127   :  { %2022 = vmatpush.bf16.msrb.mxu3 %v9584_v15  ;;  %2242 = vmatpush.bf16.msrb.mxu0 %v9528_v17  ;;  %v9635_v15 = vld [vmem:[#allocation7 + $0x690] sm:$0xff]  ;;  %v9632_v17 = vld [vmem:[#allocation7 + $0x678] sm:$0xff] }
 0x128   :  { %v10469_v22 = vld [vmem:[#allocation1] sm:$0xff]  ;;  %v10471_v31 = vld [vmem:[#allocation1 + $0x9] sm:$0xff]  ;;  %v2044_v24 = vld [vmem:[#allocation1 + $0x12] sm:$0xff]  ;;  %2255 = vmatpush.bf16.msrb.mxu1 %v9536_v18  ;;  %1991 = vmatmul.bf16.vlgmr.msra.gmra.mxu0 %v1783_v30  ;;  %12778 = vst [vmem:[#allocation21_spill] sm:$0xff] %v10490_v61  ;;  %v10498_v46 = vpack.c.b16 %v10490_v61, %v10490_v61  ;;  %v923_v18 = vrot.slane %v920_v13, 7 }
 0x129   :  { %v10473_v25 = vld [vmem:[#allocation1 + $0x1b] sm:$0xff]  ;;  %2004 = vmatmul.bf16.vlgmr.msra.gmra.mxu1 %v1784_v8 }
 0x12a   :  { %2424 = vst [vmem:[#allocation1] ss:$9 sm:$0xff] %v10326_v34  ;;  %2274 = vmatpush.bf16.msra.mxu2 %v9538_v45  ;;  %v9525_v34 = vld [vmem:[#allocation7 + $0x720] sm:$0xff]  ;;  %v10501_v7 = vshrl.u32 %v10498_v46, 16 }
 0x12b   :  { %2023 = vmatpush.bf16.msrb.mxu3 %v9583_v19  ;;  %2426 = vst [vmem:[#allocation1 + $0x1] ss:$9 sm:$0xff] %v10395_v55  ;;  %2243 = vmatpush.bf16.msrb.mxu0 %v9527_v20  ;;  %v9577_v30 = vld [vmem:[#allocation7 + $0x1c0] sm:$0xff]  ;;  %v9551_v19 = vld [vmem:[#allocation7 + $0x7f0] sm:$0xff]  ;;  %v925_v20 = vrot.slane %v920_v13, 5  ;;  %v9648_v13 = vld [vmem:[#allocation7 + $0x6f8] sm:$0xff] }
 0x12c   :  { %2428 = vst [vmem:[#allocation1 + $0x2] ss:$9 sm:$0xff] %v10331_v39  ;;  %2256 = vmatpush.bf16.msrb.mxu1 %v9535_v21  ;;  %v9524_v39 = vld [vmem:[#allocation7 + $0x718] sm:$0xff]  ;;  %v9521_v8 = vld [vmem:[#allocation7 + $0x700] sm:$0xff]  ;;  %v919_v53 = vsel %vm10302_vm8, %v10501_v7, 0  ;;  %v9634_v21 = vld [vmem:[#allocation7 + $0x688] sm:$0xff] }
 0x12d   :  { %2430 = vst [vmem:[#allocation1 + $0x3] ss:$9 sm:$0xff] %v10399_v58  ;;  %v924_v45 = vrot.slane %v919_v53, 6 }
 0x12e   :  { %2275 = vmatpush.bf16.msra.mxu2 %v9537_v32  ;;  %12779 = vst [vmem:[#allocation22_spill] sm:$0xff] %v10498_v46  ;;  %v9550_v32 = vld [vmem:[#allocation7 + $0x7e8] sm:$0xff] }
 0x12f   :  { %2024 = vmatpush.bf16.msrb.mxu3 %v9582_v28  ;;  %2244 = vmatpush.bf16.msrb.mxu0 %v9526_v37  ;;  %12780 = vst [vmem:[#allocation23_spill] sm:$0xff] %v10501_v7  ;;  %v9631_v28 = vld [vmem:[#allocation7 + $0x670] sm:$0xff]  ;;  %v928_v37 = vsel %vm538_vm3, %v919_v53, %v923_v18  ;;  %v9600_v53 = vld [vmem:[#allocation7 + $0x878] sm:$0xff]  ;;  %v9646_v18 = vld [vmem:[#allocation7 + $0x6e8] sm:$0xff] }
 0x130   :  { %2257 = vmatpush.bf16.msrb.mxu1 %v9534_v38  ;;  %v931_v38 = vsel %vm540_vm4, %v924_v45, %v925_v20  ;;  %v9590_v45 = vld [vmem:[#allocation7 + $0x828] sm:$0xff]  ;;  %vm10678_vm4 = vmand %vm542_vm6, %vm4223_vm2 }
 0x131   :  { %2276 = vmatmul.bf16.vlgmr.msra.gmra.mxu2 %v2044_v24  ;;  %v9623_v24 = vld [vmem:[#allocation7 + $0x630] sm:$0xff]  ;;  %v9598_v20 = vld [vmem:[#allocation7 + $0x868] sm:$0xff] }
 0x132   :  { %2657 = vmatpush.bf16.msrb.mxu2 %v9640_v40  ;;  %v9622_v40 = vld [vmem:[#allocation7 + $0x628] sm:$0xff] }
 0x133   :  { %2025 = vmatpush.bf16.msrb.mxu3 %v9581_v43  ;;  %2245 = vmatpush.bf16.msrb.mxu0 %v9525_v34  ;;  %v9630_v43 = vld [vmem:[#allocation7 + $0x668] sm:$0xff]  ;;  %v9608_v34 = vld [vmem:[#allocation7 + $0x8b8] sm:$0xff] }
 0x134   :  { %v10480_v51 = vld [vmem:[#allocation1] sm:$0xff]  ;;  %v10482_v52 = vld [vmem:[#allocation1 + $0x9] sm:$0xff]  ;;  %v10484_v54 = vld [vmem:[#allocation1 + $0x12] sm:$0xff]  ;;  %2258 = vmatpush.bf16.msrb.mxu1 %v9533_v44 }
 0x135   :  { %v10487_v59 = vld [vmem:[#allocation1 + $0x1b] sm:$0xff] }
 0x136   :  { %2658 = vmatpush.bf16.msrb.mxu2 %v9639_v41  ;;  %2683 = vst [vmem:[#allocation1] ss:$9 sm:$0xff] %v10425_v29  ;;  %v9549_v44 = vld [vmem:[#allocation7 + $0x7e0] sm:$0xff] }
 0x137   :  { %2026 = vmatpush.bf16.msrb.mxu3 %v9580_v42  ;;  %2685 = vst [vmem:[#allocation1 + $0x1] ss:$9 sm:$0xff] %v10433_v23  ;;  %2246 = vmatpush.bf16.msrb.mxu0 %v9524_v39  ;;  %v9621_v39 = vld [vmem:[#allocation7 + $0x620] sm:$0xff] }
 0x138   :  { %2687 = vst [vmem:[#allocation1 + $0x2] ss:$9 sm:$0xff] %v10437_v26  ;;  %2259 = vmatpush.bf16.msrb.mxu1 %v9532_v49  ;;  %v9629_v49 = vld [vmem:[#allocation7 + $0x660] sm:$0xff] }
 0x139   :  { %2689 = vst [vmem:[#allocation1 + $0x3] ss:$9 sm:$0xff] %v10441_v50 }
 0x13a   :  { %2659 = vmatpush.bf16.msrb.mxu2 %v9638_v60  ;;  %v9548_v60 = vld [vmem:[#allocation7 + $0x7d8] sm:$0xff] }
 0x13b   :  { %2027 = vmatpush.bf16.msrb.mxu3 %v9579_v62  ;;  %2247 = vmatpush.bf16.msrb.mxu0 %v9523_v35  ;;  %v9620_v62 = vld [vmem:[#allocation7 + $0x618] sm:$0xff] }
 0x13c   :  { %2260 = vmatpush.bf16.msrb.mxu1 %v9531_v63  ;;  %v9628_v35 = vld [vmem:[#allocation7 + $0x658] sm:$0xff]  ;;  %v9606_v63 = vld [vmem:[#allocation7 + $0x8a8] sm:$0xff] }
 0x13e   :  { %2660 = vmatpush.bf16.msrb.mxu2 %v9637_v1  ;;  %v9627_v1 = vld [vmem:[#allocation7 + $0x650] sm:$0xff] }
 0x13f   :  { %2028 = vmatpush.bf16.msrb.mxu3 %v9578_v2  ;;  %2248 = vmatpush.bf16.msrb.mxu0 %v9522_v3  ;;  %v9605_v2 = vld [vmem:[#allocation7 + $0x8a0] sm:$0xff] }
 0x140   :  { %v10503_v11 = vld [vmem:[#allocation1] sm:$0xff]  ;;  %v10505_v33 = vld [vmem:[#allocation1 + $0x9] sm:$0xff]  ;;  %v10507_v12 = vld [vmem:[#allocation1 + $0x12] sm:$0xff]  ;;  %2261 = vmatpush.bf16.msrb.mxu1 %v9530_v4 }
 0x141   :  { %v10511_v14 = vld [vmem:[#allocation1 + $0x1b] sm:$0xff] }
 0x142   :  { %2661 = vmatpush.bf16.msrb.mxu2 %v9636_v6  ;;  %3007 = vst [vmem:[#allocation1] ss:$9 sm:$0xff] %v10433_v23  ;;  %v9618_v6 = vld [vmem:[#allocation7 + $0x608] sm:$0xff] }
 0x143   :  { %2029 = vmatpush.bf16.msrb.mxu3 %v9577_v30  ;;  %3009 = vst [vmem:[#allocation1 + $0x1] ss:$9 sm:$0xff] %v10454_v48  ;;  %2249 = vmatpush.bf16.msrb.mxu0 %v9521_v8  ;;  %v9626_v30 = vld [vmem:[#allocation7 + $0x648] sm:$0xff]  ;;  %v9604_v8 = vld [vmem:[#allocation7 + $0x898] sm:$0xff] }
 0x144   :  { %3011 = vst [vmem:[#allocation1 + $0x2] ss:$9 sm:$0xff] %v10441_v50  ;;  %2262 = vmatpush.bf16.msrb.mxu1 %v9529_v9  ;;  %v9545_v9 = vld [vmem:[#allocation7 + $0x7c0] sm:$0xff] }
 0x145   :  { %3013 = vst [vmem:[#allocation1 + $0x3] ss:$9 sm:$0xff] %v10454_v48  ;;  %v9633_v48 = vld [vmem:[#allocation7 + $0x680] sm:$0xff] }
 0x146   :  { %2662 = vmatpush.bf16.msrb.mxu2 %v9635_v15  ;;  %2030 = vmatmul.bf16.vlgmr.msrb.gmra.mxu3 %v10463_v47  ;;  %v932_v47 = vsel %vm542_vm6, %v928_v37, %v931_v38  ;;  %v9625_v15 = vld [vmem:[#allocation7 + $0x640] sm:$0xff]  ;;  %v9596_v37 = vld [vmem:[#allocation7 + $0x858] sm:$0xff]  ;;  %v9670_v38 = vld [vmem:[#allocation7 + $0x2a8] sm:$0xff] }
 0x147   :  { %2281 = vmatpush.bf16.msra.mxu3 %v9552_v10  ;;  %2631 = vmatpush.bf16.msra.mxu0 %v9624_v16  ;;  %v9617_v10 = vld [vmem:[#allocation7 + $0x600] sm:$0xff]  ;;  %v9603_v16 = vld [vmem:[#allocation7 + $0x890] sm:$0xff] }
 0x148   :  { %2644 = vmatpush.bf16.msra.mxu1 %v9632_v17  ;;  %2250 = vmatmul.bf16.vlgmr.msrb.gmra.mxu0 %v10469_v22  ;;  %v9647_v17 = vld [vmem:[#allocation7 + $0x6f0] sm:$0xff] }
 0x149   :  { %2263 = vmatmul.bf16.vlgmr.msrb.gmra.mxu1 %v10471_v31 }
 0x14a   :  { %2663 = vmatpush.bf16.msrb.mxu2 %v9634_v21  ;;  %v9672_v21 = vld [vmem:[#allocation7 + $0x2b8] sm:$0xff] }
 0x14b   :  { %2282 = vmatpush.bf16.msra.mxu3 %v9551_v19  ;;  %2632 = vmatpush.bf16.msra.mxu0 %v9623_v24  ;;  %v9601_v19 = vld [vmem:[#allocation7 + $0x880] sm:$0xff] }
 0x14c   :  { %2645 = vmatpush.bf16.msra.mxu1 %v9631_v28  ;;  %v10526_v41 = vld [vmem:[#allocation1] sm:$0xff]  ;;  %v10528_v22 = vld [vmem:[#allocation1 + $0x9] sm:$0xff]  ;;  %v10530_v31 = vld [vmem:[#allocation1 + $0x12] sm:$0xff] }
 0x14d   :  { %v10532_v42 = vld [vmem:[#allocation1 + $0x1b] sm:$0xff] }
 0x14e   :  { %2664 = vmatpush.bf16.msrb.mxu2 %v9633_v48  ;;  %3331 = vst [vmem:[#allocation1] ss:$9 sm:$0xff] %v10395_v55  ;;  %v9547_v55 = vld [vmem:[#allocation7 + $0x7d0] sm:$0xff]  ;;  %v9645_v24 = vld [vmem:[#allocation7 + $0x6e0] sm:$0xff] }
 0x14f   :  { %2283 = vmatpush.bf16.msra.mxu3 %v9550_v32  ;;  %2633 = vmatpush.bf16.msra.mxu0 %v9622_v40  ;;  %3333 = vst [vmem:[#allocation1 + $0x1] ss:$9 sm:$0xff] %v932_v47  ;;  %v9589_v28 = vld [vmem:[#allocation7 + $0x820] sm:$0xff]  ;;  %v9588_v32 = vld [vmem:[#allocation7 + $0x818] sm:$0xff]  ;;  %v9643_v48 = vld [vmem:[#allocation7 + $0x6d0] sm:$0xff] }
 0x150   :  { %2646 = vmatpush.bf16.msra.mxu1 %v9630_v43  ;;  %3335 = vst [vmem:[#allocation1 + $0x2] ss:$9 sm:$0xff] %v10399_v58  ;;  %v9546_v58 = vld [vmem:[#allocation7 + $0x7c8] sm:$0xff]  ;;  %v9587_v40 = vld [vmem:[#allocation7 + $0x810] sm:$0xff] }
 0x151   :  { %2665 = vmatmul.bf16.vlgmr.msrb.gmra.mxu2 %v10484_v54  ;;  %3337 = vst [vmem:[#allocation1 + $0x3] ss:$9 sm:$0xff] %v932_v47  ;;  %v9595_v43 = vld [vmem:[#allocation7 + $0x850] sm:$0xff]  ;;  %v9594_v47 = vld [vmem:[#allocation7 + $0x848] sm:$0xff] }
 0x152   :  { %2916 = vmatpush.bf16.msra.mxu2 %v9608_v34  ;;  %v9669_v34 = vld [vmem:[#allocation7 + $0x2a0] sm:$0xff] }
 0x153   :  { %2284 = vmatpush.bf16.msra.mxu3 %v9549_v44  ;;  %2634 = vmatpush.bf16.msra.mxu0 %v9621_v39  ;;  %v9642_v44 = vld [vmem:[#allocation7 + $0x6c8] sm:$0xff]  ;;  %v9668_v39 = vld [vmem:[#allocation7 + $0x298] sm:$0xff] }
 0x154   :  { %2647 = vmatpush.bf16.msra.mxu1 %v9629_v49  ;;  %v9641_v49 = vld [vmem:[#allocation7 + $0x6c0] sm:$0xff] }
 0x156   :  { %2917 = vmatpush.bf16.msra.mxu2 %v9607_v56  ;;  %v9616_v56 = vld [vmem:[#allocation7 + $0x8f8] sm:$0xff] }
 0x157   :  { %2285 = vmatpush.bf16.msra.mxu3 %v9548_v60  ;;  %2635 = vmatpush.bf16.msra.mxu0 %v9620_v62  ;;  %v9585_v60 = vld [vmem:[#allocation7 + $0x800] sm:$0xff] }
 0x158   :  { %2648 = vmatpush.bf16.msra.mxu1 %v9628_v35  ;;  %v10537_v3 = vld [vmem:[#allocation1] sm:$0xff]  ;;  %v10539_v54 = vld [vmem:[#allocation1 + $0x9] sm:$0xff]  ;;  %v10541_v4 = vld [vmem:[#allocation1 + $0x12] sm:$0xff] }
 0x159   :  { %v10543_v5 = vld [vmem:[#allocation1 + $0x1b] sm:$0xff]  ;;  %v9667_v35 = vld [vmem:[#allocation7 + $0x290] sm:$0xff] }
 0x15a   :  { %2918 = vmatpush.bf16.msra.mxu2 %v9606_v63  ;;  %3595 = vst [vmem:[#allocation1] ss:$9 sm:$0xff] %v10425_v29  ;;  %v9592_v29 = vld [vmem:[#allocation7 + $0x838] sm:$0xff]  ;;  %v9593_v62 = vld [vmem:[#allocation7 + $0x840] sm:$0xff] }
 0x15b   :  { %2286 = vmatpush.bf16.msra.mxu3 %v9547_v55  ;;  %2636 = vmatpush.bf16.msra.mxu0 %v9619_v0  ;;  %3597 = vst [vmem:[#allocation1 + $0x1] ss:$9 sm:$0xff] %v10433_v23  ;;  %v9602_v23 = vld [vmem:[#allocation7 + $0x888] sm:$0xff]  ;;  %v9656_v63 = vld [vmem:[#allocation7 + $0x238] sm:$0xff]  ;;  %v9615_v0 = vld [vmem:[#allocation7 + $0x8f0] sm:$0xff] }
 0x15c   :  { %2649 = vmatpush.bf16.msra.mxu1 %v9627_v1  ;;  %3599 = vst [vmem:[#allocation1 + $0x2] ss:$9 sm:$0xff] %v10437_v26  ;;  %v9591_v26 = vld [vmem:[#allocation7 + $0x830] sm:$0xff]  ;;  %v9664_v55 = vld [vmem:[#allocation7 + $0x278] sm:$0xff]  ;;  %v9666_v1 = vld [vmem:[#allocation7 + $0x288] sm:$0xff] }
 0x15d   :  { %3601 = vst [vmem:[#allocation1 + $0x3] ss:$9 sm:$0xff] %v10441_v50  ;;  %v9599_v50 = vld [vmem:[#allocation7 + $0x870] sm:$0xff] }
 0x15e   :  { %2919 = vmatpush.bf16.msra.mxu2 %v9605_v2  ;;  %v9655_v2 = vld [vmem:[#allocation7 + $0x230] sm:$0xff] }
 0x15f   :  { %2287 = vmatpush.bf16.msra.mxu3 %v9546_v58  ;;  %2637 = vmatpush.bf16.msra.mxu0 %v9618_v6  ;;  %v9663_v58 = vld [vmem:[#allocation7 + $0x270] sm:$0xff] }
 0x160   :  { %2650 = vmatpush.bf16.msra.mxu1 %v9626_v30  ;;  %v9614_v30 = vld [vmem:[#allocation7 + $0x8e8] sm:$0xff] }
 0x162   :  { %2920 = vmatpush.bf16.msra.mxu2 %v9604_v8 }
 0x163   :  { %2288 = vmatpush.bf16.msra.mxu3 %v9545_v9  ;;  %2638 = vmatpush.bf16.msra.mxu0 %v9617_v10  ;;  %v9665_v9 = vld [vmem:[#allocation7 + $0x280] sm:$0xff]  ;;  %v9654_v10 = vld [vmem:[#allocation7 + $0x228] sm:$0xff] }
 0x164   :  { %2651 = vmatpush.bf16.msra.mxu1 %v9625_v15  ;;  %v9662_v15 = vld [vmem:[#allocation7 + $0x268] sm:$0xff] }
 0x166   :  { %2921 = vmatpush.bf16.msra.mxu2 %v9603_v16  ;;  %2289 = vmatmul.bf16.vlgmr.msra.gmra.mxu3 %v10473_v25  ;;  %v9597_v25 = vld [vmem:[#allocation7 + $0x860] sm:$0xff]  ;;  %v9704_v16 = vld [vmem:[#allocation7 + $0xb8] sm:$0xff] }
 0x167   :  { %2670 = vmatpush.bf16.msrb.mxu3 %v9648_v13  ;;  %2890 = vmatpush.bf16.msrb.mxu0 %v9592_v29  ;;  %v9613_v29 = vld [vmem:[#allocation7 + $0x8e0] sm:$0xff] }
 0x168   :  { %2903 = vmatpush.bf16.msrb.mxu1 %v9600_v53  ;;  %2639 = vmatmul.bf16.vlgmr.msra.gmra.mxu0 %v10480_v51  ;;  %v9671_v51 = vld [vmem:[#allocation7 + $0x2b0] sm:$0xff] }
 0x169   :  { %2652 = vmatmul.bf16.vlgmr.msra.gmra.mxu1 %v10482_v52  ;;  %v9644_v52 = vld [vmem:[#allocation7 + $0x6d8] sm:$0xff] }
 0x16a   :  { %2922 = vmatpush.bf16.msra.mxu2 %v9602_v23 }
 0x16b   :  { %2671 = vmatpush.bf16.msrb.mxu3 %v9647_v17  ;;  %2891 = vmatpush.bf16.msrb.mxu0 %v9591_v26  ;;  %v9612_v26 = vld [vmem:[#allocation7 + $0x8d8] sm:$0xff] }
 0x16c   :  { %2904 = vmatpush.bf16.msrb.mxu1 %v9599_v50 }
 0x16e   :  { %2923 = vmatpush.bf16.msra.mxu2 %v9601_v19  ;;  %v9660_v19 = vld [vmem:[#allocation7 + $0x258] sm:$0xff] }
 0x16f   :  { %2672 = vmatpush.bf16.msrb.mxu3 %v9646_v18  ;;  %2892 = vmatpush.bf16.msrb.mxu0 %v9590_v45  ;;  %v9652_v18 = vld [vmem:[#allocation7 + $0x218] sm:$0xff]  ;;  %v9702_v45 = vld [vmem:[#allocation7 + $0xa8] sm:$0xff] }
 0x170   :  { %2905 = vmatpush.bf16.msrb.mxu1 %v9598_v20  ;;  %v9611_v20 = vld [vmem:[#allocation7 + $0x8d0] sm:$0xff] }
 0x171   :  { %2924 = vmatmul.bf16.vlgmr.msra.gmra.mxu2 %v10507_v12  ;;  %v9586_v12 = vld [vmem:[#allocation7 + $0x808] sm:$0xff] }
 0x172   :  { %3240 = vmatpush.bf16.msrb.mxu2 %v9672_v21  ;;  %v9651_v21 = vld [vmem:[#allocation7 + $0x210] sm:$0xff] }
 0x173   :  { %2673 = vmatpush.bf16.msrb.mxu3 %v9645_v24  ;;  %2893 = vmatpush.bf16.msrb.mxu0 %v9589_v28  ;;  %v9659_v24 = vld [vmem:[#allocation7 + $0x250] sm:$0xff]  ;;  %v9701_v28 = vld [vmem:[#allocation7 + $0xa0] sm:$0xff] }
 0x174   :  { %2906 = vmatpush.bf16.msrb.mxu1 %v9597_v25 }
 0x176   :  { %3241 = vmatpush.bf16.msrb.mxu2 %v9671_v51 }
 0x177   :  { %2674 = vmatpush.bf16.msrb.mxu3 %v9644_v52  ;;  %2894 = vmatpush.bf16.msrb.mxu0 %v9588_v32  ;;  %v9650_v52 = vld [vmem:[#allocation7 + $0x208] sm:$0xff] }
 0x178   :  { %2907 = vmatpush.bf16.msrb.mxu1 %v9596_v37  ;;  %v9658_v37 = vld [vmem:[#allocation7 + $0x248] sm:$0xff] }
 0x17a   :  { %3242 = vmatpush.bf16.msrb.mxu2 %v9670_v38  ;;  %v9700_v38 = vld [vmem:[#allocation7 + $0x98] sm:$0xff] }
 0x17b   :  { %2675 = vmatpush.bf16.msrb.mxu3 %v9643_v48  ;;  %2895 = vmatpush.bf16.msrb.mxu0 %v9587_v40  ;;  %v9609_v40 = vld [vmem:[#allocation7 + $0x8c0] sm:$0xff] }
 0x17c   :  { %2908 = vmatpush.bf16.msrb.mxu1 %v9595_v43  ;;  %v9649_v43 = vld [vmem:[#allocation7 + $0x200] sm:$0xff] }
 0x17e   :  { %3243 = vmatpush.bf16.msrb.mxu2 %v9669_v34  ;;  %v9680_v34 = vld [vmem:[#allocation7 + $0x2f8] sm:$0xff] }
 0x17f   :  { %2676 = vmatpush.bf16.msrb.mxu3 %v9642_v44  ;;  %2896 = vmatpush.bf16.msrb.mxu0 %v9586_v12  ;;  %v9657_v44 = vld [vmem:[#allocation7 + $0x240] sm:$0xff]  ;;  %v9699_v12 = vld [vmem:[#allocation7 + $0x90] sm:$0xff] }
 0x180   :  { %2909 = vmatpush.bf16.msrb.mxu1 %v9594_v47 }
 0x182   :  { %3244 = vmatpush.bf16.msrb.mxu2 %v9668_v39  ;;  %v1344_v6 = vpop.f32.mrf.mxu0  ;;  %v1357_v8 = vpop.f32.mrf.mxu1  ;;  %v9688_v39 = vld [vmem:[#allocation7 + $0x38] sm:$0xff] }
 0x183   :  { %2677 = vmatpush.bf16.msrb.mxu3 %v9641_v49  ;;  %2897 = vmatpush.bf16.msrb.mxu0 %v9585_v60  ;;  %v1358_v13 = vadd.f32 %v1357_v8, %v1344_v6  ;;  %v9696_v49 = vld [vmem:[#allocation7 + $0x78] sm:$0xff]  ;;  %v9678_v6 = vld [vmem:[#allocation7 + $0x2e8] sm:$0xff]  ;;  %v9697_v8 = vld [vmem:[#allocation7 + $0x80] sm:$0xff] }
 0x184   :  { %2910 = vmatpush.bf16.msrb.mxu1 %v9593_v62 }
 0x186   :  { %3245 = vmatpush.bf16.msrb.mxu2 %v9667_v35  ;;  %2678 = vmatmul.bf16.vlgmr.msrb.gmra.mxu3 %v10487_v59  ;;  %v9653_v59 = vld [vmem:[#allocation7 + $0x220] sm:$0xff]  ;;  %v9679_v35 = vld [vmem:[#allocation7 + $0x2f0] sm:$0xff] }
 0x187   :  { %2929 = vmatpush.bf16.msra.mxu3 %v9616_v56  ;;  %3214 = vmatpush.bf16.msra.mxu0 %v9656_v63 }
 0x188   :  { %3227 = vmatpush.bf16.msra.mxu1 %v9664_v55  ;;  %2898 = vmatmul.bf16.vlgmr.msrb.gmra.mxu0 %v10503_v11  ;;  %v9661_v11 = vld [vmem:[#allocation7 + $0x260] sm:$0xff]  ;;  %v9698_v55 = vld [vmem:[#allocation7 + $0x88] sm:$0xff] }
 0x189   :  { %2911 = vmatmul.bf16.vlgmr.msrb.gmra.mxu1 %v10505_v33  ;;  %v9703_v33 = vld [vmem:[#allocation7 + $0xb0] sm:$0xff]  ;;  %v1370_v53 = vpop.f32.mrf.mxu3 }
 0x18a   :  { %3246 = vmatpush.bf16.msrb.mxu2 %v9666_v1  ;;  %v1371_v17 = vadd.f32 %v1370_v53, %v1358_v13  ;;  %v1346_v23 = vpop.f32.mrf.mxu0  ;;  %v1359_v50 = vpop.f32.mrf.mxu1  ;;  %v9687_v1 = vld [vmem:[#allocation7 + $0x30] sm:$0xff]  ;;  %v9694_v13 = vld [vmem:[#allocation7 + $0x68] sm:$0xff]  ;;  %v9676_v53 = vld [vmem:[#allocation7 + $0x2d8] sm:$0xff] }
 0x18b   :  { %2930 = vmatpush.bf16.msra.mxu3 %v9615_v0  ;;  %3215 = vmatpush.bf16.msra.mxu0 %v9655_v2  ;;  %v9695_v2 = vld [vmem:[#allocation7 + $0x70] sm:$0xff]  ;;  %v9692_v23 = vld [vmem:[#allocation7 + $0x58] sm:$0xff]  ;;  %v9446_v50 = vld [vmem:[#allocation7 + $0x4a8] sm:$0xff] }
 0x18c   :  { %3228 = vmatpush.bf16.msra.mxu1 %v9663_v58 }
 0x18e   :  { %3247 = vmatpush.bf16.msrb.mxu2 %v9665_v9 }
 0x18f   :  { %2931 = vmatpush.bf16.msra.mxu3 %v9614_v30  ;;  %3216 = vmatpush.bf16.msra.mxu0 %v9654_v10  ;;  %v9686_v10 = vld [vmem:[#allocation7 + $0x28] sm:$0xff] }
 0x190   :  { %3229 = vmatpush.bf16.msra.mxu1 %v9662_v15  ;;  %v9448_v15 = vld [vmem:[#allocation7 + $0x4b8] sm:$0xff] }
 0x191   :  { %3248 = vmatmul.bf16.vlgmr.msrb.gmra.mxu2 %v10530_v31  ;;  %v1372_v25 = vpop.f32.mrf.mxu3  ;;  %v9610_v31 = vld [vmem:[#allocation7 + $0x8c8] sm:$0xff] }
 0x192   :  { %3564 = vmatpush.bf16.msra.mxu2 %v9704_v16  ;;  %v1603_v51 = vpop.f32.mrf.mxu0  ;;  %v1616_v48 = vpop.f32.mrf.mxu1  ;;  %v9677_v16 = vld [vmem:[#allocation7 + $0x2e0] sm:$0xff] }
 0x193   :  { %2932 = vmatpush.bf16.msra.mxu3 %v9613_v29  ;;  %3217 = vmatpush.bf16.msra.mxu0 %v9653_v59  ;;  %v9445_v25 = vld [vmem:[#allocation7 + $0x4a0] sm:$0xff] }
 0x194   :  { %3230 = vmatpush.bf16.msra.mxu1 %v9661_v11  ;;  %v1629_v32 = vpop.f32.mrf.mxu2  ;;  %v9447_v11 = vld [vmem:[#allocation7 + $0x4b0] sm:$0xff] }
 0x196   :  { %3565 = vmatpush.bf16.msra.mxu2 %v9703_v33 }
 0x197   :  { %2933 = vmatpush.bf16.msra.mxu3 %v9612_v26  ;;  %3218 = vmatpush.bf16.msra.mxu0 %v9652_v18 }
 0x198   :  { %3231 = vmatpush.bf16.msra.mxu1 %v9660_v19  ;;  %v9675_v19 = vld [vmem:[#allocation7 + $0x2d0] sm:$0xff] }
 0x199   :  { %v1383_v47 = vpop.f32.mrf.mxu3 }
 0x19a   :  { %3566 = vmatpush.bf16.msra.mxu2 %v9702_v45  ;;  %v1384_v56 = vadd.f32 %v1383_v47, %v1371_v17  ;;  %v1605_v60 = vpop.f32.mrf.mxu0  ;;  %v1618_v0 = vpop.f32.mrf.mxu1  ;;  %v9684_v17 = vld [vmem:[#allocation7 + $0x18] sm:$0xff] }
 0x19b   :  { %2934 = vmatpush.bf16.msra.mxu3 %v9611_v20  ;;  %3219 = vmatpush.bf16.msra.mxu0 %v9651_v21  ;;  %v9683_v21 = vld [vmem:[#allocation7 + $0x10] sm:$0xff]  ;;  %v9440_v47 = vld [vmem:[#allocation7 + $0x478] sm:$0xff]  ;;  %v9438_v0 = vld [vmem:[#allocation7 + $0x468] sm:$0xff] }
 0x19c   :  { %3232 = vmatpush.bf16.msra.mxu1 %v9659_v24  ;;  %v1604_v62 = vadd.f32 %v1603_v51, %v1384_v56  ;;  %v1631_v63 = vpop.f32.mrf.mxu2  ;;  %v9691_v24 = vld [vmem:[#allocation7 + $0x50] sm:$0xff]  ;;  %v9674_v51 = vld [vmem:[#allocation7 + $0x2c8] sm:$0xff] }
 0x19d   :  { %v9431_v56 = vld [vmem:[#allocation7 + $0x430] sm:$0xff]  ;;  %v9441_v63 = vld [vmem:[#allocation7 + $0x480] sm:$0xff] }
 0x19e   :  { %3567 = vmatpush.bf16.msra.mxu2 %v9701_v28  ;;  %v1617_v58 = vadd.f32 %v1616_v48, %v1604_v62  ;;  %v9439_v60 = vld [vmem:[#allocation7 + $0x470] sm:$0xff] }
 0x19f   :  { %2935 = vmatpush.bf16.msra.mxu3 %v9610_v31  ;;  %3220 = vmatpush.bf16.msra.mxu0 %v9650_v52  ;;  %v9682_v31 = vld [vmem:[#allocation7 + $0x8] sm:$0xff] }
 0x1a0   :  { %3233 = vmatpush.bf16.msra.mxu1 %v9658_v37  ;;  %v1630_v30 = vadd.f32 %v1629_v32, %v1617_v58  ;;  %v9690_v52 = vld [vmem:[#allocation7 + $0x48] sm:$0xff]  ;;  %v9444_v32 = vld [vmem:[#allocation7 + $0x498] sm:$0xff] }
 0x1a1   :  { %v1385_v9 = vpop.f32.mrf.mxu3 }
 0x1a2   :  { %3568 = vmatpush.bf16.msra.mxu2 %v9700_v38  ;;  %v9673_v38 = vld [vmem:[#allocation7 + $0x2c0] sm:$0xff] }
 0x1a3   :  { %2936 = vmatpush.bf16.msra.mxu3 %v9609_v40  ;;  %3221 = vmatpush.bf16.msra.mxu0 %v9649_v43  ;;  %v9712_v40 = vld [vmem:[#allocation7 + $0xf8] sm:$0xff]  ;;  %v9681_v43 = vld [vmem:[#allocation7] sm:$0xff] }
 0x1a4   :  { %3234 = vmatpush.bf16.msra.mxu1 %v9657_v44  ;;  %v2018_v29 = vpop.f32.mrf.mxu2  ;;  %v9443_v44 = vld [vmem:[#allocation7 + $0x490] sm:$0xff] }
 0x1a6   :  { %3569 = vmatpush.bf16.msra.mxu2 %v9699_v12  ;;  %2937 = vmatmul.bf16.vlgmr.msra.gmra.mxu3 %v10511_v14  ;;  %v1992_v14 = vpop.f32.mrf.mxu0  ;;  %v2005_v59 = vpop.f32.mrf.mxu1  ;;  %v9432_v12 = vld [vmem:[#allocation7 + $0x438] sm:$0xff] }
 0x1a7   :  { %3253 = vmatpush.bf16.msrb.mxu3 %v9680_v34  ;;  %3538 = vmatpush.bf16.msrb.mxu0 %v9688_v39  ;;  %v2006_v33 = vadd.f32 %v2005_v59, %v1992_v14  ;;  %v9689_v34 = vld [vmem:[#allocation7 + $0x40] sm:$0xff]  ;;  %v9711_v39 = vld [vmem:[#allocation7 + $0xf0] sm:$0xff] }
 0x1a8   :  { %3551 = vmatpush.bf16.msrb.mxu1 %v9696_v49  ;;  %3222 = vmatmul.bf16.vlgmr.msra.gmra.mxu0 %v10526_v41  ;;  %v9685_v41 = vld [vmem:[#allocation7 + $0x20] sm:$0xff]  ;;  %v9442_v49 = vld [vmem:[#allocation7 + $0x488] sm:$0xff] }
 0x1a9   :  { %3235 = vmatmul.bf16.vlgmr.msra.gmra.mxu1 %v10528_v22  ;;  %v9693_v22 = vld [vmem:[#allocation7 + $0x60] sm:$0xff]  ;;  %v10561_v26 = vadd.f32 %v2018_v29, %v2006_v33  ;;  %v1642_v18 = vpop.f32.mrf.mxu3  ;;  %v9434_v33 = vld [vmem:[#allocation7 + $0x448] sm:$0xff] }
 0x1aa   :  { %3570 = vmatpush.bf16.msra.mxu2 %v9698_v55  ;;  %v10563_v45 = vadd.f32 %v1642_v18, %v1630_v30  ;;  %v9430_v55 = vld [vmem:[#allocation7 + $0x428] sm:$0xff]  ;;  %v9428_v30 = vld [vmem:[#allocation7 + $0x418] sm:$0xff] }
 0x1ab   :  { %3254 = vmatpush.bf16.msrb.mxu3 %v9679_v35  ;;  %3539 = vmatpush.bf16.msrb.mxu0 %v9687_v1  ;;  %v9710_v35 = vld [vmem:[#allocation7 + $0xe8] sm:$0xff]  ;;  %v9709_v1 = vld [vmem:[#allocation7 + $0xe0] sm:$0xff]  ;;  %v9456_v18 = vld [vmem:[#allocation7 + $0x4f8] sm:$0xff] }
 0x1ac   :  { %3552 = vmatpush.bf16.msrb.mxu1 %v9695_v2  ;;  %v2020_v20 = vpop.f32.mrf.mxu2  ;;  %v9429_v2 = vld [vmem:[#allocation7 + $0x420] sm:$0xff] }
 0x1ad   :  { %v9455_v20 = vld [vmem:[#allocation7 + $0x4f0] sm:$0xff] }
 0x1ae   :  { %3571 = vmatpush.bf16.msra.mxu2 %v9697_v8  ;;  %v2007_v28 = vpop.f32.mrf.mxu1  ;;  %v9436_v8 = vld [vmem:[#allocation7 + $0x458] sm:$0xff] }
 0x1af   :  { %3255 = vmatpush.bf16.msrb.mxu3 %v9678_v6  ;;  %3540 = vmatpush.bf16.msrb.mxu0 %v9686_v10  ;;  %v3604_v6 = vld [vmem:[#allocation1 + $0x12] sm:$0xff]  ;;  %v9454_v28 = vld [vmem:[#allocation7 + $0x4e8] sm:$0xff] }
 0x1b0   :  { %3553 = vmatpush.bf16.msrb.mxu1 %v9694_v13  ;;  %v9707_v13 = vld [vmem:[#allocation7 + $0xd0] sm:$0xff] }
 0x1b1   :  { %3572 = vmatmul.bf16.vlgmr.msra.gmra.mxu2 %v10541_v4  ;;  %v1994_v4 = vpop.f32.mrf.mxu0  ;;  %v1644_v37 = vpop.f32.mrf.mxu3 }
 0x1b2   :  { %3828 = vmatpush.bf16.msrb.mxu2 %v9448_v15  ;;  %v9427_v15 = vld [vmem:[#allocation7 + $0x410] sm:$0xff]  ;;  %v3602_v4 = vld [vmem:[#allocation1] sm:$0xff] }
 0x1b3   :  { %3256 = vmatpush.bf16.msrb.mxu3 %v9677_v16  ;;  %3541 = vmatpush.bf16.msrb.mxu0 %v9685_v41  ;;  %v9435_v41 = vld [vmem:[#allocation7 + $0x450] sm:$0xff] }
 0x1b4   :  { %3554 = vmatpush.bf16.msrb.mxu1 %v9693_v22  ;;  %v10565_v48 = vpop.f32.mrf.mxu2  ;;  %v9706_v22 = vld [vmem:[#allocation7 + $0xc8] sm:$0xff] }
 0x1b6   :  { %3829 = vmatpush.bf16.msrb.mxu2 %v9447_v11  ;;  %v9426_v11 = vld [vmem:[#allocation7 + $0x408] sm:$0xff] }
 0x1b7   :  { %3257 = vmatpush.bf16.msrb.mxu3 %v9676_v53  ;;  %3542 = vmatpush.bf16.msrb.mxu0 %v9684_v17 }
 0x1b8   :  { %3555 = vmatpush.bf16.msrb.mxu1 %v9692_v23  ;;  %v9705_v23 = vld [vmem:[#allocation7 + $0xc0] sm:$0xff] }
 0x1ba   :  { %3830 = vmatpush.bf16.msrb.mxu2 %v9446_v50  ;;  %v9425_v50 = vld [vmem:[#allocation7 + $0x400] sm:$0xff] }
 0x1bb   :  { %3258 = vmatpush.bf16.msrb.mxu3 %v9675_v19  ;;  %3543 = vmatpush.bf16.msrb.mxu0 %v9683_v21  ;;  %v9433_v19 = vld [vmem:[#allocation7 + $0x440] sm:$0xff]  ;;  %v3603_v21 = vld [vmem:[#allocation1 + $0x9] sm:$0xff] }
 0x1bc   :  { %3556 = vmatpush.bf16.msrb.mxu1 %v9691_v24  ;;  %v2279_v62 = vpop.f32.mrf.mxu2 }
 0x1be   :  { %3831 = vmatpush.bf16.msrb.mxu2 %v9445_v25  ;;  %v9453_v25 = vld [vmem:[#allocation7 + $0x4e0] sm:$0xff] }
 0x1bf   :  { %3259 = vmatpush.bf16.msrb.mxu3 %v9674_v51  ;;  %3544 = vmatpush.bf16.msrb.mxu0 %v9682_v31 }
 0x1c0   :  { %3557 = vmatpush.bf16.msrb.mxu1 %v9690_v52 }
 0x1c2   :  { %3832 = vmatpush.bf16.msrb.mxu2 %v9444_v32  ;;  %v9452_v32 = vld [vmem:[#allocation7 + $0x4d8] sm:$0xff] }
 0x1c3   :  { %3260 = vmatpush.bf16.msrb.mxu3 %v9673_v38  ;;  %3545 = vmatpush.bf16.msrb.mxu0 %v9681_v43 }
 0x1c4   :  { %3558 = vmatpush.bf16.msrb.mxu1 %v9689_v34  ;;  %v9450_v34 = vld [vmem:[#allocation7 + $0x4c8] sm:$0xff] }
 0x1c6   :  { %3833 = vmatpush.bf16.msrb.mxu2 %v9443_v44  ;;  %3261 = vmatmul.bf16.vlgmr.msrb.gmra.mxu3 %v10532_v42  ;;  %v2251_v42 = vpop.f32.mrf.mxu0  ;;  %v2264_v58 = vpop.f32.mrf.mxu1 }
 0x1c7   :  { %3577 = vmatpush.bf16.msra.mxu3 %v9712_v40  ;;  %3802 = vmatpush.bf16.msra.mxu0 %v9432_v12  ;;  %v9449_v12 = vld [vmem:[#allocation7 + $0x4c0] sm:$0xff] }
 0x1c8   :  { %3815 = vmatpush.bf16.msra.mxu1 %v9440_v47  ;;  %3546 = vmatmul.bf16.vlgmr.msrb.gmra.mxu0 %v10537_v3  ;;  %v9437_v3 = vld [vmem:[#allocation7 + $0x460] sm:$0xff] }
 0x1c9   :  { %3559 = vmatmul.bf16.vlgmr.msrb.gmra.mxu1 %v10539_v54  ;;  %v9708_v54 = vld [vmem:[#allocation7 + $0xd8] sm:$0xff]  ;;  %v2031_v9 = vpop.f32.mrf.mxu3 }
 0x1ca   :  { %3834 = vmatpush.bf16.msrb.mxu2 %v9442_v49  ;;  %v2032_v10 = vadd.f32 %v2031_v9, %v10561_v26 }
 0x1cb   :  { %3578 = vmatpush.bf16.msra.mxu3 %v9711_v39  ;;  %3803 = vmatpush.bf16.msra.mxu0 %v9431_v56  ;;  %v3605_v39 = vld [vmem:[#allocation1 + $0x1b] sm:$0xff] }
 0x1cc   :  { %3816 = vmatpush.bf16.msra.mxu1 %v9439_v60  ;;  %v2252_v16 = vadd.f32 %v2251_v42, %v2032_v10 }
 0x1ce   :  { %3835 = vmatpush.bf16.msrb.mxu2 %v9441_v63  ;;  %v2253_v29 = vpop.f32.mrf.mxu0  ;;  %v2266_v14 = vpop.f32.mrf.mxu1  ;;  %v2265_v59 = vadd.f32 %v2264_v58, %v2252_v16 }
 0x1cf   :  { %3579 = vmatpush.bf16.msra.mxu3 %v9710_v35  ;;  %3804 = vmatpush.bf16.msra.mxu0 %v9430_v55 }
 0x1d0   :  { %3817 = vmatpush.bf16.msra.mxu1 %v9438_v0  ;;  %v2278_v53 = vadd.f32 %v10565_v48, %v2265_v59  ;;  %v9451_v48 = vld [vmem:[#allocation7 + $0x4d0] sm:$0xff] }
 0x1d1   :  { %3836 = vmatmul.bf16.vlgmr.msrb.gmra.mxu2 %v3604_v6  ;;  %v2033_v17 = vpop.f32.mrf.mxu3 }
 0x1d3   :  { %3580 = vmatpush.bf16.msra.mxu3 %v9709_v1  ;;  %3805 = vmatpush.bf16.msra.mxu0 %v9429_v2 }
 0x1d4   :  { %3818 = vmatpush.bf16.msra.mxu1 %v9437_v3  ;;  %v2666_v26 = vpop.f32.mrf.mxu2 }
 0x1d7   :  { %3581 = vmatpush.bf16.msra.mxu3 %v9708_v54  ;;  %3806 = vmatpush.bf16.msra.mxu0 %v9428_v30 }
 0x1d8   :  { %3819 = vmatpush.bf16.msra.mxu1 %v9436_v8 }
 0x1db   :  { %3582 = vmatpush.bf16.msra.mxu3 %v9707_v13  ;;  %3807 = vmatpush.bf16.msra.mxu0 %v9427_v15 }
 0x1dc   :  { %3820 = vmatpush.bf16.msra.mxu1 %v9435_v41  ;;  %v2668_v24 = vpop.f32.mrf.mxu2 }
 0x1df   :  { %3583 = vmatpush.bf16.msra.mxu3 %v9706_v22  ;;  %3808 = vmatpush.bf16.msra.mxu0 %v9426_v11 }
 0x1e0   :  { %3821 = vmatpush.bf16.msra.mxu1 %v9434_v33 }
 0x1e3   :  { %3584 = vmatpush.bf16.msra.mxu3 %v9705_v23  ;;  %3809 = vmatpush.bf16.msra.mxu0 %v9425_v50 }
 0x1e4   :  { %3822 = vmatpush.bf16.msra.mxu1 %v9433_v19 }
 0x1e5   :  { %v2640_v51 = vpop.f32.mrf.mxu0 }
 0x1e6   :  { %3585 = vmatmul.bf16.vlgmr.msra.gmra.mxu3 %v10543_v5  ;;  %3810 = vmatmul.bf16.vlgmr.msra.gmra.mxu0 %v3602_v4  ;;  %v2653_v31 = vpop.f32.mrf.mxu1 }
 0x1e7   :  { %3841 = vmatpush.bf16.msrb.mxu3 %v9456_v18  ;;  %3823 = vmatmul.bf16.vlgmr.msra.gmra.mxu1 %v3603_v21  ;;  %v2654_v52 = vadd.f32 %v2653_v31, %v2640_v51 }
 0x1e9   :  { %v2667_v37 = vadd.f32 %v2666_v26, %v2654_v52  ;;  %v2290_v38 = vpop.f32.mrf.mxu3  ;;  %v9805_v52 = vld [vmem:[#allocation9] ss:$0 sm:$0xff] }
 0x1ea   :  { %v2291_v40 = vadd.f32 %v2290_v38, %v2278_v53 }
 0x1eb   :  { %3842 = vmatpush.bf16.msrb.mxu3 %v9455_v20 }
 0x1ed   :  { %v2642_v43 = vpop.f32.mrf.mxu0 }
 0x1ee   :  { %v2655_v5 = vpop.f32.mrf.mxu1 }
 0x1ef   :  { %3843 = vmatpush.bf16.msrb.mxu3 %v9454_v28 }
 0x1f1   :  { %v2292_v44 = vpop.f32.mrf.mxu3 }
 0x1f2   :  { %v10120_v44 = vmov 32.0  }
 0x1f3   :  { %3844 = vmatpush.bf16.msrb.mxu3 %v9453_v25  ;;  %9808 = vrcp.f32 %v10120_v44 }
 0x1f4   :  { %v2925_v47 = vpop.f32.mrf.mxu2 }
 0x1f7   :  { %3845 = vmatpush.bf16.msrb.mxu3 %v9452_v32  ;;  %v10574_v32 = vadd.f32 %v9805_v52, %v10563_v45 }
 0x1f9   :  { %v3866_v38 = vsel %vm3857_vm9, %v10574_v32, 0.0 }
 0x1fb   :  { %3846 = vmatpush.bf16.msrb.mxu3 %v9451_v48 }
 0x1fc   :  { %v2927_v49 = vpop.f32.mrf.mxu2 }
 0x1ff   :  { %3847 = vmatpush.bf16.msrb.mxu3 %v9450_v34  ;;  %v3867_v34 = vrot.slane %v3866_v38, 4 }
 0x203   :  { %3848 = vmatpush.bf16.msrb.mxu3 %v9449_v12 }
 0x205   :  { %v2899_v56 = vpop.f32.mrf.mxu0 }
 0x206   :  { %3849 = vmatmul.bf16.vlgmr.msrb.gmra.mxu3 %v3605_v39  ;;  %v2912_v60 = vpop.f32.mrf.mxu1  ;;  %v3868_v39 = vadd.f32 %v3867_v34, %v3866_v38 }
 0x209   :  { %v2679_v62 = vpop.f32.mrf.mxu3 }
 0x20a   :  { %v2680_v35 = vadd.f32 %v2679_v62, %v2667_v37  ;;  %v10576_v37 = vadd.f32 %v9805_v52, %v2291_v40 }
 0x20c   :  { %v2900_v63 = vadd.f32 %v2899_v56, %v2680_v35  ;;  %v3874_v5 = vsel %vm3857_vm9, %v10576_v37, 0.0  ;;  %v9809_v56 = vpop.eup %9808 }
 0x20d   :  { %v2901_v55 = vpop.f32.mrf.mxu0  ;;  %vm3895_vm10 = vweird.f32 %v9809_v56 }
 0x20e   :  { %v2914_v0 = vpop.f32.mrf.mxu1  ;;  %v2913_v1 = vadd.f32 %v2912_v60, %v2900_v63  ;;  %v3869_v63 = vrot.slane %v3868_v39, 2 }
 0x210   :  { %v2926_v2 = vadd.f32 %v2925_v47, %v2913_v1  ;;  %v3875_v47 = vrot.slane %v3874_v5, 4  ;;  %v3891_v1 = vmul.f32 32.0, %v9809_v56 }
 0x211   :  { %v2681_v42 = vpop.f32.mrf.mxu3 }
 0x212   :  { %v3876_v60 = vadd.f32 %v3875_v47, %v3874_v5 }
 0x214   :  { %v3249_v58 = vpop.f32.mrf.mxu2 }
 0x21c   :  { %v3251_v3 = vpop.f32.mrf.mxu2 }
 0x225   :  { %v3223_v6 = vpop.f32.mrf.mxu0 }
 0x226   :  { %v3236_v54 = vpop.f32.mrf.mxu1 }
 0x227   :  { %v3237_v30 = vadd.f32 %v3236_v54, %v3223_v6  ;;  %v3892_v54 = vsub.f32 1.0, %v3891_v1 }
 0x229   :  { %v3250_v8 = vadd.f32 %v3249_v58, %v3237_v30  ;;  %v2938_v9 = vpop.f32.mrf.mxu3  ;;  %v3870_v58 = vadd.f32 %v3869_v63, %v3868_v39 }
 0x22a   :  { %v2939_v10 = vadd.f32 %v2938_v9, %v2926_v2  ;;  %v3877_v2 = vrot.slane %v3876_v60, 2 }
 0x22c   :  { %v3878_v30 = vadd.f32 %v3877_v2, %v3876_v60 }
 0x22d   :  { %v3225_v13 = vpop.f32.mrf.mxu0 }
 0x22e   :  { %v3238_v15 = vpop.f32.mrf.mxu1 }
 0x231   :  { %v2940_v16 = vpop.f32.mrf.mxu3 }
 0x232   :  { %v3893_v16 = vmul.f32 %v9809_v56, %v3892_v54 }
 0x234   :  { %v3573_v29 = vpop.f32.mrf.mxu2 }
 0x23c   :  { %v3575_v14 = vpop.f32.mrf.mxu2 }
 0x245   :  { %v3547_v41 = vpop.f32.mrf.mxu0 }
 0x246   :  { %v3560_v22 = vpop.f32.mrf.mxu1 }
 0x247   :  { %v3561_v18 = vadd.f32 %v3560_v22, %v3547_v41 }
 0x249   :  { %v3262_v59 = vpop.f32.mrf.mxu3  ;;  %v3574_v4 = vadd.f32 %v3573_v29, %v3561_v18  ;;  %v3879_v29 = vrot.slane %v3878_v30, 1 }
 0x24a   :  { %v3263_v11 = vadd.f32 %v3262_v59, %v3250_v8 }
 0x24c   :  { %v3266_v33 = vadd.f32 %v3263_v11, %v2939_v10  ;;  %v3871_v10 = vrot.slane %v3870_v58, 1  ;;  %v3894_v11 = vadd.f32 %v9809_v56, %v3893_v16 }
 0x24d   :  { %v3549_v53 = vpop.f32.mrf.mxu0 }
 0x24e   :  { %v3562_v17 = vpop.f32.mrf.mxu1  ;;  %v3872_v41 = vadd.f32 %v3871_v10, %v3870_v58 }
 0x251   :  { %v3264_v23 = vpop.f32.mrf.mxu3 }
 0x254   :  { %v3837_v26 = vpop.f32.mrf.mxu2 }
 0x25c   :  { %v3839_v50 = vpop.f32.mrf.mxu2 }
 0x263   :  { %v3811_v19 = vpop.f32.mrf.mxu0 }
 0x264   :  { %v3824_v20 = vpop.f32.mrf.mxu1  ;;  %v3812_v48 = vadd.f32 %v9805_v52, %v3811_v19 }
 0x266   :  { %v3825_v12 = vadd.f32 %v3824_v20, %v3812_v48 }
 0x268   :  { %v3838_v49 = vadd.f32 %v3837_v26, %v3825_v12  ;;  %v3896_v26 = vsel %vm3895_vm10, %v9809_v56, %v3894_v11  ;;  %v3939_v11 = vld [vmem:[%s12712_s5] sm:$0x1] }
 0x269   :  { %v3586_v21 = vpop.f32.mrf.mxu3 }
 0x26a   :  { %v3587_v24 = vadd.f32 %v3586_v21, %v3574_v4 }
 0x26b   :  { %v3813_v25 = vpop.f32.mrf.mxu0 }
 0x26c   :  { %v3590_v28 = vadd.f32 %v3587_v24, %v3266_v33  ;;  %v3826_v51 = vpop.f32.mrf.mxu1  ;;  %v3880_v33 = vadd.f32 %v3879_v29, %v3878_v30 }
 0x26e   :  { %v10580_v43 = vadd.f32 %v9805_v52, %v3590_v28 }
 0x270   :  { %v3882_v45 = vsel %vm3857_vm9, %v10580_v43, 0.0 }
 0x271   :  { %v3588_v31 = vpop.f32.mrf.mxu3  ;;  %v3883_v40 = vrot.slane %v3882_v45, 4 }
 0x273   :  { %v3884_v55 = vadd.f32 %v3883_v40, %v3882_v45 }
 0x275   :  { %v3885_v3 = vrot.slane %v3884_v55, 2 }
 0x277   :  { %v3886_v13 = vadd.f32 %v3885_v3, %v3884_v55 }
 0x279   :  { %v3887_v22 = vrot.slane %v3886_v13, 1 }
 0x27b   :  { %v3888_v17 = vadd.f32 %v3887_v22, %v3886_v13 }
 0x289   :  { %v3850_v62 = vpop.f32.mrf.mxu3 }
 0x28a   :  { %v10586_v35 = vadd.f32 %v3850_v62, %v3838_v49 }
 0x28c   :  { %v3858_v0 = vsel %vm3857_vm9, %v10586_v35, 0.0 }
 0x28d   :  { %v3859_v42 = vrot.slane %v3858_v0, 4 }
 0x28f   :  { %v3860_v6 = vadd.f32 %v3859_v42, %v3858_v0 }
 0x291   :  { %v3861_v8 = vrot.slane %v3860_v6, 2  ;;  %v3852_v9 = vpop.f32.mrf.mxu3 }
 0x293   :  { %v3862_v15 = vadd.f32 %v3861_v8, %v3860_v6 }
 0x295   :  { %v3863_v14 = vrot.slane %v3862_v15, 1 }
 0x297   :  { %v3864_v59 = vadd.f32 %v3863_v14, %v3862_v15 }
 0x299   :  { %v3873_v53 = vadd.f32 %v3872_v41, %v3864_v59 }
 0x29b   :  { %v3881_v23 = vadd.f32 %v3880_v33, %v3873_v53 }
 0x29d   :  { %v3889_v50 = vadd.f32 %v3888_v17, %v3881_v23  ;;  %v3952_v23 = vld [vmem:[%s12713_s6] sm:$0x1] }
 0x29f   :  { %v3897_v18 = vmul.f32 %v3896_v26, %v3889_v50 }
 0x2a1   :  { %v3898_v19 = vsub.f32 %v10586_v35, %v3897_v18  ;;  %v3908_v20 = vsub.f32 %v10574_v32, %v3897_v18  ;;  %v3918_v4 = vsub.f32 %v10576_v37, %v3897_v18  ;;  %v3928_v21 = vsub.f32 %v10580_v43, %v3897_v18 }
 0x2a3   :  { %v3899_v24 = vmul.f32 %v3898_v19, %v3898_v19  ;;  %v3909_v28 = vmul.f32 %v3908_v20, %v3908_v20  ;;  %v3919_v25 = vmul.f32 %v3918_v4, %v3918_v4  ;;  %v3929_v51 = vmul.f32 %v3928_v21, %v3928_v21 }
 0x2a5   :  { %v3900_v31 = vsel %vm3857_vm9, %v3899_v24, 0.0  ;;  %v3910_v52 = vsel %vm3857_vm9, %v3909_v28, 0.0  ;;  %v3920_v38 = vsel %vm3857_vm9, %v3919_v25, 0.0  ;;  %v3930_v48 = vsel %vm3857_vm9, %v3929_v51, 0.0 }
 0x2a6   :  { %v3901_v5 = vrot.slane %v3900_v31, 4  ;;  %v3911_v34 = vrot.slane %v3910_v52, 4  ;;  %v3921_v44 = vrot.slane %v3920_v38, 4  ;;  %v3931_v12 = vrot.slane %v3930_v48, 4 }
 0x2a8   :  { %v3902_v45 = vadd.f32 %v3901_v5, %v3900_v31  ;;  %v3912_v47 = vadd.f32 %v3911_v34, %v3910_v52  ;;  %v3922_v39 = vadd.f32 %v3921_v44, %v3920_v38  ;;  %v3932_v40 = vadd.f32 %v3931_v12, %v3930_v48 }
 0x2aa   :  { %v3903_v49 = vrot.slane %v3902_v45, 2  ;;  %v3913_v56 = vrot.slane %v3912_v47, 2  ;;  %v3923_v60 = vrot.slane %v3922_v39, 2  ;;  %v3933_v62 = vrot.slane %v3932_v40, 2 }
 0x2ac   :  { %v3904_v63 = vadd.f32 %v3903_v49, %v3902_v45  ;;  %v3914_v55 = vadd.f32 %v3913_v56, %v3912_v47  ;;  %v3924_v0 = vadd.f32 %v3923_v60, %v3922_v39  ;;  %v3934_v1 = vadd.f32 %v3933_v62, %v3932_v40 }
 0x2ae   :  { %v3905_v2 = vrot.slane %v3904_v63, 1  ;;  %v3915_v42 = vrot.slane %v3914_v55, 1  ;;  %v3925_v58 = vrot.slane %v3924_v0, 1  ;;  %v3935_v54 = vrot.slane %v3934_v1, 1 }
 0x2b0   :  { %v3906_v3 = vadd.f32 %v3905_v2, %v3904_v63  ;;  %v3916_v6 = vadd.f32 %v3915_v42, %v3914_v55  ;;  %v3926_v8 = vadd.f32 %v3925_v58, %v3924_v0  ;;  %v3936_v10 = vadd.f32 %v3935_v54, %v3934_v1 }
 0x2b2   :  { %v3917_v30 = vadd.f32 %v3916_v6, %v3906_v3 }
 0x2b4   :  { %v3927_v9 = vadd.f32 %v3926_v8, %v3917_v30 }
 0x2b6   :  { %v3937_v13 = vadd.f32 %v3936_v10, %v3927_v9 }
 0x2b8   :  { %v3938_v15 = vmul.f32 %v3937_v13, %v3896_v26 }
 0x2ba   :  { %v3940_v16 = vadd.f32 1e-05, %v3938_v15 }
 0x2bc   :  { %9810 = vrsqrt.f32 %v3940_v16  ;;  %vm3947_vm12 = vweird.f32 %v3940_v16 }
 0x2c2   :  { %v9811_v29 = vpop.eup %9810 }
 0x2c3   :  { %v3942_v14 = vmul.f32 %v9811_v29, %v3940_v16  ;;  %vm3948_vm11 = vweird.f32 %v9811_v29 }
 0x2c4   :  { %vm3949_vm13 = vmor %vm3947_vm12, %vm3948_vm11 }
 0x2c5   :  { %v3943_v41 = vmul.f32 %v9811_v29, %v3942_v14 }
 0x2c7   :  { %v3944_v22 = vmul.f32 0.5, %v3943_v41 }
 0x2c9   :  { %v3945_v59 = vsub.f32 1.5, %v3944_v22 }
 0x2cb   :  { %v3946_v33 = vmul.f32 %v9811_v29, %v3945_v59 }
 0x2cd   :  { %v3950_v53 = vsel %vm3949_vm13, %v9811_v29, %v3946_v33 }
 0x2ce   :  { %v3951_v17 = vmul.f32 %v3950_v53, %v3939_v11 }
 0x2d0   :  { %v3953_v26 = vmul.f32 %v3951_v17, %v3897_v18  ;;  %v3956_v50 = vperm.slane %v3951_v17, 0 }
 0x2d2   :  { %v3954_v19 = vsub.f32 %v3952_v23, %v3953_v26  ;;  %v3958_v20 = vmul.f32 %v3956_v50, %v10586_v35  ;;  %v3966_v21 = vmul.f32 %v3956_v50, %v10574_v32  ;;  %v3976_v25 = vmul.f32 %v3956_v50, %v10580_v43 }
 0x2d3   :  { %v3971_v52 = vmul.f32 %v3956_v50, %v10576_v37 }
 0x2d4   :  { %v3960_v4 = vperm.slane %v3954_v19, 0 }
 0x2d6   :  { %v3962_v24 = vadd.f32 %v3960_v4, %v3958_v20  ;;  %v3967_v28 = vadd.f32 %v3966_v21, %v3960_v4  ;;  %v3977_v38 = vadd.f32 %v3976_v25, %v3960_v4  ;;  %v3972_v18 = vadd.f32 %v3971_v52, %v3960_v4 }
 0x2d8   :  { %v3964_v51 = vmul.f32 0.01, %v3962_v24  ;;  %vm3968_vm14 = vcmp.ge.f32.partialorder %v3967_v28, 0.0  ;;  %v3969_v31 = vmul.f32 0.01, %v3967_v28  ;;  %vm3963_vm15 = vcmp.ge.f32.partialorder %v3962_v24, 0.0 }
 0x2d9   :  { %v3979_v35 = vmul.f32 0.01, %v3977_v38  ;;  %vm3978_vm0 = vcmp.ge.f32.partialorder %v3977_v38, 0.0  ;;  %v3974_v32 = vmul.f32 0.01, %v3972_v18  ;;  %vm3973_vm1 = vcmp.ge.f32.partialorder %v3972_v18, 0.0 }
 0x2da   :  { %v10608_v48 = vsel %vm3968_vm14, %v3967_v28, %v3969_v31  ;;  %v10610_v5 = vsel %vm3963_vm15, %v3962_v24, %v3964_v51  ;;  %v9724_v31 = vld [vmem:[#allocation10 + $0x78] sm:$0xff] }
 0x2db   :  { %v3997_v34 = vrot.slane %v10608_v48, 1  ;;  %v3982_v44 = vrot.slane %v10610_v5, 1  ;;  %v4004_v43 = vperm.slane %v10608_v48, 0  ;;  %v10615_v45 = vsel %vm3978_vm0, %v3977_v38, %v3979_v35  ;;  %4323 = vmatpush.bf16.msrb.mxu0 %v9724_v31 }
 0x2dc   :  { %v3998_v39 = vrot.slane %v10608_v48, 2  ;;  %v10621_v40 = vsel %vm3973_vm1, %v3972_v18, %v3974_v32  ;;  %v3999_v49 = vrot.slane %v10608_v48, 3  ;;  %v4044_v56 = vrot.slane %v10615_v45, 1  ;;  %v9723_v32 = vld [vmem:[#allocation10 + $0x70] sm:$0xff] }
 0x2dd   :  { %v4005_v12 = vperm.slane %v3997_v34, 0  ;;  %v4020_v37 = vsel %vm538_vm3, %v10610_v5, %v4004_v43  ;;  %v4029_v62 = vrot.slane %v10621_v40, 1  ;;  %v4051_v63 = vperm.slane %v10615_v45, 0 }
 0x2de   :  { %4091 = vst [vmem:[#allocation1] ss:$4 sm:$0xff] %v4020_v37  ;;  %v4006_v60 = vperm.slane %v3998_v39, 0  ;;  %v4052_v55 = vperm.slane %v4044_v56, 0  ;;  %v4007_v0 = vperm.slane %v3999_v49, 0  ;;  %v3983_v1 = vrot.slane %v10610_v5, 2 }
 0x2df   :  { %v4021_v47 = vsel %vm538_vm3, %v3982_v44, %v4005_v12  ;;  %v4067_v2 = vsel %vm538_vm3, %v10621_v40, %v4051_v63  ;;  %v3984_v58 = vrot.slane %v10610_v5, 3  ;;  %v4045_v3 = vrot.slane %v10615_v45, 2  ;;  %4324 = vmatpush.bf16.msrb.mxu0 %v9723_v32 }
 0x2e0   :  { %4093 = vst [vmem:[#allocation1 + $0x1] ss:$4 sm:$0xff] %v4021_v47  ;;  %v4068_v42 = vsel %vm538_vm3, %v4029_v62, %v4052_v55  ;;  %v4022_v6 = vsel %vm538_vm3, %v3983_v1, %v4006_v60  ;;  %v4046_v54 = vrot.slane %v10615_v45, 3  ;;  %v4000_v8 = vrot.slane %v10608_v48, 4 }
 0x2e1   :  { %4096 = vst [vmem:[#allocation1 + $0x20] ss:$4 sm:$0xff] %v4067_v2  ;;  %v4023_v9 = vsel %vm538_vm3, %v3984_v58, %v4007_v0  ;;  %v4001_v10 = vrot.slane %v10608_v48, 5  ;;  %v4053_v15 = vperm.slane %v4045_v3, 0  ;;  %v4030_v14 = vrot.slane %v10621_v40, 2  ;;  %v9720_v58 = vld [vmem:[#allocation10 + $0xb8] sm:$0xff] }
 0x2e2   :  { %4098 = vst [vmem:[#allocation1 + $0x21] ss:$4 sm:$0xff] %v4068_v42  ;;  %v4054_v16 = vperm.slane %v4046_v54, 0  ;;  %v4008_v29 = vperm.slane %v4000_v8, 0  ;;  %v4031_v22 = vrot.slane %v10621_v40, 3  ;;  %v3985_v11 = vrot.slane %v10610_v5, 4  ;;  %4395 = vmatpush.bf16.msrb.mxu1 %v9720_v58 }
 0x2e3   :  { %v4009_v41 = vperm.slane %v4001_v10, 0  ;;  %v3986_v33 = vrot.slane %v10610_v5, 5  ;;  %v4069_v53 = vsel %vm538_vm3, %v4030_v14, %v4053_v15  ;;  %v4002_v23 = vrot.slane %v10608_v48, 6  ;;  %v9722_v42 = vld [vmem:[#allocation10 + $0x68] sm:$0xff]  ;;  %v9721_v14 = vld [vmem:[#allocation10 + $0x60] sm:$0xff]  ;;  %v9728_v58 = vld [vmem:[#allocation10 + $0xf8] sm:$0xff] }
 0x2e4   :  { %v4047_v26 = vrot.slane %v10615_v45, 4  ;;  %v4070_v50 = vsel %vm538_vm3, %v4031_v22, %v4054_v16  ;;  %v4024_v20 = vsel %vm538_vm3, %v3985_v11, %v4008_v29  ;;  %v4048_v4 = vrot.slane %v10615_v45, 5  ;;  %4325 = vmatpush.bf16.msrb.mxu0 %v9722_v42  ;;  %v9730_v42 = vld [vmem:[#allocation10 + $0x28] sm:$0xff]  ;;  %4541 = vmatpush.bf16.msra.mxu3 %v9728_v58  ;;  %v9715_v58 = vld [vmem:[#allocation10 + $0x90] sm:$0xff] }
 0x2e5   :  { %v4025_v24 = vsel %vm538_vm3, %v3986_v33, %v4009_v41  ;;  %v4003_v52 = vrot.slane %v10608_v48, 7  ;;  %v4010_v44 = vperm.slane %v4002_v23, 0  ;;  %v4032_v43 = vrot.slane %v10621_v40, 4  ;;  %v9719_v41 = vld [vmem:[#allocation10 + $0xb0] sm:$0xff] }
 0x2e6   :  { %v4055_v38 = vperm.slane %v4047_v26, 0  ;;  %v4056_v34 = vperm.slane %v4048_v4, 0  ;;  %v3987_v47 = vrot.slane %v10610_v5, 6  ;;  %v4033_v49 = vrot.slane %v10621_v40, 5  ;;  %4396 = vmatpush.bf16.msrb.mxu1 %v9719_v41 }
 0x2e7   :  { %v4094_v30 = vld.sshfl [vmem:[#allocation1] sm:$0xff pattern:$0x73625140]  ;;  %v4011_v39 = vperm.slane %v4003_v52, 0  ;;  %v3988_v48 = vrot.slane %v10610_v5, 7  ;;  %v4049_v56 = vrot.slane %v10615_v45, 6 }
 0x2e8   :  { %4100 = vst [vmem:[#allocation1] ss:$4 sm:$0xff] %v4022_v6  ;;  %v10638_v13 = vpack.c.bf16 %v4094_v30, %v4094_v30  ;;  %v4071_v60 = vsel %vm538_vm3, %v4032_v43, %v4055_v38  ;;  %v4050_v55 = vrot.slane %v10615_v45, 7  ;;  %v4072_v0 = vsel %vm538_vm3, %v4033_v49, %v4056_v34  ;;  %4326 = vmatpush.bf16.msrb.mxu0 %v9721_v14  ;;  %v9732_v34 = vld [vmem:[#allocation10 + $0x38] sm:$0xff] }
 0x2e9   :  { %4101 = vst [vmem:[#allocation1 + $0x1] ss:$4 sm:$0xff] %v4023_v9  ;;  %v4099_v17 = vld.sshfl [vmem:[#allocation1 + $0x20] sm:$0xff pattern:$0x73625140]  ;;  %v4026_v3 = vsel %vm538_vm3, %v3987_v47, %v4010_v44  ;;  %v4027_v54 = vsel %vm538_vm3, %v3988_v48, %v4011_v39  ;;  %v4057_v8 = vperm.slane %v4049_v56, 0  ;;  %4477 = vmatpush.bf16.msra.mxu2 %v9732_v34 }
 0x2ea   :  { %v4142_v59 = vunpack.c.l.b16 %v10638_v13  ;;  %4103 = vst [vmem:[#allocation1 + $0x20] ss:$4 sm:$0xff] %v4069_v53  ;;  %v10649_v19 = vpack.c.bf16 %v4099_v17, %v4099_v17  ;;  %v4034_v22 = vrot.slane %v10621_v40, 6  ;;  %v9717_v48 = vld [vmem:[#allocation10 + $0xa0] sm:$0xff]  ;;  %v9731_v56 = vld [vmem:[#allocation10 + $0x30] sm:$0xff]  ;;  %v9744_v34 = vld [vmem:[#allocation10 + $0x58] sm:$0xff] }
 0x2eb   :  { %4104 = vst [vmem:[#allocation1 + $0x21] ss:$4 sm:$0xff] %v4070_v50  ;;  %v4035_v50 = vrot.slane %v10621_v40, 7  ;;  %v9718_v40 = vld [vmem:[#allocation10 + $0xa8] sm:$0xff] }
 0x2ec   :  { %v4143_v25 = vunpack.c.l.b16 %v10649_v19  ;;  %v4150_v51 = vpack.c.b16 %v4142_v59, %v4142_v59  ;;  %v4058_v59 = vperm.slane %v4050_v55, 0  ;;  %4397 = vmatpush.bf16.msrb.mxu1 %v9718_v40 }
 0x2ed   :  { %4478 = vmatpush.bf16.msra.mxu2 %v9731_v56  ;;  %v9742_v56 = vld [vmem:[#allocation10 + $0x48] sm:$0xff] }
 0x2ee   :  { %v4151_v35 = vpack.c.b16 %v4143_v25, %v4143_v25  ;;  %v4161_v37 = vshll.u32 %v4150_v51, 16  ;;  %v4159_v9 = vshrl.u32 %v4150_v51, 16  ;;  %v4074_v52 = vsel %vm538_vm3, %v4035_v50, %v4058_v59 }
 0x2f0   :  { %v4102_v21 = vld.sshfl [vmem:[#allocation1] sm:$0xff pattern:$0x73625140]  ;;  %v4168_v63 = vshll.u32 %v4151_v35, 16  ;;  %v4163_v6 = vrot.slane %v4161_v37, 1  ;;  %v4166_v33 = vshrl.u32 %v4151_v35, 16  ;;  %4398 = vmatpush.bf16.msrb.mxu1 %v9717_v48 }
 0x2f1   :  { %4106 = vst [vmem:[#allocation1] ss:$4 sm:$0xff] %v4024_v20  ;;  %v10654_v28 = vpack.c.bf16 %v4102_v21, %v4102_v21  ;;  %v4073_v20 = vsel %vm538_vm3, %v4034_v22, %v4057_v8  ;;  %4479 = vmatpush.bf16.msra.mxu2 %v9730_v42 }
 0x2f2   :  { %4107 = vst [vmem:[#allocation1 + $0x1] ss:$4 sm:$0xff] %v4025_v24  ;;  %v4105_v62 = vld.sshfl [vmem:[#allocation1 + $0x20] sm:$0xff pattern:$0x73625140]  ;;  %v4170_v10 = vrot.slane %v4168_v63, 1  ;;  %v4164_v11 = vor.u32 %v4163_v6, %v4159_v9 }
 0x2f3   :  { %v4144_v18 = vunpack.c.l.b16 %v10654_v28  ;;  %4109 = vst [vmem:[#allocation1 + $0x20] ss:$4 sm:$0xff] %v4071_v60  ;;  %v10667_v1 = vpack.c.bf16 %v4105_v62, %v4105_v62 }
 0x2f4   :  { %4110 = vst [vmem:[#allocation1 + $0x21] ss:$4 sm:$0xff] %v4072_v0  ;;  %v4171_v4 = vor.u32 %v4170_v10, %v4166_v33  ;;  %v10689_v35 = vsel %vm10678_vm4, %v4164_v11, 0 }
 0x2f5   :  { %v4152_v12 = vpack.c.b16 %v4144_v18, %v4144_v18  ;;  %v4145_v45 = vunpack.c.l.b16 %v10667_v1 }
 0x2f6   :  { %v10696_v47 = vsel %vm10678_vm4, %v4171_v4, 0  ;;  %v9739_v4 = vld [vmem:[#allocation10 + $0xd0] sm:$0xff] }
 0x2f7   :  { %v4175_v2 = vshll.u32 %v4152_v12, 16  ;;  %v4153_v16 = vpack.c.b16 %v4145_v45, %v4145_v45  ;;  %v4173_v23 = vshrl.u32 %v4152_v12, 16 }
 0x2f9   :  { %v4108_v5 = vld.sshfl [vmem:[#allocation1] sm:$0xff pattern:$0x73625140]  ;;  %v4177_v29 = vrot.slane %v4175_v2, 1  ;;  %v4182_v26 = vshll.u32 %v4153_v16, 16  ;;  %v4180_v25 = vshrl.u32 %v4153_v16, 16 }
 0x2fa   :  { %4112 = vst [vmem:[#allocation1] ss:$4 sm:$0xff] %v4026_v3  ;;  %v10671_v30 = vpack.c.bf16 %v4108_v5, %v4108_v5  ;;  %v9729_v16 = vld [vmem:[#allocation10 + $0x20] sm:$0xff] }
 0x2fb   :  { %4113 = vst [vmem:[#allocation1 + $0x1] ss:$4 sm:$0xff] %v4027_v54  ;;  %v4111_v21 = vld.sshfl [vmem:[#allocation1 + $0x20] sm:$0xff pattern:$0x73625140]  ;;  %v4178_v24 = vor.u32 %v4177_v29, %v4173_v23  ;;  %v4184_v51 = vrot.slane %v4182_v26, 1  ;;  %4480 = vmatpush.bf16.msra.mxu2 %v9729_v16 }
 0x2fc   :  { %v4146_v15 = vunpack.c.l.b16 %v10671_v30  ;;  %4115 = vst [vmem:[#allocation1 + $0x20] ss:$4 sm:$0xff] %v4073_v20  ;;  %v10685_v38 = vpack.c.bf16 %v4111_v21, %v4111_v21  ;;  %v9727_v29 = vld [vmem:[#allocation10 + $0xf0] sm:$0xff]  ;;  %v9726_v23 = vld [vmem:[#allocation10 + $0xe8] sm:$0xff]  ;;  %v9725_v21 = vld [vmem:[#allocation10 + $0xe0] sm:$0xff] }
 0x2fd   :  { %4116 = vst [vmem:[#allocation1 + $0x21] ss:$4 sm:$0xff] %v4074_v52  ;;  %v4185_v44 = vor.u32 %v4184_v51, %v4180_v25  ;;  %v10701_v49 = vsel %vm10678_vm4, %v4178_v24, 0  ;;  %4542 = vmatpush.bf16.msra.mxu3 %v9727_v29  ;;  %v9738_v25 = vld [vmem:[#allocation10 + $0xc8] sm:$0xff]  ;;  %v9736_v51 = vld [vmem:[#allocation10 + $0x118] sm:$0xff]  ;;  %v9737_v52 = vld [vmem:[#allocation10 + $0xc0] sm:$0xff] }
 0x2fe   :  { %v4154_v17 = vpack.c.b16 %v4146_v15, %v4146_v15  ;;  %v4147_v37 = vunpack.c.l.b16 %v10685_v38  ;;  %4687 = vmatpush.bf16.msra.mxu1 %v9736_v51 }
 0x2ff   :  { %v10707_v63 = vsel %vm10678_vm4, %v4185_v44, 0  ;;  %4760 = vmatpush.bf16.msrb.mxu2 %v9744_v34  ;;  %v9743_v44 = vld [vmem:[#allocation10 + $0x50] sm:$0xff] }
 0x300   :  { %v4189_v31 = vshll.u32 %v4154_v17, 16  ;;  %v4187_v18 = vshrl.u32 %v4154_v17, 16  ;;  %v4155_v62 = vpack.c.b16 %v4147_v37, %v4147_v37  ;;  %v9740_v17 = vld [vmem:[#allocation10 + $0xd8] sm:$0xff] }
 0x301   :  { %4623 = vmatpush.bf16.msra.mxu0 %v9740_v17  ;;  %4543 = vmatpush.bf16.msra.mxu3 %v9726_v23 }
 0x302   :  { %v4114_v32 = vld.sshfl [vmem:[#allocation1] sm:$0xff pattern:$0x73625140]  ;;  %v4191_v43 = vrot.slane %v4189_v31, 1  ;;  %v4196_v0 = vshll.u32 %v4155_v62, 16  ;;  %v4194_v5 = vshrl.u32 %v4155_v62, 16 }
 0x303   :  { %v10691_v12 = vpack.c.bf16 %v4114_v32, %v4114_v32  ;;  %4267 = vst [vmem:[#allocation1] ss:$4 sm:$0xff] %v10689_v35  ;;  %v9734_v32 = vld [vmem:[#allocation10 + $0x108] sm:$0xff]  ;;  %4761 = vmatpush.bf16.msrb.mxu2 %v9743_v44  ;;  %v9741_v62 = vld [vmem:[#allocation10 + $0x40] sm:$0xff] }
 0x304   :  { %v4192_v39 = vor.u32 %v4191_v43, %v4187_v18  ;;  %4270 = vst [vmem:[#allocation1 + $0x1] ss:$4 sm:$0xff] %v10696_v47  ;;  %v4117_v3 = vld.sshfl [vmem:[#allocation1 + $0x20] sm:$0xff pattern:$0x73625140]  ;;  %v4198_v6 = vrot.slane %v4196_v0, 1 }
 0x305   :  { %v4148_v60 = vunpack.c.l.b16 %v10691_v12  ;;  %4273 = vst [vmem:[#allocation1 + $0x2] ss:$4 sm:$0xff] %v10701_v49  ;;  %v10715_v45 = vpack.c.bf16 %v4117_v3, %v4117_v3  ;;  %4624 = vmatpush.bf16.msra.mxu0 %v9739_v4  ;;  %4544 = vmatpush.bf16.msra.mxu3 %v9725_v21  ;;  %v9735_v18 = vld [vmem:[#allocation10 + $0x110] sm:$0xff]  ;;  %v9733_v43 = vld [vmem:[#allocation10 + $0x100] sm:$0xff]  ;;  %v9746_v0 = vld [vmem:[#allocation10 + $0x8] sm:$0xff] }
 0x306   :  { %4276 = vst [vmem:[#allocation1 + $0x3] ss:$4 sm:$0xff] %v10707_v63  ;;  %v10713_v2 = vsel %vm10678_vm4, %v4192_v39, 0  ;;  %v4199_v8 = vor.u32 %v4198_v6, %v4194_v5  ;;  %4688 = vmatpush.bf16.msra.mxu1 %v9735_v18  ;;  %v9748_v39 = vld [vmem:[#allocation10 + $0x18] sm:$0xff]  ;;  %v9714_v5 = vld [vmem:[#allocation10 + $0x88] sm:$0xff]  ;;  %v9745_v6 = vld [vmem:[#allocation10] sm:$0xff] }
 0x307   :  { %v4156_v55 = vpack.c.b16 %v4148_v60, %v4148_v60  ;;  %4279 = vst [vmem:[#allocation1 + $0x20] ss:$4 sm:$0xff] %v10713_v2  ;;  %v4149_v15 = vunpack.c.l.b16 %v10715_v45  ;;  %4762 = vmatpush.bf16.msrb.mxu2 %v9742_v56  ;;  %v9747_v60 = vld [vmem:[#allocation10 + $0x10] sm:$0xff] }
 0x308   :  { %v10721_v41 = vsel %vm10678_vm4, %v4199_v8, 0  ;;  %v9713_v8 = vld [vmem:[#allocation10 + $0x80] sm:$0xff] }
 0x309   :  { %v4203_v54 = vshll.u32 %v4156_v55, 16  ;;  %v4201_v9 = vshrl.u32 %v4156_v55, 16  ;;  %v4157_v59 = vpack.c.b16 %v4149_v15, %v4149_v15  ;;  %4282 = vst [vmem:[#allocation1 + $0x21] ss:$4 sm:$0xff] %v10721_v41  ;;  %4625 = vmatpush.bf16.msra.mxu0 %v9738_v25  ;;  %4837 = vmatpush.bf16.msrb.mxu3 %v9748_v39  ;;  %v9716_v55 = vld [vmem:[#allocation10 + $0x98] sm:$0xff] }
 0x30a   :  { %4689 = vmatpush.bf16.msra.mxu1 %v9734_v32 }
 0x30b   :  { %v4205_v10 = vrot.slane %v4203_v54, 1  ;;  %v4210_v33 = vshll.u32 %v4157_v59, 16  ;;  %v4208_v26 = vshrl.u32 %v4157_v59, 16  ;;  %4763 = vmatpush.bf16.msrb.mxu2 %v9741_v62 }
 0x30d   :  { %v4206_v14 = vor.u32 %v4205_v10, %v4201_v9  ;;  %v4289_v22 = vld.sshfl [vmem:[#allocation1] sm:$0xff pattern:$0x73625140]  ;;  %v4212_v50 = vrot.slane %v4210_v33, 1  ;;  %4626 = vmatpush.bf16.msra.mxu0 %v9737_v52  ;;  %4838 = vmatpush.bf16.msrb.mxu3 %v9747_v60  ;;  %v12721_v9 = vshll.u32 %v10498_v46, 16 }
 0x30e   :  { %9047 = vmatmul.msk.bf16.vlgmr.msrb.gmra.mxu0 %vm3857_vm9, %v4289_v22  ;;  %4339 = vst [vmem:[#allocation1] ss:$4 sm:$0xff] %v10638_v13  ;;  %4690 = vmatpush.bf16.msra.mxu1 %v9733_v43  ;;  %v10823_v43 = vld [vmem:[#allocation12] ss:$0 sm:$0xff] }
 0x30f   :  { %v10727_v11 = vsel %vm10678_vm4, %v4206_v14, 0  ;;  %4342 = vst [vmem:[#allocation1 + $0x1] ss:$4 sm:$0xff] %v10649_v19  ;;  %v4213_v20 = vor.u32 %v4212_v50, %v4208_v26 }
 0x310   :  { %4285 = vst [vmem:[#allocation1 + $0x22] ss:$4 sm:$0xff] %v10727_v11 }
 0x311   :  { %4345 = vst [vmem:[#allocation1 + $0x2] ss:$4 sm:$0xff] %v10654_v28  ;;  %v10736_v24 = vsel %vm10678_vm4, %v4213_v20, 0  ;;  %4909 = vmatpush.bf16.msrb.mxu0 %v9716_v55  ;;  %4839 = vmatpush.bf16.msrb.mxu3 %v9746_v0 }
 0x312   :  { %4348 = vst [vmem:[#allocation1 + $0x3] ss:$4 sm:$0xff] %v10667_v1 }
 0x313   :  { %4288 = vst [vmem:[#allocation1 + $0x23] ss:$4 sm:$0xff] %v10736_v24 }
 0x315   :  { %4910 = vmatpush.bf16.msrb.mxu0 %v9715_v58  ;;  %4840 = vmatpush.bf16.msrb.mxu3 %v9745_v6 }
 0x319   :  { %v4361_v31 = vld.sshfl [vmem:[#allocation1] sm:$0xff pattern:$0x73625140]  ;;  %4911 = vmatpush.bf16.msrb.mxu0 %v9714_v5 }
 0x31a   :  { %9065 = vmatmul.msk.bf16.vlgmr.msrb.gmra.mxu1 %vm3857_vm9, %v4361_v31  ;;  %4428 = vst [vmem:[#allocation1] ss:$4 sm:$0xff] %v10649_v19  ;;  %v4290_v40 = vld.sshfl [vmem:[#allocation1 + $0x20] sm:$0xff pattern:$0x73625140] }
 0x31b   :  { %4430 = vst [vmem:[#allocation1 + $0x1] ss:$4 sm:$0xff] %v10654_v28 }
 0x31c   :  { %4432 = vst [vmem:[#allocation1 + $0x2] ss:$4 sm:$0xff] %v10667_v1 }
 0x31d   :  { %4434 = vst [vmem:[#allocation1 + $0x3] ss:$4 sm:$0xff] %v12722_v27  ;;  %4912 = vmatpush.bf16.msrb.mxu0 %v9713_v8 }
 0x31e   :  { %4351 = vst [vmem:[#allocation1 + $0x20] ss:$4 sm:$0xff] %v10671_v30  ;;  %9048 = vmatmul.msk.bf16.gmra.mxu0 %vm3857_vm9, %v4290_v40 }
 0x31f   :  { %4354 = vst [vmem:[#allocation1 + $0x21] ss:$4 sm:$0xff] %v10685_v38 }
 0x320   :  { %4357 = vst [vmem:[#allocation1 + $0x22] ss:$4 sm:$0xff] %v10691_v12 }
 0x321   :  { %4360 = vst [vmem:[#allocation1 + $0x23] ss:$4 sm:$0xff] %v10715_v45 }
 0x324   :  { %v4443_v37 = vld.sshfl [vmem:[#allocation1] sm:$0xff pattern:$0x73625140] }
 0x325   :  { %9083 = vmatmul.msk.bf16.vlgmr.msra.gmra.mxu2 %vm3857_vm9, %v4443_v37  ;;  %4492 = vst [vmem:[#allocation1] ss:$4 sm:$0xff] %v10638_v13 }
 0x326   :  { %4494 = vst [vmem:[#allocation1 + $0x1] ss:$4 sm:$0xff] %v10649_v19 }
 0x327   :  { %4496 = vst [vmem:[#allocation1 + $0x2] ss:$4 sm:$0xff] %v10654_v28 }
 0x328   :  { %v4362_v48 = vld.sshfl [vmem:[#allocation1 + $0x20] sm:$0xff pattern:$0x73625140]  ;;  %4498 = vst [vmem:[#allocation1 + $0x3] ss:$4 sm:$0xff] %v10667_v1 }
 0x329   :  { %4436 = vst [vmem:[#allocation1 + $0x20] ss:$4 sm:$0xff] %v10685_v38 }
 0x32a   :  { %4438 = vst [vmem:[#allocation1 + $0x21] ss:$4 sm:$0xff] %v10691_v12  ;;  %9066 = vmatmul.msk.bf16.gmra.mxu1 %vm3857_vm9, %v4362_v48 }
 0x32b   :  { %4440 = vst [vmem:[#allocation1 + $0x22] ss:$4 sm:$0xff] %v10715_v45 }
 0x32c   :  { %4442 = vst [vmem:[#allocation1 + $0x23] ss:$4 sm:$0xff] %v12722_v27 }
 0x32f   :  { %v4507_v42 = vld.sshfl [vmem:[#allocation1] sm:$0xff pattern:$0x73625140] }
 0x330   :  { %9101 = vmatmul.msk.bf16.vlgmr.msra.gmra.mxu3 %vm3857_vm9, %v4507_v42  ;;  %4574 = vst [vmem:[#allocation1] ss:$4 sm:$0xff] %v10689_v35 }
 0x331   :  { %4576 = vst [vmem:[#allocation1 + $0x1] ss:$4 sm:$0xff] %v10696_v47 }
 0x332   :  { %4578 = vst [vmem:[#allocation1 + $0x2] ss:$4 sm:$0xff] %v10701_v49 }
 0x333   :  { %v4444_v3 = vld.sshfl [vmem:[#allocation1 + $0x20] sm:$0xff pattern:$0x73625140]  ;;  %4580 = vst [vmem:[#allocation1 + $0x3] ss:$4 sm:$0xff] %v10707_v63 }
 0x334   :  { %4500 = vst [vmem:[#allocation1 + $0x20] ss:$4 sm:$0xff] %v10671_v30 }
 0x335   :  { %4502 = vst [vmem:[#allocation1 + $0x21] ss:$4 sm:$0xff] %v10685_v38  ;;  %9084 = vmatmul.msk.bf16.gmra.mxu2 %vm3857_vm9, %v4444_v3 }
 0x336   :  { %4504 = vst [vmem:[#allocation1 + $0x22] ss:$4 sm:$0xff] %v10691_v12 }
 0x337   :  { %4506 = vst [vmem:[#allocation1 + $0x23] ss:$4 sm:$0xff] %v10715_v45 }
 0x33a   :  { %v4589_v35 = vld.sshfl [vmem:[#allocation1] sm:$0xff pattern:$0x73625140] }
 0x33b   :  { %9119 = vmatmul.msk.bf16.vlgmr.msra.gmra.mxu0 %vm3857_vm9, %v4589_v35  ;;  %4638 = vst [vmem:[#allocation1] ss:$4 sm:$0xff] %v10638_v13 }
 0x33c   :  { %4640 = vst [vmem:[#allocation1 + $0x1] ss:$4 sm:$0xff] %v10649_v19 }
 0x33d   :  { %4642 = vst [vmem:[#allocation1 + $0x2] ss:$4 sm:$0xff] %v10654_v28 }
 0x33e   :  { %v4508_v54 = vld.sshfl [vmem:[#allocation1 + $0x20] sm:$0xff pattern:$0x73625140]  ;;  %4644 = vst [vmem:[#allocation1 + $0x3] ss:$4 sm:$0xff] %v10667_v1 }
 0x33f   :  { %4582 = vst [vmem:[#allocation1 + $0x20] ss:$4 sm:$0xff] %v10713_v2  ;;  %v4235_v2 = vrot.slane %v12721_v9, 1 }
 0x340   :  { %4584 = vst [vmem:[#allocation1 + $0x21] ss:$4 sm:$0xff] %v10721_v41  ;;  %9102 = vmatmul.msk.bf16.gmra.mxu3 %vm3857_vm9, %v4508_v54 }
 0x341   :  { %4586 = vst [vmem:[#allocation1 + $0x22] ss:$4 sm:$0xff] %v10727_v11  ;;  %v10792_v16 = vor.u32 %v4235_v2, %v10501_v7 }
 0x342   :  { %4588 = vst [vmem:[#allocation1 + $0x23] ss:$4 sm:$0xff] %v10736_v24 }
 0x343   :  { %12783 = vst [vmem:[#allocation24_spill] sm:$0xff] %v10792_v16  ;;  %v4238_v14 = vsel %vm10678_vm4, %v10792_v16, 0 }
 0x345   :  { %v4653_v10 = vld.sshfl [vmem:[#allocation1] sm:$0xff pattern:$0x73625140] }
 0x346   :  { %9137 = vmatmul.msk.bf16.vlgmr.msra.gmra.mxu1 %vm3857_vm9, %v4653_v10  ;;  %4711 = vst [vmem:[#allocation1] ss:$4 sm:$0xff] %v10649_v19 }
 0x347   :  { %4713 = vst [vmem:[#allocation1 + $0x1] ss:$4 sm:$0xff] %v10654_v28 }
 0x348   :  { %4715 = vst [vmem:[#allocation1 + $0x2] ss:$4 sm:$0xff] %v10667_v1 }
 0x349   :  { %v4590_v15 = vld.sshfl [vmem:[#allocation1 + $0x20] sm:$0xff pattern:$0x73625140]  ;;  %4717 = vst [vmem:[#allocation1 + $0x3] ss:$4 sm:$0xff] %v12722_v27 }
 0x34a   :  { %4646 = vst [vmem:[#allocation1 + $0x20] ss:$4 sm:$0xff] %v10671_v30 }
 0x34b   :  { %4648 = vst [vmem:[#allocation1 + $0x21] ss:$4 sm:$0xff] %v10685_v38  ;;  %9120 = vmatmul.msk.bf16.gmra.mxu0 %vm3857_vm9, %v4590_v15 }
 0x34c   :  { %4650 = vst [vmem:[#allocation1 + $0x22] ss:$4 sm:$0xff] %v10691_v12 }
 0x34d   :  { %4652 = vst [vmem:[#allocation1 + $0x23] ss:$4 sm:$0xff] %v10715_v45 }
 0x350   :  { %v4726_v29 = vld.sshfl [vmem:[#allocation1] sm:$0xff pattern:$0x73625140] }
 0x351   :  { %9155 = vmatmul.msk.bf16.vlgmr.msrb.gmra.mxu2 %vm3857_vm9, %v4726_v29  ;;  %4787 = vst [vmem:[#allocation1] ss:$4 sm:$0xff] %v10696_v47 }
 0x352   :  { %4789 = vst [vmem:[#allocation1 + $0x1] ss:$4 sm:$0xff] %v10701_v49 }
 0x353   :  { %4791 = vst [vmem:[#allocation1 + $0x2] ss:$4 sm:$0xff] %v10707_v63 }
 0x354   :  { %4794 = vst [vmem:[#allocation1 + $0x3] ss:$4 sm:$0xff] %v4238_v14  ;;  %v4654_v22 = vld.sshfl [vmem:[#allocation1 + $0x20] sm:$0xff pattern:$0x73625140] }
 0x355   :  { %4719 = vst [vmem:[#allocation1 + $0x20] ss:$4 sm:$0xff] %v10685_v38 }
 0x356   :  { %9138 = vmatmul.msk.bf16.gmra.mxu1 %vm3857_vm9, %v4654_v22  ;;  %4721 = vst [vmem:[#allocation1 + $0x21] ss:$4 sm:$0xff] %v10691_v12 }
 0x357   :  { %4723 = vst [vmem:[#allocation1 + $0x22] ss:$4 sm:$0xff] %v10715_v45 }
 0x358   :  { %4725 = vst [vmem:[#allocation1 + $0x23] ss:$4 sm:$0xff] %v12722_v27 }
 0x35b   :  { %v4803_v53 = vld.sshfl [vmem:[#allocation1] sm:$0xff pattern:$0x73625140] }
 0x35c   :  { %9173 = vmatmul.msk.bf16.vlgmr.msrb.gmra.mxu3 %vm3857_vm9, %v4803_v53  ;;  %4860 = vst [vmem:[#allocation1] ss:$4 sm:$0xff] %v10638_v13 }
 0x35d   :  { %4862 = vst [vmem:[#allocation1 + $0x1] ss:$4 sm:$0xff] %v10649_v19 }
 0x35e   :  { %4864 = vst [vmem:[#allocation1 + $0x2] ss:$4 sm:$0xff] %v10654_v28 }
 0x35f   :  { %4866 = vst [vmem:[#allocation1 + $0x3] ss:$4 sm:$0xff] %v10667_v1  ;;  %v4727_v47 = vld.sshfl [vmem:[#allocation1 + $0x20] sm:$0xff pattern:$0x73625140] }
 0x360   :  { %4796 = vst [vmem:[#allocation1 + $0x20] ss:$4 sm:$0xff] %v10721_v41 }
 0x361   :  { %9156 = vmatmul.msk.bf16.gmra.mxu2 %vm3857_vm9, %v4727_v47  ;;  %4798 = vst [vmem:[#allocation1 + $0x21] ss:$4 sm:$0xff] %v10727_v11 }
 0x362   :  { %4800 = vst [vmem:[#allocation1 + $0x22] ss:$4 sm:$0xff] %v10736_v24 }
 0x363   :  { %4802 = vst [vmem:[#allocation1 + $0x23] ss:$4 sm:$0xff] %v4238_v14 }
 0x366   :  { %v4875_v49 = vld.sshfl [vmem:[#allocation1] sm:$0xff pattern:$0x73625140] }
 0x367   :  { %9191 = vmatmul.msk.bf16.vlgmr.msrb.gmra.mxu0 %vm3857_vm9, %v4875_v49 }
 0x36a   :  { %v4804_v13 = vld.sshfl [vmem:[#allocation1 + $0x20] sm:$0xff pattern:$0x73625140] }
 0x36b   :  { %4868 = vst [vmem:[#allocation1 + $0x20] ss:$4 sm:$0xff] %v10671_v30 }
 0x36c   :  { %9174 = vmatmul.msk.bf16.gmra.mxu3 %vm3857_vm9, %v4804_v13  ;;  %4870 = vst [vmem:[#allocation1 + $0x21] ss:$4 sm:$0xff] %v10685_v38 }
 0x36d   :  { %4872 = vst [vmem:[#allocation1 + $0x22] ss:$4 sm:$0xff] %v10691_v12 }
 0x36e   :  { %4874 = vst [vmem:[#allocation1 + $0x23] ss:$4 sm:$0xff] %v10715_v45 }
 0x375   :  { %v4876_v19 = vld.sshfl [vmem:[#allocation1 + $0x20] sm:$0xff pattern:$0x73625140] }
 0x377   :  { %9192 = vmatmul.msk.bf16.gmra.mxu0 %vm3857_vm9, %v4876_v19 }
 0x38b   :  { %v4328_v28 = vpop.f32.mrf.mxu0 }
 0x393   :  { %v4330_v1 = vpop.f32.mrf.mxu0 }
 0x397   :  { %v4400_v41 = vpop.f32.mrf.mxu1 }
 0x398   :  { %v4401_v44 = vadd.f32 %v4400_v41, %v4328_v28 }
 0x39a   :  { %v10829_v55 = vadd.f32 %v10823_v43, %v4401_v44 }
 0x39b   :  { %v4333_v63 = vpop.f32.mrf.mxu0 }
 0x39c   :  { %v4950_v14 = vsel %vm3857_vm9, %v10829_v55, 0.0 }
 0x39f   :  { %v4402_v33 = vpop.f32.mrf.mxu1 }
 0x3a0   :  { %v4403_v34 = vadd.f32 %v4402_v33, %v4330_v1 }
 0x3a2   :  { %v10826_v39 = vadd.f32 %v10823_v43, %v4403_v34 }
 0x3a3   :  { %v4335_v11 = vpop.f32.mrf.mxu0 }
 0x3a4   :  { %v4951_v6 = vsel %vm3857_vm9, %v10826_v39, 0.0 }
 0x3a5   :  { %v4952_v28 = vadd.f32 %v4951_v6, %v4950_v14 }
 0x3a7   :  { %v4405_v26 = vpop.f32.mrf.mxu1 }
 0x3a8   :  { %v4482_v59 = vpop.f32.mrf.mxu2  ;;  %v4406_v37 = vadd.f32 %v4405_v26, %v4333_v63 }
 0x3aa   :  { %v10832_v3 = vadd.f32 %v10823_v43, %v4406_v37 }
 0x3ac   :  { %v4953_v47 = vsel %vm3857_vm9, %v10832_v3, 0.0 }
 0x3af   :  { %v4407_v12 = vpop.f32.mrf.mxu1 }
 0x3b0   :  { %v4484_v17 = vpop.f32.mrf.mxu2  ;;  %v4408_v62 = vadd.f32 %v4407_v12, %v4335_v11 }
 0x3b2   :  { %v10840_v8 = vadd.f32 %v10823_v43, %v4408_v62 }
 0x3b3   :  { %v4546_v30 = vpop.f32.mrf.mxu3 }
 0x3b4   :  { %v4547_v0 = vadd.f32 %v4546_v30, %v4482_v59  ;;  %v4955_v59 = vsel %vm3857_vm9, %v10840_v8, 0.0 }
 0x3b6   :  { %v10845_v22 = vadd.f32 %v10823_v43, %v4547_v0  ;;  %v10121_v0 = vmov 128.0  }
 0x3b7   :  { %9812 = vrcp.f32 %v10121_v0 }
 0x3b8   :  { %v4628_v23 = vpop.f32.mrf.mxu0  ;;  %v4487_v50 = vpop.f32.mrf.mxu2  ;;  %v4964_v30 = vsel %vm3857_vm9, %v10845_v22, 0.0 }
 0x3bb   :  { %v4548_v38 = vpop.f32.mrf.mxu3 }
 0x3bc   :  { %v4549_v48 = vadd.f32 %v4548_v38, %v4484_v17  ;;  %v4954_v17 = vadd.f32 %v4953_v47, %v4952_v28 }
 0x3be   :  { %v10837_v35 = vadd.f32 %v10823_v43, %v4549_v48 }
 0x3c0   :  { %v4630_v20 = vpop.f32.mrf.mxu0  ;;  %v4489_v4 = vpop.f32.mrf.mxu2  ;;  %v4965_v1 = vsel %vm3857_vm9, %v10837_v35, 0.0 }
 0x3c3   :  { %v4551_v45 = vpop.f32.mrf.mxu3  ;;  %v4692_v24 = vpop.f32.mrf.mxu1 }
 0x3c4   :  { %v4552_v42 = vadd.f32 %v4551_v45, %v4487_v50  ;;  %v4693_v10 = vadd.f32 %v4692_v24, %v4628_v23  ;;  %v4966_v50 = vadd.f32 %v4965_v1, %v4964_v30 }
 0x3c6   :  { %v10848_v53 = vadd.f32 %v10823_v43, %v4552_v42 }
 0x3c8   :  { %v4633_v21 = vpop.f32.mrf.mxu0  ;;  %v4967_v23 = vsel %vm3857_vm9, %v10848_v53, 0.0 }
 0x3c9   :  { %v4968_v45 = vadd.f32 %v4967_v23, %v4966_v50 }
 0x3cb   :  { %v4553_v25 = vpop.f32.mrf.mxu3  ;;  %v4694_v52 = vpop.f32.mrf.mxu1 }
 0x3cc   :  { %v4695_v5 = vadd.f32 %v4694_v52, %v4630_v20  ;;  %v4554_v54 = vadd.f32 %v4553_v25, %v4489_v4  ;;  %v4956_v20 = vadd.f32 %v4955_v59, %v4954_v17 }
 0x3ce   :  { %v10855_v63 = vadd.f32 %v10823_v43, %v4554_v54  ;;  %v4957_v44 = vrot.slane %v4956_v20, 4 }
 0x3d0   :  { %v4635_v31 = vpop.f32.mrf.mxu0  ;;  %v4969_v12 = vsel %vm3857_vm9, %v10855_v63, 0.0 }
 0x3d3   :  { %v4697_v56 = vpop.f32.mrf.mxu1 }
 0x3d4   :  { %v4765_v51 = vpop.f32.mrf.mxu2  ;;  %v4698_v2 = vadd.f32 %v4697_v56, %v4633_v21 }
 0x3d5   :  { %v4775_v49 = vadd.f32 %v4765_v51, %v4693_v10 }
 0x3db   :  { %v4699_v26 = vpop.f32.mrf.mxu1 }
 0x3dc   :  { %v4767_v18 = vpop.f32.mrf.mxu2  ;;  %v4700_v24 = vadd.f32 %v4699_v26, %v4635_v31 }
 0x3dd   :  { %v4776_v15 = vadd.f32 %v4767_v18, %v4695_v5  ;;  %v4970_v18 = vadd.f32 %v4969_v12, %v4968_v45 }
 0x3df   :  { %v4842_v40 = vpop.f32.mrf.mxu3  ;;  %v4971_v5 = vrot.slane %v4970_v18, 4 }
 0x3e0   :  { %v4852_v11 = vadd.f32 %v4842_v40, %v4775_v49 }
 0x3e2   :  { %v10869_v21 = vadd.f32 %v10823_v43, %v4852_v11 }
 0x3e4   :  { %v4914_v32 = vpop.f32.mrf.mxu0  ;;  %v4770_v58 = vpop.f32.mrf.mxu2  ;;  %v4978_v56 = vsel %vm3857_vm9, %v10869_v21, 0.0 }
 0x3e5   :  { %v4777_v13 = vadd.f32 %v4770_v58, %v4698_v2  ;;  %v10880_v37 = vadd.f32 %v10823_v43, %v4914_v32  ;;  %v4958_v2 = vadd.f32 %v4957_v44, %v4956_v20 }
 0x3e7   :  { %v4844_v60 = vpop.f32.mrf.mxu3  ;;  %v4936_v6 = vsel %vm3857_vm9, %v10880_v37, 0.0  ;;  %v4959_v59 = vrot.slane %v4958_v2, 2 }
 0x3e8   :  { %v4853_v19 = vadd.f32 %v4844_v60, %v4776_v15 }
 0x3e9   :  { %v4960_v26 = vadd.f32 %v4959_v59, %v4958_v2 }
 0x3ea   :  { %v10864_v38 = vadd.f32 %v10823_v43, %v4853_v19  ;;  %v4972_v19 = vadd.f32 %v4971_v5, %v4970_v18 }
 0x3eb   :  { %v4961_v45 = vrot.slane %v4960_v26, 1 }
 0x3ec   :  { %v4916_v29 = vpop.f32.mrf.mxu0  ;;  %v4772_v4 = vpop.f32.mrf.mxu2  ;;  %v4979_v40 = vsel %vm3857_vm9, %v10864_v38, 0.0  ;;  %v4973_v30 = vrot.slane %v4972_v19, 2 }
 0x3ed   :  { %v10875_v52 = vadd.f32 %v10823_v43, %v4916_v29  ;;  %v4778_v34 = vadd.f32 %v4772_v4, %v4700_v24  ;;  %v4980_v42 = vadd.f32 %v4979_v40, %v4978_v56  ;;  %v4962_v44 = vadd.f32 %v4961_v45, %v4960_v26 }
 0x3ee   :  { %v4974_v4 = vadd.f32 %v4973_v30, %v4972_v19 }
 0x3ef   :  { %v4847_v41 = vpop.f32.mrf.mxu3  ;;  %v4937_v58 = vsel %vm3857_vm9, %v10875_v52, 0.0 }
 0x3f0   :  { %v4854_v33 = vadd.f32 %v4847_v41, %v4777_v13  ;;  %v4938_v15 = vadd.f32 %v4937_v58, %v4936_v6  ;;  %v9813_v13 = vpop.eup %9812  ;;  %v4975_v40 = vrot.slane %v4974_v4, 1 }
 0x3f1   :  { %v4993_v17 = vmul.f32 128.0, %v9813_v13  ;;  %vm4997_vm5 = vweird.f32 %v9813_v13 }
 0x3f2   :  { %v10872_v25 = vadd.f32 %v10823_v43, %v4854_v33 }
 0x3f3   :  { %v4994_v12 = vsub.f32 1.0, %v4993_v17 }
 0x3f4   :  { %v4919_v51 = vpop.f32.mrf.mxu0  ;;  %v4981_v60 = vsel %vm3857_vm9, %v10872_v25, 0.0 }
 0x3f5   :  { %v10883_v48 = vadd.f32 %v10823_v43, %v4919_v51  ;;  %v4982_v54 = vadd.f32 %v4981_v60, %v4980_v42  ;;  %v4995_v18 = vmul.f32 %v9813_v13, %v4994_v12 }
 0x3f7   :  { %v4849_v31 = vpop.f32.mrf.mxu3  ;;  %v4939_v10 = vsel %vm3857_vm9, %v10883_v48, 0.0  ;;  %v4996_v60 = vadd.f32 %v9813_v13, %v4995_v18 }
 0x3f8   :  { %v4855_v62 = vadd.f32 %v4849_v31, %v4778_v34  ;;  %v4940_v28 = vadd.f32 %v4939_v10, %v4938_v15 }
 0x3f9   :  { %v10905_v5 = vsel %vm4997_vm5, %v9813_v13, %v4996_v60 }
 0x3fa   :  { %v10892_v32 = vadd.f32 %v10823_v43, %v4855_v62  ;;  %v4976_v62 = vadd.f32 %v4975_v40, %v4974_v4 }
 0x3fc   :  { %v4983_v29 = vsel %vm3857_vm9, %v10892_v32, 0.0  ;;  %v4921_v14 = vpop.f32.mrf.mxu0 }
 0x3fd   :  { %v4984_v47 = vadd.f32 %v4983_v29, %v4982_v54  ;;  %v10901_v49 = vadd.f32 %v10823_v43, %v4921_v14 }
 0x3ff   :  { %v4985_v1 = vrot.slane %v4984_v47, 4  ;;  %v4941_v41 = vsel %vm3857_vm9, %v10901_v49, 0.0 }
 0x400   :  { %v4942_v11 = vadd.f32 %v4941_v41, %v4940_v28 }
 0x401   :  { %v4986_v33 = vadd.f32 %v4985_v1, %v4984_v47 }
 0x402   :  { %v4943_v23 = vrot.slane %v4942_v11, 4 }
 0x403   :  { %v4987_v50 = vrot.slane %v4986_v33, 2 }
 0x404   :  { %v4944_v20 = vadd.f32 %v4943_v23, %v4942_v11 }
 0x405   :  { %v4988_v24 = vadd.f32 %v4987_v50, %v4986_v33 }
 0x406   :  { %v4945_v43 = vrot.slane %v4944_v20, 2 }
 0x407   :  { %v4989_v31 = vrot.slane %v4988_v24, 1 }
 0x408   :  { %v4946_v51 = vadd.f32 %v4945_v43, %v4944_v20 }
 0x409   :  { %v4990_v42 = vadd.f32 %v4989_v31, %v4988_v24 }
 0x40a   :  { %v4947_v34 = vrot.slane %v4946_v51, 1 }
 0x40c   :  { %v4948_v56 = vadd.f32 %v4947_v34, %v4946_v51 }
 0x40e   :  { %v4963_v0 = vadd.f32 %v4962_v44, %v4948_v56 }
 0x410   :  { %v4977_v58 = vadd.f32 %v4976_v62, %v4963_v0 }
 0x412   :  { %v4991_v6 = vadd.f32 %v4990_v42, %v4977_v58 }
 0x414   :  { %v10908_v54 = vmul.f32 %v10905_v5, %v4991_v6 }
 0x416   :  { %v5000_v10 = vsub.f32 %v10880_v37, %v10908_v54  ;;  %v5001_v2 = vsub.f32 %v10875_v52, %v10908_v54  ;;  %v5002_v15 = vsub.f32 %v10883_v48, %v10908_v54  ;;  %v5003_v29 = vsub.f32 %v10901_v49, %v10908_v54 }
 0x417   :  { %v5022_v14 = vsub.f32 %v10829_v55, %v10908_v54  ;;  %v5023_v47 = vsub.f32 %v10826_v39, %v10908_v54  ;;  %v5024_v13 = vsub.f32 %v10832_v3, %v10908_v54  ;;  %v5025_v19 = vsub.f32 %v10840_v8, %v10908_v54 }
 0x418   :  { %v5004_v28 = vmul.f32 %v5000_v10, %v5000_v10  ;;  %v5005_v1 = vmul.f32 %v5001_v2, %v5001_v2  ;;  %v5006_v41 = vmul.f32 %v5002_v15, %v5002_v15  ;;  %v5007_v59 = vmul.f32 %v5003_v29, %v5003_v29 }
 0x419   :  { %v5026_v11 = vmul.f32 %v5022_v14, %v5022_v14  ;;  %v5027_v33 = vmul.f32 %v5023_v47, %v5023_v47  ;;  %v5028_v17 = vmul.f32 %v5024_v13, %v5024_v13  ;;  %v5029_v30 = vmul.f32 %v5025_v19, %v5025_v19 }
 0x41a   :  { %v5008_v23 = vsel %vm3857_vm9, %v5004_v28, 0.0  ;;  %v5009_v26 = vsel %vm3857_vm9, %v5005_v1, 0.0  ;;  %v5011_v50 = vsel %vm3857_vm9, %v5006_v41, 0.0  ;;  %v5013_v20 = vsel %vm3857_vm9, %v5007_v59, 0.0 }
 0x41b   :  { %v5010_v12 = vadd.f32 %v5009_v26, %v5008_v23  ;;  %v5030_v4 = vsel %vm3857_vm9, %v5026_v11, 0.0  ;;  %v5031_v43 = vsel %vm3857_vm9, %v5027_v33, 0.0  ;;  %v5033_v45 = vsel %vm3857_vm9, %v5028_v17, 0.0 }
 0x41c   :  { %v5032_v24 = vadd.f32 %v5031_v43, %v5030_v4  ;;  %v5035_v51 = vsel %vm3857_vm9, %v5029_v30, 0.0  ;;  %v5044_v18 = vsub.f32 %v10845_v22, %v10908_v54  ;;  %v5045_v40 = vsub.f32 %v10837_v35, %v10908_v54 }
 0x41d   :  { %v5012_v34 = vadd.f32 %v5011_v50, %v5010_v12  ;;  %v5046_v44 = vsub.f32 %v10848_v53, %v10908_v54  ;;  %v5047_v31 = vsub.f32 %v10855_v63, %v10908_v54  ;;  %v5066_v56 = vsub.f32 %v10869_v21, %v10908_v54 }
 0x41e   :  { %v5034_v60 = vadd.f32 %v5033_v45, %v5032_v24  ;;  %v5048_v62 = vmul.f32 %v5044_v18, %v5044_v18  ;;  %v5049_v0 = vmul.f32 %v5045_v40, %v5045_v40  ;;  %v5067_v42 = vsub.f32 %v10864_v38, %v10908_v54 }
 0x41f   :  { %v5014_v58 = vadd.f32 %v5013_v20, %v5012_v34  ;;  %v5050_v6 = vmul.f32 %v5046_v44, %v5046_v44  ;;  %v5051_v10 = vmul.f32 %v5047_v31, %v5047_v31  ;;  %v5068_v2 = vsub.f32 %v10872_v25, %v10908_v54 }
 0x420   :  { %v5036_v15 = vadd.f32 %v5035_v51, %v5034_v60  ;;  %v5052_v29 = vsel %vm3857_vm9, %v5048_v62, 0.0  ;;  %v5053_v14 = vsel %vm3857_vm9, %v5049_v0, 0.0  ;;  %v5069_v47 = vsub.f32 %v10892_v32, %v10908_v54 }
 0x421   :  { %v5015_v13 = vrot.slane %v5014_v58, 4  ;;  %v5054_v19 = vadd.f32 %v5053_v14, %v5052_v29  ;;  %v5055_v28 = vsel %vm3857_vm9, %v5050_v6, 0.0  ;;  %v5070_v41 = vmul.f32 %v5066_v56, %v5066_v56 }
 0x422   :  { %v5037_v1 = vrot.slane %v5036_v15, 4  ;;  %v5071_v59 = vmul.f32 %v5067_v42, %v5067_v42  ;;  %v5072_v11 = vmul.f32 %v5068_v2, %v5068_v2  ;;  %v5057_v30 = vsel %vm3857_vm9, %v5051_v10, 0.0 }
 0x423   :  { %v5016_v33 = vadd.f32 %v5015_v13, %v5014_v58  ;;  %v5056_v17 = vadd.f32 %v5055_v28, %v5054_v19  ;;  %v5073_v26 = vmul.f32 %v5069_v47, %v5069_v47  ;;  %v5074_v50 = vsel %vm3857_vm9, %v5070_v41, 0.0 }
 0x424   :  { %v5038_v23 = vadd.f32 %v5037_v1, %v5036_v15  ;;  %v5075_v20 = vsel %vm3857_vm9, %v5071_v59, 0.0  ;;  %v5077_v24 = vsel %vm3857_vm9, %v5072_v11, 0.0 }
 0x425   :  { %v5017_v12 = vrot.slane %v5016_v33, 2  ;;  %v5058_v4 = vadd.f32 %v5057_v30, %v5056_v17  ;;  %v5076_v43 = vadd.f32 %v5075_v20, %v5074_v50  ;;  %v5079_v44 = vsel %vm3857_vm9, %v5073_v26, 0.0  ;;  %v5089_v50 = vld [vmem:[%s12716_s9] sm:$0x1] }
 0x426   :  { %v5039_v45 = vrot.slane %v5038_v23, 2 }
 0x427   :  { %v5018_v51 = vadd.f32 %v5017_v12, %v5016_v33  ;;  %v5059_v18 = vrot.slane %v5058_v4, 4  ;;  %v5078_v40 = vadd.f32 %v5077_v24, %v5076_v43 }
 0x428   :  { %v5040_v34 = vadd.f32 %v5039_v45, %v5038_v23 }
 0x429   :  { %v5019_v31 = vrot.slane %v5018_v51, 1  ;;  %v5060_v56 = vadd.f32 %v5059_v18, %v5058_v4  ;;  %v5080_v60 = vadd.f32 %v5079_v44, %v5078_v40 }
 0x42a   :  { %v5041_v62 = vrot.slane %v5040_v34, 1 }
 0x42b   :  { %v5020_v0 = vadd.f32 %v5019_v31, %v5018_v51  ;;  %v5061_v42 = vrot.slane %v5060_v56, 2  ;;  %v5081_v58 = vrot.slane %v5080_v60, 4 }
 0x42c   :  { %v5042_v6 = vadd.f32 %v5041_v62, %v5040_v34 }
 0x42d   :  { %v5062_v10 = vadd.f32 %v5061_v42, %v5060_v56  ;;  %v5082_v2 = vadd.f32 %v5081_v58, %v5080_v60 }
 0x42e   :  { %v5043_v15 = vadd.f32 %v5042_v6, %v5020_v0 }
 0x42f   :  { %v5063_v29 = vrot.slane %v5062_v10, 1  ;;  %v5083_v14 = vrot.slane %v5082_v2, 2 }
 0x431   :  { %v5064_v47 = vadd.f32 %v5063_v29, %v5062_v10  ;;  %v5084_v13 = vadd.f32 %v5083_v14, %v5082_v2 }
 0x433   :  { %v5065_v19 = vadd.f32 %v5064_v47, %v5043_v15  ;;  %v5085_v28 = vrot.slane %v5084_v13, 1 }
 0x435   :  { %v5086_v1 = vadd.f32 %v5085_v28, %v5084_v13 }
 0x437   :  { %v5087_v41 = vadd.f32 %v5086_v1, %v5065_v19 }
 0x439   :  { %v5088_v59 = vmul.f32 %v5087_v41, %v10905_v5  ;;  %v5102_v5 = vld [vmem:[%s12717_s10] sm:$0x1] }
 0x43b   :  { %v5090_v11 = vadd.f32 1e-05, %v5088_v59 }
 0x43d   :  { %9814 = vrsqrt.f32 %v5090_v11  ;;  %vm5097_vm7 = vweird.f32 %v5090_v11 }
 0x443   :  { %v9815_v33 = vpop.eup %9814 }
 0x444   :  { %v5092_v17 = vmul.f32 %v9815_v33, %v5090_v11  ;;  %vm5098_vm6 = vweird.f32 %v9815_v33 }
 0x445   :  { %vm5099_vm10 = vmor %vm5097_vm7, %vm5098_vm6 }
 0x446   :  { %v5093_v30 = vmul.f32 %v9815_v33, %v5092_v17 }
 0x448   :  { %v5094_v23 = vmul.f32 0.5, %v5093_v30 }
 0x44a   :  { %v5095_v26 = vsub.f32 1.5, %v5094_v23 }
 0x44c   :  { %v5096_v20 = vmul.f32 %v9815_v33, %v5095_v26 }
 0x44e   :  { %v5100_v12 = vsel %vm5099_vm10, %v9815_v33, %v5096_v20 }
 0x44f   :  { %v5101_v4 = vmul.f32 %v5100_v12, %v5089_v50 }
 0x451   :  { %v5103_v43 = vmul.f32 %v5101_v4, %v10908_v54  ;;  %v5106_v45 = vperm.slane %v5101_v4, 0 }
 0x453   :  { %v5104_v24 = vsub.f32 %v5102_v5, %v5103_v43  ;;  %v5110_v51 = vmul.f32 %v5106_v45, %v10883_v48  ;;  %v5111_v18 = vmul.f32 %v5106_v45, %v10901_v49  ;;  %v5108_v34 = vmul.f32 %v5106_v45, %v10880_v37 }
 0x454   :  { %v5109_v44 = vmul.f32 %v5106_v45, %v10875_v52  ;;  %v5133_v31 = vmul.f32 %v5106_v45, %v10832_v3  ;;  %v5134_v56 = vmul.f32 %v5106_v45, %v10840_v8  ;;  %v5131_v6 = vmul.f32 %v5106_v45, %v10829_v55 }
 0x455   :  { %v5113_v40 = vperm.slane %v5104_v24, 0  ;;  %v5132_v48 = vmul.f32 %v5106_v45, %v10826_v39  ;;  %v5151_v10 = vmul.f32 %v5106_v45, %v10845_v22  ;;  %v5152_v37 = vmul.f32 %v5106_v45, %v10837_v35 }
 0x456   :  { %v5153_v52 = vmul.f32 %v5106_v45, %v10848_v53  ;;  %v5154_v15 = vmul.f32 %v5106_v45, %v10855_v63  ;;  %v5171_v14 = vmul.f32 %v5106_v45, %v10869_v21  ;;  %v5172_v35 = vmul.f32 %v5106_v45, %v10864_v38 }
 0x457   :  { %v5117_v60 = vadd.f32 %v5113_v40, %v5110_v51  ;;  %v5118_v62 = vadd.f32 %v5113_v40, %v5111_v18  ;;  %v5115_v0 = vadd.f32 %v5113_v40, %v5108_v34  ;;  %v5116_v42 = vadd.f32 %v5113_v40, %v5109_v44 }
 0x458   :  { %v5137_v54 = vadd.f32 %v5133_v31, %v5113_v40  ;;  %v5138_v58 = vadd.f32 %v5134_v56, %v5113_v40  ;;  %v5135_v49 = vadd.f32 %v5131_v6, %v5113_v40  ;;  %v5136_v8 = vadd.f32 %v5132_v48, %v5113_v40 }
 0x459   :  { %v5123_v3 = vmul.f32 0.01, %v5115_v0  ;;  %v5124_v2 = vmul.f32 0.01, %v5116_v42  ;;  %vm5119_vm11 = vcmp.ge.f32.partialorder %v5115_v0, 0.0  ;;  %vm5120_vm12 = vcmp.ge.f32.partialorder %v5116_v42, 0.0 }
 0x45a   :  { %v5125_v29 = vmul.f32 0.01, %v5117_v60  ;;  %vm5121_vm13 = vcmp.ge.f32.partialorder %v5117_v60, 0.0  ;;  %v5126_v55 = vmul.f32 0.01, %v5118_v62  ;;  %v5157_v39 = vadd.f32 %v5153_v52, %v5113_v40 }
 0x45b   :  { %v5158_v47 = vadd.f32 %v5154_v15, %v5113_v40  ;;  %vm5122_vm14 = vcmp.ge.f32.partialorder %v5118_v62, 0.0  ;;  %vm5139_vm15 = vcmp.ge.f32.partialorder %v5135_v49, 0.0  ;;  %v5155_v22 = vadd.f32 %v5151_v10, %v5113_v40 }
 0x45c   :  { %v10980_v53 = vsel %vm5119_vm11, %v5115_v0, %v5123_v3  ;;  %v10982_v13 = vsel %vm5120_vm12, %v5116_v42, %v5124_v2  ;;  %vm5140_vm0 = vcmp.ge.f32.partialorder %v5136_v8, 0.0  ;;  %vm5141_vm1 = vcmp.ge.f32.partialorder %v5137_v54, 0.0 }
 0x45d   :  { %v10984_v63 = vsel %vm5121_vm13, %v5117_v60, %v5125_v29  ;;  %v5143_v19 = vmul.f32 0.01, %v5135_v49  ;;  %v5156_v28 = vadd.f32 %v5152_v37, %v5113_v40  ;;  %v5173_v21 = vmul.f32 %v5106_v45, %v10872_v25 }
 0x45e   :  { %v10987_v1 = vsel %vm5122_vm14, %v5118_v62, %v5126_v55  ;;  %vm5142_vm2 = vcmp.ge.f32.partialorder %v5138_v58, 0.0  ;;  %v5174_v41 = vmul.f32 %v5106_v45, %v10892_v32  ;;  %v5175_v59 = vadd.f32 %v5171_v14, %v5113_v40 }
 0x45f   :  { %v5144_v11 = vmul.f32 0.01, %v5136_v8  ;;  %v5145_v38 = vmul.f32 0.01, %v5137_v54  ;;  %v5176_v33 = vadd.f32 %v5172_v35, %v5113_v40  ;;  %v5177_v17 = vadd.f32 %v5173_v21, %v5113_v40 }
 0x460   :  { %v5146_v30 = vmul.f32 0.01, %v5138_v58  ;;  %vm5159_vm4 = vcmp.ge.f32.partialorder %v5155_v22, 0.0  ;;  %v5163_v23 = vmul.f32 0.01, %v5155_v22  ;;  %v10990_v26 = vadd.f32 %v5174_v41, %v5113_v40 }
 0x461   :  { %v10993_v50 = vsel %vm5139_vm15, %v5135_v49, %v5143_v19  ;;  %v5164_v20 = vmul.f32 0.01, %v5156_v28  ;;  %v5165_v25 = vmul.f32 0.01, %v5157_v39  ;;  %v5166_v12 = vmul.f32 0.01, %v5158_v47 }
 0x462   :  { %vm5160_vm5 = vcmp.ge.f32.partialorder %v5156_v28, 0.0  ;;  %vm5161_vm6 = vcmp.ge.f32.partialorder %v5157_v39, 0.0  ;;  %vm5162_vm7 = vcmp.ge.f32.partialorder %v5158_v47, 0.0  ;;  %v5183_v32 = vmul.f32 0.01, %v5175_v59 }
 0x463   :  { %v10996_v4 = vsel %vm5140_vm0, %v5136_v8, %v5144_v11  ;;  %vm5179_vm10 = vcmp.ge.f32.partialorder %v5175_v59, 0.0  ;;  %v5184_v5 = vmul.f32 0.01, %v5176_v33  ;;  %v5185_v43 = vmul.f32 0.01, %v5177_v17 }
 0x464   :  { %v10999_v45 = vsel %vm5141_vm1, %v5137_v54, %v5145_v38  ;;  %v11002_v24 = vsel %vm5142_vm2, %v5138_v58, %v5146_v30  ;;  %vm5180_vm11 = vcmp.ge.f32.partialorder %v5176_v33, 0.0  ;;  %vm5181_vm12 = vcmp.ge.f32.partialorder %v5177_v17, 0.0 }
 0x465   :  { %v11005_v51 = vsel %vm5159_vm4, %v5155_v22, %v5163_v23  ;;  %v11007_v18 = vsel %vm5160_vm5, %v5156_v28, %v5164_v20  ;;  %v11009_v40 = vsel %vm5161_vm6, %v5157_v39, %v5165_v25  ;;  %v11011_v34 = vsel %vm5162_vm7, %v5158_v47, %v5166_v12 }
 0x466   :  { %v11014_v44 = vmul.f32 0.01, %v10990_v26  ;;  %v11016_v31 = vsel %vm5179_vm10, %v5175_v59, %v5183_v32  ;;  %v5195_v56 = vrot.slane %v10980_v53, 1  ;;  %v5196_v60 = vrot.slane %v10980_v53, 2 }
 0x467   :  { %v11020_v62 = vsel %vm5180_vm11, %v5176_v33, %v5184_v5  ;;  %v11022_v0 = vsel %vm5181_vm12, %v5177_v17, %v5185_v43  ;;  %v5197_v42 = vrot.slane %v10980_v53, 3  ;;  %v5209_v15 = vrot.slane %v10984_v63, 1 }
 0x468   :  { %v5255_v38 = vrot.slane %v10993_v50, 1  ;;  %v5256_v33 = vrot.slane %v10993_v50, 2  ;;  %v5257_v17 = vrot.slane %v10993_v50, 3  ;;  %v5258_v30 = vrot.slane %v10993_v50, 4 }
 0x469   :  { %v5259_v23 = vrot.slane %v10993_v50, 5  ;;  %v5260_v20 = vrot.slane %v10993_v50, 6  ;;  %v5261_v25 = vrot.slane %v10993_v50, 7  ;;  %v5262_v12 = vrot.slane %v10996_v4, 1 }
 0x46a   :  { %vm5182_vm13 = vcmp.ge.f32.partialorder %v10990_v26, 0.0  ;;  %v5263_v32 = vrot.slane %v10996_v4, 2  ;;  %v5264_v5 = vrot.slane %v10996_v4, 3  ;;  %v5265_v43 = vrot.slane %v10996_v4, 4 }
 0x46b   :  { %v5269_v2 = vrot.slane %v10999_v45, 1  ;;  %v5270_v3 = vrot.slane %v10999_v45, 2  ;;  %v5271_v52 = vrot.slane %v10999_v45, 3  ;;  %v5272_v37 = vrot.slane %v10999_v45, 4 }
 0x46c   :  { %v5273_v10 = vrot.slane %v10999_v45, 5  ;;  %v5274_v49 = vrot.slane %v10999_v45, 6  ;;  %v5275_v48 = vrot.slane %v10999_v45, 7  ;;  %v5276_v6 = vrot.slane %v11002_v24, 1 }
 0x46d   :  { %v5277_v58 = vrot.slane %v11002_v24, 2  ;;  %v5278_v54 = vrot.slane %v11002_v24, 3  ;;  %v5279_v8 = vrot.slane %v11002_v24, 4  ;;  %v5280_v11 = vrot.slane %v11002_v24, 5 }
 0x46e   :  { %v5281_v59 = vrot.slane %v11002_v24, 6  ;;  %v5282_v27 = vrot.slane %v11002_v24, 7  ;;  %v5283_v9 = vperm.slane %v10993_v50, 0  ;;  %v5284_v41 = vperm.slane %v5255_v38, 0 }
 0x46f   :  { %v5285_v21 = vperm.slane %v5256_v33, 0  ;;  %v5286_v28 = vperm.slane %v5257_v17, 0  ;;  %v11080_v19 = vperm.slane %v5258_v30, 0  ;;  %v11082_v35 = vperm.slane %v5259_v23, 0 }
 0x470   :  { %v11084_v22 = vperm.slane %v5260_v20, 0  ;;  %v11086_v47 = vperm.slane %v5261_v25, 0  ;;  %v5291_v39 = vperm.slane %v10996_v4, 0  ;;  %v11089_v55 = vperm.slane %v5262_v12, 0 }
 0x471   :  { %v11091_v14 = vperm.slane %v5263_v32, 0  ;;  %v11093_v29 = vperm.slane %v5264_v5, 0  ;;  %v11095_v50 = vperm.slane %v5265_v43, 0  ;;  %v5299_v38 = vperm.slane %v10999_v45, 0 }
 0x472   :  { %v5300_v33 = vperm.slane %v5269_v2, 0  ;;  %v5301_v17 = vperm.slane %v5270_v3, 0  ;;  %v5302_v30 = vperm.slane %v5271_v52, 0  ;;  %v5303_v23 = vperm.slane %v5272_v37, 0 }
 0x473   :  { %v5347_v20 = vsel %vm538_vm3, %v10980_v53, %v5283_v9  ;;  %v5348_v25 = vsel %vm538_vm3, %v5195_v56, %v5284_v41  ;;  %v5304_v12 = vperm.slane %v5273_v10, 0  ;;  %v5305_v32 = vperm.slane %v5274_v49, 0  ;;  %v9756_v49 = vld [vmem:[#allocation13 + $0x38] sm:$0xff]  ;;  %v9755_v41 = vld [vmem:[#allocation13 + $0x30] sm:$0xff] }
 0x474   :  { %v5349_v5 = vsel %vm538_vm3, %v5196_v60, %v5285_v21  ;;  %v5350_v45 = vsel %vm538_vm3, %v5197_v42, %v5286_v28  ;;  %5631 = vst [vmem:[#allocation1] ss:$4 sm:$0xff] %v5347_v20  ;;  %v11113_v9 = vsel %vm5182_vm13, %v10990_v26, %v11014_v44  ;;  %v5306_v37 = vperm.slane %v5275_v48, 0  ;;  %5989 = vmatpush.bf16.msrb.mxu1 %v9756_v49 }
 0x475   :  { %v5307_v56 = vperm.slane %v11002_v24, 0  ;;  %v5308_v10 = vperm.slane %v5276_v6, 0  ;;  %5633 = vst [vmem:[#allocation1 + $0x1] ss:$4 sm:$0xff] %v5348_v25  ;;  %v5309_v52 = vperm.slane %v5277_v58, 0  ;;  %v5310_v3 = vperm.slane %v5278_v54, 0  ;;  %9785 = vmatpush.bf16.msra.mxu2 %v9756_v49 }
 0x476   :  { %v5311_v60 = vperm.slane %v5279_v8, 0  ;;  %v5312_v2 = vperm.slane %v5280_v11, 0  ;;  %5635 = vst [vmem:[#allocation1 + $0x2] ss:$4 sm:$0xff] %v5349_v5  ;;  %v5313_v21 = vperm.slane %v5281_v59, 0  ;;  %v5314_v42 = vperm.slane %v5282_v27, 0 }
 0x477   :  { %v11118_v28 = vsel %vm538_vm3, %v10984_v63, %v5299_v38  ;;  %v11123_v26 = vsel %vm538_vm3, %v5209_v15, %v5300_v33  ;;  %5637 = vst [vmem:[#allocation1 + $0x3] ss:$4 sm:$0xff] %v5350_v45  ;;  %v9760_v24 = vld [vmem:[#allocation13 + $0x58] sm:$0xff]  ;;  %v12784_v44 = vrot.slane %v10984_v63, 2  ;;  %v12785_v58 = vrot.slane %v10984_v63, 3 }
 0x478   :  { %v12787_v6 = vrot.slane %v10984_v63, 4  ;;  %v12789_v8 = vrot.slane %v10984_v63, 5  ;;  %v9764_v59 = vld [vmem:[#allocation13 + $0x78] sm:$0xff]  ;;  %v12791_v11 = vrot.slane %v10984_v63, 6  ;;  %v12793_v38 = vrot.slane %v10984_v63, 7  ;;  %6331 = vmatpush.bf16.msra.mxu3 %v9760_v24  ;;  %5990 = vmatpush.bf16.msrb.mxu1 %v9755_v41 }
 0x479   :  { %v11128_v54 = vsel %vm538_vm3, %v12784_v44, %v5301_v17  ;;  %v11133_v27 = vsel %vm538_vm3, %v12785_v58, %v5302_v30  ;;  %v11157_v17 = vsel %vm538_vm3, %v10987_v1, %v5307_v56  ;;  %v12796_v30 = vrot.slane %v10987_v1, 1  ;;  %v9759_v56 = vld [vmem:[#allocation13 + $0x50] sm:$0xff]  ;;  %6657 = vmatpush.bf16.msra.mxu0 %v9764_v59  ;;  %v9754_v59 = vld [vmem:[#allocation13 + $0x28] sm:$0xff]  ;;  %9786 = vmatpush.bf16.msra.mxu2 %v9755_v41 }
 0x47a   :  { %12786 = vst [vmem:[#allocation25_spill] sm:$0xff] %v11133_v27  ;;  %v11138_v48 = vsel %vm538_vm3, %v12787_v6, %v5303_v23  ;;  %v11143_v15 = vsel %vm538_vm3, %v12789_v8, %v5304_v12  ;;  %v11148_v43 = vsel %vm538_vm3, %v12791_v11, %v5305_v32  ;;  %v11153_v33 = vsel %vm538_vm3, %v12793_v38, %v5306_v37 }
 0x47b   :  { %12788 = vst [vmem:[#allocation26_spill] sm:$0xff] %v11138_v48  ;;  %v11162_v23 = vsel %vm538_vm3, %v12796_v30, %v5308_v10  ;;  %v12798_v20 = vrot.slane %v10987_v1, 2  ;;  %v12800_v63 = vrot.slane %v10987_v1, 3  ;;  %v12802_v32 = vrot.slane %v10987_v1, 4 }
 0x47c   :  { %12790 = vst [vmem:[#allocation27_spill] sm:$0xff] %v11143_v15  ;;  %v12804_v45 = vrot.slane %v10987_v1, 5  ;;  %v12806_v10 = vrot.slane %v10996_v4, 5  ;;  %v12808_v44 = vrot.slane %v10987_v1, 6  ;;  %v12810_v58 = vrot.slane %v10987_v1, 7  ;;  %6332 = vmatpush.bf16.msra.mxu3 %v9759_v56  ;;  %5991 = vmatpush.bf16.msrb.mxu1 %v9754_v59  ;;  %v9753_v56 = vld [vmem:[#allocation13 + $0x20] sm:$0xff] }
 0x47d   :  { %12792 = vst [vmem:[#allocation28_spill] sm:$0xff] %v11148_v43  ;;  %v11167_v25 = vsel %vm538_vm3, %v12798_v20, %v5309_v52  ;;  %v11172_v12 = vsel %vm538_vm3, %v12800_v63, %v5310_v3  ;;  %v11177_v5 = vsel %vm538_vm3, %v12802_v32, %v5311_v60  ;;  %v12807_v52 = vrot.slane %v10996_v4, 6  ;;  %9787 = vmatpush.bf16.msra.mxu2 %v9754_v59 }
 0x47e   :  { %12794 = vst [vmem:[#allocation29_spill] sm:$0xff] %v11153_v33  ;;  %v11182_v37 = vsel %vm538_vm3, %v12804_v45, %v5312_v2  ;;  %v11186_v49 = vperm.slane %v12806_v10, 0  ;;  %v11195_v60 = vsel %vm538_vm3, %v12808_v44, %v5313_v21  ;;  %v11200_v2 = vsel %vm538_vm3, %v12810_v58, %v5314_v42  ;;  %v9762_v58 = vld [vmem:[#allocation13 + $0x68] sm:$0xff] }
 0x47f   :  { %12795 = vst [vmem:[#allocation30_spill] sm:$0xff] %v11157_v17  ;;  %v11190_v3 = vperm.slane %v12807_v52, 0  ;;  %v12812_v24 = vrot.slane %v10996_v4, 7  ;;  %v12813_v8 = vrot.slane %v10980_v53, 4  ;;  %v12814_v21 = vrot.slane %v10980_v53, 5 }
 0x480   :  { %12797 = vst [vmem:[#allocation31_spill] sm:$0xff] %v11162_v23  ;;  %v12815_v1 = vrot.slane %v10980_v53, 6  ;;  %v12816_v30 = vrot.slane %v10980_v53, 7  ;;  %v12817_v20 = vrot.slane %v10982_v13, 1  ;;  %v12818_v63 = vrot.slane %v10982_v13, 2  ;;  %5992 = vmatpush.bf16.msrb.mxu1 %v9753_v56 }
 0x481   :  { %12799 = vst [vmem:[#allocation32_spill] sm:$0xff] %v11167_v25  ;;  %v11204_v6 = vperm.slane %v12812_v24, 0  ;;  %v11210_v11 = vsel %vm538_vm3, %v12813_v8, %v11080_v19  ;;  %v11216_v38 = vsel %vm538_vm3, %v12814_v21, %v11082_v35  ;;  %v11234_v35 = vsel %vm538_vm3, %v10982_v13, %v5291_v39  ;;  %v9757_v21 = vld [vmem:[#allocation13 + $0x40] sm:$0xff]  ;;  %9788 = vmatpush.bf16.msra.mxu2 %v9753_v56 }
 0x482   :  { %12801 = vst [vmem:[#allocation33_spill] sm:$0xff] %v11172_v12  ;;  %v11222_v42 = vsel %vm538_vm3, %v12815_v1, %v11084_v22  ;;  %v11228_v19 = vsel %vm538_vm3, %v12816_v30, %v11086_v47  ;;  %v11240_v22 = vsel %vm538_vm3, %v12817_v20, %v11089_v55  ;;  %v11246_v53 = vsel %vm538_vm3, %v12818_v63, %v11091_v14  ;;  %v9763_v47 = vld [vmem:[#allocation13 + $0x70] sm:$0xff]  ;;  %v9758_v14 = vld [vmem:[#allocation13 + $0x48] sm:$0xff] }
 0x483   :  { %12803 = vst [vmem:[#allocation34_spill] sm:$0xff] %v11177_v5  ;;  %v12819_v4 = vrot.slane %v10982_v13, 3  ;;  %v12820_v32 = vrot.slane %v10982_v13, 4  ;;  %6658 = vmatpush.bf16.msra.mxu0 %v9763_v47  ;;  %6333 = vmatpush.bf16.msra.mxu3 %v9758_v14  ;;  %v9761_v14 = vld [vmem:[#allocation13 + $0x60] sm:$0xff]  ;;  %v5443_v44 = vrot.slane %v11016_v31, 1  ;;  %v5444_v52 = vrot.slane %v11016_v31, 2 }
 0x484   :  { %12805 = vst [vmem:[#allocation35_spill] sm:$0xff] %v11182_v37  ;;  %v5445_v1 = vrot.slane %v11016_v31, 3  ;;  %v5446_v30 = vrot.slane %v11016_v31, 4  ;;  %v5448_v59 = vrot.slane %v11016_v31, 6  ;;  %v5449_v63 = vrot.slane %v11016_v31, 7 }
 0x485   :  { %12809 = vst [vmem:[#allocation36_spill] sm:$0xff] %v11195_v60  ;;  %v11252_v39 = vsel %vm538_vm3, %v12819_v4, %v11093_v29  ;;  %v11258_v55 = vsel %vm538_vm3, %v12820_v32, %v11095_v50  ;;  %v5450_v24 = vrot.slane %v11020_v62, 1  ;;  %v5451_v29 = vrot.slane %v11020_v62, 2 }
 0x486   :  { %12811 = vst [vmem:[#allocation37_spill] sm:$0xff] %v11200_v2  ;;  %v5452_v20 = vrot.slane %v11020_v62, 3  ;;  %v5453_v50 = vrot.slane %v11020_v62, 4  ;;  %v5457_v4 = vrot.slane %v11022_v0, 1  ;;  %v5458_v47 = vrot.slane %v11022_v0, 2 }
 0x487   :  { %6659 = vmatpush.bf16.msra.mxu0 %v9762_v58  ;;  %v5447_v58 = vrot.slane %v11016_v31, 5  ;;  %6334 = vmatpush.bf16.msra.mxu3 %v9757_v21  ;;  %v5459_v10 = vrot.slane %v11022_v0, 3  ;;  %v5460_v21 = vrot.slane %v11022_v0, 4  ;;  %v5461_v41 = vrot.slane %v11022_v0, 5 }
 0x488   :  { %v5462_v45 = vrot.slane %v11022_v0, 6  ;;  %v5464_v16 = vrot.slane %v11113_v9, 1  ;;  %v5467_v56 = vrot.slane %v11113_v9, 4  ;;  %v5468_v32 = vrot.slane %v11113_v9, 5 }
 0x489   :  { %v5469_v8 = vrot.slane %v11113_v9, 6  ;;  %v5470_v46 = vrot.slane %v11113_v9, 7  ;;  %v5471_v7 = vperm.slane %v11016_v31, 0  ;;  %v5472_v2 = vperm.slane %v5443_v44, 0 }
 0x48a   :  { %v5473_v60 = vperm.slane %v5444_v52, 0  ;;  %v5474_v37 = vperm.slane %v5445_v1, 0  ;;  %v5475_v5 = vperm.slane %v5446_v30, 0  ;;  %v5476_v12 = vperm.slane %v5447_v58, 0 }
 0x48b   :  { %6660 = vmatpush.bf16.msra.mxu0 %v9761_v14  ;;  %v5465_v14 = vrot.slane %v11113_v9, 2  ;;  %v11313_v25 = vperm.slane %v5448_v59, 0  ;;  %v11315_v23 = vperm.slane %v5449_v63, 0  ;;  %v11318_v33 = vperm.slane %v5450_v24, 0 }
 0x48c   :  { %v11320_v43 = vperm.slane %v5451_v29, 0  ;;  %v5487_v15 = vperm.slane %v11022_v0, 0  ;;  %v5488_v48 = vperm.slane %v5457_v4, 0  ;;  %v5489_v27 = vperm.slane %v5458_v47, 0 }
 0x48d   :  { %v5490_v31 = vperm.slane %v5459_v10, 0  ;;  %v5491_v44 = vperm.slane %v5460_v21, 0  ;;  %v5492_v52 = vperm.slane %v5461_v41, 0  ;;  %v5493_v1 = vperm.slane %v5462_v45, 0 }
 0x48e   :  { %v5495_v30 = vperm.slane %v11113_v9, 0  ;;  %v5535_v63 = vsel %vm538_vm3, %v11005_v51, %v5471_v7  ;;  %v12821_v59 = vrot.slane %v11005_v51, 1  ;;  %v12822_v29 = vrot.slane %v11005_v51, 3 }
 0x48f   :  { %v5496_v17 = vperm.slane %v5464_v16, 0  ;;  %v5497_v4 = vperm.slane %v5465_v14, 0  ;;  %v5499_v47 = vperm.slane %v5467_v56, 0  ;;  %v12823_v10 = vrot.slane %v11005_v51, 2  ;;  %5640 = vst [vmem:[#allocation1 + $0x20] ss:$4 sm:$0xff] %v5535_v63 }
 0x490   :  { %v5536_v24 = vsel %vm538_vm3, %v12821_v59, %v5472_v2  ;;  %v5538_v58 = vsel %vm538_vm3, %v12822_v29, %v5474_v37  ;;  %v12824_v41 = vrot.slane %v10982_v13, 5  ;;  %v12825_v2 = vrot.slane %v10982_v13, 6  ;;  %v5638_v56 = vld.sshfl [vmem:[#allocation1] sm:$0xff pattern:$0x73625140] }
 0x491   :  { %v5537_v45 = vsel %vm538_vm3, %v12823_v10, %v5473_v60  ;;  %5646 = vst [vmem:[#allocation1 + $0x23] ss:$4 sm:$0xff] %v5538_v58  ;;  %v12826_v16 = vrot.slane %v10982_v13, 7  ;;  %v5500_v60 = vperm.slane %v5468_v32, 0  ;;  %v11353_v14 = vperm.slane %v5452_v20, 0 }
 0x492   :  { %v11339_v7 = vsel %vm538_vm3, %v12824_v41, %v11186_v49  ;;  %v11345_v21 = vsel %vm538_vm3, %v12825_v2, %v11190_v3  ;;  %v11355_v59 = vperm.slane %v5453_v50, 0  ;;  %v5501_v49 = vperm.slane %v5469_v8, 0  ;;  %5642 = vst [vmem:[#allocation1 + $0x21] ss:$4 sm:$0xff] %v5536_v24 }
 0x493   :  { %v11351_v37 = vsel %vm538_vm3, %v12826_v16, %v11204_v6  ;;  %v11357_v29 = vperm.slane %v5470_v46, 0  ;;  %v11361_v3 = vsel %vm538_vm3, %v11009_v40, %v5487_v15  ;;  %v12827_v13 = vrot.slane %v11009_v40, 1  ;;  %5644 = vst [vmem:[#allocation1 + $0x22] ss:$4 sm:$0xff] %v5537_v45 }
 0x494   :  { %v12828_v32 = vrot.slane %v11009_v40, 2  ;;  %v12829_v50 = vrot.slane %v11009_v40, 3  ;;  %v12830_v8 = vrot.slane %v11009_v40, 4  ;;  %v12831_v63 = vrot.slane %v11009_v40, 5  ;;  %5648 = vst [vmem:[#allocation1] ss:$4 sm:$0xff] %v11210_v11 }
 0x495   :  { %v11366_v6 = vsel %vm538_vm3, %v12827_v13, %v5488_v48  ;;  %v12832_v24 = vrot.slane %v11009_v40, 6  ;;  %v12833_v58 = vrot.slane %v11011_v34, 1  ;;  %v12834_v10 = vrot.slane %v11011_v34, 2  ;;  %5649 = vst [vmem:[#allocation1 + $0x1] ss:$4 sm:$0xff] %v11216_v38 }
 0x496   :  { %v11371_v20 = vsel %vm538_vm3, %v12828_v32, %v5489_v27  ;;  %v11376_v46 = vsel %vm538_vm3, %v12829_v50, %v5490_v31  ;;  %v11381_v15 = vsel %vm538_vm3, %v12830_v8, %v5491_v44  ;;  %v11386_v48 = vsel %vm538_vm3, %v12831_v63, %v5492_v52  ;;  %5650 = vst [vmem:[#allocation1 + $0x2] ss:$4 sm:$0xff] %v11222_v42 }
 0x497   :  { %v11391_v27 = vsel %vm538_vm3, %v12832_v24, %v5493_v1  ;;  %v11395_v31 = vsel %vm538_vm3, %v11011_v34, %v5495_v30  ;;  %v11401_v44 = vsel %vm538_vm3, %v12833_v58, %v5496_v17  ;;  %v11406_v52 = vsel %vm538_vm3, %v12834_v10, %v5497_v4  ;;  %5651 = vst [vmem:[#allocation1 + $0x3] ss:$4 sm:$0xff] %v11228_v19 }
 0x498   :  { %v12835_v45 = vrot.slane %v11011_v34, 4  ;;  %v12836_v30 = vrot.slane %v11011_v34, 5  ;;  %v12837_v17 = vrot.slane %v11011_v34, 6  ;;  %v5734_v2 = vpack.c.bf16 %v5638_v56, %v5638_v56 }
 0x499   :  { %vm6214_vm14 = vcmask 1043456   ;;  %vm6215_vm15 = vsmask.f32 3328  ;;  %v12838_v4 = vrot.slane %v11005_v51, 4  ;;  %v12839_v16 = vrot.slane %v11005_v51, 5 }
 0x49a   :  { %v11411_v1 = vsel %vm538_vm3, %v12835_v45, %v5499_v47  ;;  %v11416_v41 = vsel %vm538_vm3, %v12836_v30, %v5500_v60  ;;  %v11422_v11 = vsel %vm538_vm3, %v12837_v17, %v5501_v49  ;;  %vm11432_vm0 = vmand %vm6214_vm14, %vm6215_vm15  ;;  %v5463_v56 = vrot.slane %v11022_v0, 7  ;;  %v5647_v24 = vld.sshfl [vmem:[#allocation1 + $0x20] sm:$0xff pattern:$0x73625140] }
 0x49b   :  { %v5539_v47 = vsel %vm538_vm3, %v12838_v4, %v5475_v5  ;;  %v5540_v60 = vsel %vm538_vm3, %v12839_v16, %v5476_v12  ;;  %v5466_v42 = vrot.slane %v11113_v9, 3  ;;  %v11438_v49 = vunpack.c.l.b16 %v5734_v2 }
 0x49c   :  { %v5757_v13 = vshrl.u32 %v5734_v2, 16  ;;  %v5760_v32 = vshll.u32 %v5734_v2, 16  ;;  %v5403_v5 = vrot.slane %v11009_v40, 7  ;;  %v6217_v12 = vsel %vm11432_vm0, %v10447_v36, 0  ;;  %5653 = vst [vmem:[#allocation1 + $0x20] ss:$4 sm:$0xff] %v5539_v47 }
 0x49d   :  { %v5494_v50 = vperm.slane %v5463_v56, 0  ;;  %v5406_v19 = vrot.slane %v11011_v34, 3  ;;  %v5498_v8 = vperm.slane %v5466_v42, 0  ;;  %v5929_v63 = vpack.c.b16 %v11438_v49, %v10490_v61  ;;  %5654 = vst [vmem:[#allocation1 + $0x21] ss:$4 sm:$0xff] %v5540_v60 }
 0x49e   :  { %v6171_v0 = vrot.slane %v5760_v32, 1  ;;  %v11449_v9 = vpack.c.b16 %v11438_v49, %v11438_v49  ;;  %v5759_v58 = vrot.slane %v5757_v13, 7  ;;  %v12843_v40 = vrot.slane %v11005_v51, 6 }
 0x49f   :  { %v5735_v36 = vpack.c.bf16 %v5647_v24, %v5647_v24  ;;  %v11456_v45 = vsel %vm538_vm3, %v5403_v5, %v5494_v50  ;;  %v11459_v30 = vsel %vm538_vm3, %v5406_v19, %v5498_v8  ;;  %v12844_v17 = vrot.slane %v11005_v51, 7  ;;  %9209 = vmatmul.msk.bf16.vlgmr.msrb.gmra.mxu1 %vm3857_vm9, %v5929_v63  ;;  %v9768_v19 = vld [vmem:[#allocation13 + $0x98] sm:$0xff] }
 0x4a0   :  { %12842 = vst [vmem:[#allocation38_spill] sm:$0xff] %v11449_v9  ;;  %v5541_v10 = vsel %vm538_vm3, %v12843_v40, %v11313_v25  ;;  %v6172_v4 = vor.u32 %v6171_v0, %v5757_v13  ;;  %v12726_v16 = vshrl.u32 %v11449_v9, 16  ;;  %v9752_v25 = vld [vmem:[#allocation13 + $0x18] sm:$0xff]  ;;  %v11467_v56 = vor.u32 %v5760_v32, %v5759_v58  ;;  %v5652_v40 = vld.sshfl [vmem:[#allocation1] sm:$0xff pattern:$0x73625140]  ;;  %6787 = vmatpush.bf16.msra.mxu1 %v9768_v19 }
 0x4a1   :  { %v5542_v2 = vsel %vm538_vm3, %v12844_v17, %v11315_v23  ;;  %v11469_v47 = vunpack.c.l.b16 %v6217_v12  ;;  %v11471_v42 = vunpack.c.l.b16 %v5735_v36  ;;  %5655 = vst [vmem:[#allocation1 + $0x22] ss:$4 sm:$0xff] %v5541_v10  ;;  %v5764_v5 = vshrl.u32 %v5735_v36, 16  ;;  %6124 = vmatpush.bf16.msrb.mxu2 %v9752_v25  ;;  %v9767_v10 = vld [vmem:[#allocation13 + $0x90] sm:$0xff] }
 0x4a2   :  { %12845 = vst [vmem:[#allocation39_spill] sm:$0xff] %v11467_v56  ;;  %v5767_v50 = vshll.u32 %v5735_v36, 16  ;;  %v6218_v51 = vsel %vm11432_vm0, %v6172_v4, 0  ;;  %v6415_v23 = vrot.slane %v12726_v16, 7  ;;  %v12727_v13 = vshll.u32 %v11449_v9, 16 }
 0x4a3   :  { %5656 = vst [vmem:[#allocation1 + $0x23] ss:$4 sm:$0xff] %v5542_v2  ;;  %v12846_v60 = vrot.slane %v11011_v34, 7  ;;  %v12847_v12 = vrot.slane %v11020_v62, 5  ;;  %v12848_v63 = vrot.slane %v11020_v62, 6  ;;  %v6257_v24 = vunpack.c.l.b16 %v6218_v51 }
 0x4a4   :  { %v6397_v58 = vpack.c.b16 %v11471_v42, %v11471_v42  ;;  %v12849_v34 = vperm.slane %v11020_v62, 0  ;;  %v6418_v36 = vor.u32 %v12727_v13, %v6415_v23  ;;  %v5736_v17 = vpack.c.bf16 %v5652_v40, %v5652_v40  ;;  %5658 = vst [vmem:[#allocation1] ss:$4 sm:$0xff] %v11234_v35  ;;  %6788 = vmatpush.bf16.msra.mxu1 %v9767_v10 }
 0x4a5   :  { %v11482_v32 = vsel %vm538_vm3, %v12846_v60, %v11357_v29  ;;  %v11486_v8 = vperm.slane %v12847_v12, 0  ;;  %v11490_v0 = vperm.slane %v12848_v63, 0  ;;  %v6173_v2 = vrot.slane %v5767_v50, 1  ;;  %5659 = vst [vmem:[#allocation1 + $0x1] ss:$4 sm:$0xff] %v11240_v22 }
 0x4a6   :  { %v5543_v29 = vsel %vm538_vm3, %v11007_v18, %v12849_v34  ;;  %v6271_v4 = vpack.c.b16 %v6257_v24, %v11469_v47  ;;  %v6420_v25 = vshrl.u32 %v6397_v58, 16  ;;  %v6423_v51 = vshll.u32 %v6397_v58, 16  ;;  %5660 = vst [vmem:[#allocation1 + $0x2] ss:$4 sm:$0xff] %v11246_v53 }
 0x4a7   :  { %v5766_v19 = vrot.slane %v5764_v5, 7  ;;  %v6540_v60 = vsel %vm10302_vm8, 0, %v6418_v36  ;;  %v11505_v12 = vunpack.c.l.b16 %v5736_v17  ;;  %v5771_v63 = vshrl.u32 %v5736_v17, 16  ;;  %5661 = vst [vmem:[#allocation1 + $0x3] ss:$4 sm:$0xff] %v11252_v39 }
 0x4a8   :  { %v5774_v23 = vshll.u32 %v5736_v17, 16  ;;  %v12850_v40 = vrot.slane %v11020_v62, 7  ;;  %v12851_v24 = vrot.slane %v11007_v18, 1  ;;  %v12852_v22 = vrot.slane %v11007_v18, 2  ;;  %9257 = vmatmul.msk.bf16.vlgmr.msra.gmra.mxu3 %vm3857_vm9, %v6271_v4 }
 0x4a9   :  { %v6422_v36 = vrot.slane %v6420_v25, 7  ;;  %v6581_v53 = vunpack.c.l.b16 %v6540_v60  ;;  %v6174_v62 = vor.u32 %v6173_v2, %v5764_v5  ;;  %v6850_v9 = vrot.slane %v6423_v51, 1 }
 0x4aa   :  { %v11510_v35 = vperm.slane %v12850_v40, 0  ;;  %v5544_v58 = vsel %vm538_vm3, %v12851_v24, %v11318_v33  ;;  %v5545_v34 = vsel %vm538_vm3, %v12852_v22, %v11320_v43  ;;  %v6175_v17 = vrot.slane %v5774_v23, 1  ;;  %v5657_v13 = vld.sshfl [vmem:[#allocation1 + $0x20] sm:$0xff pattern:$0x73625140] }
 0x4ab   :  { %v6398_v40 = vpack.c.b16 %v11505_v12, %v11505_v12  ;;  %v6425_v16 = vor.u32 %v6423_v51, %v6422_v36  ;;  %v5769_v33 = vor.u32 %v5767_v50, %v5766_v19  ;;  %v5773_v24 = vrot.slane %v5771_v63, 7  ;;  %5663 = vst [vmem:[#allocation1 + $0x20] ss:$4 sm:$0xff] %v5543_v29 }
 0x4ac   :  { %v6176_v56 = vor.u32 %v6175_v17, %v5771_v63  ;;  %v11524_v43 = vpack.c.bf16 %v5657_v13, %v5657_v13  ;;  %v12853_v39 = vrot.slane %v11007_v18, 3  ;;  %5664 = vst [vmem:[#allocation1 + $0x21] ss:$4 sm:$0xff] %v5544_v58  ;;  %v11532_v60 = vor.u32 %v6850_v9, %v6420_v25 }
 0x4ad   :  { %v6427_v4 = vshrl.u32 %v6398_v40, 16  ;;  %v6430_v22 = vshll.u32 %v6398_v40, 16  ;;  %v6541_v10 = vsel %vm10302_vm8, 0, %v6425_v16  ;;  %v5776_v2 = vor.u32 %v5774_v23, %v5773_v24  ;;  %5665 = vst [vmem:[#allocation1 + $0x22] ss:$4 sm:$0xff] %v5545_v34 }
 0x4ae   :  { %v5546_v5 = vsel %vm538_vm3, %v12853_v39, %v11353_v14  ;;  %v12854_v50 = vrot.slane %v11007_v18, 4  ;;  %v11538_v29 = vunpack.c.l.b16 %v6541_v10  ;;  %v11541_v51 = vunpack.c.l.b16 %v11524_v43  ;;  %v5662_v63 = vld.sshfl [vmem:[#allocation1] sm:$0xff pattern:$0x73625140]  ;;  %v9751_v10 = vld [vmem:[#allocation13 + $0x10] sm:$0xff] }
 0x4af   :  { %v6429_v19 = vrot.slane %v6427_v4, 7  ;;  %v11545_v14 = vpack.c.b16 %v11505_v12, %v11471_v42  ;;  %v6219_v9 = vsel %vm11432_vm0, %v6174_v62, 0  ;;  %v6220_v16 = vsel %vm11432_vm0, %v6176_v56, 0  ;;  %5666 = vst [vmem:[#allocation1 + $0x23] ss:$4 sm:$0xff] %v5546_v5  ;;  %6125 = vmatpush.bf16.msrb.mxu2 %v9751_v10 }
 0x4b0   :  { %v5547_v13 = vsel %vm538_vm3, %v12854_v50, %v11355_v59  ;;  %v6852_v25 = vrot.slane %v6430_v22, 1  ;;  %v6597_v59 = vpack.c.b16 %v11538_v29, %v6581_v53  ;;  %v11554_v23 = vpack.c.b16 %v11541_v51, %v11541_v51  ;;  %5668 = vst [vmem:[#allocation1] ss:$4 sm:$0xff] %v11258_v55 }
 0x4b1   :  { %v6432_v58 = vor.u32 %v6430_v22, %v6429_v19  ;;  %v5778_v34 = vshrl.u32 %v11524_v43, 16  ;;  %v5738_v62 = vpack.c.bf16 %v5662_v63, %v5662_v63  ;;  %v5781_v17 = vshll.u32 %v11524_v43, 16  ;;  %9210 = vmatmul.msk.bf16.gmra.mxu1 %vm3857_vm9, %v11545_v14  ;;  %5669 = vst [vmem:[#allocation1 + $0x1] ss:$4 sm:$0xff] %v11339_v7 }
 0x4b2   :  { %v11558_v36 = vor.u32 %v6852_v25, %v6427_v4  ;;  %v5871_v56 = vsel %vm10302_vm8, 0, %v5769_v33  ;;  %9281 = vmatmul.msk.bf16.vlgmr.msra.gmra.mxu0 %vm3857_vm9, %v6597_v59  ;;  %v6259_v53 = vunpack.c.l.b16 %v6220_v16  ;;  %v12730_v40 = vshrl.u32 %v11554_v23, 16  ;;  %v9766_v4 = vld [vmem:[#allocation13 + $0x88] sm:$0xff]  ;;  %5670 = vst [vmem:[#allocation1 + $0x2] ss:$4 sm:$0xff] %v11345_v21  ;;  %v9765_v16 = vld [vmem:[#allocation13 + $0x80] sm:$0xff] }
 0x4b3   :  { %v12731_v55 = vshll.u32 %v11554_v23, 16  ;;  %v6542_v24 = vsel %vm10302_vm8, 0, %v6432_v58  ;;  %v11574_v33 = vunpack.c.l.b16 %v5738_v62  ;;  %v5785_v39 = vshrl.u32 %v5738_v62, 16  ;;  %5671 = vst [vmem:[#allocation1 + $0x3] ss:$4 sm:$0xff] %v11351_v37  ;;  %6789 = vmatpush.bf16.msra.mxu1 %v9766_v4 }
 0x4b4   :  { %v11572_v22 = vunpack.c.l.b16 %v6542_v24  ;;  %v5788_v5 = vshll.u32 %v5738_v62, 16  ;;  %v12855_v7 = vrot.slane %v11007_v18, 5  ;;  %v6436_v19 = vrot.slane %v12730_v40, 7 }
 0x4b5   :  { %v5872_v21 = vsel %vm10302_vm8, 0, %v5776_v2  ;;  %v5780_v25 = vrot.slane %v5778_v34, 7  ;;  %v6258_v59 = vunpack.c.l.b16 %v6219_v9  ;;  %v11593_v37 = vunpack.c.l.b16 %v5871_v56 }
 0x4b6   :  { %v5548_v50 = vsel %vm538_vm3, %v12855_v7, %v11486_v8  ;;  %v11591_v8 = vpack.c.b16 %v11574_v33, %v11574_v33  ;;  %v5667_v58 = vld.sshfl [vmem:[#allocation1 + $0x20] sm:$0xff pattern:$0x73625140]  ;;  %v6439_v62 = vor.u32 %v12731_v55, %v6436_v19  ;;  %v6179_v24 = vrot.slane %v5788_v5, 1 }
 0x4b7   :  { %v11597_v2 = vunpack.c.l.b16 %v5872_v21  ;;  %v5783_v4 = vor.u32 %v5781_v17, %v5780_v25  ;;  %v12856_v9 = vrot.slane %v11007_v18, 6  ;;  %v6272_v63 = vpack.c.b16 %v6259_v53, %v6258_v59  ;;  %5673 = vst [vmem:[#allocation1 + $0x20] ss:$4 sm:$0xff] %v5547_v13  ;;  %6790 = vmatpush.bf16.msra.mxu1 %v9765_v16 }
 0x4b8   :  { %v11603_v40 = vpack.c.bf16 %v5667_v58, %v5667_v58  ;;  %v12733_v56 = vshrl.u32 %v11591_v8, 16  ;;  %5674 = vst [vmem:[#allocation1 + $0x21] ss:$4 sm:$0xff] %v5548_v50  ;;  %v6543_v10 = vsel %vm10302_vm8, 0, %v6439_v62  ;;  %v6177_v19 = vrot.slane %v5781_v17, 1 }
 0x4b9   :  { %v5549_v7 = vsel %vm538_vm3, %v12856_v9, %v11490_v0  ;;  %v5787_v25 = vrot.slane %v5785_v39, 7  ;;  %v12857_v55 = vrot.slane %v11007_v18, 7  ;;  %9258 = vmatmul.msk.bf16.gmra.mxu3 %vm3857_vm9, %v6272_v63  ;;  %v12734_v17 = vshll.u32 %v11591_v8, 16 }
 0x4ba   :  { %v11616_v13 = vunpack.c.l.b16 %v11603_v40  ;;  %5675 = vst [vmem:[#allocation1 + $0x22] ss:$4 sm:$0xff] %v5549_v7  ;;  %v6443_v53 = vrot.slane %v12733_v56, 7  ;;  %v11621_v50 = vunpack.c.l.b16 %v6543_v10  ;;  %v6180_v16 = vor.u32 %v6179_v24, %v5785_v39  ;;  %v5672_v58 = vld.sshfl [vmem:[#allocation1] sm:$0xff pattern:$0x73625140] }
 0x4bb   :  { %v5550_v0 = vsel %vm538_vm3, %v12857_v55, %v11510_v35  ;;  %v5790_v59 = vor.u32 %v5788_v5, %v5787_v25  ;;  %v11629_v55 = vpack.c.bf16 %v5672_v58, %v5672_v58  ;;  %5678 = vst [vmem:[#allocation1] ss:$4 sm:$0xff] %v11118_v28  ;;  %v6178_v63 = vor.u32 %v6177_v19, %v5778_v34 }
 0x4bc   :  { %5676 = vst [vmem:[#allocation1 + $0x23] ss:$4 sm:$0xff] %v5550_v0  ;;  %v11625_v18 = vpack.c.b16 %v11616_v13, %v11616_v13  ;;  %v6446_v35 = vor.u32 %v12734_v17, %v6443_v53  ;;  %v5873_v62 = vsel %vm10302_vm8, 0, %v5783_v4  ;;  %v12737_v24 = vshrl.u32 %v11603_v40, 16  ;;  %v12860_v4 = vld [vmem:[#allocation25_spill] sm:$0xff] }
 0x4bd   :  { %12858 = vst [vmem:[#allocation40_spill] sm:$0xff] %v11621_v50  ;;  %v5874_v9 = vsel %vm10302_vm8, 0, %v5790_v59  ;;  %v11644_v28 = vunpack.c.l.b16 %v11629_v55  ;;  %v6598_v43 = vpack.c.b16 %v11621_v50, %v11572_v22  ;;  %v5799_v10 = vshrl.u32 %v11629_v55, 16 }
 0x4be   :  { %5679 = vst [vmem:[#allocation1 + $0x1] ss:$4 sm:$0xff] %v11123_v26  ;;  %v12732_v39 = vshrl.u32 %v11625_v18, 16  ;;  %v6544_v5 = vsel %vm10302_vm8, 0, %v6446_v35  ;;  %v6222_v26 = vsel %vm11432_vm0, %v6180_v16, 0  ;;  %v11657_v19 = vunpack.c.l.b16 %v5873_v62  ;;  %v9750_v62 = vld [vmem:[#allocation13 + $0x8] sm:$0xff] }
 0x4bf   :  { %5680 = vst [vmem:[#allocation1 + $0x2] ss:$4 sm:$0xff] %v11128_v54  ;;  %v11651_v34 = vunpack.c.l.b16 %v6544_v5  ;;  %v11659_v25 = vunpack.c.l.b16 %v5874_v9  ;;  %v11663_v54 = vpack.c.b16 %v11644_v28, %v11616_v13  ;;  %v12736_v0 = vshll.u32 %v11625_v18, 16  ;;  %6126 = vmatpush.bf16.msrb.mxu2 %v9750_v62 }
 0x4c0   :  { %5681 = vst [vmem:[#allocation1 + $0x3] ss:$4 sm:$0xff] %v12860_v4  ;;  %v6450_v7 = vrot.slane %v12732_v39, 7  ;;  %v11668_v53 = vpack.c.b16 %v11644_v28, %v11644_v28  ;;  %v11674_v59 = vpack.c.b16 %v11574_v33, %v11541_v51  ;;  %v5795_v58 = vshll.u32 %v11603_v40, 16 }
 0x4c1   :  { %12859 = vst [vmem:[#allocation41_spill] sm:$0xff] %v11651_v34  ;;  %v5794_v5 = vrot.slane %v12737_v24, 7  ;;  %9212 = vmatmul.msk.bf16.vlgmr.msra.gmra.mxu2 %vm3857_vm9, %v11663_v54  ;;  %v6221_v9 = vsel %vm11432_vm0, %v6178_v63, 0  ;;  %v6261_v39 = vunpack.c.l.b16 %v6222_v26  ;;  %v5802_v56 = vshll.u32 %v11629_v55, 16 }
 0x4c2   :  { %12861 = vst [vmem:[#allocation25_spill] sm:$0xff] %v11663_v54  ;;  %9282 = vmatmul.msk.bf16.gmra.mxu0 %vm3857_vm9, %v6598_v43  ;;  %v6453_v4 = vor.u32 %v12736_v0, %v6450_v7  ;;  %v12735_v21 = vshrl.u32 %v11668_v53, 16  ;;  %9211 = vmatmul.msk.bf16.gmra.mxu1 %vm3857_vm9, %v11674_v59  ;;  %v5801_v17 = vrot.slane %v5799_v10, 7  ;;  %v12739_v7 = vshll.u32 %v11668_v53, 16 }
 0x4c3   :  { %12862 = vst [vmem:[#allocation42_spill] sm:$0xff] %v11674_v59  ;;  %v5677_v35 = vld.sshfl [vmem:[#allocation1 + $0x20] sm:$0xff pattern:$0x73625140]  ;;  %v5797_v43 = vor.u32 %v5795_v58, %v5794_v5  ;;  %v6181_v0 = vrot.slane %v5795_v58, 1  ;;  %v6897_v58 = vsel %vm11432_vm0, %v11532_v60, 0 }
 0x4c4   :  { %5683 = vst [vmem:[#allocation1 + $0x20] ss:$4 sm:$0xff] %v11361_v3  ;;  %v5741_v16 = vpack.c.bf16 %v5677_v35, %v5677_v35  ;;  %v6457_v3 = vrot.slane %v12735_v21, 7  ;;  %v6260_v35 = vunpack.c.l.b16 %v6221_v9  ;;  %v5804_v26 = vor.u32 %v5802_v56, %v5801_v17  ;;  %v12863_v9 = vld [vmem:[#allocation26_spill] sm:$0xff] }
 0x4c5   :  { %5684 = vst [vmem:[#allocation1 + $0x21] ss:$4 sm:$0xff] %v11366_v6  ;;  %v5875_v55 = vsel %vm10302_vm8, 0, %v5797_v43  ;;  %v6545_v5 = vsel %vm10302_vm8, 0, %v6453_v4  ;;  %v12864_v43 = vld [vmem:[#allocation27_spill] sm:$0xff]  ;;  %vm7773_vm1 = vcmask 23552  }
 0x4c6   :  { %5685 = vst [vmem:[#allocation1 + $0x22] ss:$4 sm:$0xff] %v11371_v20  ;;  %v11695_v63 = vunpack.c.l.b16 %v5741_v16  ;;  %v6460_v16 = vor.u32 %v12739_v7, %v6457_v3  ;;  %v6273_v21 = vpack.c.b16 %v6261_v39, %v6260_v35  ;;  %v5876_v17 = vsel %vm10302_vm8, 0, %v5804_v26  ;;  %v12867_v39 = vld [vmem:[#allocation28_spill] sm:$0xff]  ;;  %v12870_v26 = vld [vmem:[#allocation29_spill] sm:$0xff] }
 0x4c7   :  { %5686 = vst [vmem:[#allocation1 + $0x23] ss:$4 sm:$0xff] %v11376_v46  ;;  %v5682_v6 = vld.sshfl [vmem:[#allocation1] sm:$0xff pattern:$0x73625140]  ;;  %v6183_v46 = vrot.slane %v5802_v56, 1  ;;  %v11719_v24 = vunpack.c.l.b16 %v5875_v55  ;;  %v11721_v54 = vunpack.c.l.b16 %v5876_v17  ;;  %v11725_v3 = vunpack.c.l.b16 %v6545_v5 }
 0x4c8   :  { %v11707_v20 = vpack.c.b16 %v11695_v63, %v11695_v63  ;;  %v11711_v62 = vpack.c.bf16 %v5682_v6, %v5682_v6  ;;  %5688 = vst [vmem:[#allocation1] ss:$4 sm:$0xff] %v12863_v9  ;;  %v6546_v4 = vsel %vm10302_vm8, 0, %v6460_v16  ;;  %v12871_v9 = vmov 0  }
 0x4c9   :  { %5689 = vst [vmem:[#allocation1 + $0x1] ss:$4 sm:$0xff] %v12864_v43  ;;  %9259 = vmatmul.msk.bf16.gmra.mxu3 %vm3857_vm9, %v6273_v21  ;;  %v11727_v56 = vunpack.c.l.b16 %v6546_v4  ;;  %v6898_v21 = vsel %vm11432_vm0, %v11558_v36, 0  ;;  %v6184_v16 = vor.u32 %v6183_v46, %v5799_v10  ;;  %v5752_v17 = vrot.slane %v12871_v9, 7 }
 0x4ca   :  { %12865 = vst [vmem:[#allocation26_spill] sm:$0xff] %v11719_v24  ;;  %v5806_v35 = vshrl.u32 %v11711_v62, 16  ;;  %v12740_v55 = vshrl.u32 %v11707_v20, 16  ;;  %v11741_v5 = vunpack.c.l.b16 %v11711_v62  ;;  %v5809_v4 = vshll.u32 %v11711_v62, 16 }
 0x4cb   :  { %12866 = vst [vmem:[#allocation27_spill] sm:$0xff] %v11721_v54  ;;  %v11751_v6 = vunpack.c.l.b16 %v6898_v21  ;;  %v12873_v36 = vshrl.u32 %v11603_v40, 16  ;;  %v5869_v40 = vsel %vm10302_vm8, 0, %v5752_v17 }
 0x4cc   :  { %5690 = vst [vmem:[#allocation1 + $0x2] ss:$4 sm:$0xff] %v12867_v39  ;;  %v5808_v39 = vrot.slane %v5806_v35, 7  ;;  %v6464_v46 = vrot.slane %v12740_v55, 7  ;;  %v12877_v55 = vld [vmem:[#allocation32_spill] sm:$0xff] }
 0x4cd   :  { %12868 = vst [vmem:[#allocation28_spill] sm:$0xff] %v11725_v3  ;;  %v6182_v7 = vor.u32 %v6181_v0, %v12873_v36  ;;  %v12741_v0 = vshll.u32 %v11707_v20, 16  ;;  %v12874_v36 = vld [vmem:[#allocation30_spill] sm:$0xff] }
 0x4ce   :  { %12869 = vst [vmem:[#allocation43_spill] sm:$0xff] %v11727_v56  ;;  %v5687_v43 = vld.sshfl [vmem:[#allocation1 + $0x20] sm:$0xff pattern:$0x73625140]  ;;  %v5811_v9 = vor.u32 %v5809_v4, %v5808_v39 }
 0x4cf   :  { %5691 = vst [vmem:[#allocation1 + $0x3] ss:$4 sm:$0xff] %v12870_v26  ;;  %v11749_v26 = vunpack.c.l.b16 %v6897_v58  ;;  %v11756_v10 = vpack.c.bf16 %v5687_v43, %v5687_v43  ;;  %v6224_v58 = vsel %vm11432_vm0, %v6184_v16, 0  ;;  %v6727_v16 = vpack.c.b16 %v11471_v42, %v11438_v49 }
 0x4d0   :  { %5693 = vst [vmem:[#allocation1 + $0x20] ss:$4 sm:$0xff] %v11381_v15  ;;  %v5933_v15 = vpack.c.b16 %v11741_v5, %v10490_v61  ;;  %v5877_v21 = vsel %vm10302_vm8, 0, %v5811_v9  ;;  %v11782_v43 = vpack.c.b16 %v11741_v5, %v11741_v5  ;;  %v6467_v49 = vor.u32 %v12741_v0, %v6464_v46  ;;  %v12876_v9 = vld [vmem:[#allocation31_spill] sm:$0xff] }
 0x4d1   :  { %12872 = vst [vmem:[#allocation29_spill] sm:$0xff] %v11749_v26  ;;  %v11794_v42 = vunpack.c.l.b16 %v5877_v21  ;;  %v12878_v21 = vld [vmem:[#allocation33_spill] sm:$0xff]  ;;  %v6185_v0 = vrot.slane %v5809_v4, 1  ;;  %v5816_v4 = vshll.u32 %v11756_v10, 16 }
 0x4d2   :  { %5694 = vst [vmem:[#allocation1 + $0x21] ss:$4 sm:$0xff] %v11386_v48  ;;  %v6599_v48 = vpack.c.b16 %v11725_v3, %v11651_v34  ;;  %9213 = vmatmul.msk.bf16.gmra.mxu2 %vm3857_vm9, %v5933_v15  ;;  %9305 = vmatmul.msk.bf16.vlgmr.msra.gmra.mxu1 %vm3857_vm9, %v6727_v16  ;;  %v9749_v15 = vld [vmem:[#allocation13] sm:$0xff]  ;;  %v6547_v16 = vsel %vm10302_vm8, 0, %v6467_v49  ;;  %v12890_v3 = vshll.u32 %v11554_v23, 16 }
 0x4d3   :  { %5695 = vst [vmem:[#allocation1 + $0x22] ss:$4 sm:$0xff] %v11391_v27  ;;  %v6223_v27 = vsel %vm11432_vm0, %v6182_v7, 0  ;;  %v6263_v7 = vunpack.c.l.b16 %v6224_v58  ;;  %6127 = vmatpush.bf16.msrb.mxu2 %v9749_v15 }
 0x4d4   :  { %5696 = vst [vmem:[#allocation1 + $0x23] ss:$4 sm:$0xff] %v11456_v45  ;;  %9283 = vmatmul.msk.bf16.gmra.mxu0 %vm3857_vm9, %v6599_v48  ;;  %v11789_v45 = vunpack.c.l.b16 %v11756_v10  ;;  %v12744_v48 = vshrl.u32 %v11756_v10, 16  ;;  %v6262_v46 = vunpack.c.l.b16 %v6223_v27 }
 0x4d5   :  { %12875 = vst [vmem:[#allocation30_spill] sm:$0xff] %v11794_v42 }
 0x4d6   :  { %v5692_v17 = vld.sshfl [vmem:[#allocation1] sm:$0xff pattern:$0x73625140]  ;;  %v6274_v27 = vpack.c.b16 %v6263_v7, %v6262_v46  ;;  %v5815_v15 = vrot.slane %v12744_v48, 7  ;;  %v6186_v7 = vor.u32 %v6185_v0, %v5806_v35  ;;  %v11834_v48 = vunpack.c.l.b16 %v6547_v16 }
 0x4d7   :  { %v11786_v39 = vpack.c.bf16 %v5692_v17, %v5692_v17  ;;  %5698 = vst [vmem:[#allocation1] ss:$4 sm:$0xff] %v12874_v36  ;;  %v11799_v17 = vunpack.c.l.b16 %v5869_v40  ;;  %v11813_v40 = vpack.c.b16 %v11789_v45, %v11789_v45 }
 0x4d8   :  { %5699 = vst [vmem:[#allocation1 + $0x1] ss:$4 sm:$0xff] %v12876_v9  ;;  %v5818_v61 = vor.u32 %v5816_v4, %v5815_v15  ;;  %v12881_v15 = vld [vmem:[#allocation34_spill] sm:$0xff] }
 0x4d9   :  { %v11802_v60 = vunpack.c.l.b16 %v11786_v39  ;;  %5700 = vst [vmem:[#allocation1 + $0x2] ss:$4 sm:$0xff] %v12877_v55  ;;  %v12745_v36 = vshrl.u32 %v11786_v39, 16  ;;  %9260 = vmatmul.msk.bf16.gmra.mxu3 %vm3857_vm9, %v6274_v27  ;;  %v5823_v46 = vshll.u32 %v11786_v39, 16 }
 0x4da   :  { %5701 = vst [vmem:[#allocation1 + $0x3] ss:$4 sm:$0xff] %v12878_v21 }
 0x4db   :  { %v11818_v55 = vpack.c.b16 %v11802_v60, %v11802_v60  ;;  %v5697_v21 = vld.sshfl [vmem:[#allocation1 + $0x20] sm:$0xff pattern:$0x73625140]  ;;  %v5822_v49 = vrot.slane %v12745_v36, 7  ;;  %12879 = vst [vmem:[#allocation31_spill] sm:$0xff] %v11834_v48  ;;  %v12880_v36 = vshrl.u32 %v11782_v43, 16 }
 0x4dc   :  { %v11825_v58 = vpack.c.bf16 %v5697_v21, %v5697_v21  ;;  %5703 = vst [vmem:[#allocation1 + $0x20] ss:$4 sm:$0xff] %v11395_v31  ;;  %v12751_v21 = vshll.u32 %v11782_v43, 16 }
 0x4dd   :  { %v12746_v9 = vshrl.u32 %v11818_v55, 16  ;;  %5704 = vst [vmem:[#allocation1 + $0x21] ss:$4 sm:$0xff] %v11401_v44  ;;  %v6471_v27 = vrot.slane %v12880_v36, 7  ;;  %v5825_v62 = vor.u32 %v5823_v46, %v5822_v49  ;;  %v6728_v44 = vpack.c.b16 %v11541_v51, %v11505_v12  ;;  %v12882_v12 = vld [vmem:[#allocation35_spill] sm:$0xff] }
 0x4de   :  { %5705 = vst [vmem:[#allocation1 + $0x22] ss:$4 sm:$0xff] %v11406_v52  ;;  %v11839_v31 = vunpack.c.l.b16 %v11825_v58  ;;  %v6225_v52 = vsel %vm11432_vm0, %v6186_v7, 0  ;;  %v6600_v36 = vpack.c.b16 %v11834_v48, %v11727_v56  ;;  %v12883_v51 = vshrl.u32 %v11813_v40, 16 }
 0x4df   :  { %5706 = vst [vmem:[#allocation1 + $0x23] ss:$4 sm:$0xff] %v11459_v30  ;;  %v6485_v0 = vrot.slane %v12746_v9, 7  ;;  %v5878_v30 = vsel %vm10302_vm8, 0, %v5818_v61  ;;  %v5879_v7 = vsel %vm10302_vm8, 0, %v5825_v62  ;;  %v6474_v61 = vor.u32 %v12751_v21, %v6471_v27  ;;  %v12886_v9 = vld [vmem:[#allocation37_spill] sm:$0xff] }
 0x4e0   :  { %v6478_v49 = vrot.slane %v12883_v51, 7  ;;  %v11877_v51 = vpack.c.b16 %v11802_v60, %v11789_v45  ;;  %v12887_v62 = vshll.u32 %v11818_v55, 16  ;;  %v11882_v42 = vunpack.c.l.b16 %v5878_v30 }
 0x4e1   :  { %v5702_v35 = vld.sshfl [vmem:[#allocation1] sm:$0xff pattern:$0x73625140]  ;;  %v6264_v27 = vunpack.c.l.b16 %v6225_v52  ;;  %v6187_v21 = vrot.slane %v5816_v4, 1  ;;  %v6854_v56 = vrot.slane %v12890_v3, 1  ;;  %v6189_v30 = vrot.slane %v5823_v46, 1 }
 0x4e2   :  { %v11850_v16 = vpack.c.bf16 %v5702_v35, %v5702_v35  ;;  %5708 = vst [vmem:[#allocation1] ss:$4 sm:$0xff] %v12881_v15  ;;  %v12884_v15 = vld [vmem:[#allocation36_spill] sm:$0xff]  ;;  %v6488_v26 = vor.u32 %v12887_v62, %v6485_v0  ;;  %9214 = vmatmul.msk.bf16.gmra.mxu2 %vm3857_vm9, %v11877_v51  ;;  %v12892_v52 = vshll.u32 %v11591_v8, 16  ;;  %9306 = vmatmul.msk.bf16.gmra.mxu1 %vm3857_vm9, %v6728_v44  ;;  %v6548_v3 = vsel %vm10302_vm8, 0, %v6474_v61 }
 0x4e3   :  { %5709 = vst [vmem:[#allocation1 + $0x1] ss:$4 sm:$0xff] %v12882_v12  ;;  %v11873_v12 = vpack.c.b16 %v11839_v31, %v11839_v31  ;;  %v12894_v44 = vshrl.u32 %v11591_v8, 16  ;;  %v6589_v8 = vunpack.c.l.b16 %v6548_v3 }
 0x4e4   :  { %v11865_v35 = vunpack.c.l.b16 %v11850_v16  ;;  %5710 = vst [vmem:[#allocation1 + $0x2] ss:$4 sm:$0xff] %v12884_v15  ;;  %v11884_v15 = vunpack.c.l.b16 %v5879_v7  ;;  %9284 = vmatmul.msk.bf16.gmra.mxu0 %vm3857_vm9, %v6600_v36  ;;  %v6856_v62 = vrot.slane %v12892_v52, 1  ;;  %v6550_v46 = vsel %vm10302_vm8, 0, %v6488_v26 }
 0x4e5   :  { %12885 = vst [vmem:[#allocation32_spill] sm:$0xff] %v11877_v51  ;;  %v12756_v36 = vshrl.u32 %v11873_v12, 16  ;;  %v12895_v26 = vshrl.u32 %v11756_v10, 16 }
 0x4e6   :  { %5711 = vst [vmem:[#allocation1 + $0x3] ss:$4 sm:$0xff] %v12886_v9  ;;  %v11888_v48 = vpack.c.b16 %v11865_v35, %v11865_v35  ;;  %v12891_v9 = vshll.u32 %v11813_v40, 16  ;;  %v5707_v7 = vld.sshfl [vmem:[#allocation1 + $0x20] sm:$0xff pattern:$0x73625140]  ;;  %v6857_v4 = vor.u32 %v6856_v62, %v12894_v44 }
 0x4e7   :  { %12888 = vst [vmem:[#allocation33_spill] sm:$0xff] %v11882_v42  ;;  %v11904_v59 = vpack.c.bf16 %v5707_v7, %v5707_v7  ;;  %v6188_v7 = vor.u32 %v6187_v21, %v12895_v26  ;;  %v6492_v62 = vrot.slane %v12756_v36, 7 }
 0x4e8   :  { %12889 = vst [vmem:[#allocation34_spill] sm:$0xff] %v11884_v15  ;;  %v6481_v0 = vor.u32 %v12891_v9, %v6478_v49  ;;  %v12893_v9 = vshrl.u32 %v11554_v23, 16  ;;  %v12896_v49 = vshrl.u32 %v11786_v39, 16  ;;  %v9780_v15 = vld [vmem:[#allocation13 + $0xf8] sm:$0xff] }
 0x4e9   :  { %5713 = vst [vmem:[#allocation1 + $0x20] ss:$4 sm:$0xff] %v11411_v1  ;;  %v11917_v61 = vunpack.c.l.b16 %v11904_v59  ;;  %v6275_v1 = vpack.c.b16 %v6264_v27, %v11469_v47  ;;  %v12897_v27 = vshrl.u32 %v11888_v48, 16  ;;  %7255 = vmatpush.bf16.msrb.mxu0 %v9780_v15 }
 0x4ea   :  { %5714 = vst [vmem:[#allocation1 + $0x21] ss:$4 sm:$0xff] %v11416_v41  ;;  %v6855_v52 = vor.u32 %v6854_v56, %v12893_v9  ;;  %v6549_v41 = vsel %vm10302_vm8, 0, %v6481_v0  ;;  %v6190_v23 = vor.u32 %v6189_v30, %v12896_v49  ;;  %v11930_v9 = vunpack.c.l.b16 %v6550_v46 }
 0x4eb   :  { %5715 = vst [vmem:[#allocation1 + $0x22] ss:$4 sm:$0xff] %v11422_v11  ;;  %v12759_v11 = vshrl.u32 %v11825_v58, 16  ;;  %v6499_v10 = vrot.slane %v12897_v27, 7  ;;  %9261 = vmatmul.msk.bf16.gmra.mxu3 %vm3857_vm9, %v6275_v1  ;;  %v11942_v21 = vunpack.c.l.b16 %v6549_v41  ;;  %v12757_v0 = vshll.u32 %v11873_v12, 16 }
 0x4ec   :  { %5716 = vst [vmem:[#allocation1 + $0x23] ss:$4 sm:$0xff] %v11482_v32  ;;  %v6899_v39 = vsel %vm11432_vm0, %v6855_v52, 0  ;;  %v6900_v32 = vsel %vm11432_vm0, %v6857_v4, 0  ;;  %v12761_v30 = vshrl.u32 %v11850_v16, 16  ;;  %v11948_v3 = vpack.c.b16 %v11917_v61, %v11917_v61 }
 0x4ed   :  { %v5712_v56 = vld.sshfl [vmem:[#allocation1] sm:$0xff pattern:$0x73625140]  ;;  %12898 = vst [vmem:[#allocation35_spill] sm:$0xff] %v11942_v21  ;;  %v6226_v46 = vsel %vm11432_vm0, %v6188_v7, 0  ;;  %v6227_v49 = vsel %vm11432_vm0, %v6190_v23, 0  ;;  %v6495_v44 = vor.u32 %v12757_v0, %v6492_v62  ;;  %v11960_v1 = vunpack.c.l.b16 %v6899_v39 }
 0x4ee   :  { %v11933_v47 = vpack.c.bf16 %v5712_v56, %v5712_v56  ;;  %v12755_v52 = vshll.u32 %v11888_v48, 16  ;;  %v11962_v41 = vunpack.c.l.b16 %v6900_v32  ;;  %v5830_v7 = vshll.u32 %v11825_v58, 16 }
 0x4ef   :  { %v5829_v27 = vrot.slane %v12759_v11, 7  ;;  %v5837_v62 = vshll.u32 %v11850_v16, 16  ;;  %v5836_v26 = vrot.slane %v12761_v30, 7  ;;  %v6266_v36 = vunpack.c.l.b16 %v6227_v49 }
 0x4f0   :  { %v11955_v4 = vunpack.c.l.b16 %v11933_v47  ;;  %v6502_v23 = vor.u32 %v12755_v52, %v6499_v10  ;;  %v6729_v10 = vpack.c.b16 %v11616_v13, %v11574_v33  ;;  %v6265_v52 = vunpack.c.l.b16 %v6226_v46  ;;  %v9772_v33 = vld [vmem:[#allocation13 + $0xb8] sm:$0xff] }
 0x4f1   :  { %v6601_v51 = vpack.c.b16 %v11942_v21, %v6589_v8  ;;  %v6551_v11 = vsel %vm10302_vm8, 0, %v6495_v44  ;;  %v5832_v42 = vor.u32 %v5830_v7, %v5829_v27  ;;  %v5839_v39 = vor.u32 %v5837_v62, %v5836_v26  ;;  %v9776_v21 = vld [vmem:[#allocation13 + $0xd8] sm:$0xff]  ;;  %7013 = vmatpush.bf16.msra.mxu2 %v9772_v33 }
 0x4f2   :  { %v11971_v56 = vpack.c.b16 %v11955_v4, %v11955_v4  ;;  %v11989_v32 = vpack.c.b16 %v11865_v35, %v11839_v31  ;;  %v6552_v30 = vsel %vm10302_vm8, 0, %v6502_v23  ;;  %v12900_v46 = vshrl.u32 %v11948_v3, 16  ;;  %9307 = vmatmul.msk.bf16.gmra.mxu1 %vm3857_vm9, %v6729_v10  ;;  %7149 = vmatpush.bf16.msrb.mxu3 %v9776_v21 }
 0x4f3   :  { %v5880_v49 = vsel %vm10302_vm8, 0, %v5832_v42  ;;  %v5881_v44 = vsel %vm10302_vm8, 0, %v5839_v39  ;;  %v12901_v26 = vshll.u32 %v11625_v18, 16  ;;  %v12007_v23 = vunpack.c.l.b16 %v6551_v11  ;;  %v5717_v24 = vld.sshfl [vmem:[#allocation1 + $0x20] sm:$0xff pattern:$0x73625140] }
 0x4f4   :  { %v12762_v0 = vshrl.u32 %v11971_v56, 16  ;;  %12899 = vst [vmem:[#allocation36_spill] sm:$0xff] %v11989_v32  ;;  %v6506_v8 = vrot.slane %v12900_v46, 7  ;;  %9215 = vmatmul.msk.bf16.gmra.mxu2 %vm3857_vm9, %v11989_v32  ;;  %9285 = vmatmul.msk.bf16.gmra.mxu0 %vm3857_vm9, %v6601_v51  ;;  %v12770_v42 = vshll.u32 %v11971_v56, 16  ;;  %v12013_v54 = vunpack.c.l.b16 %v5880_v49 }
 0x4f5   :  { %v6858_v27 = vrot.slane %v12901_v26, 1  ;;  %v9784_v26 = vld [vmem:[#allocation13 + $0x118] sm:$0xff]  ;;  %v12015_v32 = vunpack.c.l.b16 %v5881_v44  ;;  %v12902_v51 = vshrl.u32 %v11625_v18, 16  ;;  %v5844_v46 = vshll.u32 %v11904_v59, 16 }
 0x4f6   :  { %v6513_v13 = vrot.slane %v12762_v0, 7  ;;  %v6193_v0 = vrot.slane %v5837_v62, 1  ;;  %v12019_v62 = vunpack.c.l.b16 %v6552_v30  ;;  %v12903_v39 = vshll.u32 %v11668_v53, 16  ;;  %7388 = vmatpush.bf16.msrb.mxu1 %v9784_v26 }
 0x4f7   :  { %v6859_v11 = vor.u32 %v6858_v27, %v12902_v51  ;;  %v12904_v49 = vshll.u32 %v11948_v3, 16  ;;  %v5851_v18 = vshll.u32 %v11933_v47, 16  ;;  %v12905_v30 = vshrl.u32 %v11904_v59, 16 }
 0x4f8   :  { %v6516_v10 = vor.u32 %v12770_v42, %v6513_v13  ;;  %v6860_v50 = vrot.slane %v12903_v39, 1  ;;  %v5749_v44 = vpack.c.bf16 %v5717_v24, %v5717_v24  ;;  %v12906_v27 = vshrl.u32 %v11668_v53, 16 }
 0x4f9   :  { %v6509_v34 = vor.u32 %v12904_v49, %v6506_v8  ;;  %v5843_v33 = vrot.slane %v12905_v30, 7  ;;  %v6901_v39 = vsel %vm11432_vm0, %v6859_v11, 0  ;;  %v12907_v51 = vshrl.u32 %v11933_v47, 16 }
 0x4fa   :  { %v6861_v13 = vor.u32 %v6860_v50, %v12906_v27  ;;  %v6276_v15 = vpack.c.b16 %v6266_v36, %v6265_v52  ;;  %v6191_v26 = vrot.slane %v5830_v7, 1  ;;  %v12908_v21 = vshll.u32 %v11707_v20, 16 }
 0x4fb   :  { %v5850_v8 = vrot.slane %v12907_v51, 7  ;;  %v5846_v49 = vor.u32 %v5844_v46, %v5843_v33  ;;  %v6554_v24 = vsel %vm10302_vm8, 0, %v6516_v10  ;;  %v12052_v36 = vunpack.c.l.b16 %v6901_v39 }
 0x4fc   :  { %v6862_v42 = vrot.slane %v12908_v21, 1  ;;  %v6902_v50 = vsel %vm11432_vm0, %v6861_v13, 0  ;;  %9262 = vmatmul.msk.bf16.gmra.mxu3 %vm3857_vm9, %v6276_v15  ;;  %v12909_v10 = vshrl.u32 %v11707_v20, 16  ;;  %v12910_v30 = vshrl.u32 %v11850_v16, 16 }
 0x4fd   :  { %v5853_v11 = vor.u32 %v5851_v18, %v5850_v8  ;;  %v12054_v52 = vunpack.c.l.b16 %v6902_v50  ;;  %v5882_v7 = vsel %vm10302_vm8, 0, %v5846_v49  ;;  %v6553_v27 = vsel %vm10302_vm8, 0, %v6509_v34 }
 0x4fe   :  { %v6863_v21 = vor.u32 %v6862_v42, %v12909_v10  ;;  %v6194_v33 = vor.u32 %v6193_v0, %v12910_v30  ;;  %v12064_v13 = vunpack.c.l.b16 %v5749_v44  ;;  %v12070_v8 = vunpack.c.l.b16 %v5882_v7 }
 0x4ff   :  { %v5883_v39 = vsel %vm10302_vm8, 0, %v5853_v11  ;;  %v12076_v16 = vunpack.c.l.b16 %v6554_v24  ;;  %v12911_v34 = vshll.u32 %v11813_v40, 16  ;;  %v12912_v49 = vshrl.u32 %v11825_v58, 16 }
 0x500   :  { %v12072_v15 = vunpack.c.l.b16 %v5883_v39  ;;  %v6903_v20 = vsel %vm11432_vm0, %v6863_v21, 0  ;;  %v12090_v10 = vunpack.c.l.b16 %v6553_v27  ;;  %v12913_v24 = vshrl.u32 %v11813_v40, 16 }
 0x501   :  { %v12078_v0 = vunpack.c.l.b16 %v6903_v20  ;;  %v6866_v42 = vrot.slane %v12911_v34, 1  ;;  %v6192_v50 = vor.u32 %v6191_v26, %v12912_v49  ;;  %v12914_v39 = vshll.u32 %v11782_v43, 16  ;;  %v9775_v34 = vld [vmem:[#allocation13 + $0xd0] sm:$0xff] }
 0x502   :  { %v12100_v58 = vpack.c.b16 %v11955_v4, %v11917_v61  ;;  %v6602_v26 = vpack.c.b16 %v12007_v23, %v11930_v9  ;;  %v6229_v27 = vsel %vm11432_vm0, %v6194_v33, 0  ;;  %v12108_v40 = vpack.c.b16 %v12064_v13, %v12064_v13  ;;  %7150 = vmatpush.bf16.msrb.mxu3 %v9775_v34 }
 0x503   :  { %v6867_v21 = vor.u32 %v6866_v42, %v12913_v24  ;;  %v6864_v20 = vrot.slane %v12914_v39, 1  ;;  %v12915_v42 = vshll.u32 %v11818_v55, 16  ;;  %v12916_v39 = vshll.u32 %v11873_v12, 16 }
 0x504   :  { %v6730_v7 = vpack.c.b16 %v11695_v63, %v11644_v28  ;;  %v12917_v33 = vshrl.u32 %v11782_v43, 16  ;;  %9216 = vmatmul.msk.bf16.gmra.mxu2 %vm3857_vm9, %v12100_v58  ;;  %9286 = vmatmul.msk.bf16.gmra.mxu0 %vm3857_vm9, %v6602_v26  ;;  %v6268_v43 = vunpack.c.l.b16 %v6229_v27  ;;  %v6518_v26 = vshrl.u32 %v12108_v40, 16 }
 0x505   :  { %v6868_v49 = vrot.slane %v12915_v42, 1  ;;  %v6905_v24 = vsel %vm11432_vm0, %v6867_v21, 0  ;;  %v6870_v30 = vrot.slane %v12916_v39, 1  ;;  %v6228_v42 = vsel %vm11432_vm0, %v6192_v50, 0  ;;  %v9774_v50 = vld [vmem:[#allocation13 + $0xc8] sm:$0xff] }
 0x506   :  { %v6865_v44 = vor.u32 %v6864_v20, %v12917_v33  ;;  %v12918_v21 = vshrl.u32 %v11818_v55, 16  ;;  %v12129_v53 = vunpack.c.l.b16 %v6905_v24  ;;  %v12920_v39 = vshrl.u32 %v11873_v12, 16  ;;  %9308 = vmatmul.msk.bf16.gmra.mxu1 %vm3857_vm9, %v6730_v7  ;;  %v9779_v20 = vld [vmem:[#allocation13 + $0xf0] sm:$0xff]  ;;  %v9778_v7 = vld [vmem:[#allocation13 + $0xe8] sm:$0xff]  ;;  %7151 = vmatpush.bf16.msrb.mxu3 %v9774_v50 }
 0x507   :  { %v6267_v12 = vunpack.c.l.b16 %v6228_v42  ;;  %7256 = vmatpush.bf16.msrb.mxu0 %v9779_v20  ;;  %v12923_v42 = vld [vmem:[#allocation39_spill] sm:$0xff]  ;;  %v6520_v20 = vrot.slane %v6518_v26, 7  ;;  %v12928_v51 = vshrl.u32 %v11948_v3, 16 }
 0x508   :  { %v6869_v11 = vor.u32 %v6868_v49, %v12918_v21  ;;  %12919 = vst [vmem:[#allocation37_spill] sm:$0xff] %v12129_v53  ;;  %v6871_v28 = vor.u32 %v6870_v30, %v12920_v39  ;;  %v6904_v33 = vsel %vm11432_vm0, %v6865_v44, 0  ;;  %v6197_v21 = vrot.slane %v5851_v18, 1  ;;  %v12926_v39 = vld [vmem:[#allocation23_spill] sm:$0xff] }
 0x509   :  { %v12141_v24 = vunpack.c.l.b16 %v6904_v33  ;;  %v6277_v34 = vpack.c.b16 %v6268_v43, %v6267_v12  ;;  %v9773_v33 = vld [vmem:[#allocation13 + $0xc0] sm:$0xff]  ;;  %v12925_v43 = vshll.u32 %v11948_v3, 16  ;;  %v6195_v18 = vrot.slane %v5844_v46, 1 }
 0x50a   :  { %v6906_v55 = vsel %vm11432_vm0, %v6869_v11, 0  ;;  %v6907_v49 = vsel %vm11432_vm0, %v6871_v28, 0  ;;  %v5870_v28 = vsel %vm10302_vm8, 0, %v12923_v42  ;;  %v7074_v44 = vrot.slane %v12926_v39, 7  ;;  %7152 = vmatpush.bf16.msrb.mxu3 %v9773_v33 }
 0x50b   :  { %12921 = vst [vmem:[#allocation44_spill] sm:$0xff] %v12141_v24  ;;  %v12143_v30 = vunpack.c.l.b16 %v6906_v55  ;;  %v12145_v27 = vunpack.c.l.b16 %v6907_v49  ;;  %v12924_v55 = vshll.u32 %v11888_v48, 16  ;;  %v6874_v12 = vrot.slane %v12925_v43, 1  ;;  %7257 = vmatpush.bf16.msrb.mxu0 %v9778_v7 }
 0x50c   :  { %9263 = vmatmul.msk.bf16.gmra.mxu3 %vm3857_vm9, %v6277_v34  ;;  %v6521_v11 = vshll.u32 %v12108_v40, 16  ;;  %v12927_v42 = vshrl.u32 %v11888_v48, 16  ;;  %v12929_v53 = vshrl.u32 %v11933_v47, 16  ;;  %v12930_v40 = vshrl.u32 %v11904_v59, 16  ;;  %v12931_v48 = vld [vmem:[#allocation22_spill] sm:$0xff] }
 0x50d   :  { %12922 = vst [vmem:[#allocation45_spill] sm:$0xff] %v12143_v30  ;;  %v6872_v49 = vrot.slane %v12924_v55, 1  ;;  %v6875_v24 = vor.u32 %v6874_v12, %v12928_v51  ;;  %v6050_v55 = vunpack.c.l.b16 %v5870_v28  ;;  %v12932_v39 = vshll.u32 %v12931_v48, 16 }
 0x50e   :  { %v6198_v43 = vor.u32 %v6197_v21, %v12929_v53  ;;  %v6523_v30 = vor.u32 %v6521_v11, %v6520_v20  ;;  %v6196_v34 = vor.u32 %v6195_v18, %v12930_v40  ;;  %v6603_v59 = vpack.c.b16 %v12090_v10, %v12019_v62 }
 0x50f   :  { %v6873_v50 = vor.u32 %v6872_v49, %v12927_v42  ;;  %v6909_v7 = vsel %vm11432_vm0, %v6875_v24, 0  ;;  %v7075_v49 = vor.u32 %v7074_v44, %v12932_v39  ;;  %v6064_v47 = vpack.c.b16 %v6050_v55, %v11799_v17  ;;  %v9771_v55 = vld [vmem:[#allocation13 + $0xb0] sm:$0xff] }
 0x510   :  { %v12183_v51 = vunpack.c.l.b16 %v6909_v7  ;;  %v6231_v53 = vsel %vm11432_vm0, %v6198_v43, 0  ;;  %v6555_v44 = vsel %vm10302_vm8, 0, %v6523_v30  ;;  %v12933_v28 = vshll.u32 %v11971_v56, 16  ;;  %v9777_v30 = vld [vmem:[#allocation13 + $0xe0] sm:$0xff]  ;;  %7014 = vmatpush.bf16.msra.mxu2 %v9771_v55  ;;  %v12945_v55 = vld [vmem:[#allocation42_spill] sm:$0xff] }
 0x511   :  { %v6908_v46 = vsel %vm11432_vm0, %v6873_v50, 0  ;;  %v6878_v33 = vrot.slane %v6521_v11, 1  ;;  %v6731_v12 = vpack.c.b16 %v11789_v45, %v11741_v5  ;;  %v6230_v18 = vsel %vm11432_vm0, %v6196_v34, 0  ;;  %v12934_v43 = vld [vmem:[#allocation24_spill] sm:$0xff]  ;;  %7258 = vmatpush.bf16.msrb.mxu0 %v9777_v30 }
 0x512   :  { %v12181_v3 = vunpack.c.l.b16 %v6908_v46  ;;  %v6876_v20 = vrot.slane %v12933_v28, 1  ;;  %v7077_v42 = vsel %vm10302_vm8, 0, %v7075_v49  ;;  %v6270_v50 = vunpack.c.l.b16 %v6231_v53 }
 0x513   :  { %v7316_v11 = vsel %vm11432_vm0, %v12934_v43, 0  ;;  %v12935_v46 = vshrl.u32 %v11971_v56, 16  ;;  %v6879_v45 = vor.u32 %v6878_v33, %v6518_v26  ;;  %v12212_v7 = vunpack.c.l.b16 %v6555_v44 }
 0x514   :  { %v7333_v21 = vpack.c.b16 %v12181_v3, %v12145_v27  ;;  %9233 = vmatmul.msk.bf16.vlgmr.msrb.gmra.mxu2 %vm3857_vm9, %v6064_v47  ;;  %9287 = vmatmul.msk.bf16.gmra.mxu0 %vm3857_vm9, %v6603_v59  ;;  %v6269_v57 = vunpack.c.l.b16 %v6230_v18  ;;  %v12218_v48 = vunpack.c.l.b16 %v7077_v42  ;;  %v12220_v39 = vunpack.c.l.b16 %v7316_v11  ;;  %v9783_v47 = vld [vmem:[#allocation13 + $0x110] sm:$0xff] }
 0x515   :  { %v6877_v5 = vor.u32 %v6876_v20, %v12935_v46  ;;  %v6911_v34 = vsel %vm11432_vm0, %v6879_v45, 0  ;;  %7389 = vmatpush.bf16.msrb.mxu1 %v9783_v47  ;;  %v6604_v20 = vpack.c.b16 %v12212_v7, %v12076_v16  ;;  %v6732_v33 = vpack.c.b16 %v11839_v31, %v11802_v60  ;;  %v12940_v31 = vld [vmem:[#allocation40_spill] sm:$0xff]  ;;  %v12946_v11 = vld [vmem:[#allocation43_spill] sm:$0xff] }
 0x516   :  { %9309 = vmatmul.msk.bf16.gmra.mxu1 %vm3857_vm9, %v6731_v12  ;;  %v12224_v26 = vunpack.c.l.b16 %v6911_v34  ;;  %v6278_v49 = vpack.c.b16 %v6270_v50, %v6269_v57  ;;  %v7096_v53 = vpack.c.b16 %v12218_v48, %v12212_v7  ;;  %v12936_v12 = vpack.c.b16 %v11597_v2, %v11593_v37  ;;  %v9770_v37 = vld [vmem:[#allocation13 + $0xa8] sm:$0xff]  ;;  %v12947_v46 = vld [vmem:[#allocation28_spill] sm:$0xff] }
 0x517   :  { %v6910_v40 = vsel %vm11432_vm0, %v6877_v5, 0  ;;  %v12937_v18 = vpack.c.b16 %v11572_v22, %v11538_v29  ;;  %v6733_v42 = vpack.c.b16 %v11917_v61, %v11865_v35  ;;  %v12938_v60 = vpack.c.b16 %v11659_v25, %v11657_v19  ;;  %v9782_v2 = vld [vmem:[#allocation13 + $0x108] sm:$0xff]  ;;  %7015 = vmatpush.bf16.msra.mxu2 %v9770_v37  ;;  %v9781_v29 = vld [vmem:[#allocation13 + $0x100] sm:$0xff]  ;;  %v12942_v25 = vld [vmem:[#allocation27_spill] sm:$0xff] }
 0x518   :  { %v12222_v56 = vunpack.c.l.b16 %v6910_v40  ;;  %v7335_v44 = vpack.c.b16 %v12220_v39, %v12224_v26  ;;  %v12939_v22 = vld [vmem:[#allocation41_spill] sm:$0xff]  ;;  %v6734_v19 = vpack.c.b16 %v12064_v13, %v11955_v4  ;;  %v12948_v5 = vpack.c.b16 %v12946_v11, %v12947_v46  ;;  %v12949_v57 = vld [vmem:[#allocation30_spill] sm:$0xff] }
 0x519   :  { %7390 = vmatpush.bf16.msrb.mxu1 %v9782_v2  ;;  %v12941_v50 = vpack.c.b16 %v12939_v22, %v12940_v31  ;;  %v12950_v40 = vpack.c.b16 %v12949_v57, %v11799_v17  ;;  %v12951_v34 = vld [vmem:[#allocation25_spill] sm:$0xff]  ;;  %v12956_v31 = vld [vmem:[#allocation34_spill] sm:$0xff] }
 0x51a   :  { %v7334_v59 = vpack.c.b16 %v12222_v56, %v12183_v51 }
 0x51c   :  { %9264 = vmatmul.msk.bf16.gmra.mxu3 %vm3857_vm9, %v6278_v49  ;;  %v12262_v35 = vpop.f32.mrf.mxu1  ;;  %v9769_v49 = vld [vmem:[#allocation13 + $0xa0] sm:$0xff] }
 0x51d   :  { %7391 = vmatpush.bf16.msrb.mxu1 %v9781_v29  ;;  %7016 = vmatpush.bf16.msra.mxu2 %v9769_v49  ;;  %v12955_v29 = vld [vmem:[#allocation21_spill] sm:$0xff]  ;;  %v12964_v49 = vpack.c.b16 %v12015_v32, %v12013_v54 }
 0x51e   :  { %v7219_v22 = vpack.c.b16 %v12955_v29, %v11695_v63  ;;  %v12961_v63 = vld [vmem:[#allocation35_spill] sm:$0xff] }
 0x51f   :  { %v12962_v46 = vpack.c.b16 %v11930_v9, %v12961_v63  ;;  %v12966_v9 = vpack.c.b16 %v12054_v52, %v12052_v36 }
 0x524   :  { %9234 = vmatmul.msk.bf16.gmra.mxu2 %vm3857_vm9, %v12936_v12  ;;  %9288 = vmatmul.msk.bf16.gmra.mxu0 %vm3857_vm9, %v6604_v20  ;;  %v12275_v43 = vpop.f32.mrf.mxu1  ;;  %v12952_v20 = vld [vmem:[#allocation29_spill] sm:$0xff] }
 0x526   :  { %9310 = vmatmul.msk.bf16.gmra.mxu1 %vm3857_vm9, %v6732_v33  ;;  %v12953_v33 = vpack.c.b16 %v11751_v6, %v12952_v20 }
 0x52b   :  { %v12283_v45 = vpop.f32.mrf.mxu3 }
 0x52c   :  { %9353 = vmatmul.msk.bf16.vlgmr.msrb.gmra.mxu3 %vm3857_vm9, %v12937_v18  ;;  %v12954_v18 = vld [vmem:[#allocation31_spill] sm:$0xff] }
 0x52e   :  { %v12291_v47 = vpop.f32.mrf.mxu1 }
 0x52f   :  { %v12302_v17 = vpop.f32.mrf.mxu0 }
 0x534   :  { %9235 = vmatmul.msk.bf16.gmra.mxu2 %vm3857_vm9, %v12938_v60  ;;  %9377 = vmatmul.msk.bf16.vlgmr.msrb.gmra.mxu0 %vm3857_vm9, %v11545_v14  ;;  %v12943_v14 = vld [vmem:[#allocation26_spill] sm:$0xff]  ;;  %v12304_v60 = vpop.f32.mrf.mxu3 }
 0x535   :  { %v12944_v61 = vpack.c.b16 %v12942_v25, %v12943_v14  ;;  %v12959_v25 = vpack.c.b16 %v11962_v41, %v11960_v1 }
 0x536   :  { %9311 = vmatmul.msk.bf16.gmra.mxu1 %vm3857_vm9, %v6733_v42  ;;  %v7092_v42 = vpack.c.b16 %v12218_v48, %v12954_v18  ;;  %v12306_v37 = vpop.f32.mrf.mxu1 }
 0x53c   :  { %9354 = vmatmul.msk.bf16.gmra.mxu3 %vm3857_vm9, %v12941_v50  ;;  %v12957_v50 = vld [vmem:[#allocation33_spill] sm:$0xff] }
 0x53f   :  { %v12327_v11 = vpop.f32.mrf.mxu1 }
 0x544   :  { %9236 = vmatmul.msk.bf16.gmra.mxu2 %vm3857_vm9, %v12944_v61  ;;  %9378 = vmatmul.msk.bf16.gmra.mxu0 %vm3857_vm9, %v12945_v55  ;;  %v12273_v30 = vpop.f32.mrf.mxu2  ;;  %v12323_v61 = vpop.f32.mrf.mxu0 }
 0x545   :  { %v12325_v55 = vpop.f32.mrf.mxu3 }
 0x546   :  { %9312 = vmatmul.msk.bf16.gmra.mxu1 %vm3857_vm9, %v6734_v19  ;;  %v12958_v19 = vpack.c.b16 %v12956_v31, %v12957_v50  ;;  %v7331_v50 = vpack.c.b16 %v12220_v39, %v12078_v0 }
 0x54c   :  { %9355 = vmatmul.msk.bf16.gmra.mxu3 %vm3857_vm9, %v12948_v5  ;;  %v12281_v4 = vpop.f32.mrf.mxu2  ;;  %v12335_v57 = vpop.f32.mrf.mxu0 }
 0x554   :  { %9237 = vmatmul.msk.bf16.gmra.mxu2 %vm3857_vm9, %v12950_v40  ;;  %9379 = vmatmul.msk.bf16.gmra.mxu0 %vm3857_vm9, %v12951_v34  ;;  %v12337_v40 = vpop.f32.mrf.mxu3  ;;  %v12339_v34 = vpop.f32.mrf.mxu1 }
 0x555   :  { %v12297_v12 = vpop.f32.mrf.mxu2 }
 0x556   :  { %9401 = vmatmul.msk.bf16.vlgmr.msrb.gmra.mxu1 %vm3857_vm9, %v12953_v33  ;;  %v12965_v33 = vld [vmem:[#allocation32_spill] sm:$0xff] }
 0x55c   :  { %9356 = vmatmul.msk.bf16.gmra.mxu3 %vm3857_vm9, %v7092_v42  ;;  %v12968_v42 = vpack.c.b16 %v12019_v62, %v12007_v23  ;;  %v12359_v54 = vpop.f32.mrf.mxu3  ;;  %v12361_v32 = vpop.f32.mrf.mxu1  ;;  %v12973_v23 = vld [vmem:[#allocation36_spill] sm:$0xff] }
 0x55d   :  { %v12308_v2 = vpop.f32.mrf.mxu2 }
 0x564   :  { %9238 = vmatmul.msk.bf16.gmra.mxu2 %vm3857_vm9, %v12958_v19  ;;  %9380 = vmatmul.msk.bf16.gmra.mxu0 %vm3857_vm9, %v7219_v22  ;;  %v12357_v22 = vpop.f32.mrf.mxu0  ;;  %v12970_v19 = vld [vmem:[#allocation38_spill] sm:$0xff] }
 0x565   :  { %v12321_v14 = vpop.f32.mrf.mxu2 }
 0x566   :  { %9402 = vmatmul.msk.bf16.gmra.mxu1 %vm3857_vm9, %v12959_v25  ;;  %12960 = vst [vmem:[#allocation39_spill] sm:$0xff] %v12321_v14  ;;  %v12971_v25 = vshll.u32 %v12970_v19, 16 }
 0x568   :  { %v6848_v63 = vrot.slane %v12971_v25, 1 }
 0x56c   :  { %9357 = vmatmul.msk.bf16.gmra.mxu3 %vm3857_vm9, %v12962_v46  ;;  %v12972_v46 = vpack.c.b16 %v12072_v15, %v12070_v8  ;;  %v12376_v62 = vpop.f32.mrf.mxu0  ;;  %v12976_v8 = vpack.c.b16 %v12076_v16, %v12090_v10  ;;  %v12978_v16 = vld [vmem:[#allocation45_spill] sm:$0xff] }
 0x56d   :  { %v12333_v5 = vpop.f32.mrf.mxu2  ;;  %v12979_v10 = vld [vmem:[#allocation37_spill] sm:$0xff] }
 0x56e   :  { %12963 = vst [vmem:[#allocation23_spill] sm:$0xff] %v12333_v5  ;;  %v12980_v38 = vpack.c.b16 %v12978_v16, %v12979_v10  ;;  %v12990_v5 = vpack.c.b16 %v12145_v27, %v12978_v16 }
 0x574   :  { %9239 = vmatmul.msk.bf16.gmra.mxu2 %vm3857_vm9, %v12964_v49  ;;  %9381 = vmatmul.msk.bf16.gmra.mxu0 %vm3857_vm9, %v12965_v33  ;;  %v12378_v49 = vpop.f32.mrf.mxu3  ;;  %v12380_v33 = vpop.f32.mrf.mxu1 }
 0x576   :  { %9403 = vmatmul.msk.bf16.gmra.mxu1 %vm3857_vm9, %v12966_v9 }
 0x577   :  { %v12351_v18 = vpop.f32.mrf.mxu2 }
 0x578   :  { %12967 = vst [vmem:[#allocation22_spill] sm:$0xff] %v12351_v18 }
 0x57c   :  { %9358 = vmatmul.msk.bf16.gmra.mxu3 %vm3857_vm9, %v12968_v42  ;;  %v12975_v42 = vshrl.u32 %v12970_v19, 16  ;;  %v12396_v28 = vpop.f32.mrf.mxu3  ;;  %v12398_v24 = vpop.f32.mrf.mxu1 }
 0x57e   :  { %v6849_v25 = vor.u32 %v6848_v63, %v12975_v42 }
 0x57f   :  { %v12363_v31 = vpop.f32.mrf.mxu2 }
 0x580   :  { %12969 = vst [vmem:[#allocation24_spill] sm:$0xff] %v12363_v31  ;;  %v6896_v15 = vsel %vm11432_vm0, %v6849_v25, 0 }
 0x584   :  { %9240 = vmatmul.msk.bf16.gmra.mxu2 %vm3857_vm9, %v12972_v46  ;;  %9382 = vmatmul.msk.bf16.gmra.mxu0 %vm3857_vm9, %v12973_v23  ;;  %v12394_v23 = vpop.f32.mrf.mxu0  ;;  %v12410_v25 = vpop.f32.mrf.mxu3 }
 0x586   :  { %9404 = vmatmul.msk.bf16.gmra.mxu1 %vm3857_vm9, %v7331_v50  ;;  %v6937_v50 = vunpack.c.l.b16 %v6896_v15 }
 0x587   :  { %v12382_v9 = vpop.f32.mrf.mxu2 }
 0x588   :  { %12974 = vst [vmem:[#allocation41_spill] sm:$0xff] %v12382_v9  ;;  %v6953_v19 = vpack.c.b16 %v12952_v20, %v6937_v50  ;;  %v12981_v50 = vpack.c.b16 %v11960_v1, %v11751_v6  ;;  %v12982_v6 = vpack.c.b16 %v12052_v36, %v11962_v41 }
 0x58c   :  { %9359 = vmatmul.msk.bf16.gmra.mxu3 %vm3857_vm9, %v12976_v8  ;;  %v12408_v42 = vpop.f32.mrf.mxu0  ;;  %v12412_v8 = vpop.f32.mrf.mxu1 }
 0x58d   :  { %v12465_v36 = vpop.f32.mrf.mxu3 }
 0x58f   :  { %v12392_v46 = vpop.f32.mrf.mxu2 }
 0x590   :  { %12977 = vst [vmem:[#allocation40_spill] sm:$0xff] %v12392_v46 }
 0x594   :  { %9329 = vmatmul.msk.bf16.vlgmr.msra.gmra.mxu2 %vm3857_vm9, %v6953_v19  ;;  %9383 = vmatmul.msk.bf16.gmra.mxu0 %vm3857_vm9, %v12100_v58  ;;  %v7220_v58 = vpack.c.b16 %v12955_v29, %v12064_v13  ;;  %v12420_v15 = vpop.f32.mrf.mxu0  ;;  %v12427_v19 = vpop.f32.mrf.mxu1 }
 0x596   :  { %9405 = vmatmul.msk.bf16.gmra.mxu1 %vm3857_vm9, %v12980_v38  ;;  %v12983_v38 = vpack.c.b16 %v12078_v0, %v12054_v52  ;;  %v12984_v52 = vld [vmem:[#allocation44_spill] sm:$0xff] }
 0x597   :  { %v6129_v63 = vpop.f32.mrf.mxu2  ;;  %v12985_v0 = vpack.c.b16 %v12979_v10, %v12984_v52 }
 0x59c   :  { %9360 = vmatmul.msk.bf16.gmra.mxu3 %vm3857_vm9, %v7096_v53  ;;  %v12435_v48 = vpop.f32.mrf.mxu1 }
 0x59f   :  { %v6131_v20 = vpop.f32.mrf.mxu2 }
 0x5a4   :  { %9330 = vmatmul.msk.bf16.gmra.mxu2 %vm3857_vm9, %v12981_v50  ;;  %9384 = vmatmul.msk.bf16.gmra.mxu0 %vm3857_vm9, %v7220_v58  ;;  %v12449_v53 = vpop.f32.mrf.mxu1 }
 0x5a6   :  { %9406 = vmatmul.msk.bf16.gmra.mxu1 %vm3857_vm9, %v7333_v21 }
 0x5a7   :  { %v12433_v7 = vpop.f32.mrf.mxu2 }
 0x5ac   :  { %v12453_v29 = vpop.f32.mrf.mxu1 }
 0x5af   :  { %v12437_v13 = vpop.f32.mrf.mxu2 }
 0x5b4   :  { %9331 = vmatmul.msk.bf16.gmra.mxu2 %vm3857_vm9, %v12982_v6  ;;  %v12469_v58 = vpop.f32.mrf.mxu1  ;;  %v12473_v6 = vpop.f32.mrf.mxu3 }
 0x5b6   :  { %9407 = vmatmul.msk.bf16.gmra.mxu1 %vm3857_vm9, %v7334_v59  ;;  %v12467_v59 = vpop.f32.mrf.mxu0 }
 0x5b7   :  { %v12447_v1 = vpop.f32.mrf.mxu2 }
 0x5bc   :  { %v12485_v46 = vpop.f32.mrf.mxu3 }
 0x5bd   :  { %12987 = vst [vmem:[#allocation26_spill] sm:$0xff] %v12485_v46 }
 0x5be   :  { %v12479_v39 = vpop.f32.mrf.mxu0 }
 0x5bf   :  { %v12451_v21 = vpop.f32.mrf.mxu2 }
 0x5c4   :  { %9332 = vmatmul.msk.bf16.gmra.mxu2 %vm3857_vm9, %v12983_v38  ;;  %v12497_v10 = vpop.f32.mrf.mxu3 }
 0x5c5   :  { %12991 = vst [vmem:[#allocation28_spill] sm:$0xff] %v12497_v10 }
 0x5c6   :  { %9408 = vmatmul.msk.bf16.gmra.mxu1 %vm3857_vm9, %v7335_v44  ;;  %v12481_v44 = vpop.f32.mrf.mxu1  ;;  %v12487_v9 = vpop.f32.mrf.mxu0 }
 0x5c7   :  { %v12463_v41 = vpop.f32.mrf.mxu2  ;;  %12986 = vst [vmem:[#allocation27_spill] sm:$0xff] %v12481_v44 }
 0x5c8   :  { %12988 = vst [vmem:[#allocation42_spill] sm:$0xff] %v12487_v9 }
 0x5cc   :  { %v12507_v9 = vpop.f32.mrf.mxu3 }
 0x5cd   :  { %12994 = vst [vmem:[#allocation29_spill] sm:$0xff] %v12507_v9 }
 0x5ce   :  { %v12491_v18 = vpop.f32.mrf.mxu1 }
 0x5cf   :  { %v12471_v50 = vpop.f32.mrf.mxu2  ;;  %12989 = vst [vmem:[#allocation43_spill] sm:$0xff] %v12491_v18  ;;  %v12996_v18 = vpack.c.b16 %v12183_v51, %v12181_v3 }
 0x5d4   :  { %9333 = vmatmul.msk.bf16.gmra.mxu2 %vm3857_vm9, %v12985_v0  ;;  %v12501_v0 = vpop.f32.mrf.mxu0  ;;  %v12519_v16 = vpop.f32.mrf.mxu3 }
 0x5d5   :  { %12992 = vst [vmem:[#allocation30_spill] sm:$0xff] %v12501_v0 }
 0x5d6   :  { %v12503_v44 = vpop.f32.mrf.mxu1  ;;  %12998 = vst [vmem:[#allocation34_spill] sm:$0xff] %v12519_v16  ;;  %v6130_v16 = vadd.f32 %v6129_v63, %v12262_v35 }
 0x5d7   :  { %v12483_v38 = vpop.f32.mrf.mxu2  ;;  %12993 = vst [vmem:[#allocation25_spill] sm:$0xff] %v12503_v44 }
 0x5dc   :  { %v12509_v14 = vpop.f32.mrf.mxu0  ;;  %v12527_v9 = vpop.f32.mrf.mxu3 }
 0x5dd   :  { %12995 = vst [vmem:[#allocation31_spill] sm:$0xff] %v12509_v14  ;;  %v13003_v14 = vpack.c.b16 %v12224_v26, %v12222_v56 }
 0x5de   :  { %v12515_v27 = vpop.f32.mrf.mxu1  ;;  %13002 = vst [vmem:[#allocation38_spill] sm:$0xff] %v12527_v9 }
 0x5df   :  { %v12489_v31 = vpop.f32.mrf.mxu2  ;;  %12997 = vst [vmem:[#allocation21_spill] sm:$0xff] %v12515_v27 }
 0x5e4   :  { %9334 = vmatmul.msk.bf16.gmra.mxu2 %vm3857_vm9, %v12990_v5  ;;  %v12521_v0 = vpop.f32.mrf.mxu0 }
 0x5e5   :  { %12999 = vst [vmem:[#allocation33_spill] sm:$0xff] %v12521_v0  ;;  %v6376_v0 = vadd.f32 %v12283_v45, %v6130_v16 }
 0x5e6   :  { %v12523_v44 = vpop.f32.mrf.mxu1 }
 0x5e7   :  { %v12499_v52 = vpop.f32.mrf.mxu2  ;;  %13000 = vst [vmem:[#allocation35_spill] sm:$0xff] %v12523_v44  ;;  %v12541_v44 = vpop.f32.mrf.mxu3  ;;  %v6702_v56 = vadd.f32 %v12302_v17, %v6376_v0  ;;  %v6135_v17 = vadd.f32 %v12433_v7, %v12291_v47  ;;  %v6137_v47 = vadd.f32 %v12437_v13, %v12306_v37  ;;  %v6140_v13 = vadd.f32 %v12447_v1, %v12327_v11 }
 0x5e8   :  { %13007 = vst [vmem:[#allocation44_spill] sm:$0xff] %v12541_v44 }
 0x5ec   :  { %v12533_v3 = vpop.f32.mrf.mxu0 }
 0x5ed   :  { %13004 = vst [vmem:[#allocation36_spill] sm:$0xff] %v12533_v3  ;;  %v6832_v3 = vadd.f32 %v12361_v32, %v6702_v56 }
 0x5ef   :  { %v12505_v46 = vpop.f32.mrf.mxu2  ;;  %v7154_v35 = vpop.f32.mrf.mxu3 }
 0x5f4   :  { %9335 = vmatmul.msk.bf16.gmra.mxu2 %vm3857_vm9, %v12996_v18  ;;  %v12537_v18 = vpop.f32.mrf.mxu1  ;;  %v12545_v9 = vpop.f32.mrf.mxu0 }
 0x5f5   :  { %13006 = vst [vmem:[#allocation37_spill] sm:$0xff] %v12537_v18 }
 0x5f6   :  { %13009 = vst [vmem:[#allocation47_spill] sm:$0xff] %v12545_v9 }
 0x5f7   :  { %v12517_v5 = vpop.f32.mrf.mxu2 }
 0x5fc   :  { %v12548_v26 = vpop.f32.mrf.mxu1  ;;  %v7260_v16 = vpop.f32.mrf.mxu0 }
 0x5ff   :  { %v12525_v10 = vpop.f32.mrf.mxu2 }
 0x600   :  { %13001 = vst [vmem:[#allocation32_spill] sm:$0xff] %v12525_v10  ;;  %v12553_v10 = vld [vmem:[#allocation15] ss:$0 sm:$0xff] }
 0x604   :  { %9336 = vmatmul.msk.bf16.gmra.mxu2 %vm3857_vm9, %v13003_v14  ;;  %v6132_v14 = vadd.f32 %v6131_v20, %v12275_v43 }
 0x606   :  { %v6377_v18 = vadd.f32 %v12304_v60, %v6132_v14  ;;  %v6378_v60 = vadd.f32 %v12325_v55, %v6135_v17 }
 0x607   :  { %v12535_v51 = vpop.f32.mrf.mxu2 }
 0x608   :  { %13005 = vst [vmem:[#allocation45_spill] sm:$0xff] %v12535_v51  ;;  %v6703_v9 = vadd.f32 %v12323_v61, %v6377_v18  ;;  %v6704_v18 = vadd.f32 %v12335_v57, %v6378_v60 }
 0x60a   :  { %v6833_v32 = vadd.f32 %v12380_v33, %v6703_v9  ;;  %v6834_v9 = vadd.f32 %v12398_v24, %v6704_v18 }
 0x60f   :  { %v12543_v27 = vpop.f32.mrf.mxu2 }
 0x610   :  { %13008 = vst [vmem:[#allocation46_spill] sm:$0xff] %v12543_v27  ;;  %v7393_v27 = vpop.f32.mrf.mxu1 }
 0x617   :  { %v7018_v51 = vpop.f32.mrf.mxu2 }
 0x618   :  { %v7058_v63 = vadd.f32 %v7018_v51, %v6832_v3  ;;  %v7156_v3 = vpop.f32.mrf.mxu3 }
 0x61a   :  { %v7194_v45 = vadd.f32 %v7154_v35, %v7058_v63  ;;  %v7262_v63 = vpop.f32.mrf.mxu0 }
 0x61c   :  { %v7300_v44 = vadd.f32 %v7260_v16, %v7194_v45  ;;  %v7395_v45 = vpop.f32.mrf.mxu1 }
 0x61e   :  { %v7433_v0 = vadd.f32 %v7393_v27, %v7300_v44  ;;  %v6379_v27 = vadd.f32 %v12337_v40, %v6137_v47 }
 0x61f   :  { %v7020_v20 = vpop.f32.mrf.mxu2 }
 0x620   :  { %v7453_v43 = vadd.f32 %v12553_v10, %v7433_v0  ;;  %v7059_v56 = vadd.f32 %v7020_v20, %v6833_v32  ;;  %v7159_v16 = vpop.f32.mrf.mxu3  ;;  %v6705_v37 = vadd.f32 %v12357_v22, %v6379_v27  ;;  %v6142_v27 = vadd.f32 %v12451_v21, %v12339_v34 }
 0x622   :  { %v7469_v51 = vsub.f32 0.0, %v7453_v43  ;;  %v7195_v35 = vadd.f32 %v7156_v3, %v7059_v56  ;;  %v7265_v57 = vpop.f32.mrf.mxu0  ;;  %v6835_v40 = vadd.f32 %v12412_v8, %v6705_v37 }
 0x624   :  { %v7485_v14 = vmul.f32 1.442695, %v7469_v51  ;;  %v7301_v61 = vadd.f32 %v7262_v63, %v7195_v35  ;;  %v7398_v24 = vpop.f32.mrf.mxu1 }
 0x626   :  { %9816 = vpow2.f32 %v7485_v14  ;;  %v7434_v7 = vadd.f32 %v7395_v45, %v7301_v61  ;;  %v6380_v14 = vadd.f32 %v12359_v54, %v6140_v13  ;;  %v6381_v13 = vadd.f32 %v12378_v49, %v6142_v27 }
 0x627   :  { %v7023_v55 = vpop.f32.mrf.mxu2 }
 0x628   :  { %v7454_v33 = vadd.f32 %v12553_v10, %v7434_v7  ;;  %v7060_v0 = vadd.f32 %v7023_v55, %v6834_v9  ;;  %v7161_v61 = vpop.f32.mrf.mxu3  ;;  %v6707_v49 = vadd.f32 %v12394_v23, %v6381_v13 }
 0x62a   :  { %v7470_v17 = vsub.f32 0.0, %v7454_v33  ;;  %v7196_v20 = vadd.f32 %v7159_v16, %v7060_v0  ;;  %v7267_v11 = vpop.f32.mrf.mxu0 }
 0x62c   :  { %v9817_v44 = vpop.eup %9816  ;;  %v7487_v32 = vmul.f32 1.442695, %v7470_v17  ;;  %v7302_v60 = vadd.f32 %v7265_v57, %v7196_v20  ;;  %v7400_v16 = vpop.f32.mrf.mxu1 }
 0x62d   :  { %v7517_v43 = vadd.f32 1.0, %v9817_v44  ;;  %v6706_v44 = vadd.f32 %v12376_v62, %v6380_v14 }
 0x62e   :  { %v7435_v3 = vadd.f32 %v7398_v24, %v7302_v60 }
 0x62f   :  { %9818 = vrcp.f32 %v7517_v43  ;;  %v7025_v35 = vpop.f32.mrf.mxu2  ;;  %v7542_v1 = vand.u32 2147483647, %v7517_v43  ;;  %v7544_v55 = vand.u32 2147483648, %v7517_v43  ;;  %vm7538_vm8 = vweird.f32 %v7517_v43 }
 0x630   :  { %9820 = vpow2.f32 %v7487_v32  ;;  %v7455_v51 = vadd.f32 %v12553_v10, %v7435_v3  ;;  %v7061_v47 = vadd.f32 %v7025_v35, %v6835_v40  ;;  %v6836_v20 = vadd.f32 %v12427_v19, %v6706_v44  ;;  %v7164_v21 = vpop.f32.mrf.mxu3 }
 0x631   :  { %v7545_v32 = vor.u32 1.1754944e-38, %v7544_v55  ;;  %vm7543_vm2 = vcmp.eq.f32.partialorder %v7542_v1, 8.507059e+37  ;;  %v6837_v1 = vadd.f32 %v12435_v48, %v6707_v49 }
 0x632   :  { %v7471_v45 = vsub.f32 0.0, %v7455_v51  ;;  %v7197_v9 = vadd.f32 %v7161_v61, %v7061_v47  ;;  %v7270_v35 = vpop.f32.mrf.mxu0  ;;  %v6145_v47 = vadd.f32 %v12463_v41, %v12273_v30 }
 0x634   :  { %v7489_v33 = vmul.f32 1.442695, %v7471_v45  ;;  %v7303_v54 = vadd.f32 %v7267_v11, %v7197_v9 }
 0x635   :  { %v9819_v56 = vpop.eup %9818 }
 0x636   :  { %v9821_v63 = vpop.eup %9820  ;;  %v7534_v18 = vmul.f32 %v9819_v56, %v7517_v43  ;;  %vm7539_vm3 = vweird.f32 %v9819_v56  ;;  %v7436_v0 = vadd.f32 %v7400_v16, %v7303_v54  ;;  %v6382_v54 = vadd.f32 %v12396_v28, %v6145_v47 }
 0x637   :  { %v7518_v7 = vadd.f32 1.0, %v9821_v63  ;;  %vm7540_vm9 = vmor %vm7538_vm8, %vm7539_vm3  ;;  %v7028_v60 = vpop.f32.mrf.mxu2 }
 0x638   :  { %v7535_v22 = vsub.f32 1.0, %v7534_v18  ;;  %v7456_v62 = vadd.f32 %v12553_v10, %v7436_v0  ;;  %v7062_v3 = vadd.f32 %v7028_v60, %v6836_v20  ;;  %v7166_v30 = vpop.f32.mrf.mxu3  ;;  %v6708_v28 = vadd.f32 %v12408_v42, %v6382_v54 }
 0x639   :  { %9822 = vrcp.f32 %v7518_v7  ;;  %v7557_v63 = vand.u32 2147483647, %v7518_v7  ;;  %v7559_v61 = vand.u32 2147483648, %v7518_v7  ;;  %vm7553_vm5 = vweird.f32 %v7518_v7 }
 0x63a   :  { %v7536_v8 = vmul.f32 %v9819_v56, %v7535_v22  ;;  %9824 = vpow2.f32 %v7489_v33  ;;  %v7472_v51 = vsub.f32 0.0, %v7456_v62  ;;  %v7198_v40 = vadd.f32 %v7164_v21, %v7062_v3  ;;  %v7403_v22 = vpop.f32.mrf.mxu1 }
 0x63b   :  { %v7560_v11 = vor.u32 1.1754944e-38, %v7559_v61  ;;  %vm7558_vm7 = vcmp.eq.f32.partialorder %v7557_v63, 8.507059e+37 }
 0x63c   :  { %v7537_v17 = vadd.f32 %v9819_v56, %v7536_v8  ;;  %v7491_v14 = vmul.f32 1.442695, %v7472_v51  ;;  %v7304_v45 = vadd.f32 %v7270_v35, %v7198_v40  ;;  %v6838_v51 = vadd.f32 %v12449_v53, %v6708_v28 }
 0x63e   :  { %v7541_v57 = vsel %vm7540_vm9, %v9819_v56, %v7537_v17  ;;  %v7437_v9 = vadd.f32 %v7403_v22, %v7304_v45 }
 0x63f   :  { %v9823_v37 = vpop.eup %9822  ;;  %v7546_v24 = vsel %vm7543_vm2, %v7545_v32, %v7541_v57  ;;  %v7030_v23 = vpop.f32.mrf.mxu2 }
 0x640   :  { %v9825_v34 = vpop.eup %9824  ;;  %7774 = vst.msk [vmem:[%s12720_s13] sm:$0xff] %vm7773_vm1, %v7546_v24  ;;  %v7549_v43 = vmul.f32 %v9823_v37, %v7518_v7  ;;  %vm7554_vm4 = vweird.f32 %v9823_v37  ;;  %v7457_v44 = vadd.f32 %v12553_v10, %v7437_v9  ;;  %v7063_v16 = vadd.f32 %v7030_v23, %v6837_v1  ;;  %v7272_v57 = vpop.f32.mrf.mxu0 }
 0x641   :  { %v7519_v19 = vadd.f32 1.0, %v9825_v34  ;;  %vm7555_vm6 = vmor %vm7553_vm5, %vm7554_vm4  ;;  %v6147_v24 = vadd.f32 %v12471_v50, %v12281_v4  ;;  %v7169_v4 = vpop.f32.mrf.mxu3 }
 0x642   :  { %v7550_v56 = vsub.f32 1.0, %v7549_v43  ;;  %v7473_v7 = vsub.f32 0.0, %v7457_v44  ;;  %v7199_v0 = vadd.f32 %v7166_v30, %v7063_v16  ;;  %v7405_v3 = vpop.f32.mrf.mxu1 }
 0x643   :  { %9826 = vrcp.f32 %v7519_v19  ;;  %v7572_v62 = vand.u32 2147483647, %v7519_v19  ;;  %v7574_v60 = vand.u32 2147483648, %v7519_v19  ;;  %vm7568_vm11 = vweird.f32 %v7519_v19 }
 0x644   :  { %v7551_v18 = vmul.f32 %v9823_v37, %v7550_v56  ;;  %9828 = vpow2.f32 %v7491_v14  ;;  %v7493_v20 = vmul.f32 1.442695, %v7473_v7  ;;  %v7305_v13 = vadd.f32 %v7272_v57, %v7199_v0 }
 0x645   :  { %v7575_v43 = vor.u32 1.1754944e-38, %v7574_v60  ;;  %vm7573_vm13 = vcmp.eq.f32.partialorder %v7572_v62, 8.507059e+37  ;;  %v6383_v35 = vadd.f32 %v12410_v25, %v6147_v24 }
 0x646   :  { %v7552_v33 = vadd.f32 %v9823_v37, %v7551_v18  ;;  %v7438_v21 = vadd.f32 %v7405_v3, %v7305_v13  ;;  %v6152_v3 = vadd.f32 %v12489_v31, %v12308_v2 }
 0x647   :  { %v7033_v42 = vpop.f32.mrf.mxu2  ;;  %v6709_v25 = vadd.f32 %v12420_v15, %v6383_v35 }
 0x648   :  { %v7556_v55 = vsel %vm7555_vm6, %v9823_v37, %v7552_v33  ;;  %v7458_v56 = vadd.f32 %v12553_v10, %v7438_v21  ;;  %v7064_v61 = vadd.f32 %v7033_v42, %v6838_v51  ;;  %v7275_v22 = vpop.f32.mrf.mxu0  ;;  %v6385_v35 = vadd.f32 %v12473_v6, %v6152_v3 }
 0x649   :  { %v9827_v8 = vpop.eup %9826  ;;  %v7561_v27 = vsel %vm7558_vm7, %v7560_v11, %v7556_v55  ;;  %v6150_v55 = vadd.f32 %v12483_v38, %v12297_v12  ;;  %v7171_v12 = vpop.f32.mrf.mxu3 }
 0x64a   :  { %v9829_v17 = vpop.eup %9828  ;;  %7775 = vst.msk [vmem:[%s12720_s13 + $0x8] sm:$0xff] %vm7773_vm1, %v7561_v27  ;;  %v7564_v41 = vmul.f32 %v9827_v8, %v7519_v19  ;;  %vm7569_vm10 = vweird.f32 %v9827_v8  ;;  %v7474_v19 = vsub.f32 0.0, %v7458_v56  ;;  %v7200_v18 = vadd.f32 %v7169_v4, %v7064_v61  ;;  %v7408_v44 = vpop.f32.mrf.mxu1 }
 0x64b   :  { %v7520_v48 = vadd.f32 1.0, %v9829_v17  ;;  %vm7570_vm12 = vmor %vm7568_vm11, %vm7569_vm10  ;;  %v6839_v27 = vadd.f32 %v12453_v29, %v6709_v25  ;;  %v6711_v6 = vadd.f32 %v12479_v39, %v6385_v35  ;;  %v13016_v35 = vld [vmem:[#allocation28_spill] sm:$0xff] }
 0x64c   :  { %v7565_v32 = vsub.f32 1.0, %v7564_v41  ;;  %v7495_v47 = vmul.f32 1.442695, %v7474_v19  ;;  %v7306_v1 = vadd.f32 %v7275_v22, %v7200_v18  ;;  %v6384_v41 = vadd.f32 %v12465_v36, %v6150_v55 }
 0x64d   :  { %9830 = vrcp.f32 %v7520_v48  ;;  %v7587_v33 = vand.u32 2147483647, %v7520_v48  ;;  %v7589_v9 = vand.u32 2147483648, %v7520_v48  ;;  %vm7583_vm15 = vweird.f32 %v7520_v48 }
 0x64e   :  { %v7566_v37 = vmul.f32 %v9827_v8, %v7565_v32  ;;  %9832 = vpow2.f32 %v7493_v20  ;;  %v6710_v36 = vadd.f32 %v12467_v59, %v6384_v41 }
 0x64f   :  { %v7590_v54 = vor.u32 1.1754944e-38, %v7589_v9  ;;  %vm7588_vm3 = vcmp.eq.f32.partialorder %v7587_v33, 8.507059e+37  ;;  %v7035_v15 = vpop.f32.mrf.mxu2  ;;  %v13010_v9 = vld [vmem:[#allocation39_spill] sm:$0xff] }
 0x650   :  { %v7567_v34 = vadd.f32 %v9827_v8, %v7566_v37  ;;  %v7065_v0 = vadd.f32 %v7035_v15, %v6839_v27  ;;  %v7277_v60 = vpop.f32.mrf.mxu0  ;;  %v6155_v25 = vadd.f32 %v12499_v52, %v13010_v9 }
 0x651   :  { %v7174_v2 = vpop.f32.mrf.mxu3 }
 0x652   :  { %v7571_v40 = vsel %vm7570_vm12, %v9827_v8, %v7567_v34  ;;  %v7439_v8 = vadd.f32 %v7408_v44, %v7306_v1  ;;  %v7201_v20 = vadd.f32 %v7171_v12, %v7065_v0  ;;  %v7410_v34 = vpop.f32.mrf.mxu1 }
 0x653   :  { %v9831_v14 = vpop.eup %9830  ;;  %v7576_v63 = vsel %vm7573_vm13, %v7575_v43, %v7571_v40  ;;  %v6840_v40 = vadd.f32 %v12469_v58, %v6710_v36 }
 0x654   :  { %v9833_v49 = vpop.eup %9832  ;;  %7776 = vst.msk [vmem:[%s12720_s13 + $0x10] sm:$0xff] %vm7773_vm1, %v7576_v63  ;;  %v7579_v50 = vmul.f32 %v9831_v14, %v7520_v48  ;;  %vm7584_vm14 = vweird.f32 %v9831_v14  ;;  %v7459_v17 = vadd.f32 %v12553_v10, %v7439_v8  ;;  %v7307_v24 = vadd.f32 %v7277_v60, %v7201_v20  ;;  %v13013_v60 = vld [vmem:[#allocation42_spill] sm:$0xff] }
 0x655   :  { %v7521_v53 = vadd.f32 1.0, %v9833_v49  ;;  %vm7585_vm0 = vmor %vm7583_vm15, %vm7584_vm14 }
 0x656   :  { %v7580_v45 = vsub.f32 1.0, %v7579_v50  ;;  %v7475_v48 = vsub.f32 0.0, %v7459_v17  ;;  %v7440_v43 = vadd.f32 %v7410_v34, %v7307_v24  ;;  %v13012_v17 = vld [vmem:[#allocation26_spill] sm:$0xff] }
 0x657   :  { %9834 = vrcp.f32 %v7521_v53  ;;  %v7602_v28 = vand.u32 2147483647, %v7521_v53  ;;  %v7604_v37 = vand.u32 2147483648, %v7521_v53  ;;  %vm7598_vm9 = vweird.f32 %v7521_v53  ;;  %v7038_v59 = vpop.f32.mrf.mxu2 }
 0x658   :  { %v7581_v11 = vmul.f32 %v9831_v14, %v7580_v45  ;;  %9836 = vpow2.f32 %v7495_v47  ;;  %v7497_v62 = vmul.f32 1.442695, %v7475_v48  ;;  %v7460_v42 = vadd.f32 %v12553_v10, %v7440_v43  ;;  %v7280_v18 = vpop.f32.mrf.mxu0 }
 0x659   :  { %v7605_v51 = vor.u32 1.1754944e-38, %v7604_v37  ;;  %vm7603_vm4 = vcmp.eq.f32.partialorder %v7602_v28, 8.507059e+37  ;;  %v7066_v61 = vadd.f32 %v7038_v59, %v6840_v40  ;;  %v6386_v15 = vadd.f32 %v13012_v17, %v6155_v25  ;;  %v7176_v52 = vpop.f32.mrf.mxu3  ;;  %v13018_v25 = vld [vmem:[#allocation22_spill] sm:$0xff] }
 0x65a   :  { %v7582_v23 = vadd.f32 %v9831_v14, %v7581_v11  ;;  %v7476_v4 = vsub.f32 0.0, %v7460_v42  ;;  %v7413_v11 = vpop.f32.mrf.mxu1 }
 0x65b   :  { %v7202_v50 = vadd.f32 %v7174_v2, %v7066_v61  ;;  %v6712_v28 = vadd.f32 %v13013_v60, %v6386_v15  ;;  %v13020_v15 = vld [vmem:[#allocation29_spill] sm:$0xff]  ;;  %v13021_v60 = vld [vmem:[#allocation31_spill] sm:$0xff] }
 0x65c   :  { %v7586_v16 = vsel %vm7585_vm0, %v9831_v14, %v7582_v23  ;;  %v13011_v23 = vld [vmem:[#allocation27_spill] sm:$0xff] }
 0x65d   :  { %v9835_v30 = vpop.eup %9834  ;;  %v7591_v7 = vsel %vm7588_vm3, %v7590_v54, %v7586_v16  ;;  %v7308_v33 = vadd.f32 %v7280_v18, %v7202_v50  ;;  %v6841_v8 = vadd.f32 %v13011_v23, %v6711_v6  ;;  %v13017_v6 = vld [vmem:[#allocation30_spill] sm:$0xff] }
 0x65e   :  { %v9837_v32 = vpop.eup %9836  ;;  %7777 = vst.msk [vmem:[%s12720_s13 + $0x18] sm:$0xff] %vm7773_vm1, %v7591_v7  ;;  %v7594_v38 = vmul.f32 %v9835_v30, %v7521_v53  ;;  %vm7599_vm8 = vweird.f32 %v9835_v30  ;;  %v7499_v53 = vmul.f32 1.442695, %v7476_v4 }
 0x65f   :  { %v7522_v29 = vadd.f32 1.0, %v9837_v32  ;;  %vm7600_vm2 = vmor %vm7598_vm9, %vm7599_vm8  ;;  %v7441_v55 = vadd.f32 %v7413_v11, %v7308_v33  ;;  %v7040_v39 = vpop.f32.mrf.mxu2  ;;  %v6160_v11 = vadd.f32 %v12517_v5, %v13018_v25 }
 0x660   :  { %v7595_v57 = vsub.f32 1.0, %v7594_v38  ;;  %v7067_v41 = vadd.f32 %v7040_v39, %v6841_v8  ;;  %v7282_v20 = vpop.f32.mrf.mxu0  ;;  %v13019_v8 = vld [vmem:[#allocation25_spill] sm:$0xff] }
 0x661   :  { %9838 = vrcp.f32 %v7522_v29  ;;  %v7617_v45 = vand.u32 2147483647, %v7522_v29  ;;  %v7619_v47 = vand.u32 2147483648, %v7522_v29  ;;  %vm7613_vm6 = vweird.f32 %v7522_v29 }
 0x662   :  { %v7596_v13 = vmul.f32 %v9835_v30, %v7595_v57  ;;  %9840 = vpow2.f32 %v7497_v62  ;;  %v7461_v27 = vadd.f32 %v12553_v10, %v7441_v55  ;;  %v7203_v38 = vadd.f32 %v7176_v52, %v7067_v41  ;;  %v7415_v3 = vpop.f32.mrf.mxu1 }
 0x663   :  { %v7620_v44 = vor.u32 1.1754944e-38, %v7619_v47  ;;  %vm7618_vm10 = vcmp.eq.f32.partialorder %v7617_v45, 8.507059e+37 }
 0x664   :  { %v7597_v21 = vadd.f32 %v9835_v30, %v7596_v13  ;;  %v7477_v32 = vsub.f32 0.0, %v7461_v27  ;;  %v7309_v36 = vadd.f32 %v7282_v20, %v7203_v38  ;;  %v13014_v13 = vld [vmem:[#allocation23_spill] sm:$0xff] }
 0x665   :  { %v6157_v24 = vadd.f32 %v12505_v46, %v13014_v13  ;;  %v7179_v46 = vpop.f32.mrf.mxu3  ;;  %v13022_v13 = vld [vmem:[#allocation24_spill] sm:$0xff] }
 0x666   :  { %v7601_v56 = vsel %vm7600_vm2, %v9835_v30, %v7597_v21  ;;  %v7442_v21 = vadd.f32 %v7415_v3, %v7309_v36 }
 0x667   :  { %v9839_v14 = vpop.eup %9838  ;;  %v7606_v63 = vsel %vm7603_vm4, %v7605_v51, %v7601_v56  ;;  %v13015_v51 = vld [vmem:[#allocation43_spill] sm:$0xff]  ;;  %v7043_v59 = vpop.f32.mrf.mxu2 }
 0x668   :  { %v9841_v49 = vpop.eup %9840  ;;  %7778 = vst.msk [vmem:[%s12720_s13 + $0x20] sm:$0xff] %vm7773_vm1, %v7606_v63  ;;  %v7609_v31 = vmul.f32 %v9839_v14, %v7522_v29  ;;  %vm7614_vm5 = vweird.f32 %v9839_v14  ;;  %v7501_v29 = vmul.f32 1.442695, %v7477_v32  ;;  %v6842_v40 = vadd.f32 %v13015_v51, %v6712_v28  ;;  %v7285_v18 = vpop.f32.mrf.mxu0 }
 0x669   :  { %v7523_v58 = vadd.f32 1.0, %v9841_v49  ;;  %vm7615_vm7 = vmor %vm7613_vm6, %vm7614_vm5  ;;  %v7462_v42 = vadd.f32 %v12553_v10, %v7442_v21  ;;  %v6387_v63 = vadd.f32 %v13016_v35, %v6157_v24  ;;  %v13023_v24 = vld [vmem:[#allocation32_spill] sm:$0xff] }
 0x66a   :  { %v7610_v19 = vsub.f32 1.0, %v7609_v31  ;;  %v7068_v49 = vadd.f32 %v7043_v59, %v6842_v40  ;;  %v6162_v3 = vadd.f32 %v13023_v24, %v13022_v13  ;;  %v13024_v40 = vld [vmem:[#allocation21_spill] sm:$0xff] }
 0x66b   :  { %9842 = vrcp.f32 %v7523_v58  ;;  %v7632_v57 = vand.u32 2147483647, %v7523_v58  ;;  %v7634_v62 = vand.u32 2147483648, %v7523_v58  ;;  %vm7628_vm12 = vweird.f32 %v7523_v58 }
 0x66c   :  { %v7611_v22 = vmul.f32 %v9839_v14, %v7610_v19  ;;  %9844 = vpow2.f32 %v7499_v53  ;;  %v7478_v4 = vsub.f32 0.0, %v7462_v42  ;;  %v7204_v50 = vadd.f32 %v7179_v46, %v7068_v49 }
 0x66d   :  { %v7635_v43 = vor.u32 1.1754944e-38, %v7634_v62  ;;  %vm7633_vm14 = vcmp.eq.f32.partialorder %v7632_v57, 8.507059e+37  ;;  %v7181_v5 = vpop.f32.mrf.mxu3 }
 0x66e   :  { %v7612_v1 = vadd.f32 %v9839_v14, %v7611_v22  ;;  %v7503_v53 = vmul.f32 1.442695, %v7478_v4  ;;  %v6713_v22 = vadd.f32 %v13017_v6, %v6387_v63  ;;  %v7310_v9 = vadd.f32 %v7285_v18, %v7204_v50  ;;  %v13025_v63 = vld [vmem:[#allocation34_spill] sm:$0xff] }
 0x670   :  { %v7616_v54 = vsel %vm7615_vm7, %v9839_v14, %v7612_v1  ;;  %v7418_v1 = vpop.f32.mrf.mxu1  ;;  %v7287_v20 = vpop.f32.mrf.mxu0 }
 0x671   :  { %v9843_v16 = vpop.eup %9842  ;;  %v7621_v30 = vsel %vm7618_vm10, %v7620_v44, %v7616_v54  ;;  %v7443_v44 = vadd.f32 %v7418_v1, %v7310_v9  ;;  %v6843_v54 = vadd.f32 %v13019_v8, %v6713_v22  ;;  %v13026_v22 = vld [vmem:[#allocation33_spill] sm:$0xff] }
 0x672   :  { %v9845_v7 = vpop.eup %9844  ;;  %7779 = vst.msk [vmem:[%s12720_s13 + $0x28] sm:$0xff] %vm7773_vm1, %v7621_v30  ;;  %v7624_v0 = vmul.f32 %v9843_v16, %v7523_v58  ;;  %vm7629_vm11 = vweird.f32 %v9843_v16  ;;  %v6388_v30 = vadd.f32 %v13020_v15, %v6160_v11  ;;  %v13027_v11 = vld [vmem:[#allocation41_spill] sm:$0xff] }
 0x673   :  { %v7524_v12 = vadd.f32 1.0, %v9845_v7  ;;  %vm7630_vm13 = vmor %vm7628_vm12, %vm7629_vm11  ;;  %v7463_v39 = vadd.f32 %v12553_v10, %v7443_v44  ;;  %v13028_v1 = vld [vmem:[#allocation45_spill] sm:$0xff] }
 0x674   :  { %v7625_v48 = vsub.f32 1.0, %v7624_v0  ;;  %v6714_v28 = vadd.f32 %v13021_v60, %v6388_v30 }
 0x675   :  { %9846 = vrcp.f32 %v7524_v12  ;;  %v7647_v45 = vand.u32 2147483647, %v7524_v12  ;;  %v7649_v47 = vand.u32 2147483648, %v7524_v12  ;;  %vm7643_vm0 = vweird.f32 %v7524_v12 }
 0x676   :  { %v7626_v37 = vmul.f32 %v9843_v16, %v7625_v48  ;;  %9848 = vpow2.f32 %v7501_v29  ;;  %v7479_v32 = vsub.f32 0.0, %v7463_v39 }
 0x677   :  { %v7650_v23 = vor.u32 1.1754944e-38, %v7649_v47  ;;  %vm7648_vm8 = vcmp.eq.f32.partialorder %v7647_v45, 8.507059e+37 }
 0x678   :  { %v7627_v34 = vadd.f32 %v9843_v16, %v7626_v37  ;;  %v7505_v29 = vmul.f32 1.442695, %v7479_v32  ;;  %v7290_v45 = vpop.f32.mrf.mxu0 }
 0x67a   :  { %v7631_v56 = vsel %vm7630_vm13, %v9843_v16, %v7627_v34  ;;  %v7045_v16 = vpop.f32.mrf.mxu2  ;;  %v7420_v34 = vpop.f32.mrf.mxu1 }
 0x67b   :  { %v9847_v14 = vpop.eup %9846  ;;  %v7636_v61 = vsel %vm7633_vm14, %v7635_v43, %v7631_v56  ;;  %v7069_v7 = vadd.f32 %v7045_v16, %v6843_v54  ;;  %v6844_v56 = vadd.f32 %v13024_v40, %v6714_v28 }
 0x67c   :  { %v9849_v2 = vpop.eup %9848  ;;  %7780 = vst.msk [vmem:[%s12720_s13 + $0x30] sm:$0xff] %vm7773_vm1, %v7636_v61  ;;  %v7639_v31 = vmul.f32 %v9847_v14, %v7524_v12  ;;  %vm7644_vm15 = vweird.f32 %v9847_v14  ;;  %v6389_v61 = vadd.f32 %v13025_v63, %v6162_v3  ;;  %v13032_v3 = vld [vmem:[#allocation40_spill] sm:$0xff] }
 0x67d   :  { %v7525_v58 = vadd.f32 1.0, %v9849_v2  ;;  %vm7645_vm3 = vmor %vm7643_vm0, %vm7644_vm15  ;;  %v7205_v38 = vadd.f32 %v7181_v5, %v7069_v7 }
 0x67e   :  { %v7640_v19 = vsub.f32 1.0, %v7639_v31  ;;  %v7184_v31 = vpop.f32.mrf.mxu3 }
 0x67f   :  { %9850 = vrcp.f32 %v7525_v58  ;;  %v7662_v57 = vand.u32 2147483647, %v7525_v58  ;;  %v7664_v62 = vand.u32 2147483648, %v7525_v58  ;;  %v7311_v36 = vadd.f32 %v7287_v20, %v7205_v38 }
 0x680   :  { %v7641_v33 = vmul.f32 %v9847_v14, %v7640_v19  ;;  %9852 = vpow2.f32 %v7503_v53  ;;  %vm7658_vm2 = vweird.f32 %v7525_v58 }
 0x681   :  { %v7444_v43 = vadd.f32 %v7420_v34, %v7311_v36  ;;  %v7665_v51 = vor.u32 1.1754944e-38, %v7664_v62  ;;  %vm7663_vm5 = vcmp.eq.f32.partialorder %v7662_v57, 8.507059e+37  ;;  %v7292_v62 = vpop.f32.mrf.mxu0  ;;  %v13033_v34 = vld [vmem:[#allocation46_spill] sm:$0xff] }
 0x682   :  { %v7642_v55 = vadd.f32 %v9847_v14, %v7641_v33  ;;  %v6715_v33 = vadd.f32 %v13026_v22, %v6389_v61  ;;  %v7423_v44 = vpop.f32.mrf.mxu1 }
 0x683   :  { %v7464_v59 = vadd.f32 %v12553_v10, %v7444_v43 }
 0x684   :  { %v7646_v27 = vsel %vm7645_vm3, %v9847_v14, %v7642_v55  ;;  %v7048_v14 = vpop.f32.mrf.mxu2  ;;  %v6165_v55 = vadd.f32 %v13028_v1, %v13027_v11 }
 0x685   :  { %v9851_v17 = vpop.eup %9850  ;;  %v7651_v41 = vsel %vm7648_vm8, %v7650_v23, %v7646_v27  ;;  %v7070_v2 = vadd.f32 %v7048_v14, %v6844_v56  ;;  %v13029_v27 = vld [vmem:[#allocation35_spill] sm:$0xff] }
 0x686   :  { %v9853_v52 = vpop.eup %9852  ;;  %7781 = vst.msk [vmem:[%s12720_s13 + $0x38] sm:$0xff] %vm7773_vm1, %v7651_v41  ;;  %v7654_v0 = vmul.f32 %v9851_v17, %v7525_v58  ;;  %vm7659_vm9 = vweird.f32 %v9851_v17  ;;  %v7480_v58 = vsub.f32 0.0, %v7464_v59  ;;  %v6845_v39 = vadd.f32 %v13029_v27, %v6715_v33  ;;  %v13030_v41 = vld [vmem:[#allocation38_spill] sm:$0xff]  ;;  %v7186_v32 = vpop.f32.mrf.mxu3 }
 0x687   :  { %v7526_v12 = vadd.f32 1.0, %v9853_v52  ;;  %vm7660_vm4 = vmor %vm7658_vm2, %vm7659_vm9  ;;  %v7206_v19 = vadd.f32 %v7184_v31, %v7070_v2  ;;  %v6390_v7 = vadd.f32 %v13030_v41, %v6165_v55 }
 0x688   :  { %v7655_v48 = vsub.f32 1.0, %v7654_v0  ;;  %v7507_v18 = vmul.f32 1.442695, %v7480_v58 }
 0x689   :  { %9854 = vrcp.f32 %v7526_v12  ;;  %v7677_v47 = vand.u32 2147483647, %v7526_v12  ;;  %v7679_v6 = vand.u32 2147483648, %v7526_v12  ;;  %v7312_v25 = vadd.f32 %v7290_v45, %v7206_v19 }
 0x68a   :  { %v7656_v37 = vmul.f32 %v9851_v17, %v7655_v48  ;;  %9856 = vpow2.f32 %v7505_v29  ;;  %vm7673_vm7 = vweird.f32 %v7526_v12  ;;  %v7425_v43 = vpop.f32.mrf.mxu1 }
 0x68b   :  { %v7445_v8 = vadd.f32 %v7423_v44, %v7312_v25  ;;  %v7680_v54 = vor.u32 1.1754944e-38, %v7679_v6  ;;  %vm7678_vm11 = vcmp.eq.f32.partialorder %v7677_v47, 8.507059e+37  ;;  %v7295_v6 = vpop.f32.mrf.mxu0 }
 0x68c   :  { %v7657_v21 = vadd.f32 %v9851_v17, %v7656_v37  ;;  %v7050_v15 = vpop.f32.mrf.mxu2  ;;  %v13031_v37 = vld [vmem:[#allocation36_spill] sm:$0xff] }
 0x68d   :  { %v7071_v5 = vadd.f32 %v7050_v15, %v6845_v39  ;;  %v6716_v36 = vadd.f32 %v13031_v37, %v6390_v7 }
 0x68e   :  { %v7661_v42 = vsel %vm7660_vm4, %v9851_v17, %v7657_v21  ;;  %v7465_v17 = vadd.f32 %v12553_v10, %v7445_v8  ;;  %v6167_v21 = vadd.f32 %v13033_v34, %v13032_v3  ;;  %v7189_v58 = vpop.f32.mrf.mxu3 }
 0x68f   :  { %v9855_v35 = vpop.eup %9854  ;;  %v7666_v49 = vsel %vm7663_vm5, %v7665_v51, %v7661_v42  ;;  %v7207_v29 = vadd.f32 %v7186_v32, %v7071_v5  ;;  %v13034_v42 = vld [vmem:[#allocation37_spill] sm:$0xff] }
 0x690   :  { %v9857_v46 = vpop.eup %9856  ;;  %7782 = vst.msk [vmem:[%s12720_s13 + $0x40] sm:$0xff] %vm7773_vm1, %v7666_v49  ;;  %v7669_v4 = vmul.f32 %v9855_v35, %v7526_v12  ;;  %vm7674_vm6 = vweird.f32 %v9855_v35  ;;  %v7481_v38 = vsub.f32 0.0, %v7465_v17  ;;  %v6846_v59 = vadd.f32 %v13034_v42, %v6716_v36  ;;  %v13035_v49 = vld [vmem:[#allocation44_spill] sm:$0xff] }
 0x691   :  { %v7527_v50 = vadd.f32 1.0, %v9857_v46  ;;  %vm7675_vm10 = vmor %vm7673_vm7, %vm7674_vm6  ;;  %v7313_v24 = vadd.f32 %v7292_v62, %v7207_v29  ;;  %v6391_v2 = vadd.f32 %v13035_v49, %v6167_v21 }
 0x692   :  { %v7670_v53 = vsub.f32 1.0, %v7669_v4  ;;  %v7509_v57 = vmul.f32 1.442695, %v7481_v38  ;;  %v7428_v55 = vpop.f32.mrf.mxu1 }
 0x693   :  { %9858 = vrcp.f32 %v7527_v50  ;;  %v7692_v60 = vand.u32 2147483647, %v7527_v50  ;;  %v7694_v28 = vand.u32 2147483648, %v7527_v50  ;;  %vm7688_vm13 = vweird.f32 %v7527_v50  ;;  %v7297_v38 = vpop.f32.mrf.mxu0 }
 0x694   :  { %v7671_v9 = vmul.f32 %v9855_v35, %v7670_v53  ;;  %9860 = vpow2.f32 %v7507_v18  ;;  %v7446_v40 = vadd.f32 %v7425_v43, %v7313_v24  ;;  %v7053_v63 = vpop.f32.mrf.mxu2 }
 0x695   :  { %v7695_v56 = vor.u32 1.1754944e-38, %v7694_v28  ;;  %vm7693_vm15 = vcmp.eq.f32.partialorder %v7692_v60, 8.507059e+37  ;;  %v7072_v31 = vadd.f32 %v7053_v63, %v6846_v59 }
 0x696   :  { %v7672_v23 = vadd.f32 %v9855_v35, %v7671_v9  ;;  %v13036_v9 = vld [vmem:[#allocation47_spill] sm:$0xff]  ;;  %v7191_v7 = vpop.f32.mrf.mxu3 }
 0x697   :  { %v7208_v18 = vadd.f32 %v7189_v58, %v7072_v31  ;;  %v6717_v25 = vadd.f32 %v13036_v9, %v6391_v2 }
 0x698   :  { %v7676_v16 = vsel %vm7675_vm10, %v9855_v35, %v7672_v23  ;;  %v7466_v35 = vadd.f32 %v12553_v10, %v7446_v40 }
 0x699   :  { %v9859_v30 = vpop.eup %9858  ;;  %v7681_v52 = vsel %vm7678_vm11, %v7680_v54, %v7676_v16  ;;  %v7314_v1 = vadd.f32 %v7295_v6, %v7208_v18  ;;  %v6847_v54 = vadd.f32 %v12548_v26, %v6717_v25 }
 0x69a   :  { %v9861_v0 = vpop.eup %9860  ;;  %7783 = vst.msk [vmem:[%s12720_s13 + $0x48] sm:$0xff] %vm7773_vm1, %v7681_v52  ;;  %v7684_v12 = vmul.f32 %v9859_v30, %v7527_v50  ;;  %vm7689_vm12 = vweird.f32 %v9859_v30  ;;  %v7482_v19 = vsub.f32 0.0, %v7466_v35  ;;  %v7430_v62 = vpop.f32.mrf.mxu1 }
 0x69b   :  { %v7528_v48 = vadd.f32 1.0, %v9861_v0  ;;  %vm7690_vm14 = vmor %vm7688_vm13, %vm7689_vm12  ;;  %v7447_v23 = vadd.f32 %v7428_v55, %v7314_v1 }
 0x69c   :  { %v7685_v20 = vsub.f32 1.0, %v7684_v12  ;;  %v7511_v47 = vmul.f32 1.442695, %v7482_v19  ;;  %v7055_v16 = vpop.f32.mrf.mxu2 }
 0x69d   :  { %9862 = vrcp.f32 %v7528_v48  ;;  %v7707_v22 = vand.u32 2147483647, %v7528_v48  ;;  %v7709_v33 = vand.u32 2147483648, %v7528_v48  ;;  %vm7703_vm3 = vweird.f32 %v7528_v48 }
 0x69e   :  { %v7686_v13 = vmul.f32 %v9859_v30, %v7685_v20  ;;  %9864 = vpow2.f32 %v7509_v57  ;;  %v7467_v39 = vadd.f32 %v12553_v10, %v7447_v23 }
 0x69f   :  { %v7710_v8 = vor.u32 1.1754944e-38, %v7709_v33  ;;  %vm7708_vm9 = vcmp.eq.f32.partialorder %v7707_v22, 8.507059e+37 }
 0x6a0   :  { %v7687_v51 = vadd.f32 %v9859_v30, %v7686_v13  ;;  %v7483_v5 = vsub.f32 0.0, %v7467_v39 }
 0x6a2   :  { %v7691_v14 = vsel %vm7690_vm14, %v9859_v30, %v7687_v51  ;;  %v7073_v30 = vadd.f32 %v7055_v16, %v6847_v54  ;;  %v7513_v12 = vmul.f32 1.442695, %v7483_v5 }
 0x6a3   :  { %v9863_v61 = vpop.eup %9862  ;;  %v7696_v46 = vsel %vm7693_vm15, %v7695_v56, %v7691_v14 }
 0x6a4   :  { %v9865_v4 = vpop.eup %9864  ;;  %7784 = vst.msk [vmem:[%s12720_s13 + $0x50] sm:$0xff] %vm7773_vm1, %v7696_v46  ;;  %v7699_v50 = vmul.f32 %v9863_v61, %v7528_v48  ;;  %vm7704_vm0 = vweird.f32 %v9863_v61  ;;  %v7209_v32 = vadd.f32 %v7191_v7, %v7073_v30 }
 0x6a5   :  { %v7529_v53 = vadd.f32 1.0, %v9865_v4  ;;  %vm7705_vm8 = vmor %vm7703_vm3, %vm7704_vm0 }
 0x6a6   :  { %v7700_v45 = vsub.f32 1.0, %v7699_v50  ;;  %v7315_v57 = vadd.f32 %v7297_v38, %v7209_v32 }
 0x6a7   :  { %9866 = vrcp.f32 %v7529_v53  ;;  %v7722_v48 = vand.u32 2147483647, %v7529_v53  ;;  %v7724_v29 = vand.u32 2147483648, %v7529_v53  ;;  %vm7718_vm4 = vweird.f32 %v7529_v53 }
 0x6a8   :  { %v7701_v11 = vmul.f32 %v9863_v61, %v7700_v45  ;;  %9868 = vpow2.f32 %v7511_v47  ;;  %v7448_v28 = vadd.f32 %v7430_v62, %v7315_v57 }
 0x6a9   :  { %v7725_v37 = vor.u32 1.1754944e-38, %v7724_v29  ;;  %vm7723_vm6 = vcmp.eq.f32.partialorder %v7722_v48, 8.507059e+37 }
 0x6aa   :  { %v7702_v44 = vadd.f32 %v9863_v61, %v7701_v11  ;;  %v7468_v13 = vadd.f32 %v12553_v10, %v7448_v28 }
 0x6ac   :  { %v7706_v27 = vsel %vm7705_vm8, %v9863_v61, %v7702_v44  ;;  %v7484_v43 = vsub.f32 0.0, %v7468_v13 }
 0x6ad   :  { %v9867_v17 = vpop.eup %9866  ;;  %v7711_v15 = vsel %vm7708_vm9, %v7710_v8, %v7706_v27 }
 0x6ae   :  { %v9869_v41 = vpop.eup %9868  ;;  %7785 = vst.msk [vmem:[%s12720_s13 + $0x58] sm:$0xff] %vm7773_vm1, %v7711_v15  ;;  %v7714_v52 = vmul.f32 %v9867_v17, %v7529_v53  ;;  %vm7719_vm2 = vweird.f32 %v9867_v17  ;;  %v7515_v56 = vmul.f32 1.442695, %v7484_v43 }
 0x6af   :  { %v7530_v0 = vadd.f32 1.0, %v9869_v41  ;;  %vm7720_vm5 = vmor %vm7718_vm4, %vm7719_vm2 }
 0x6b0   :  { %v7715_v26 = vsub.f32 1.0, %v7714_v52 }
 0x6b1   :  { %9870 = vrcp.f32 %v7530_v0  ;;  %v7739_v42 = vand.u32 2147483648, %v7530_v0  ;;  %v7737_v14 = vand.u32 2147483647, %v7530_v0  ;;  %vm7733_vm10 = vweird.f32 %v7530_v0 }
 0x6b2   :  { %v7716_v20 = vmul.f32 %v9867_v17, %v7715_v26  ;;  %9872 = vpow2.f32 %v7513_v12 }
 0x6b3   :  { %v7740_v35 = vor.u32 1.1754944e-38, %v7739_v42  ;;  %vm7738_vm12 = vcmp.eq.f32.partialorder %v7737_v14, 8.507059e+37 }
 0x6b4   :  { %v7717_v60 = vadd.f32 %v9867_v17, %v7716_v20 }
 0x6b6   :  { %v7721_v36 = vsel %vm7720_vm5, %v9867_v17, %v7717_v60 }
 0x6b7   :  { %v9871_v24 = vpop.eup %9870  ;;  %v7726_v3 = vsel %vm7723_vm6, %v7725_v37, %v7721_v36 }
 0x6b8   :  { %v9873_v34 = vpop.eup %9872  ;;  %7786 = vst.msk [vmem:[%s12720_s13 + $0x60] sm:$0xff] %vm7773_vm1, %v7726_v3  ;;  %v7729_v21 = vmul.f32 %v9871_v24, %v7530_v0  ;;  %vm7734_vm7 = vweird.f32 %v9871_v24 }
 0x6b9   :  { %v7531_v51 = vadd.f32 1.0, %v9873_v34  ;;  %vm7735_vm11 = vmor %vm7733_vm10, %vm7734_vm7 }
 0x6ba   :  { %v7730_v40 = vsub.f32 1.0, %v7729_v21 }
 0x6bb   :  { %9874 = vrcp.f32 %v7531_v51  ;;  %v7754_v58 = vand.u32 2147483648, %v7531_v51  ;;  %v7752_v19 = vand.u32 2147483647, %v7531_v51  ;;  %vm7748_vm14 = vweird.f32 %v7531_v51 }
 0x6bc   :  { %v7731_v59 = vmul.f32 %v9871_v24, %v7730_v40  ;;  %9876 = vpow2.f32 %v7515_v56 }
 0x6bd   :  { %v7755_v18 = vor.u32 1.1754944e-38, %v7754_v58  ;;  %vm7753_vm0 = vcmp.eq.f32.partialorder %v7752_v19, 8.507059e+37 }
 0x6be   :  { %v7732_v10 = vadd.f32 %v9871_v24, %v7731_v59 }
 0x6c0   :  { %v7736_v63 = vsel %vm7735_vm11, %v9871_v24, %v7732_v10 }
 0x6c1   :  { %v9875_v61 = vpop.eup %9874  ;;  %v7741_v49 = vsel %vm7738_vm12, %v7740_v35, %v7736_v63 }
 0x6c2   :  { %v9877_v2 = vpop.eup %9876  ;;  %7787 = vst.msk [vmem:[%s12720_s13 + $0x68] sm:$0xff] %vm7773_vm1, %v7741_v49  ;;  %v7744_v46 = vmul.f32 %v9875_v61, %v7531_v51  ;;  %vm7749_vm13 = vweird.f32 %v9875_v61 }
 0x6c3   :  { %v7532_v31 = vadd.f32 1.0, %v9877_v2  ;;  %vm7750_vm15 = vmor %vm7748_vm14, %vm7749_vm13 }
 0x6c4   :  { %v7745_v4 = vsub.f32 1.0, %v7744_v46 }
 0x6c5   :  { %9878 = vrcp.f32 %v7532_v31  ;;  %v7769_v9 = vand.u32 2147483648, %v7532_v31  ;;  %v7767_v11 = vand.u32 2147483647, %v7532_v31  ;;  %vm7763_vm8 = vweird.f32 %v7532_v31 }
 0x6c6   :  { %v7746_v50 = vmul.f32 %v9875_v61, %v7745_v4 }
 0x6c7   :  { %v7770_v55 = vor.u32 1.1754944e-38, %v7769_v9  ;;  %vm7768_vm2 = vcmp.eq.f32.partialorder %v7767_v11, 8.507059e+37 }
 0x6c8   :  { %v7747_v53 = vadd.f32 %v9875_v61, %v7746_v50 }
 0x6ca   :  { %v7751_v45 = vsel %vm7750_vm15, %v9875_v61, %v7747_v53 }
 0x6cb   :  { %v9879_v47 = vpop.eup %9878  ;;  %v7756_v6 = vsel %vm7753_vm0, %v7755_v18, %v7751_v45 }
 0x6cc   :  { %7788 = vst.msk [vmem:[%s12720_s13 + $0x70] sm:$0xff] %vm7773_vm1, %v7756_v6  ;;  %v7759_v22 = vmul.f32 %v9879_v47, %v7532_v31  ;;  %vm7764_vm3 = vweird.f32 %v9879_v47 }
 0x6cd   :  { %vm7765_vm9 = vmor %vm7763_vm8, %vm7764_vm3 }
 0x6ce   :  { %v7760_v33 = vsub.f32 1.0, %v7759_v22 }
 0x6d0   :  { %v7761_v25 = vmul.f32 %v9879_v47, %v7760_v33 }
 0x6d2   :  { %v7762_v1 = vadd.f32 %v9879_v47, %v7761_v25 }
 0x6d4   :  { %v7766_v44 = vsel %vm7765_vm9, %v9879_v47, %v7762_v1 }
 0x6d5   :  { %v7771_v23 = vsel %vm7768_vm2, %v7770_v55, %v7766_v44 }
 0x6d6   :  { %7789 = vst.msk [vmem:[%s12720_s13 + $0x78] sm:$0xff] %vm7773_vm1, %v7771_v23 }
 0x6d7   :  { %7794 = vsyncpa [#allocation3], 1 }
 0x6d8   :  { %7795 = vsyncpa [#allocation5], 1 }
 0x6d9   :  { %7796 = vsyncpa [#allocation8], 1 }
 0x6da   :  { %7797 = vsyncpa [#allocation11], 1 }
 0x6db   :  { %7798 = vsyncpa [#allocation14], 1 }

</bundles_post_ra>
